<compile_context>
chip_gen: v5e
topology: v5e:2x2
jax: 0.10.0
libtpu: 0.0.40
codegen_flags: <defaults>
</compile_context>

<pallas_src>
import functools
import math

import numpy as np
import jax
import jax.numpy as jnp
from jax.experimental import pallas as pl
from jax.experimental.pallas import tpu as pltpu

EMBED_DIM = 128          # embed_dim (lane aligned; reference default is 1936)
NHEAD = 8
FFN_DIM = 256            # dim_feedforward
ENC_LAYERS = 1
DEC_LAYERS = 3
LN_EPS = 1e-5
NEG_INF = -1e9           # additive key-padding mask value (finite -> no NaN rows)

ENC_KEYS = ("wqkv", "bqkv", "wo", "bo", "g1", "be1", "w1", "b1", "w2", "b2", "g2", "be2")
DEC_KEYS = ("wqk", "bqk", "wv", "bv", "wo", "bo", "g1", "be1", "w1", "b1", "w2", "b2")


def _lane_pad(n):
    return ((n + 127) // 128) * 128


# --------------------------------------------------------------------------------------
# In-kernel helpers
# --------------------------------------------------------------------------------------
def _layer_norm(t, g, b):
    mu = jnp.mean(t, axis=-1, keepdims=True)
    var = jnp.mean(jnp.square(t - mu), axis=-1, keepdims=True)
    return (t - mu) * jax.lax.rsqrt(var + LN_EPS) * g + b


def _mha_stack(x, pos, addmask, W, L, H, final_norm, attw_ref):
    """Run L transformer layers on a folded-batch [R, D] activation block.

    pos is None  -> encoder layer (fused QKV projection, final LayerNorm).
    pos is array -> decoder layer (q/k from x+pos, v from x, no final LayerNorm).
    addmask [R, R] combines key-padding and cross-batch blocking (additive, f32).
    attw_ref [L, R, lane]: lane-dense head-averaged attention weights per layer.
    """
    R, D = x.shape
    Dh = D // H
    lane = attw_ref.shape[-1]

    # Per-head lane masks [H, 1, D] (f32 so head masking stays on the f32 VPU path).
    col = jax.lax.broadcasted_iota(jnp.int32, (H, D), 1)
    hid = jax.lax.broadcasted_iota(jnp.int32, (H, D), 0)
    head_mask = ((col >= hid * Dh) & (col < (hid + 1) * Dh)).astype(jnp.float32)[:, None, :]

    for li in range(L):                                   # static unroll: layers fused in VMEM
        if pos is None:
            # encoder: fused QKV projection (1/sqrt(Dh) folded into the Q slice at prep time)
            qkv = jnp.dot(x.astype(jnp.bfloat16), W["wqkv"][li],
                          preferred_element_type=jnp.float32) + W["bqkv"][li]
            q, k, v = qkv[:, :D], qkv[:, D:2 * D], qkv[:, 2 * D:3 * D]
        else:
            # decoder: q/k use x+pos, v uses x (cannot fuse V into the same matmul)
            qk = jnp.dot((x + pos).astype(jnp.bfloat16), W["wqk"][li],
                         preferred_element_type=jnp.float32) + W["bqk"][li]
            v = jnp.dot(x.astype(jnp.bfloat16), W["wv"][li],
                        preferred_element_type=jnp.float32) + W["bv"][li]
            q, k = qk[:, :D], qk[:, D:2 * D]

        # Flattened-head attention: lane-mask q per head, one [H*R, D] x [R, D]^T matmul
        # for all heads' scores; PV uses the shared (unmasked) v and one matmul.
        q_h = (q[None, :, :] * head_mask).astype(jnp.bfloat16)        # [H, R, D]
        k_bf = k.astype(jnp.bfloat16)
        v_bf = v.astype(jnp.bfloat16)

        scores = jax.lax.dot_general(                                  # q @ k^T (all heads)
            q_h.reshape(H * R, D), k_bf, (((1,), (1,)), ((), ())),
            preferred_element_type=jnp.float32).reshape(H, R, R)
        scores = scores + addmask[None, :, :]
        scores = scores - jnp.max(scores, axis=-1, keepdims=True)
        e = jnp.exp(scores)
        p = e / jnp.sum(e, axis=-1, keepdims=True)                     # exact softmax

        pv = jnp.dot(p.reshape(H * R, R).astype(jnp.bfloat16), v_bf,
                     preferred_element_type=jnp.float32).reshape(H, R, D)
        o = jnp.sum(pv * head_mask, axis=0)                            # disjoint lanes -> concat
        attn = jnp.dot(o.astype(jnp.bfloat16), W["wo"][li],
                       preferred_element_type=jnp.float32) + W["bo"][li]

        # residual + LayerNorm (norm1 / norm3)
        t = _layer_norm(x + attn, W["g1"][li], W["be1"][li])

        # feed-forward (linear1 -> relu -> linear2) + residual
        ff = jnp.maximum(jnp.dot(t.astype(jnp.bfloat16), W["w1"][li],
                                 preferred_element_type=jnp.float32) + W["b1"][li], 0.0)
        ff = jnp.dot(ff.astype(jnp.bfloat16), W["w2"][li],
                     preferred_element_type=jnp.float32) + W["b2"][li]
        t = t + ff
        if final_norm:                                    # norm2 (encoder only)
            t = _layer_norm(t, W["g2"][li], W["be2"][li])

        # lane-dense head-averaged attention weights ([R, lane] full-width store)
        p_mean = jnp.mean(p, axis=0)
        if lane > R:
            p_mean = jnp.concatenate(
                [p_mean, jnp.zeros((R, lane - R), jnp.float32)], axis=1)
        attw_ref[li] = p_mean
        x = t
    return x


def _make_fused_kernel(H, L_enc, L_dec):
    n_enc, n_dec = len(ENC_KEYS), len(DEC_KEYS)

    def kernel(*refs):
        (feat_ref, g_local_ref, enc_mask_ref, g_keep_ref, g_global_ref,
         gpos_ref, dec_mask_ref, g_out_ref) = refs[:8]
        enc_W = {k: refs[8 + j] for j, k in enumerate(ENC_KEYS)}
        dec_W = {k: refs[8 + n_enc + j] for j, k in enumerate(DEC_KEYS)}
        out_ref, local_ref, encw_ref, decw_ref = refs[8 + n_enc + n_dec:]

        feat = feat_ref[...]                                            # [N, D] f32

        # ---- relations -> zero-padded spatial-encoder layout (one-hot MXU gather) ----
        x_enc = jnp.dot(g_local_ref[...], feat, preferred_element_type=jnp.float32)
        enc_out = _mha_stack(x_enc, None, enc_mask_ref[...], enc_W, L_enc, H,
                             final_norm=True, attw_ref=encw_ref)

        # ---- encoder output back to relation order (= local_output / mem features) ----
        local_ref[...] = jnp.dot(g_keep_ref[...], enc_out,
                                 preferred_element_type=jnp.float32)

        # ---- sliding-window temporal-decoder input (one-hot gather over enc_out) ----
        x_dec = jnp.dot(g_global_ref[...], enc_out, preferred_element_type=jnp.float32)
        dec_out = _mha_stack(x_dec, gpos_ref[...], dec_mask_ref[...], dec_W, L_dec, H,
                             final_norm=False, attw_ref=decw_ref)

        # ---- scatter decoder rows back to relations (mode weights baked into g_out) ----
        out_ref[...] = jnp.dot(g_out_ref[...], dec_out, preferred_element_type=jnp.float32)

    return kernel


# --------------------------------------------------------------------------------------
# pallas_call wrapper (single fused kernel, grid=(1,), everything VMEM resident)
# --------------------------------------------------------------------------------------
def _vmem_spec(shape):
    nd = len(shape)
    return pl.BlockSpec(tuple(shape), lambda i, _nd=nd: (0,) * _nd)


def _extract_diag_blocks(attw, nb, s):
    """[L, nb*s, lane] lane-padded joint weights -> per-batch [L, nb, s, s] blocks."""
    L = attw.shape[0]
    R = nb * s
    aw = attw[:, :, :R].reshape(L, nb, s, nb, s)
    bi = jnp.arange(nb)
    aw = aw[:, bi, :, bi, :]                 # advanced-index dims go first -> [nb, L, s, s]
    return jnp.transpose(aw, (1, 0, 2, 3))


@functools.partial(jax.jit, static_argnames=("b", "l"))
def _device_forward(features, tables, pos_emb_weight, enc_W, dec_W, *, b, l):
    N, D = features.shape
    R_enc = b * l
    GL = 2 * l
    R_dec = (b - 1) * GL
    L_enc = enc_W["wqkv"].shape[0]
    L_dec = dec_W["wqk"].shape[0]
    lane_e = _lane_pad(R_enc)
    lane_d = _lane_pad(R_dec)

    # Decoder frame-position embedding rows (depends only on the pos table + static ids,
    # not on any kernel output -> one tiny gather outside the fused kernel).
    pos_tab = jnp.concatenate([pos_emb_weight.astype(jnp.float32),
                               jnp.zeros((1, D), jnp.float32)], axis=0)
    gpos = jnp.take(pos_tab, tables["pos_id"], axis=0)                  # [R_dec, D]

    inputs = [features, tables["g_local"], tables["enc_mask"], tables["g_keep"],
              tables["g_global"], gpos, tables["dec_mask"], tables["g_out"]]
    inputs += [enc_W[k] for k in ENC_KEYS]
    inputs += [dec_W[k] for k in DEC_KEYS]

    out_shape = (jax.ShapeDtypeStruct((N, D), jnp.float32),             # output
                 jax.ShapeDtypeStruct((N, D), jnp.float32),             # local_output
                 jax.ShapeDtypeStruct((L_enc, R_enc, lane_e), jnp.float32),
                 jax.ShapeDtypeStruct((L_dec, R_dec, lane_d), jnp.float32))

    kernel = _make_fused_kernel(NHEAD, L_enc, L_dec)
    out, local, encw, decw = pl.pallas_call(
        kernel,
        grid=(1,),
        in_specs=[_vmem_spec(x.shape) for x in inputs],
        out_specs=tuple(_vmem_spec(s.shape) for s in out_shape),
        out_shape=out_shape,
        compiler_params=pltpu.CompilerParams(
            dimension_semantics=("arbitrary",),
            # ~2.5 MiB footprint here; explicit limit documents headroom for v7x (64 MiB).
            vmem_limit_bytes=32 * 1024 * 1024),
        # TODO(synk): at reference D=1936, single-buffer the weight specs and tile K/N.
    )(*inputs)

    local_w = _extract_diag_blocks(encw, b, l)
    global_w = _extract_diag_blocks(decw, b - 1, GL)
    return out, local, global_w, local_w


# --------------------------------------------------------------------------------------
# Host-side integer/one-hot tables derived from im_idx only (no device round-trips).
# --------------------------------------------------------------------------------------
def _build_tables(im_idx, mode):
    im = np.asarray(im_idx, np.int64)
    N = int(im.shape[0])
    b = int(im[-1]) + 1
    counts = np.array([int((im == i).sum()) for i in range(b)], np.int64)
    l = int(counts.max())                     # count of torch.mode value
    GL = 2 * l
    R_enc, R_dec = b * l, (b - 1) * GL

    pos_in_frame = np.zeros(N, np.int64)
    seen = np.zeros(b, np.int64)
    for n in range(N):
        f = int(im[n]); pos_in_frame[n] = seen[f]; seen[f] += 1

    # one-hot gathers: relations -> padded [b, l] encoder layout, and back
    g_local = np.zeros((R_enc, N), np.float32)
    g_keep = np.zeros((N, R_enc), np.float32)
    for n in range(N):
        r = int(im[n]) * l + int(pos_in_frame[n])
        g_local[r, n] = 1.0
        g_keep[n, r] = 1.0

    # encoder additive mask: attend within own frame to valid (non-padded) keys only
    qf = np.repeat(np.arange(b), l)
    qs = np.tile(np.arange(l), b)
    valid_e = qs < counts[qf]
    enc_mask = np.where((qf[:, None] == qf[None, :]) & valid_e[None, :],
                        0.0, NEG_INF).astype(np.float32)

    # temporal decoder sliding windows over frame pairs (j, j+1)
    g_global = np.zeros((R_dec, R_enc), np.float32)
    pos_id = np.full(R_dec, 2, np.int32)                 # 2 -> zero row of the pos table
    win_len = np.zeros(b - 1, np.int64)
    dec_row = {}
    for j in range(b - 1):
        sel = np.where((im == j) | (im == j + 1))[0]
        win_len[j] = len(sel)
        for s, n in enumerate(sel):
            r = j * GL + s
            g_global[r, int(im[n]) * l + int(pos_in_frame[n])] = 1.0
            dec_row[(j, int(n))] = r
        cj = int(counts[j])
        pos_id[j * GL: j * GL + cj] = 0
        pos_id[j * GL + cj: j * GL + cj + int(counts[j + 1])] = 1

    wf = np.repeat(np.arange(b - 1), GL)
    ws = np.tile(np.arange(GL), b - 1)
    valid_d = ws < win_len[wf]
    # NOTE: reference derives decoder key padding from `row.sum()==0`; the counts-derived
    # mask is equivalent for any non-degenerate input (LayerNorm rows never sum to 0).
    dec_mask = np.where((wf[:, None] == wf[None, :]) & valid_d[None, :],
                        0.0, NEG_INF).astype(np.float32)

    # scatter decoder output rows back to relations; 'latter'/'both' weights baked in
    g_out = np.zeros((N, R_dec), np.float32)
    if mode in ("latter", "both"):
        for n in range(N):
            f = int(im[n])
            if f == 0:
                g_out[n, dec_row[(0, n)]] = 1.0
            elif mode == "latter" or f == b - 1:
                g_out[n, dec_row[(f - 1, n)]] = 1.0
            else:                                         # mode == 'both', interior frame
                g_out[n, dec_row[(f - 1, n)]] += 0.5
                g_out[n, dec_row[(f, n)]] += 0.5
    # any other mode: g_out stays zero -> output stays zero (matches reference)

    return dict(b=b, l=l, g_local=g_local, g_keep=g_keep, enc_mask=enc_mask,
                g_global=g_global, pos_id=pos_id, dec_mask=dec_mask, g_out=g_out)


# --------------------------------------------------------------------------------------
# Parameters (synthetic; shapes follow the nn.Module __init__) and kernel-side prep.
# --------------------------------------------------------------------------------------
def init_layer_params(key, D, F):
    ks = jax.random.split(key, 8)
    s = 0.05
    w = lambda k, shape: jax.random.normal(k, shape, jnp.float32) * s
    return {
        "wq": w(ks[0], (D, D)), "wk": w(ks[1], (D, D)), "wv": w(ks[2], (D, D)),
        "bq": jnp.zeros((1, D), jnp.float32),
        "bk": jnp.zeros((1, D), jnp.float32),
        "bv": jnp.zeros((1, D), jnp.float32),
        "wo": w(ks[3], (D, D)), "bo": jnp.zeros((1, D), jnp.float32),
        "g1": jnp.ones((1, D), jnp.float32), "be1": jnp.zeros((1, D), jnp.float32),
        "w1": w(ks[4], (D, F)), "b1": w(ks[5], (1, F)),
        "w2": w(ks[6], (F, D)), "b2": w(ks[7], (1, D)),
        "g2": jnp.ones((1, D), jnp.float32), "be2": jnp.zeros((1, D), jnp.float32),
    }


def prep_encoder_params(params_list, H):
    """Fuse Wq|Wk|Wv (scale folded into Wq/bq), cast MXU weights to bf16, stack layers."""
    D = params_list[0]["wq"].shape[0]
    scale = 1.0 / math.sqrt(D // H)

    def one(p):
        return {
            "wqkv": jnp.concatenate([p["wq"] * scale, p["wk"], p["wv"]],
                                    axis=1).astype(jnp.bfloat16),
            "bqkv": jnp.concatenate([p["bq"] * scale, p["bk"], p["bv"]],
                                    axis=1).astype(jnp.float32),
            "wo": p["wo"].astype(jnp.bfloat16), "bo": p["bo"].astype(jnp.float32),
            "g1": p["g1"], "be1": p["be1"],
            "w1": p["w1"].astype(jnp.bfloat16), "b1": p["b1"].astype(jnp.float32),
            "w2": p["w2"].astype(jnp.bfloat16), "b2": p["b2"].astype(jnp.float32),
            "g2": p["g2"], "be2": p["be2"],
        }

    per = [one(p) for p in params_list]
    return {k: jnp.stack([d[k] for d in per], axis=0) for k in per[0]}


def prep_decoder_params(params_list, H):
    """Fuse Wq|Wk (scale folded), keep Wv separate (q/k input is x+pos, v input is x)."""
    D = params_list[0]["wq"].shape[0]
    scale = 1.0 / math.sqrt(D // H)

    def one(p):
        return {
            "wqk": jnp.concatenate([p["wq"] * scale, p["wk"]], axis=1).astype(jnp.bfloat16),
            "bqk": jnp.concatenate([p["bq"] * scale, p["bk"]], axis=1).astype(jnp.float32),
            "wv": p["wv"].astype(jnp.bfloat16), "bv": p["bv"].astype(jnp.float32),
            "wo": p["wo"].astype(jnp.bfloat16), "bo": p["bo"].astype(jnp.float32),
            "g1": p["g1"], "be1": p["be1"],
            "w1": p["w1"].astype(jnp.bfloat16), "b1": p["b1"].astype(jnp.float32),
            "w2": p["w2"].astype(jnp.bfloat16), "b2": p["b2"].astype(jnp.float32),
        }

    per = [one(p) for p in params_list]
    return {k: jnp.stack([d[k] for d in per], axis=0) for k in per[0]}


# --------------------------------------------------------------------------------------
# Public forward (matches the nn.Module return signature)
# --------------------------------------------------------------------------------------
def transformer_forward(features, im_idx, enc_params, dec_params, pos_emb_weight,
                        mode="latter"):
    T = _build_tables(im_idx, mode)
    tables = {
        "g_local": jnp.asarray(T["g_local"]),
        "enc_mask": jnp.asarray(T["enc_mask"]),
        "g_keep": jnp.asarray(T["g_keep"]),
        "g_global": jnp.asarray(T["g_global"]),
        "pos_id": jnp.asarray(T["pos_id"], jnp.int32),
        "dec_mask": jnp.asarray(T["dec_mask"]),
        "g_out": jnp.asarray(T["g_out"]),
    }
    enc_W = prep_encoder_params(enc_params, NHEAD)
    dec_W = prep_decoder_params(dec_params, NHEAD)

    output, local_output, global_w, local_w = _device_forward(
        jnp.asarray(features, jnp.float32), tables,
        jnp.asarray(pos_emb_weight, jnp.float32), enc_W, dec_W,
        b=T["b"], l=T["l"])

    # mem_compute=True with mem_fusion=None and memory=[] -> memory_hallucinator is a
    # no-op, so mem_encoder_features == local_output (matches reference control flow).
    # TODO(synk): mem_attention / selector branch (memory_hallucinator) unused with memory=[].
    mem_encoder_features = local_output
    return output, local_output, mem_encoder_features, global_w, local_w


if __name__ == "__main__":
    key = jax.random.PRNGKey(0)
    D = EMBED_DIM
    # 12 relation features over 4 frames (counts 3,4,3,2 -> l = 4, b = 4)
    im_idx = np.array([0, 0, 0, 1, 1, 1, 1, 2, 2, 2, 3, 3], np.int64)
    N = im_idx.shape[0]

    kf, kp, ke, kd = jax.random.split(key, 4)
    features = jax.random.normal(kf, (N, D), jnp.float32)
    pos_emb_weight = jax.random.uniform(kp, (2, D), jnp.float32)   # nn.init.uniform_
    enc_params = [init_layer_params(k, D, FFN_DIM) for k in jax.random.split(ke, ENC_LAYERS)]
    dec_params = [init_layer_params(k, D, FFN_DIM) for k in jax.random.split(kd, DEC_LAYERS)]

    outs = transformer_forward(features, im_idx, enc_params, dec_params,
                               pos_emb_weight, mode="latter")
    for o in outs:
        jax.block_until_ready(o)
    print("KERNEL_OK")
</pallas_src>

<mosaic_0001>
module attributes {stable_mosaic.version = 11 : i64} {
  func.func @kernel(%arg0: i32, %arg1: memref<12x128xf32, #tpu.memory_space<vmem>>, %arg2: memref<16x12xf32, #tpu.memory_space<vmem>>, %arg3: memref<16x16xf32, #tpu.memory_space<vmem>>, %arg4: memref<12x16xf32, #tpu.memory_space<vmem>>, %arg5: memref<24x16xf32, #tpu.memory_space<vmem>>, %arg6: memref<24x128xf32, #tpu.memory_space<vmem>>, %arg7: memref<24x24xf32, #tpu.memory_space<vmem>>, %arg8: memref<12x24xf32, #tpu.memory_space<vmem>>, %arg9: memref<1x128x384xbf16, #tpu.memory_space<vmem>>, %arg10: memref<1x1x384xf32, #tpu.memory_space<vmem>>, %arg11: memref<1x128x128xbf16, #tpu.memory_space<vmem>>, %arg12: memref<1x1x128xf32, #tpu.memory_space<vmem>>, %arg13: memref<1x1x128xf32, #tpu.memory_space<vmem>>, %arg14: memref<1x1x128xf32, #tpu.memory_space<vmem>>, %arg15: memref<1x128x256xbf16, #tpu.memory_space<vmem>>, %arg16: memref<1x1x256xf32, #tpu.memory_space<vmem>>, %arg17: memref<1x256x128xbf16, #tpu.memory_space<vmem>>, %arg18: memref<1x1x128xf32, #tpu.memory_space<vmem>>, %arg19: memref<1x1x128xf32, #tpu.memory_space<vmem>>, %arg20: memref<1x1x128xf32, #tpu.memory_space<vmem>>, %arg21: memref<3x128x256xbf16, #tpu.memory_space<vmem>>, %arg22: memref<3x1x256xf32, #tpu.memory_space<vmem>>, %arg23: memref<3x128x128xbf16, #tpu.memory_space<vmem>>, %arg24: memref<3x1x128xf32, #tpu.memory_space<vmem>>, %arg25: memref<3x128x128xbf16, #tpu.memory_space<vmem>>, %arg26: memref<3x1x128xf32, #tpu.memory_space<vmem>>, %arg27: memref<3x1x128xf32, #tpu.memory_space<vmem>>, %arg28: memref<3x1x128xf32, #tpu.memory_space<vmem>>, %arg29: memref<3x128x256xbf16, #tpu.memory_space<vmem>>, %arg30: memref<3x1x256xf32, #tpu.memory_space<vmem>>, %arg31: memref<3x256x128xbf16, #tpu.memory_space<vmem>>, %arg32: memref<3x1x128xf32, #tpu.memory_space<vmem>>, %arg33: memref<12x128xf32, #tpu.memory_space<vmem>>, %arg34: memref<12x128xf32, #tpu.memory_space<vmem>>, %arg35: memref<1x16x128xf32, #tpu.memory_space<vmem>>, %arg36: memref<3x24x128xf32, #tpu.memory_space<vmem>>) attributes {dimension_semantics = [#tpu.dimension_semantics<arbitrary>], iteration_bounds = array<i64: 1>, scalar_prefetch = 0 : i64, scratch_operands = 0 : i64, tpu.core_type = #tpu.core_type<tc>, window_params = [{pipeline_mode = #tpu.pipeline_mode<synchronous>, transform_indices = @transform_0, window_bounds = array<i64: 12, 128>}, {pipeline_mode = #tpu.pipeline_mode<synchronous>, transform_indices = @transform_1, window_bounds = array<i64: 16, 12>}, {pipeline_mode = #tpu.pipeline_mode<synchronous>, transform_indices = @transform_2, window_bounds = array<i64: 16, 16>}, {pipeline_mode = #tpu.pipeline_mode<synchronous>, transform_indices = @transform_3, window_bounds = array<i64: 12, 16>}, {pipeline_mode = #tpu.pipeline_mode<synchronous>, transform_indices = @transform_4, window_bounds = array<i64: 24, 16>}, {pipeline_mode = #tpu.pipeline_mode<synchronous>, transform_indices = @transform_5, window_bounds = array<i64: 24, 128>}, {pipeline_mode = #tpu.pipeline_mode<synchronous>, transform_indices = @transform_6, window_bounds = array<i64: 24, 24>}, {pipeline_mode = #tpu.pipeline_mode<synchronous>, transform_indices = @transform_7, window_bounds = array<i64: 12, 24>}, {pipeline_mode = #tpu.pipeline_mode<synchronous>, transform_indices = @transform_8, window_bounds = array<i64: 1, 128, 384>}, {pipeline_mode = #tpu.pipeline_mode<synchronous>, transform_indices = @transform_9, window_bounds = array<i64: 1, 1, 384>}, {pipeline_mode = #tpu.pipeline_mode<synchronous>, transform_indices = @transform_10, window_bounds = array<i64: 1, 128, 128>}, {pipeline_mode = #tpu.pipeline_mode<synchronous>, transform_indices = @transform_11, window_bounds = array<i64: 1, 1, 128>}, {pipeline_mode = #tpu.pipeline_mode<synchronous>, transform_indices = @transform_12, window_bounds = array<i64: 1, 1, 128>}, {pipeline_mode = #tpu.pipeline_mode<synchronous>, transform_indices = @transform_13, window_bounds = array<i64: 1, 1, 128>}, {pipeline_mode = #tpu.pipeline_mode<synchronous>, transform_indices = @transform_14, window_bounds = array<i64: 1, 128, 256>}, {pipeline_mode = #tpu.pipeline_mode<synchronous>, transform_indices = @transform_15, window_bounds = array<i64: 1, 1, 256>}, {pipeline_mode = #tpu.pipeline_mode<synchronous>, transform_indices = @transform_16, window_bounds = array<i64: 1, 256, 128>}, {pipeline_mode = #tpu.pipeline_mode<synchronous>, transform_indices = @transform_17, window_bounds = array<i64: 1, 1, 128>}, {pipeline_mode = #tpu.pipeline_mode<synchronous>, transform_indices = @transform_18, window_bounds = array<i64: 1, 1, 128>}, {pipeline_mode = #tpu.pipeline_mode<synchronous>, transform_indices = @transform_19, window_bounds = array<i64: 1, 1, 128>}, {pipeline_mode = #tpu.pipeline_mode<synchronous>, transform_indices = @transform_20, window_bounds = array<i64: 3, 128, 256>}, {pipeline_mode = #tpu.pipeline_mode<synchronous>, transform_indices = @transform_21, window_bounds = array<i64: 3, 1, 256>}, {pipeline_mode = #tpu.pipeline_mode<synchronous>, transform_indices = @transform_22, window_bounds = array<i64: 3, 128, 128>}, {pipeline_mode = #tpu.pipeline_mode<synchronous>, transform_indices = @transform_23, window_bounds = array<i64: 3, 1, 128>}, {pipeline_mode = #tpu.pipeline_mode<synchronous>, transform_indices = @transform_24, window_bounds = array<i64: 3, 128, 128>}, {pipeline_mode = #tpu.pipeline_mode<synchronous>, transform_indices = @transform_25, window_bounds = array<i64: 3, 1, 128>}, {pipeline_mode = #tpu.pipeline_mode<synchronous>, transform_indices = @transform_26, window_bounds = array<i64: 3, 1, 128>}, {pipeline_mode = #tpu.pipeline_mode<synchronous>, transform_indices = @transform_27, window_bounds = array<i64: 3, 1, 128>}, {pipeline_mode = #tpu.pipeline_mode<synchronous>, transform_indices = @transform_28, window_bounds = array<i64: 3, 128, 256>}, {pipeline_mode = #tpu.pipeline_mode<synchronous>, transform_indices = @transform_29, window_bounds = array<i64: 3, 1, 256>}, {pipeline_mode = #tpu.pipeline_mode<synchronous>, transform_indices = @transform_30, window_bounds = array<i64: 3, 256, 128>}, {pipeline_mode = #tpu.pipeline_mode<synchronous>, transform_indices = @transform_31, window_bounds = array<i64: 3, 1, 128>}, {pipeline_mode = #tpu.pipeline_mode<synchronous>, transform_indices = @transform_32, window_bounds = array<i64: 12, 128>}, {pipeline_mode = #tpu.pipeline_mode<synchronous>, transform_indices = @transform_33, window_bounds = array<i64: 12, 128>}, {pipeline_mode = #tpu.pipeline_mode<synchronous>, transform_indices = @transform_34, window_bounds = array<i64: 1, 16, 128>}, {pipeline_mode = #tpu.pipeline_mode<synchronous>, transform_indices = @transform_35, window_bounds = array<i64: 3, 24, 128>}]} {
    %c0 = arith.constant 0 : index
    %c0_0 = arith.constant 0 : index
    %0 = vector.load %arg1[%c0, %c0_0] : memref<12x128xf32, #tpu.memory_space<vmem>>, vector<12x128xf32>
    %c0_1 = arith.constant 0 : index
    %c0_2 = arith.constant 0 : index
    %1 = vector.load %arg2[%c0_1, %c0_2] : memref<16x12xf32, #tpu.memory_space<vmem>>, vector<16x12xf32>
    %cst = arith.constant dense<0.000000e+00> : vector<16x128xf32>
    %2 = tpu.matmul %1, %0, %cst {dimension_numbers = #tpu.dot_dimension_numbers<[1], [0], [0], [1], [0, 0, 1, 1], [], []>} : vector<16x12xf32>, vector<12x128xf32>, vector<16x128xf32> -> vector<16x128xf32>
    %c0_3 = arith.constant 0 : index
    %c0_4 = arith.constant 0 : index
    %3 = vector.load %arg3[%c0_3, %c0_4] : memref<16x16xf32, #tpu.memory_space<vmem>>, vector<16x16xf32>
    %4 = tpu.iota {dimensions = array<i32: 1>} : vector<8x128xi32>
    %5 = tpu.iota {dimensions = array<i32: 0>} : vector<8x128xi32>
    %c16_i32 = arith.constant 16 : i32
    %6 = vector.broadcast %c16_i32 : i32 to vector<8x128xi32>
    %7 = arith.muli %5, %6 : vector<8x128xi32>
    %8 = arith.cmpi sge, %4, %7 : vector<8x128xi32>
    %c1_i32 = arith.constant 1 : i32
    %9 = vector.broadcast %c1_i32 : i32 to vector<8x128xi32>
    %10 = arith.addi %5, %9 : vector<8x128xi32>
    %c16_i32_5 = arith.constant 16 : i32
    %11 = vector.broadcast %c16_i32_5 : i32 to vector<8x128xi32>
    %12 = arith.muli %10, %11 : vector<8x128xi32>
    %13 = arith.cmpi slt, %4, %12 : vector<8x128xi32>
    %14 = arith.andi %8, %13 : vector<8x128xi1>
    %15 = arith.extui %14 : vector<8x128xi1> to vector<8x128xi32>
    %16 = arith.sitofp %15 : vector<8x128xi32> to vector<8x128xf32>
    %17 = vector.shape_cast %16 : vector<8x128xf32> to vector<8x1x128xf32>
    %18 = arith.truncf %2 : vector<16x128xf32> to vector<16x128xbf16>
    %c0_6 = arith.constant 0 : index
    %c0_7 = arith.constant 0 : index
    %c0_8 = arith.constant 0 : index
    %19 = vector.load %arg9[%c0_6, %c0_7, %c0_8] : memref<1x128x384xbf16, #tpu.memory_space<vmem>>, vector<1x128x384xbf16>
    %20 = vector.shape_cast %19 : vector<1x128x384xbf16> to vector<128x384xbf16>
    %cst_9 = arith.constant dense<0.000000e+00> : vector<16x384xf32>
    %21 = tpu.matmul %18, %20, %cst_9 {dimension_numbers = #tpu.dot_dimension_numbers<[1], [0], [0], [1], [0, 0, 1, 1], [], []>} : vector<16x128xbf16>, vector<128x384xbf16>, vector<16x384xf32> -> vector<16x384xf32>
    %c0_10 = arith.constant 0 : index
    %c0_11 = arith.constant 0 : index
    %c0_12 = arith.constant 0 : index
    %22 = vector.load %arg10[%c0_10, %c0_11, %c0_12] : memref<1x1x384xf32, #tpu.memory_space<vmem>>, vector<1x1x384xf32>
    %23 = vector.shape_cast %22 : vector<1x1x384xf32> to vector<1x384xf32>
    %24 = vector.broadcast %23 : vector<1x384xf32> to vector<16x384xf32>
    %25 = arith.addf %21, %24 : vector<16x384xf32>
    %26 = vector.extract_strided_slice %25 {offsets = [0, 0], sizes = [16, 128], strides = [1, 1]} : vector<16x384xf32> to vector<16x128xf32>
    %27 = vector.extract_strided_slice %25 {offsets = [0, 128], sizes = [16, 128], strides = [1, 1]} : vector<16x384xf32> to vector<16x128xf32>
    %28 = vector.extract_strided_slice %25 {offsets = [0, 256], sizes = [16, 128], strides = [1, 1]} : vector<16x384xf32> to vector<16x128xf32>
    %29 = vector.shape_cast %26 : vector<16x128xf32> to vector<1x16x128xf32>
    %30 = vector.broadcast %29 : vector<1x16x128xf32> to vector<8x16x128xf32>
    %31 = vector.broadcast %17 : vector<8x1x128xf32> to vector<8x16x128xf32>
    %32 = arith.mulf %30, %31 : vector<8x16x128xf32>
    %33 = arith.truncf %32 : vector<8x16x128xf32> to vector<8x16x128xbf16>
    %34 = arith.truncf %27 : vector<16x128xf32> to vector<16x128xbf16>
    %35 = arith.truncf %28 : vector<16x128xf32> to vector<16x128xbf16>
    %36 = vector.shape_cast %33 : vector<8x16x128xbf16> to vector<128x128xbf16>
    %cst_13 = arith.constant dense<0.000000e+00> : vector<128x16xf32>
    %37 = tpu.matmul %36, %34, %cst_13 {dimension_numbers = #tpu.dot_dimension_numbers<[1], [1], [0], [0], [0, 0, 1, 0], [], []>} : vector<128x128xbf16>, vector<16x128xbf16>, vector<128x16xf32> -> vector<128x16xf32>
    %38 = vector.shape_cast %37 : vector<128x16xf32> to vector<8x16x16xf32>
    %39 = vector.shape_cast %3 : vector<16x16xf32> to vector<1x16x16xf32>
    %40 = vector.broadcast %39 : vector<1x16x16xf32> to vector<8x16x16xf32>
    %41 = arith.addf %38, %40 : vector<8x16x16xf32>
    %cst_14 = arith.constant dense<0xFF800000> : vector<8x16xf32>
    %42 = vector.multi_reduction <maximumf>, %41, %cst_14 [2] : vector<8x16x16xf32> to vector<8x16xf32>
    %43 = vector.shape_cast %42 : vector<8x16xf32> to vector<8x16x1xf32>
    %44 = vector.broadcast %43 : vector<8x16x1xf32> to vector<8x16x16xf32>
    %45 = arith.subf %41, %44 : vector<8x16x16xf32>
    %46 = math.exp %45 : vector<8x16x16xf32>
    %cst_15 = arith.constant dense<0.000000e+00> : vector<8x16xf32>
    %47 = vector.multi_reduction <add>, %46, %cst_15 [2] : vector<8x16x16xf32> to vector<8x16xf32>
    %48 = vector.shape_cast %47 : vector<8x16xf32> to vector<8x16x1xf32>
    %49 = vector.broadcast %48 : vector<8x16x1xf32> to vector<8x16x16xf32>
    %50 = arith.divf %46, %49 : vector<8x16x16xf32>
    %51 = vector.shape_cast %50 : vector<8x16x16xf32> to vector<128x16xf32>
    %52 = arith.truncf %51 : vector<128x16xf32> to vector<128x16xbf16>
    %cst_16 = arith.constant dense<0.000000e+00> : vector<128x128xf32>
    %53 = tpu.matmul %52, %35, %cst_16 {dimension_numbers = #tpu.dot_dimension_numbers<[1], [0], [0], [1], [0, 0, 1, 1], [], []>} : vector<128x16xbf16>, vector<16x128xbf16>, vector<128x128xf32> -> vector<128x128xf32>
    %54 = vector.shape_cast %53 : vector<128x128xf32> to vector<8x16x128xf32>
    %55 = vector.broadcast %17 : vector<8x1x128xf32> to vector<8x16x128xf32>
    %56 = arith.mulf %54, %55 : vector<8x16x128xf32>
    %cst_17 = arith.constant dense<0.000000e+00> : vector<16x128xf32>
    %57 = vector.multi_reduction <add>, %56, %cst_17 [0] : vector<8x16x128xf32> to vector<16x128xf32>
    %58 = arith.truncf %57 : vector<16x128xf32> to vector<16x128xbf16>
    %c0_18 = arith.constant 0 : index
    %c0_19 = arith.constant 0 : index
    %c0_20 = arith.constant 0 : index
    %59 = vector.load %arg11[%c0_18, %c0_19, %c0_20] : memref<1x128x128xbf16, #tpu.memory_space<vmem>>, vector<1x128x128xbf16>
    %60 = vector.shape_cast %59 : vector<1x128x128xbf16> to vector<128x128xbf16>
    %cst_21 = arith.constant dense<0.000000e+00> : vector<16x128xf32>
    %61 = tpu.matmul %58, %60, %cst_21 {dimension_numbers = #tpu.dot_dimension_numbers<[1], [0], [0], [1], [0, 0, 1, 1], [], []>} : vector<16x128xbf16>, vector<128x128xbf16>, vector<16x128xf32> -> vector<16x128xf32>
    %c0_22 = arith.constant 0 : index
    %c0_23 = arith.constant 0 : index
    %c0_24 = arith.constant 0 : index
    %62 = vector.load %arg12[%c0_22, %c0_23, %c0_24] : memref<1x1x128xf32, #tpu.memory_space<vmem>>, vector<1x1x128xf32>
    %63 = vector.shape_cast %62 : vector<1x1x128xf32> to vector<1x128xf32>
    %64 = vector.broadcast %63 : vector<1x128xf32> to vector<16x128xf32>
    %65 = arith.addf %61, %64 : vector<16x128xf32>
    %66 = arith.addf %2, %65 : vector<16x128xf32>
    %c0_25 = arith.constant 0 : index
    %c0_26 = arith.constant 0 : index
    %c0_27 = arith.constant 0 : index
    %67 = vector.load %arg13[%c0_25, %c0_26, %c0_27] : memref<1x1x128xf32, #tpu.memory_space<vmem>>, vector<1x1x128xf32>
    %68 = vector.shape_cast %67 : vector<1x1x128xf32> to vector<1x128xf32>
    %c0_28 = arith.constant 0 : index
    %c0_29 = arith.constant 0 : index
    %c0_30 = arith.constant 0 : index
    %69 = vector.load %arg14[%c0_28, %c0_29, %c0_30] : memref<1x1x128xf32, #tpu.memory_space<vmem>>, vector<1x1x128xf32>
    %70 = vector.shape_cast %69 : vector<1x1x128xf32> to vector<1x128xf32>
    %cst_31 = arith.constant dense<0.000000e+00> : vector<16xf32>
    %71 = vector.multi_reduction <add>, %66, %cst_31 [1] : vector<16x128xf32> to vector<16xf32>
    %72 = vector.shape_cast %71 : vector<16xf32> to vector<16x1xf32>
    %cst_32 = arith.constant 1.280000e+02 : f32
    %73 = vector.broadcast %cst_32 : f32 to vector<16x1xf32>
    %74 = arith.divf %72, %73 : vector<16x1xf32>
    %75 = vector.broadcast %74 : vector<16x1xf32> to vector<16x128xf32>
    %76 = arith.subf %66, %75 : vector<16x128xf32>
    %77 = arith.mulf %76, %76 : vector<16x128xf32>
    %cst_33 = arith.constant dense<0.000000e+00> : vector<16xf32>
    %78 = vector.multi_reduction <add>, %77, %cst_33 [1] : vector<16x128xf32> to vector<16xf32>
    %79 = vector.shape_cast %78 : vector<16xf32> to vector<16x1xf32>
    %cst_34 = arith.constant 1.280000e+02 : f32
    %80 = vector.broadcast %cst_34 : f32 to vector<16x1xf32>
    %81 = arith.divf %79, %80 : vector<16x1xf32>
    %82 = vector.broadcast %74 : vector<16x1xf32> to vector<16x128xf32>
    %83 = arith.subf %66, %82 : vector<16x128xf32>
    %cst_35 = arith.constant 9.99999974E-6 : f32
    %84 = vector.broadcast %cst_35 : f32 to vector<16x1xf32>
    %85 = arith.addf %81, %84 : vector<16x1xf32>
    %86 = math.rsqrt %85 : vector<16x1xf32>
    %87 = vector.broadcast %86 : vector<16x1xf32> to vector<16x128xf32>
    %88 = arith.mulf %83, %87 : vector<16x128xf32>
    %89 = vector.broadcast %68 : vector<1x128xf32> to vector<16x128xf32>
    %90 = arith.mulf %88, %89 : vector<16x128xf32>
    %91 = vector.broadcast %70 : vector<1x128xf32> to vector<16x128xf32>
    %92 = arith.addf %90, %91 : vector<16x128xf32>
    %93 = arith.truncf %92 : vector<16x128xf32> to vector<16x128xbf16>
    %c0_36 = arith.constant 0 : index
    %c0_37 = arith.constant 0 : index
    %c0_38 = arith.constant 0 : index
    %94 = vector.load %arg15[%c0_36, %c0_37, %c0_38] : memref<1x128x256xbf16, #tpu.memory_space<vmem>>, vector<1x128x256xbf16>
    %95 = vector.shape_cast %94 : vector<1x128x256xbf16> to vector<128x256xbf16>
    %cst_39 = arith.constant dense<0.000000e+00> : vector<16x256xf32>
    %96 = tpu.matmul %93, %95, %cst_39 {dimension_numbers = #tpu.dot_dimension_numbers<[1], [0], [0], [1], [0, 0, 1, 1], [], []>} : vector<16x128xbf16>, vector<128x256xbf16>, vector<16x256xf32> -> vector<16x256xf32>
    %c0_40 = arith.constant 0 : index
    %c0_41 = arith.constant 0 : index
    %c0_42 = arith.constant 0 : index
    %97 = vector.load %arg16[%c0_40, %c0_41, %c0_42] : memref<1x1x256xf32, #tpu.memory_space<vmem>>, vector<1x1x256xf32>
    %98 = vector.shape_cast %97 : vector<1x1x256xf32> to vector<1x256xf32>
    %99 = vector.broadcast %98 : vector<1x256xf32> to vector<16x256xf32>
    %100 = arith.addf %96, %99 : vector<16x256xf32>
    %cst_43 = arith.constant 0.000000e+00 : f32
    %101 = vector.broadcast %cst_43 : f32 to vector<16x256xf32>
    %102 = arith.maximumf %100, %101 : vector<16x256xf32>
    %103 = arith.truncf %102 : vector<16x256xf32> to vector<16x256xbf16>
    %c0_44 = arith.constant 0 : index
    %c0_45 = arith.constant 0 : index
    %c0_46 = arith.constant 0 : index
    %104 = vector.load %arg17[%c0_44, %c0_45, %c0_46] : memref<1x256x128xbf16, #tpu.memory_space<vmem>>, vector<1x256x128xbf16>
    %105 = vector.shape_cast %104 : vector<1x256x128xbf16> to vector<256x128xbf16>
    %cst_47 = arith.constant dense<0.000000e+00> : vector<16x128xf32>
    %106 = tpu.matmul %103, %105, %cst_47 {dimension_numbers = #tpu.dot_dimension_numbers<[1], [0], [0], [1], [0, 0, 1, 1], [], []>} : vector<16x256xbf16>, vector<256x128xbf16>, vector<16x128xf32> -> vector<16x128xf32>
    %c0_48 = arith.constant 0 : index
    %c0_49 = arith.constant 0 : index
    %c0_50 = arith.constant 0 : index
    %107 = vector.load %arg18[%c0_48, %c0_49, %c0_50] : memref<1x1x128xf32, #tpu.memory_space<vmem>>, vector<1x1x128xf32>
    %108 = vector.shape_cast %107 : vector<1x1x128xf32> to vector<1x128xf32>
    %109 = vector.broadcast %108 : vector<1x128xf32> to vector<16x128xf32>
    %110 = arith.addf %106, %109 : vector<16x128xf32>
    %111 = arith.addf %92, %110 : vector<16x128xf32>
    %c0_51 = arith.constant 0 : index
    %c0_52 = arith.constant 0 : index
    %c0_53 = arith.constant 0 : index
    %112 = vector.load %arg19[%c0_51, %c0_52, %c0_53] : memref<1x1x128xf32, #tpu.memory_space<vmem>>, vector<1x1x128xf32>
    %113 = vector.shape_cast %112 : vector<1x1x128xf32> to vector<1x128xf32>
    %c0_54 = arith.constant 0 : index
    %c0_55 = arith.constant 0 : index
    %c0_56 = arith.constant 0 : index
    %114 = vector.load %arg20[%c0_54, %c0_55, %c0_56] : memref<1x1x128xf32, #tpu.memory_space<vmem>>, vector<1x1x128xf32>
    %115 = vector.shape_cast %114 : vector<1x1x128xf32> to vector<1x128xf32>
    %cst_57 = arith.constant dense<0.000000e+00> : vector<16xf32>
    %116 = vector.multi_reduction <add>, %111, %cst_57 [1] : vector<16x128xf32> to vector<16xf32>
    %117 = vector.shape_cast %116 : vector<16xf32> to vector<16x1xf32>
    %cst_58 = arith.constant 1.280000e+02 : f32
    %118 = vector.broadcast %cst_58 : f32 to vector<16x1xf32>
    %119 = arith.divf %117, %118 : vector<16x1xf32>
    %120 = vector.broadcast %119 : vector<16x1xf32> to vector<16x128xf32>
    %121 = arith.subf %111, %120 : vector<16x128xf32>
    %122 = arith.mulf %121, %121 : vector<16x128xf32>
    %cst_59 = arith.constant dense<0.000000e+00> : vector<16xf32>
    %123 = vector.multi_reduction <add>, %122, %cst_59 [1] : vector<16x128xf32> to vector<16xf32>
    %124 = vector.shape_cast %123 : vector<16xf32> to vector<16x1xf32>
    %cst_60 = arith.constant 1.280000e+02 : f32
    %125 = vector.broadcast %cst_60 : f32 to vector<16x1xf32>
    %126 = arith.divf %124, %125 : vector<16x1xf32>
    %127 = vector.broadcast %119 : vector<16x1xf32> to vector<16x128xf32>
    %128 = arith.subf %111, %127 : vector<16x128xf32>
    %cst_61 = arith.constant 9.99999974E-6 : f32
    %129 = vector.broadcast %cst_61 : f32 to vector<16x1xf32>
    %130 = arith.addf %126, %129 : vector<16x1xf32>
    %131 = math.rsqrt %130 : vector<16x1xf32>
    %132 = vector.broadcast %131 : vector<16x1xf32> to vector<16x128xf32>
    %133 = arith.mulf %128, %132 : vector<16x128xf32>
    %134 = vector.broadcast %113 : vector<1x128xf32> to vector<16x128xf32>
    %135 = arith.mulf %133, %134 : vector<16x128xf32>
    %136 = vector.broadcast %115 : vector<1x128xf32> to vector<16x128xf32>
    %137 = arith.addf %135, %136 : vector<16x128xf32>
    %cst_62 = arith.constant dense<0.000000e+00> : vector<16x16xf32>
    %138 = vector.multi_reduction <add>, %50, %cst_62 [0] : vector<8x16x16xf32> to vector<16x16xf32>
    %cst_63 = arith.constant 8.000000e+00 : f32
    %139 = vector.broadcast %cst_63 : f32 to vector<16x16xf32>
    %140 = arith.divf %138, %139 : vector<16x16xf32>
    %cst_64 = arith.constant 0.000000e+00 : f32
    %141 = vector.broadcast %cst_64 : f32 to vector<16x112xf32>
    %142 = tpu.concatenate %140, %141 in 1 : vector<16x16xf32>, vector<16x112xf32> -> vector<16x128xf32>
    %c0_65 = arith.constant 0 : index
    %c0_66 = arith.constant 0 : index
    %c0_67 = arith.constant 0 : index
    %143 = vector.load %arg35[%c0_65, %c0_66, %c0_67] : memref<1x16x128xf32, #tpu.memory_space<vmem>>, vector<1x16x128xf32>
    %144 = vector.shape_cast %143 : vector<1x16x128xf32> to vector<16x128xf32>
    %145 = vector.shape_cast %142 : vector<16x128xf32> to vector<1x16x128xf32>
    tpu.vector_store %arg35[%c0_65, %c0_66, %c0_67], %145 {strides = array<i32>} : memref<1x16x128xf32, #tpu.memory_space<vmem>>, vector<1x16x128xf32>,
    %c0_68 = arith.constant 0 : index
    %c0_69 = arith.constant 0 : index
    %146 = vector.load %arg4[%c0_68, %c0_69] : memref<12x16xf32, #tpu.memory_space<vmem>>, vector<12x16xf32>
    %cst_70 = arith.constant dense<0.000000e+00> : vector<12x128xf32>
    %147 = tpu.matmul %146, %137, %cst_70 {dimension_numbers = #tpu.dot_dimension_numbers<[1], [0], [0], [1], [0, 0, 1, 1], [], []>} : vector<12x16xf32>, vector<16x128xf32>, vector<12x128xf32> -> vector<12x128xf32>
    %c0_71 = arith.constant 0 : index
    %c0_72 = arith.constant 0 : index
    %148 = vector.load %arg34[%c0_71, %c0_72] : memref<12x128xf32, #tpu.memory_space<vmem>>, vector<12x128xf32>
    tpu.vector_store %arg34[%c0_71, %c0_72], %147 {strides = array<i32>} : memref<12x128xf32, #tpu.memory_space<vmem>>, vector<12x128xf32>,
    %c0_73 = arith.constant 0 : index
    %c0_74 = arith.constant 0 : index
    %149 = vector.load %arg5[%c0_73, %c0_74] : memref<24x16xf32, #tpu.memory_space<vmem>>, vector<24x16xf32>
    %cst_75 = arith.constant dense<0.000000e+00> : vector<24x128xf32>
    %150 = tpu.matmul %149, %137, %cst_75 {dimension_numbers = #tpu.dot_dimension_numbers<[1], [0], [0], [1], [0, 0, 1, 1], [], []>} : vector<24x16xf32>, vector<16x128xf32>, vector<24x128xf32> -> vector<24x128xf32>
    %c0_76 = arith.constant 0 : index
    %c0_77 = arith.constant 0 : index
    %151 = vector.load %arg6[%c0_76, %c0_77] : memref<24x128xf32, #tpu.memory_space<vmem>>, vector<24x128xf32>
    %c0_78 = arith.constant 0 : index
    %c0_79 = arith.constant 0 : index
    %152 = vector.load %arg7[%c0_78, %c0_79] : memref<24x24xf32, #tpu.memory_space<vmem>>, vector<24x24xf32>
    %153 = tpu.iota {dimensions = array<i32: 1>} : vector<8x128xi32>
    %154 = tpu.iota {dimensions = array<i32: 0>} : vector<8x128xi32>
    %c16_i32_80 = arith.constant 16 : i32
    %155 = vector.broadcast %c16_i32_80 : i32 to vector<8x128xi32>
    %156 = arith.muli %154, %155 : vector<8x128xi32>
    %157 = arith.cmpi sge, %153, %156 : vector<8x128xi32>
    %c1_i32_81 = arith.constant 1 : i32
    %158 = vector.broadcast %c1_i32_81 : i32 to vector<8x128xi32>
    %159 = arith.addi %154, %158 : vector<8x128xi32>
    %c16_i32_82 = arith.constant 16 : i32
    %160 = vector.broadcast %c16_i32_82 : i32 to vector<8x128xi32>
    %161 = arith.muli %159, %160 : vector<8x128xi32>
    %162 = arith.cmpi slt, %153, %161 : vector<8x128xi32>
    %163 = arith.andi %157, %162 : vector<8x128xi1>
    %164 = arith.extui %163 : vector<8x128xi1> to vector<8x128xi32>
    %165 = arith.sitofp %164 : vector<8x128xi32> to vector<8x128xf32>
    %166 = vector.shape_cast %165 : vector<8x128xf32> to vector<8x1x128xf32>
    %167 = arith.addf %150, %151 : vector<24x128xf32>
    %168 = arith.truncf %167 : vector<24x128xf32> to vector<24x128xbf16>
    %c0_83 = arith.constant 0 : index
    %c0_84 = arith.constant 0 : index
    %c0_85 = arith.constant 0 : index
    %169 = vector.load %arg21[%c0_83, %c0_84, %c0_85] : memref<3x128x256xbf16, #tpu.memory_space<vmem>>, vector<1x128x256xbf16>
    %170 = vector.shape_cast %169 : vector<1x128x256xbf16> to vector<128x256xbf16>
    %cst_86 = arith.constant dense<0.000000e+00> : vector<24x256xf32>
    %171 = tpu.matmul %168, %170, %cst_86 {dimension_numbers = #tpu.dot_dimension_numbers<[1], [0], [0], [1], [0, 0, 1, 1], [], []>} : vector<24x128xbf16>, vector<128x256xbf16>, vector<24x256xf32> -> vector<24x256xf32>
    %c0_87 = arith.constant 0 : index
    %c0_88 = arith.constant 0 : index
    %c0_89 = arith.constant 0 : index
    %172 = vector.load %arg22[%c0_87, %c0_88, %c0_89] : memref<3x1x256xf32, #tpu.memory_space<vmem>>, vector<1x1x256xf32>
    %173 = vector.shape_cast %172 : vector<1x1x256xf32> to vector<1x256xf32>
    %174 = vector.broadcast %173 : vector<1x256xf32> to vector<24x256xf32>
    %175 = arith.addf %171, %174 : vector<24x256xf32>
    %176 = arith.truncf %150 : vector<24x128xf32> to vector<24x128xbf16>
    %c0_90 = arith.constant 0 : index
    %c0_91 = arith.constant 0 : index
    %c0_92 = arith.constant 0 : index
    %177 = vector.load %arg23[%c0_90, %c0_91, %c0_92] : memref<3x128x128xbf16, #tpu.memory_space<vmem>>, vector<1x128x128xbf16>
    %178 = vector.shape_cast %177 : vector<1x128x128xbf16> to vector<128x128xbf16>
    %cst_93 = arith.constant dense<0.000000e+00> : vector<24x128xf32>
    %179 = tpu.matmul %176, %178, %cst_93 {dimension_numbers = #tpu.dot_dimension_numbers<[1], [0], [0], [1], [0, 0, 1, 1], [], []>} : vector<24x128xbf16>, vector<128x128xbf16>, vector<24x128xf32> -> vector<24x128xf32>
    %c0_94 = arith.constant 0 : index
    %c0_95 = arith.constant 0 : index
    %c0_96 = arith.constant 0 : index
    %180 = vector.load %arg24[%c0_94, %c0_95, %c0_96] : memref<3x1x128xf32, #tpu.memory_space<vmem>>, vector<1x1x128xf32>
    %181 = vector.shape_cast %180 : vector<1x1x128xf32> to vector<1x128xf32>
    %182 = vector.broadcast %181 : vector<1x128xf32> to vector<24x128xf32>
    %183 = arith.addf %179, %182 : vector<24x128xf32>
    %184 = vector.extract_strided_slice %175 {offsets = [0, 0], sizes = [24, 128], strides = [1, 1]} : vector<24x256xf32> to vector<24x128xf32>
    %185 = vector.extract_strided_slice %175 {offsets = [0, 128], sizes = [24, 128], strides = [1, 1]} : vector<24x256xf32> to vector<24x128xf32>
    %186 = vector.shape_cast %184 : vector<24x128xf32> to vector<1x24x128xf32>
    %187 = vector.broadcast %186 : vector<1x24x128xf32> to vector<8x24x128xf32>
    %188 = vector.broadcast %166 : vector<8x1x128xf32> to vector<8x24x128xf32>
    %189 = arith.mulf %187, %188 : vector<8x24x128xf32>
    %190 = arith.truncf %189 : vector<8x24x128xf32> to vector<8x24x128xbf16>
    %191 = arith.truncf %185 : vector<24x128xf32> to vector<24x128xbf16>
    %192 = arith.truncf %183 : vector<24x128xf32> to vector<24x128xbf16>
    %193 = vector.shape_cast %190 : vector<8x24x128xbf16> to vector<192x128xbf16>
    %cst_97 = arith.constant dense<0.000000e+00> : vector<192x24xf32>
    %194 = tpu.matmul %193, %191, %cst_97 {dimension_numbers = #tpu.dot_dimension_numbers<[1], [1], [0], [0], [0, 0, 1, 0], [], []>} : vector<192x128xbf16>, vector<24x128xbf16>, vector<192x24xf32> -> vector<192x24xf32>
    %195 = vector.shape_cast %194 : vector<192x24xf32> to vector<8x24x24xf32>
    %196 = vector.shape_cast %152 : vector<24x24xf32> to vector<1x24x24xf32>
    %197 = vector.broadcast %196 : vector<1x24x24xf32> to vector<8x24x24xf32>
    %198 = arith.addf %195, %197 : vector<8x24x24xf32>
    %cst_98 = arith.constant dense<0xFF800000> : vector<8x24xf32>
    %199 = vector.multi_reduction <maximumf>, %198, %cst_98 [2] : vector<8x24x24xf32> to vector<8x24xf32>
    %200 = vector.shape_cast %199 : vector<8x24xf32> to vector<8x24x1xf32>
    %201 = vector.broadcast %200 : vector<8x24x1xf32> to vector<8x24x24xf32>
    %202 = arith.subf %198, %201 : vector<8x24x24xf32>
    %203 = math.exp %202 : vector<8x24x24xf32>
    %cst_99 = arith.constant dense<0.000000e+00> : vector<8x24xf32>
    %204 = vector.multi_reduction <add>, %203, %cst_99 [2] : vector<8x24x24xf32> to vector<8x24xf32>
    %205 = vector.shape_cast %204 : vector<8x24xf32> to vector<8x24x1xf32>
    %206 = vector.broadcast %205 : vector<8x24x1xf32> to vector<8x24x24xf32>
    %207 = arith.divf %203, %206 : vector<8x24x24xf32>
    %208 = vector.shape_cast %207 : vector<8x24x24xf32> to vector<192x24xf32>
    %209 = arith.truncf %208 : vector<192x24xf32> to vector<192x24xbf16>
    %cst_100 = arith.constant dense<0.000000e+00> : vector<192x128xf32>
    %210 = tpu.matmul %209, %192, %cst_100 {dimension_numbers = #tpu.dot_dimension_numbers<[1], [0], [0], [1], [0, 0, 1, 1], [], []>} : vector<192x24xbf16>, vector<24x128xbf16>, vector<192x128xf32> -> vector<192x128xf32>
    %211 = vector.shape_cast %210 : vector<192x128xf32> to vector<8x24x128xf32>
    %212 = vector.broadcast %166 : vector<8x1x128xf32> to vector<8x24x128xf32>
    %213 = arith.mulf %211, %212 : vector<8x24x128xf32>
    %cst_101 = arith.constant dense<0.000000e+00> : vector<24x128xf32>
    %214 = vector.multi_reduction <add>, %213, %cst_101 [0] : vector<8x24x128xf32> to vector<24x128xf32>
    %215 = arith.truncf %214 : vector<24x128xf32> to vector<24x128xbf16>
    %c0_102 = arith.constant 0 : index
    %c0_103 = arith.constant 0 : index
    %c0_104 = arith.constant 0 : index
    %216 = vector.load %arg25[%c0_102, %c0_103, %c0_104] : memref<3x128x128xbf16, #tpu.memory_space<vmem>>, vector<1x128x128xbf16>
    %217 = vector.shape_cast %216 : vector<1x128x128xbf16> to vector<128x128xbf16>
    %cst_105 = arith.constant dense<0.000000e+00> : vector<24x128xf32>
    %218 = tpu.matmul %215, %217, %cst_105 {dimension_numbers = #tpu.dot_dimension_numbers<[1], [0], [0], [1], [0, 0, 1, 1], [], []>} : vector<24x128xbf16>, vector<128x128xbf16>, vector<24x128xf32> -> vector<24x128xf32>
    %c0_106 = arith.constant 0 : index
    %c0_107 = arith.constant 0 : index
    %c0_108 = arith.constant 0 : index
    %219 = vector.load %arg26[%c0_106, %c0_107, %c0_108] : memref<3x1x128xf32, #tpu.memory_space<vmem>>, vector<1x1x128xf32>
    %220 = vector.shape_cast %219 : vector<1x1x128xf32> to vector<1x128xf32>
    %221 = vector.broadcast %220 : vector<1x128xf32> to vector<24x128xf32>
    %222 = arith.addf %218, %221 : vector<24x128xf32>
    %223 = arith.addf %150, %222 : vector<24x128xf32>
    %c0_109 = arith.constant 0 : index
    %c0_110 = arith.constant 0 : index
    %c0_111 = arith.constant 0 : index
    %224 = vector.load %arg27[%c0_109, %c0_110, %c0_111] : memref<3x1x128xf32, #tpu.memory_space<vmem>>, vector<1x1x128xf32>
    %225 = vector.shape_cast %224 : vector<1x1x128xf32> to vector<1x128xf32>
    %c0_112 = arith.constant 0 : index
    %c0_113 = arith.constant 0 : index
    %c0_114 = arith.constant 0 : index
    %226 = vector.load %arg28[%c0_112, %c0_113, %c0_114] : memref<3x1x128xf32, #tpu.memory_space<vmem>>, vector<1x1x128xf32>
    %227 = vector.shape_cast %226 : vector<1x1x128xf32> to vector<1x128xf32>
    %cst_115 = arith.constant dense<0.000000e+00> : vector<24xf32>
    %228 = vector.multi_reduction <add>, %223, %cst_115 [1] : vector<24x128xf32> to vector<24xf32>
    %229 = vector.shape_cast %228 : vector<24xf32> to vector<24x1xf32>
    %cst_116 = arith.constant 1.280000e+02 : f32
    %230 = vector.broadcast %cst_116 : f32 to vector<24x1xf32>
    %231 = arith.divf %229, %230 : vector<24x1xf32>
    %232 = vector.broadcast %231 : vector<24x1xf32> to vector<24x128xf32>
    %233 = arith.subf %223, %232 : vector<24x128xf32>
    %234 = arith.mulf %233, %233 : vector<24x128xf32>
    %cst_117 = arith.constant dense<0.000000e+00> : vector<24xf32>
    %235 = vector.multi_reduction <add>, %234, %cst_117 [1] : vector<24x128xf32> to vector<24xf32>
    %236 = vector.shape_cast %235 : vector<24xf32> to vector<24x1xf32>
    %cst_118 = arith.constant 1.280000e+02 : f32
    %237 = vector.broadcast %cst_118 : f32 to vector<24x1xf32>
    %238 = arith.divf %236, %237 : vector<24x1xf32>
    %239 = vector.broadcast %231 : vector<24x1xf32> to vector<24x128xf32>
    %240 = arith.subf %223, %239 : vector<24x128xf32>
    %cst_119 = arith.constant 9.99999974E-6 : f32
    %241 = vector.broadcast %cst_119 : f32 to vector<24x1xf32>
    %242 = arith.addf %238, %241 : vector<24x1xf32>
    %243 = math.rsqrt %242 : vector<24x1xf32>
    %244 = vector.broadcast %243 : vector<24x1xf32> to vector<24x128xf32>
    %245 = arith.mulf %240, %244 : vector<24x128xf32>
    %246 = vector.broadcast %225 : vector<1x128xf32> to vector<24x128xf32>
    %247 = arith.mulf %245, %246 : vector<24x128xf32>
    %248 = vector.broadcast %227 : vector<1x128xf32> to vector<24x128xf32>
    %249 = arith.addf %247, %248 : vector<24x128xf32>
    %250 = arith.truncf %249 : vector<24x128xf32> to vector<24x128xbf16>
    %c0_120 = arith.constant 0 : index
    %c0_121 = arith.constant 0 : index
    %c0_122 = arith.constant 0 : index
    %251 = vector.load %arg29[%c0_120, %c0_121, %c0_122] : memref<3x128x256xbf16, #tpu.memory_space<vmem>>, vector<1x128x256xbf16>
    %252 = vector.shape_cast %251 : vector<1x128x256xbf16> to vector<128x256xbf16>
    %cst_123 = arith.constant dense<0.000000e+00> : vector<24x256xf32>
    %253 = tpu.matmul %250, %252, %cst_123 {dimension_numbers = #tpu.dot_dimension_numbers<[1], [0], [0], [1], [0, 0, 1, 1], [], []>} : vector<24x128xbf16>, vector<128x256xbf16>, vector<24x256xf32> -> vector<24x256xf32>
    %c0_124 = arith.constant 0 : index
    %c0_125 = arith.constant 0 : index
    %c0_126 = arith.constant 0 : index
    %254 = vector.load %arg30[%c0_124, %c0_125, %c0_126] : memref<3x1x256xf32, #tpu.memory_space<vmem>>, vector<1x1x256xf32>
    %255 = vector.shape_cast %254 : vector<1x1x256xf32> to vector<1x256xf32>
    %256 = vector.broadcast %255 : vector<1x256xf32> to vector<24x256xf32>
    %257 = arith.addf %253, %256 : vector<24x256xf32>
    %cst_127 = arith.constant 0.000000e+00 : f32
    %258 = vector.broadcast %cst_127 : f32 to vector<24x256xf32>
    %259 = arith.maximumf %257, %258 : vector<24x256xf32>
    %260 = arith.truncf %259 : vector<24x256xf32> to vector<24x256xbf16>
    %c0_128 = arith.constant 0 : index
    %c0_129 = arith.constant 0 : index
    %c0_130 = arith.constant 0 : index
    %261 = vector.load %arg31[%c0_128, %c0_129, %c0_130] : memref<3x256x128xbf16, #tpu.memory_space<vmem>>, vector<1x256x128xbf16>
    %262 = vector.shape_cast %261 : vector<1x256x128xbf16> to vector<256x128xbf16>
    %cst_131 = arith.constant dense<0.000000e+00> : vector<24x128xf32>
    %263 = tpu.matmul %260, %262, %cst_131 {dimension_numbers = #tpu.dot_dimension_numbers<[1], [0], [0], [1], [0, 0, 1, 1], [], []>} : vector<24x256xbf16>, vector<256x128xbf16>, vector<24x128xf32> -> vector<24x128xf32>
    %c0_132 = arith.constant 0 : index
    %c0_133 = arith.constant 0 : index
    %c0_134 = arith.constant 0 : index
    %264 = vector.load %arg32[%c0_132, %c0_133, %c0_134] : memref<3x1x128xf32, #tpu.memory_space<vmem>>, vector<1x1x128xf32>
    %265 = vector.shape_cast %264 : vector<1x1x128xf32> to vector<1x128xf32>
    %266 = vector.broadcast %265 : vector<1x128xf32> to vector<24x128xf32>
    %267 = arith.addf %263, %266 : vector<24x128xf32>
    %268 = arith.addf %249, %267 : vector<24x128xf32>
    %cst_135 = arith.constant dense<0.000000e+00> : vector<24x24xf32>
    %269 = vector.multi_reduction <add>, %207, %cst_135 [0] : vector<8x24x24xf32> to vector<24x24xf32>
    %cst_136 = arith.constant 8.000000e+00 : f32
    %270 = vector.broadcast %cst_136 : f32 to vector<24x24xf32>
    %271 = arith.divf %269, %270 : vector<24x24xf32>
    %cst_137 = arith.constant 0.000000e+00 : f32
    %272 = vector.broadcast %cst_137 : f32 to vector<24x104xf32>
    %273 = tpu.concatenate %271, %272 in 1 : vector<24x24xf32>, vector<24x104xf32> -> vector<24x128xf32>
    %c0_138 = arith.constant 0 : index
    %c0_139 = arith.constant 0 : index
    %c0_140 = arith.constant 0 : index
    %274 = vector.load %arg36[%c0_138, %c0_139, %c0_140] : memref<3x24x128xf32, #tpu.memory_space<vmem>>, vector<1x24x128xf32>
    %275 = vector.shape_cast %274 : vector<1x24x128xf32> to vector<24x128xf32>
    %276 = vector.shape_cast %273 : vector<24x128xf32> to vector<1x24x128xf32>
    tpu.vector_store %arg36[%c0_138, %c0_139, %c0_140], %276 {strides = array<i32>} : memref<3x24x128xf32, #tpu.memory_space<vmem>>, vector<1x24x128xf32>,
    %277 = arith.addf %268, %151 : vector<24x128xf32>
    %278 = arith.truncf %277 : vector<24x128xf32> to vector<24x128xbf16>
    %c1 = arith.constant 1 : index
    %c0_141 = arith.constant 0 : index
    %c0_142 = arith.constant 0 : index
    %279 = vector.load %arg21[%c1, %c0_141, %c0_142] : memref<3x128x256xbf16, #tpu.memory_space<vmem>>, vector<1x128x256xbf16>
    %280 = vector.shape_cast %279 : vector<1x128x256xbf16> to vector<128x256xbf16>
    %cst_143 = arith.constant dense<0.000000e+00> : vector<24x256xf32>
    %281 = tpu.matmul %278, %280, %cst_143 {dimension_numbers = #tpu.dot_dimension_numbers<[1], [0], [0], [1], [0, 0, 1, 1], [], []>} : vector<24x128xbf16>, vector<128x256xbf16>, vector<24x256xf32> -> vector<24x256xf32>
    %c1_144 = arith.constant 1 : index
    %c0_145 = arith.constant 0 : index
    %c0_146 = arith.constant 0 : index
    %282 = vector.load %arg22[%c1_144, %c0_145, %c0_146] : memref<3x1x256xf32, #tpu.memory_space<vmem>>, vector<1x1x256xf32>
    %283 = vector.shape_cast %282 : vector<1x1x256xf32> to vector<1x256xf32>
    %284 = vector.broadcast %283 : vector<1x256xf32> to vector<24x256xf32>
    %285 = arith.addf %281, %284 : vector<24x256xf32>
    %286 = arith.truncf %268 : vector<24x128xf32> to vector<24x128xbf16>
    %c1_147 = arith.constant 1 : index
    %c0_148 = arith.constant 0 : index
    %c0_149 = arith.constant 0 : index
    %287 = vector.load %arg23[%c1_147, %c0_148, %c0_149] : memref<3x128x128xbf16, #tpu.memory_space<vmem>>, vector<1x128x128xbf16>
    %288 = vector.shape_cast %287 : vector<1x128x128xbf16> to vector<128x128xbf16>
    %cst_150 = arith.constant dense<0.000000e+00> : vector<24x128xf32>
    %289 = tpu.matmul %286, %288, %cst_150 {dimension_numbers = #tpu.dot_dimension_numbers<[1], [0], [0], [1], [0, 0, 1, 1], [], []>} : vector<24x128xbf16>, vector<128x128xbf16>, vector<24x128xf32> -> vector<24x128xf32>
    %c1_151 = arith.constant 1 : index
    %c0_152 = arith.constant 0 : index
    %c0_153 = arith.constant 0 : index
    %290 = vector.load %arg24[%c1_151, %c0_152, %c0_153] : memref<3x1x128xf32, #tpu.memory_space<vmem>>, vector<1x1x128xf32>
    %291 = vector.shape_cast %290 : vector<1x1x128xf32> to vector<1x128xf32>
    %292 = vector.broadcast %291 : vector<1x128xf32> to vector<24x128xf32>
    %293 = arith.addf %289, %292 : vector<24x128xf32>
    %294 = vector.extract_strided_slice %285 {offsets = [0, 0], sizes = [24, 128], strides = [1, 1]} : vector<24x256xf32> to vector<24x128xf32>
    %295 = vector.extract_strided_slice %285 {offsets = [0, 128], sizes = [24, 128], strides = [1, 1]} : vector<24x256xf32> to vector<24x128xf32>
    %296 = vector.shape_cast %294 : vector<24x128xf32> to vector<1x24x128xf32>
    %297 = vector.broadcast %296 : vector<1x24x128xf32> to vector<8x24x128xf32>
    %298 = vector.broadcast %166 : vector<8x1x128xf32> to vector<8x24x128xf32>
    %299 = arith.mulf %297, %298 : vector<8x24x128xf32>
    %300 = arith.truncf %299 : vector<8x24x128xf32> to vector<8x24x128xbf16>
    %301 = arith.truncf %295 : vector<24x128xf32> to vector<24x128xbf16>
    %302 = arith.truncf %293 : vector<24x128xf32> to vector<24x128xbf16>
    %303 = vector.shape_cast %300 : vector<8x24x128xbf16> to vector<192x128xbf16>
    %cst_154 = arith.constant dense<0.000000e+00> : vector<192x24xf32>
    %304 = tpu.matmul %303, %301, %cst_154 {dimension_numbers = #tpu.dot_dimension_numbers<[1], [1], [0], [0], [0, 0, 1, 0], [], []>} : vector<192x128xbf16>, vector<24x128xbf16>, vector<192x24xf32> -> vector<192x24xf32>
    %305 = vector.shape_cast %304 : vector<192x24xf32> to vector<8x24x24xf32>
    %306 = vector.shape_cast %152 : vector<24x24xf32> to vector<1x24x24xf32>
    %307 = vector.broadcast %306 : vector<1x24x24xf32> to vector<8x24x24xf32>
    %308 = arith.addf %305, %307 : vector<8x24x24xf32>
    %cst_155 = arith.constant dense<0xFF800000> : vector<8x24xf32>
    %309 = vector.multi_reduction <maximumf>, %308, %cst_155 [2] : vector<8x24x24xf32> to vector<8x24xf32>
    %310 = vector.shape_cast %309 : vector<8x24xf32> to vector<8x24x1xf32>
    %311 = vector.broadcast %310 : vector<8x24x1xf32> to vector<8x24x24xf32>
    %312 = arith.subf %308, %311 : vector<8x24x24xf32>
    %313 = math.exp %312 : vector<8x24x24xf32>
    %cst_156 = arith.constant dense<0.000000e+00> : vector<8x24xf32>
    %314 = vector.multi_reduction <add>, %313, %cst_156 [2] : vector<8x24x24xf32> to vector<8x24xf32>
    %315 = vector.shape_cast %314 : vector<8x24xf32> to vector<8x24x1xf32>
    %316 = vector.broadcast %315 : vector<8x24x1xf32> to vector<8x24x24xf32>
    %317 = arith.divf %313, %316 : vector<8x24x24xf32>
    %318 = vector.shape_cast %317 : vector<8x24x24xf32> to vector<192x24xf32>
    %319 = arith.truncf %318 : vector<192x24xf32> to vector<192x24xbf16>
    %cst_157 = arith.constant dense<0.000000e+00> : vector<192x128xf32>
    %320 = tpu.matmul %319, %302, %cst_157 {dimension_numbers = #tpu.dot_dimension_numbers<[1], [0], [0], [1], [0, 0, 1, 1], [], []>} : vector<192x24xbf16>, vector<24x128xbf16>, vector<192x128xf32> -> vector<192x128xf32>
    %321 = vector.shape_cast %320 : vector<192x128xf32> to vector<8x24x128xf32>
    %322 = vector.broadcast %166 : vector<8x1x128xf32> to vector<8x24x128xf32>
    %323 = arith.mulf %321, %322 : vector<8x24x128xf32>
    %cst_158 = arith.constant dense<0.000000e+00> : vector<24x128xf32>
    %324 = vector.multi_reduction <add>, %323, %cst_158 [0] : vector<8x24x128xf32> to vector<24x128xf32>
    %325 = arith.truncf %324 : vector<24x128xf32> to vector<24x128xbf16>
    %c1_159 = arith.constant 1 : index
    %c0_160 = arith.constant 0 : index
    %c0_161 = arith.constant 0 : index
    %326 = vector.load %arg25[%c1_159, %c0_160, %c0_161] : memref<3x128x128xbf16, #tpu.memory_space<vmem>>, vector<1x128x128xbf16>
    %327 = vector.shape_cast %326 : vector<1x128x128xbf16> to vector<128x128xbf16>
    %cst_162 = arith.constant dense<0.000000e+00> : vector<24x128xf32>
    %328 = tpu.matmul %325, %327, %cst_162 {dimension_numbers = #tpu.dot_dimension_numbers<[1], [0], [0], [1], [0, 0, 1, 1], [], []>} : vector<24x128xbf16>, vector<128x128xbf16>, vector<24x128xf32> -> vector<24x128xf32>
    %c1_163 = arith.constant 1 : index
    %c0_164 = arith.constant 0 : index
    %c0_165 = arith.constant 0 : index
    %329 = vector.load %arg26[%c1_163, %c0_164, %c0_165] : memref<3x1x128xf32, #tpu.memory_space<vmem>>, vector<1x1x128xf32>
    %330 = vector.shape_cast %329 : vector<1x1x128xf32> to vector<1x128xf32>
    %331 = vector.broadcast %330 : vector<1x128xf32> to vector<24x128xf32>
    %332 = arith.addf %328, %331 : vector<24x128xf32>
    %333 = arith.addf %268, %332 : vector<24x128xf32>
    %c1_166 = arith.constant 1 : index
    %c0_167 = arith.constant 0 : index
    %c0_168 = arith.constant 0 : index
    %334 = vector.load %arg27[%c1_166, %c0_167, %c0_168] : memref<3x1x128xf32, #tpu.memory_space<vmem>>, vector<1x1x128xf32>
    %335 = vector.shape_cast %334 : vector<1x1x128xf32> to vector<1x128xf32>
    %c1_169 = arith.constant 1 : index
    %c0_170 = arith.constant 0 : index
    %c0_171 = arith.constant 0 : index
    %336 = vector.load %arg28[%c1_169, %c0_170, %c0_171] : memref<3x1x128xf32, #tpu.memory_space<vmem>>, vector<1x1x128xf32>
    %337 = vector.shape_cast %336 : vector<1x1x128xf32> to vector<1x128xf32>
    %cst_172 = arith.constant dense<0.000000e+00> : vector<24xf32>
    %338 = vector.multi_reduction <add>, %333, %cst_172 [1] : vector<24x128xf32> to vector<24xf32>
    %339 = vector.shape_cast %338 : vector<24xf32> to vector<24x1xf32>
    %cst_173 = arith.constant 1.280000e+02 : f32
    %340 = vector.broadcast %cst_173 : f32 to vector<24x1xf32>
    %341 = arith.divf %339, %340 : vector<24x1xf32>
    %342 = vector.broadcast %341 : vector<24x1xf32> to vector<24x128xf32>
    %343 = arith.subf %333, %342 : vector<24x128xf32>
    %344 = arith.mulf %343, %343 : vector<24x128xf32>
    %cst_174 = arith.constant dense<0.000000e+00> : vector<24xf32>
    %345 = vector.multi_reduction <add>, %344, %cst_174 [1] : vector<24x128xf32> to vector<24xf32>
    %346 = vector.shape_cast %345 : vector<24xf32> to vector<24x1xf32>
    %cst_175 = arith.constant 1.280000e+02 : f32
    %347 = vector.broadcast %cst_175 : f32 to vector<24x1xf32>
    %348 = arith.divf %346, %347 : vector<24x1xf32>
    %349 = vector.broadcast %341 : vector<24x1xf32> to vector<24x128xf32>
    %350 = arith.subf %333, %349 : vector<24x128xf32>
    %cst_176 = arith.constant 9.99999974E-6 : f32
    %351 = vector.broadcast %cst_176 : f32 to vector<24x1xf32>
    %352 = arith.addf %348, %351 : vector<24x1xf32>
    %353 = math.rsqrt %352 : vector<24x1xf32>
    %354 = vector.broadcast %353 : vector<24x1xf32> to vector<24x128xf32>
    %355 = arith.mulf %350, %354 : vector<24x128xf32>
    %356 = vector.broadcast %335 : vector<1x128xf32> to vector<24x128xf32>
    %357 = arith.mulf %355, %356 : vector<24x128xf32>
    %358 = vector.broadcast %337 : vector<1x128xf32> to vector<24x128xf32>
    %359 = arith.addf %357, %358 : vector<24x128xf32>
    %360 = arith.truncf %359 : vector<24x128xf32> to vector<24x128xbf16>
    %c1_177 = arith.constant 1 : index
    %c0_178 = arith.constant 0 : index
    %c0_179 = arith.constant 0 : index
    %361 = vector.load %arg29[%c1_177, %c0_178, %c0_179] : memref<3x128x256xbf16, #tpu.memory_space<vmem>>, vector<1x128x256xbf16>
    %362 = vector.shape_cast %361 : vector<1x128x256xbf16> to vector<128x256xbf16>
    %cst_180 = arith.constant dense<0.000000e+00> : vector<24x256xf32>
    %363 = tpu.matmul %360, %362, %cst_180 {dimension_numbers = #tpu.dot_dimension_numbers<[1], [0], [0], [1], [0, 0, 1, 1], [], []>} : vector<24x128xbf16>, vector<128x256xbf16>, vector<24x256xf32> -> vector<24x256xf32>
    %c1_181 = arith.constant 1 : index
    %c0_182 = arith.constant 0 : index
    %c0_183 = arith.constant 0 : index
    %364 = vector.load %arg30[%c1_181, %c0_182, %c0_183] : memref<3x1x256xf32, #tpu.memory_space<vmem>>, vector<1x1x256xf32>
    %365 = vector.shape_cast %364 : vector<1x1x256xf32> to vector<1x256xf32>
    %366 = vector.broadcast %365 : vector<1x256xf32> to vector<24x256xf32>
    %367 = arith.addf %363, %366 : vector<24x256xf32>
    %cst_184 = arith.constant 0.000000e+00 : f32
    %368 = vector.broadcast %cst_184 : f32 to vector<24x256xf32>
    %369 = arith.maximumf %367, %368 : vector<24x256xf32>
    %370 = arith.truncf %369 : vector<24x256xf32> to vector<24x256xbf16>
    %c1_185 = arith.constant 1 : index
    %c0_186 = arith.constant 0 : index
    %c0_187 = arith.constant 0 : index
    %371 = vector.load %arg31[%c1_185, %c0_186, %c0_187] : memref<3x256x128xbf16, #tpu.memory_space<vmem>>, vector<1x256x128xbf16>
    %372 = vector.shape_cast %371 : vector<1x256x128xbf16> to vector<256x128xbf16>
    %cst_188 = arith.constant dense<0.000000e+00> : vector<24x128xf32>
    %373 = tpu.matmul %370, %372, %cst_188 {dimension_numbers = #tpu.dot_dimension_numbers<[1], [0], [0], [1], [0, 0, 1, 1], [], []>} : vector<24x256xbf16>, vector<256x128xbf16>, vector<24x128xf32> -> vector<24x128xf32>
    %c1_189 = arith.constant 1 : index
    %c0_190 = arith.constant 0 : index
    %c0_191 = arith.constant 0 : index
    %374 = vector.load %arg32[%c1_189, %c0_190, %c0_191] : memref<3x1x128xf32, #tpu.memory_space<vmem>>, vector<1x1x128xf32>
    %375 = vector.shape_cast %374 : vector<1x1x128xf32> to vector<1x128xf32>
    %376 = vector.broadcast %375 : vector<1x128xf32> to vector<24x128xf32>
    %377 = arith.addf %373, %376 : vector<24x128xf32>
    %378 = arith.addf %359, %377 : vector<24x128xf32>
    %cst_192 = arith.constant dense<0.000000e+00> : vector<24x24xf32>
    %379 = vector.multi_reduction <add>, %317, %cst_192 [0] : vector<8x24x24xf32> to vector<24x24xf32>
    %cst_193 = arith.constant 8.000000e+00 : f32
    %380 = vector.broadcast %cst_193 : f32 to vector<24x24xf32>
    %381 = arith.divf %379, %380 : vector<24x24xf32>
    %cst_194 = arith.constant 0.000000e+00 : f32
    %382 = vector.broadcast %cst_194 : f32 to vector<24x104xf32>
    %383 = tpu.concatenate %381, %382 in 1 : vector<24x24xf32>, vector<24x104xf32> -> vector<24x128xf32>
    %c1_195 = arith.constant 1 : index
    %c0_196 = arith.constant 0 : index
    %c0_197 = arith.constant 0 : index
    %384 = vector.load %arg36[%c1_195, %c0_196, %c0_197] : memref<3x24x128xf32, #tpu.memory_space<vmem>>, vector<1x24x128xf32>
    %385 = vector.shape_cast %384 : vector<1x24x128xf32> to vector<24x128xf32>
    %386 = vector.shape_cast %383 : vector<24x128xf32> to vector<1x24x128xf32>
    tpu.vector_store %arg36[%c1_195, %c0_196, %c0_197], %386 {strides = array<i32>} : memref<3x24x128xf32, #tpu.memory_space<vmem>>, vector<1x24x128xf32>,
    %387 = arith.addf %378, %151 : vector<24x128xf32>
    %388 = arith.truncf %387 : vector<24x128xf32> to vector<24x128xbf16>
    %c2 = arith.constant 2 : index
    %c0_198 = arith.constant 0 : index
    %c0_199 = arith.constant 0 : index
    %389 = vector.load %arg21[%c2, %c0_198, %c0_199] : memref<3x128x256xbf16, #tpu.memory_space<vmem>>, vector<1x128x256xbf16>
    %390 = vector.shape_cast %389 : vector<1x128x256xbf16> to vector<128x256xbf16>
    %cst_200 = arith.constant dense<0.000000e+00> : vector<24x256xf32>
    %391 = tpu.matmul %388, %390, %cst_200 {dimension_numbers = #tpu.dot_dimension_numbers<[1], [0], [0], [1], [0, 0, 1, 1], [], []>} : vector<24x128xbf16>, vector<128x256xbf16>, vector<24x256xf32> -> vector<24x256xf32>
    %c2_201 = arith.constant 2 : index
    %c0_202 = arith.constant 0 : index
    %c0_203 = arith.constant 0 : index
    %392 = vector.load %arg22[%c2_201, %c0_202, %c0_203] : memref<3x1x256xf32, #tpu.memory_space<vmem>>, vector<1x1x256xf32>
    %393 = vector.shape_cast %392 : vector<1x1x256xf32> to vector<1x256xf32>
    %394 = vector.broadcast %393 : vector<1x256xf32> to vector<24x256xf32>
    %395 = arith.addf %391, %394 : vector<24x256xf32>
    %396 = arith.truncf %378 : vector<24x128xf32> to vector<24x128xbf16>
    %c2_204 = arith.constant 2 : index
    %c0_205 = arith.constant 0 : index
    %c0_206 = arith.constant 0 : index
    %397 = vector.load %arg23[%c2_204, %c0_205, %c0_206] : memref<3x128x128xbf16, #tpu.memory_space<vmem>>, vector<1x128x128xbf16>
    %398 = vector.shape_cast %397 : vector<1x128x128xbf16> to vector<128x128xbf16>
    %cst_207 = arith.constant dense<0.000000e+00> : vector<24x128xf32>
    %399 = tpu.matmul %396, %398, %cst_207 {dimension_numbers = #tpu.dot_dimension_numbers<[1], [0], [0], [1], [0, 0, 1, 1], [], []>} : vector<24x128xbf16>, vector<128x128xbf16>, vector<24x128xf32> -> vector<24x128xf32>
    %c2_208 = arith.constant 2 : index
    %c0_209 = arith.constant 0 : index
    %c0_210 = arith.constant 0 : index
    %400 = vector.load %arg24[%c2_208, %c0_209, %c0_210] : memref<3x1x128xf32, #tpu.memory_space<vmem>>, vector<1x1x128xf32>
    %401 = vector.shape_cast %400 : vector<1x1x128xf32> to vector<1x128xf32>
    %402 = vector.broadcast %401 : vector<1x128xf32> to vector<24x128xf32>
    %403 = arith.addf %399, %402 : vector<24x128xf32>
    %404 = vector.extract_strided_slice %395 {offsets = [0, 0], sizes = [24, 128], strides = [1, 1]} : vector<24x256xf32> to vector<24x128xf32>
    %405 = vector.extract_strided_slice %395 {offsets = [0, 128], sizes = [24, 128], strides = [1, 1]} : vector<24x256xf32> to vector<24x128xf32>
    %406 = vector.shape_cast %404 : vector<24x128xf32> to vector<1x24x128xf32>
    %407 = vector.broadcast %406 : vector<1x24x128xf32> to vector<8x24x128xf32>
    %408 = vector.broadcast %166 : vector<8x1x128xf32> to vector<8x24x128xf32>
    %409 = arith.mulf %407, %408 : vector<8x24x128xf32>
    %410 = arith.truncf %409 : vector<8x24x128xf32> to vector<8x24x128xbf16>
    %411 = arith.truncf %405 : vector<24x128xf32> to vector<24x128xbf16>
    %412 = arith.truncf %403 : vector<24x128xf32> to vector<24x128xbf16>
    %413 = vector.shape_cast %410 : vector<8x24x128xbf16> to vector<192x128xbf16>
    %cst_211 = arith.constant dense<0.000000e+00> : vector<192x24xf32>
    %414 = tpu.matmul %413, %411, %cst_211 {dimension_numbers = #tpu.dot_dimension_numbers<[1], [1], [0], [0], [0, 0, 1, 0], [], []>} : vector<192x128xbf16>, vector<24x128xbf16>, vector<192x24xf32> -> vector<192x24xf32>
    %415 = vector.shape_cast %414 : vector<192x24xf32> to vector<8x24x24xf32>
    %416 = vector.shape_cast %152 : vector<24x24xf32> to vector<1x24x24xf32>
    %417 = vector.broadcast %416 : vector<1x24x24xf32> to vector<8x24x24xf32>
    %418 = arith.addf %415, %417 : vector<8x24x24xf32>
    %cst_212 = arith.constant dense<0xFF800000> : vector<8x24xf32>
    %419 = vector.multi_reduction <maximumf>, %418, %cst_212 [2] : vector<8x24x24xf32> to vector<8x24xf32>
    %420 = vector.shape_cast %419 : vector<8x24xf32> to vector<8x24x1xf32>
    %421 = vector.broadcast %420 : vector<8x24x1xf32> to vector<8x24x24xf32>
    %422 = arith.subf %418, %421 : vector<8x24x24xf32>
    %423 = math.exp %422 : vector<8x24x24xf32>
    %cst_213 = arith.constant dense<0.000000e+00> : vector<8x24xf32>
    %424 = vector.multi_reduction <add>, %423, %cst_213 [2] : vector<8x24x24xf32> to vector<8x24xf32>
    %425 = vector.shape_cast %424 : vector<8x24xf32> to vector<8x24x1xf32>
    %426 = vector.broadcast %425 : vector<8x24x1xf32> to vector<8x24x24xf32>
    %427 = arith.divf %423, %426 : vector<8x24x24xf32>
    %428 = vector.shape_cast %427 : vector<8x24x24xf32> to vector<192x24xf32>
    %429 = arith.truncf %428 : vector<192x24xf32> to vector<192x24xbf16>
    %cst_214 = arith.constant dense<0.000000e+00> : vector<192x128xf32>
    %430 = tpu.matmul %429, %412, %cst_214 {dimension_numbers = #tpu.dot_dimension_numbers<[1], [0], [0], [1], [0, 0, 1, 1], [], []>} : vector<192x24xbf16>, vector<24x128xbf16>, vector<192x128xf32> -> vector<192x128xf32>
    %431 = vector.shape_cast %430 : vector<192x128xf32> to vector<8x24x128xf32>
    %432 = vector.broadcast %166 : vector<8x1x128xf32> to vector<8x24x128xf32>
    %433 = arith.mulf %431, %432 : vector<8x24x128xf32>
    %cst_215 = arith.constant dense<0.000000e+00> : vector<24x128xf32>
    %434 = vector.multi_reduction <add>, %433, %cst_215 [0] : vector<8x24x128xf32> to vector<24x128xf32>
    %435 = arith.truncf %434 : vector<24x128xf32> to vector<24x128xbf16>
    %c2_216 = arith.constant 2 : index
    %c0_217 = arith.constant 0 : index
    %c0_218 = arith.constant 0 : index
    %436 = vector.load %arg25[%c2_216, %c0_217, %c0_218] : memref<3x128x128xbf16, #tpu.memory_space<vmem>>, vector<1x128x128xbf16>
    %437 = vector.shape_cast %436 : vector<1x128x128xbf16> to vector<128x128xbf16>
    %cst_219 = arith.constant dense<0.000000e+00> : vector<24x128xf32>
    %438 = tpu.matmul %435, %437, %cst_219 {dimension_numbers = #tpu.dot_dimension_numbers<[1], [0], [0], [1], [0, 0, 1, 1], [], []>} : vector<24x128xbf16>, vector<128x128xbf16>, vector<24x128xf32> -> vector<24x128xf32>
    %c2_220 = arith.constant 2 : index
    %c0_221 = arith.constant 0 : index
    %c0_222 = arith.constant 0 : index
    %439 = vector.load %arg26[%c2_220, %c0_221, %c0_222] : memref<3x1x128xf32, #tpu.memory_space<vmem>>, vector<1x1x128xf32>
    %440 = vector.shape_cast %439 : vector<1x1x128xf32> to vector<1x128xf32>
    %441 = vector.broadcast %440 : vector<1x128xf32> to vector<24x128xf32>
    %442 = arith.addf %438, %441 : vector<24x128xf32>
    %443 = arith.addf %378, %442 : vector<24x128xf32>
    %c2_223 = arith.constant 2 : index
    %c0_224 = arith.constant 0 : index
    %c0_225 = arith.constant 0 : index
    %444 = vector.load %arg27[%c2_223, %c0_224, %c0_225] : memref<3x1x128xf32, #tpu.memory_space<vmem>>, vector<1x1x128xf32>
    %445 = vector.shape_cast %444 : vector<1x1x128xf32> to vector<1x128xf32>
    %c2_226 = arith.constant 2 : index
    %c0_227 = arith.constant 0 : index
    %c0_228 = arith.constant 0 : index
    %446 = vector.load %arg28[%c2_226, %c0_227, %c0_228] : memref<3x1x128xf32, #tpu.memory_space<vmem>>, vector<1x1x128xf32>
    %447 = vector.shape_cast %446 : vector<1x1x128xf32> to vector<1x128xf32>
    %cst_229 = arith.constant dense<0.000000e+00> : vector<24xf32>
    %448 = vector.multi_reduction <add>, %443, %cst_229 [1] : vector<24x128xf32> to vector<24xf32>
    %449 = vector.shape_cast %448 : vector<24xf32> to vector<24x1xf32>
    %cst_230 = arith.constant 1.280000e+02 : f32
    %450 = vector.broadcast %cst_230 : f32 to vector<24x1xf32>
    %451 = arith.divf %449, %450 : vector<24x1xf32>
    %452 = vector.broadcast %451 : vector<24x1xf32> to vector<24x128xf32>
    %453 = arith.subf %443, %452 : vector<24x128xf32>
    %454 = arith.mulf %453, %453 : vector<24x128xf32>
    %cst_231 = arith.constant dense<0.000000e+00> : vector<24xf32>
    %455 = vector.multi_reduction <add>, %454, %cst_231 [1] : vector<24x128xf32> to vector<24xf32>
    %456 = vector.shape_cast %455 : vector<24xf32> to vector<24x1xf32>
    %cst_232 = arith.constant 1.280000e+02 : f32
    %457 = vector.broadcast %cst_232 : f32 to vector<24x1xf32>
    %458 = arith.divf %456, %457 : vector<24x1xf32>
    %459 = vector.broadcast %451 : vector<24x1xf32> to vector<24x128xf32>
    %460 = arith.subf %443, %459 : vector<24x128xf32>
    %cst_233 = arith.constant 9.99999974E-6 : f32
    %461 = vector.broadcast %cst_233 : f32 to vector<24x1xf32>
    %462 = arith.addf %458, %461 : vector<24x1xf32>
    %463 = math.rsqrt %462 : vector<24x1xf32>
    %464 = vector.broadcast %463 : vector<24x1xf32> to vector<24x128xf32>
    %465 = arith.mulf %460, %464 : vector<24x128xf32>
    %466 = vector.broadcast %445 : vector<1x128xf32> to vector<24x128xf32>
    %467 = arith.mulf %465, %466 : vector<24x128xf32>
    %468 = vector.broadcast %447 : vector<1x128xf32> to vector<24x128xf32>
    %469 = arith.addf %467, %468 : vector<24x128xf32>
    %470 = arith.truncf %469 : vector<24x128xf32> to vector<24x128xbf16>
    %c2_234 = arith.constant 2 : index
    %c0_235 = arith.constant 0 : index
    %c0_236 = arith.constant 0 : index
    %471 = vector.load %arg29[%c2_234, %c0_235, %c0_236] : memref<3x128x256xbf16, #tpu.memory_space<vmem>>, vector<1x128x256xbf16>
    %472 = vector.shape_cast %471 : vector<1x128x256xbf16> to vector<128x256xbf16>
    %cst_237 = arith.constant dense<0.000000e+00> : vector<24x256xf32>
    %473 = tpu.matmul %470, %472, %cst_237 {dimension_numbers = #tpu.dot_dimension_numbers<[1], [0], [0], [1], [0, 0, 1, 1], [], []>} : vector<24x128xbf16>, vector<128x256xbf16>, vector<24x256xf32> -> vector<24x256xf32>
    %c2_238 = arith.constant 2 : index
    %c0_239 = arith.constant 0 : index
    %c0_240 = arith.constant 0 : index
    %474 = vector.load %arg30[%c2_238, %c0_239, %c0_240] : memref<3x1x256xf32, #tpu.memory_space<vmem>>, vector<1x1x256xf32>
    %475 = vector.shape_cast %474 : vector<1x1x256xf32> to vector<1x256xf32>
    %476 = vector.broadcast %475 : vector<1x256xf32> to vector<24x256xf32>
    %477 = arith.addf %473, %476 : vector<24x256xf32>
    %cst_241 = arith.constant 0.000000e+00 : f32
    %478 = vector.broadcast %cst_241 : f32 to vector<24x256xf32>
    %479 = arith.maximumf %477, %478 : vector<24x256xf32>
    %480 = arith.truncf %479 : vector<24x256xf32> to vector<24x256xbf16>
    %c2_242 = arith.constant 2 : index
    %c0_243 = arith.constant 0 : index
    %c0_244 = arith.constant 0 : index
    %481 = vector.load %arg31[%c2_242, %c0_243, %c0_244] : memref<3x256x128xbf16, #tpu.memory_space<vmem>>, vector<1x256x128xbf16>
    %482 = vector.shape_cast %481 : vector<1x256x128xbf16> to vector<256x128xbf16>
    %cst_245 = arith.constant dense<0.000000e+00> : vector<24x128xf32>
    %483 = tpu.matmul %480, %482, %cst_245 {dimension_numbers = #tpu.dot_dimension_numbers<[1], [0], [0], [1], [0, 0, 1, 1], [], []>} : vector<24x256xbf16>, vector<256x128xbf16>, vector<24x128xf32> -> vector<24x128xf32>
    %c2_246 = arith.constant 2 : index
    %c0_247 = arith.constant 0 : index
    %c0_248 = arith.constant 0 : index
    %484 = vector.load %arg32[%c2_246, %c0_247, %c0_248] : memref<3x1x128xf32, #tpu.memory_space<vmem>>, vector<1x1x128xf32>
    %485 = vector.shape_cast %484 : vector<1x1x128xf32> to vector<1x128xf32>
    %486 = vector.broadcast %485 : vector<1x128xf32> to vector<24x128xf32>
    %487 = arith.addf %483, %486 : vector<24x128xf32>
    %488 = arith.addf %469, %487 : vector<24x128xf32>
    %cst_249 = arith.constant dense<0.000000e+00> : vector<24x24xf32>
    %489 = vector.multi_reduction <add>, %427, %cst_249 [0] : vector<8x24x24xf32> to vector<24x24xf32>
    %cst_250 = arith.constant 8.000000e+00 : f32
    %490 = vector.broadcast %cst_250 : f32 to vector<24x24xf32>
    %491 = arith.divf %489, %490 : vector<24x24xf32>
    %cst_251 = arith.constant 0.000000e+00 : f32
    %492 = vector.broadcast %cst_251 : f32 to vector<24x104xf32>
    %493 = tpu.concatenate %491, %492 in 1 : vector<24x24xf32>, vector<24x104xf32> -> vector<24x128xf32>
    %c2_252 = arith.constant 2 : index
    %c0_253 = arith.constant 0 : index
    %c0_254 = arith.constant 0 : index
    %494 = vector.load %arg36[%c2_252, %c0_253, %c0_254] : memref<3x24x128xf32, #tpu.memory_space<vmem>>, vector<1x24x128xf32>
    %495 = vector.shape_cast %494 : vector<1x24x128xf32> to vector<24x128xf32>
    %496 = vector.shape_cast %493 : vector<24x128xf32> to vector<1x24x128xf32>
    tpu.vector_store %arg36[%c2_252, %c0_253, %c0_254], %496 {strides = array<i32>} : memref<3x24x128xf32, #tpu.memory_space<vmem>>, vector<1x24x128xf32>,
    %c0_255 = arith.constant 0 : index
    %c0_256 = arith.constant 0 : index
    %497 = vector.load %arg8[%c0_255, %c0_256] : memref<12x24xf32, #tpu.memory_space<vmem>>, vector<12x24xf32>
    %cst_257 = arith.constant dense<0.000000e+00> : vector<12x128xf32>
    %498 = tpu.matmul %497, %488, %cst_257 {dimension_numbers = #tpu.dot_dimension_numbers<[1], [0], [0], [1], [0, 0, 1, 1], [], []>} : vector<12x24xf32>, vector<24x128xf32>, vector<12x128xf32> -> vector<12x128xf32>
    %c0_258 = arith.constant 0 : index
    %c0_259 = arith.constant 0 : index
    %499 = vector.load %arg33[%c0_258, %c0_259] : memref<12x128xf32, #tpu.memory_space<vmem>>, vector<12x128xf32>
    tpu.vector_store %arg33[%c0_258, %c0_259], %498 {strides = array<i32>} : memref<12x128xf32, #tpu.memory_space<vmem>>, vector<12x128xf32>,
    return
  }
  func.func @transform_0(%arg0: i32) -> (i32, i32) {
    %c0_i32 = arith.constant 0 : i32
    %c0_i32_0 = arith.constant 0 : i32
    %c0_i32_1 = arith.constant 0 : i32
    return %c0_i32, %c0_i32_0 : i32, i32
  }
  func.func @transform_1(%arg0: i32) -> (i32, i32) {
    %c0_i32 = arith.constant 0 : i32
    %c0_i32_0 = arith.constant 0 : i32
    %c0_i32_1 = arith.constant 0 : i32
    return %c0_i32, %c0_i32_0 : i32, i32
  }
  func.func @transform_2(%arg0: i32) -> (i32, i32) {
    %c0_i32 = arith.constant 0 : i32
    %c0_i32_0 = arith.constant 0 : i32
    %c0_i32_1 = arith.constant 0 : i32
    return %c0_i32, %c0_i32_0 : i32, i32
  }
  func.func @transform_3(%arg0: i32) -> (i32, i32) {
    %c0_i32 = arith.constant 0 : i32
    %c0_i32_0 = arith.constant 0 : i32
    %c0_i32_1 = arith.constant 0 : i32
    return %c0_i32, %c0_i32_0 : i32, i32
  }
  func.func @transform_4(%arg0: i32) -> (i32, i32) {
    %c0_i32 = arith.constant 0 : i32
    %c0_i32_0 = arith.constant 0 : i32
    %c0_i32_1 = arith.constant 0 : i32
    return %c0_i32, %c0_i32_0 : i32, i32
  }
  func.func @transform_5(%arg0: i32) -> (i32, i32) {
    %c0_i32 = arith.constant 0 : i32
    %c0_i32_0 = arith.constant 0 : i32
    %c0_i32_1 = arith.constant 0 : i32
    return %c0_i32, %c0_i32_0 : i32, i32
  }
  func.func @transform_6(%arg0: i32) -> (i32, i32) {
    %c0_i32 = arith.constant 0 : i32
    %c0_i32_0 = arith.constant 0 : i32
    %c0_i32_1 = arith.constant 0 : i32
    return %c0_i32, %c0_i32_0 : i32, i32
  }
  func.func @transform_7(%arg0: i32) -> (i32, i32) {
    %c0_i32 = arith.constant 0 : i32
    %c0_i32_0 = arith.constant 0 : i32
    %c0_i32_1 = arith.constant 0 : i32
    return %c0_i32, %c0_i32_0 : i32, i32
  }
  func.func @transform_8(%arg0: i32) -> (i32, i32, i32) {
    %c0_i32 = arith.constant 0 : i32
    %c0_i32_0 = arith.constant 0 : i32
    %c0_i32_1 = arith.constant 0 : i32
    %c0_i32_2 = arith.constant 0 : i32
    return %c0_i32, %c0_i32_0, %c0_i32_1 : i32, i32, i32
  }
  func.func @transform_9(%arg0: i32) -> (i32, i32, i32) {
    %c0_i32 = arith.constant 0 : i32
    %c0_i32_0 = arith.constant 0 : i32
    %c0_i32_1 = arith.constant 0 : i32
    %c0_i32_2 = arith.constant 0 : i32
    return %c0_i32, %c0_i32_0, %c0_i32_1 : i32, i32, i32
  }
  func.func @transform_10(%arg0: i32) -> (i32, i32, i32) {
    %c0_i32 = arith.constant 0 : i32
    %c0_i32_0 = arith.constant 0 : i32
    %c0_i32_1 = arith.constant 0 : i32
    %c0_i32_2 = arith.constant 0 : i32
    return %c0_i32, %c0_i32_0, %c0_i32_1 : i32, i32, i32
  }
  func.func @transform_11(%arg0: i32) -> (i32, i32, i32) {
    %c0_i32 = arith.constant 0 : i32
    %c0_i32_0 = arith.constant 0 : i32
    %c0_i32_1 = arith.constant 0 : i32
    %c0_i32_2 = arith.constant 0 : i32
    return %c0_i32, %c0_i32_0, %c0_i32_1 : i32, i32, i32
  }
  func.func @transform_12(%arg0: i32) -> (i32, i32, i32) {
    %c0_i32 = arith.constant 0 : i32
    %c0_i32_0 = arith.constant 0 : i32
    %c0_i32_1 = arith.constant 0 : i32
    %c0_i32_2 = arith.constant 0 : i32
    return %c0_i32, %c0_i32_0, %c0_i32_1 : i32, i32, i32
  }
  func.func @transform_13(%arg0: i32) -> (i32, i32, i32) {
    %c0_i32 = arith.constant 0 : i32
    %c0_i32_0 = arith.constant 0 : i32
    %c0_i32_1 = arith.constant 0 : i32
    %c0_i32_2 = arith.constant 0 : i32
    return %c0_i32, %c0_i32_0, %c0_i32_1 : i32, i32, i32
  }
  func.func @transform_14(%arg0: i32) -> (i32, i32, i32) {
    %c0_i32 = arith.constant 0 : i32
    %c0_i32_0 = arith.constant 0 : i32
    %c0_i32_1 = arith.constant 0 : i32
    %c0_i32_2 = arith.constant 0 : i32
    return %c0_i32, %c0_i32_0, %c0_i32_1 : i32, i32, i32
  }
  func.func @transform_15(%arg0: i32) -> (i32, i32, i32) {
    %c0_i32 = arith.constant 0 : i32
    %c0_i32_0 = arith.constant 0 : i32
    %c0_i32_1 = arith.constant 0 : i32
    %c0_i32_2 = arith.constant 0 : i32
    return %c0_i32, %c0_i32_0, %c0_i32_1 : i32, i32, i32
  }
  func.func @transform_16(%arg0: i32) -> (i32, i32, i32) {
    %c0_i32 = arith.constant 0 : i32
    %c0_i32_0 = arith.constant 0 : i32
    %c0_i32_1 = arith.constant 0 : i32
    %c0_i32_2 = arith.constant 0 : i32
    return %c0_i32, %c0_i32_0, %c0_i32_1 : i32, i32, i32
  }
  func.func @transform_17(%arg0: i32) -> (i32, i32, i32) {
    %c0_i32 = arith.constant 0 : i32
    %c0_i32_0 = arith.constant 0 : i32
    %c0_i32_1 = arith.constant 0 : i32
    %c0_i32_2 = arith.constant 0 : i32
    return %c0_i32, %c0_i32_0, %c0_i32_1 : i32, i32, i32
  }
  func.func @transform_18(%arg0: i32) -> (i32, i32, i32) {
    %c0_i32 = arith.constant 0 : i32
    %c0_i32_0 = arith.constant 0 : i32
    %c0_i32_1 = arith.constant 0 : i32
    %c0_i32_2 = arith.constant 0 : i32
    return %c0_i32, %c0_i32_0, %c0_i32_1 : i32, i32, i32
  }
  func.func @transform_19(%arg0: i32) -> (i32, i32, i32) {
    %c0_i32 = arith.constant 0 : i32
    %c0_i32_0 = arith.constant 0 : i32
    %c0_i32_1 = arith.constant 0 : i32
    %c0_i32_2 = arith.constant 0 : i32
    return %c0_i32, %c0_i32_0, %c0_i32_1 : i32, i32, i32
  }
  func.func @transform_20(%arg0: i32) -> (i32, i32, i32) {
    %c0_i32 = arith.constant 0 : i32
    %c0_i32_0 = arith.constant 0 : i32
    %c0_i32_1 = arith.constant 0 : i32
    %c0_i32_2 = arith.constant 0 : i32
    return %c0_i32, %c0_i32_0, %c0_i32_1 : i32, i32, i32
  }
  func.func @transform_21(%arg0: i32) -> (i32, i32, i32) {
    %c0_i32 = arith.constant 0 : i32
    %c0_i32_0 = arith.constant 0 : i32
    %c0_i32_1 = arith.constant 0 : i32
    %c0_i32_2 = arith.constant 0 : i32
    return %c0_i32, %c0_i32_0, %c0_i32_1 : i32, i32, i32
  }
  func.func @transform_22(%arg0: i32) -> (i32, i32, i32) {
    %c0_i32 = arith.constant 0 : i32
    %c0_i32_0 = arith.constant 0 : i32
    %c0_i32_1 = arith.constant 0 : i32
    %c0_i32_2 = arith.constant 0 : i32
    return %c0_i32, %c0_i32_0, %c0_i32_1 : i32, i32, i32
  }
  func.func @transform_23(%arg0: i32) -> (i32, i32, i32) {
    %c0_i32 = arith.constant 0 : i32
    %c0_i32_0 = arith.constant 0 : i32
    %c0_i32_1 = arith.constant 0 : i32
    %c0_i32_2 = arith.constant 0 : i32
    return %c0_i32, %c0_i32_0, %c0_i32_1 : i32, i32, i32
  }
  func.func @transform_24(%arg0: i32) -> (i32, i32, i32) {
    %c0_i32 = arith.constant 0 : i32
    %c0_i32_0 = arith.constant 0 : i32
    %c0_i32_1 = arith.constant 0 : i32
    %c0_i32_2 = arith.constant 0 : i32
    return %c0_i32, %c0_i32_0, %c0_i32_1 : i32, i32, i32
  }
  func.func @transform_25(%arg0: i32) -> (i32, i32, i32) {
    %c0_i32 = arith.constant 0 : i32
    %c0_i32_0 = arith.constant 0 : i32
    %c0_i32_1 = arith.constant 0 : i32
    %c0_i32_2 = arith.constant 0 : i32
    return %c0_i32, %c0_i32_0, %c0_i32_1 : i32, i32, i32
  }
  func.func @transform_26(%arg0: i32) -> (i32, i32, i32) {
    %c0_i32 = arith.constant 0 : i32
    %c0_i32_0 = arith.constant 0 : i32
    %c0_i32_1 = arith.constant 0 : i32
    %c0_i32_2 = arith.constant 0 : i32
    return %c0_i32, %c0_i32_0, %c0_i32_1 : i32, i32, i32
  }
  func.func @transform_27(%arg0: i32) -> (i32, i32, i32) {
    %c0_i32 = arith.constant 0 : i32
    %c0_i32_0 = arith.constant 0 : i32
    %c0_i32_1 = arith.constant 0 : i32
    %c0_i32_2 = arith.constant 0 : i32
    return %c0_i32, %c0_i32_0, %c0_i32_1 : i32, i32, i32
  }
  func.func @transform_28(%arg0: i32) -> (i32, i32, i32) {
    %c0_i32 = arith.constant 0 : i32
    %c0_i32_0 = arith.constant 0 : i32
    %c0_i32_1 = arith.constant 0 : i32
    %c0_i32_2 = arith.constant 0 : i32
    return %c0_i32, %c0_i32_0, %c0_i32_1 : i32, i32, i32
  }
  func.func @transform_29(%arg0: i32) -> (i32, i32, i32) {
    %c0_i32 = arith.constant 0 : i32
    %c0_i32_0 = arith.constant 0 : i32
    %c0_i32_1 = arith.constant 0 : i32
    %c0_i32_2 = arith.constant 0 : i32
    return %c0_i32, %c0_i32_0, %c0_i32_1 : i32, i32, i32
  }
  func.func @transform_30(%arg0: i32) -> (i32, i32, i32) {
    %c0_i32 = arith.constant 0 : i32
    %c0_i32_0 = arith.constant 0 : i32
    %c0_i32_1 = arith.constant 0 : i32
    %c0_i32_2 = arith.constant 0 : i32
    return %c0_i32, %c0_i32_0, %c0_i32_1 : i32, i32, i32
  }
  func.func @transform_31(%arg0: i32) -> (i32, i32, i32) {
    %c0_i32 = arith.constant 0 : i32
    %c0_i32_0 = arith.constant 0 : i32
    %c0_i32_1 = arith.constant 0 : i32
    %c0_i32_2 = arith.constant 0 : i32
    return %c0_i32, %c0_i32_0, %c0_i32_1 : i32, i32, i32
  }
  func.func @transform_32(%arg0: i32) -> (i32, i32) {
    %c0_i32 = arith.constant 0 : i32
    %c0_i32_0 = arith.constant 0 : i32
    %c0_i32_1 = arith.constant 0 : i32
    return %c0_i32, %c0_i32_0 : i32, i32
  }
  func.func @transform_33(%arg0: i32) -> (i32, i32) {
    %c0_i32 = arith.constant 0 : i32
    %c0_i32_0 = arith.constant 0 : i32
    %c0_i32_1 = arith.constant 0 : i32
    return %c0_i32, %c0_i32_0 : i32, i32
  }
  func.func @transform_34(%arg0: i32) -> (i32, i32, i32) {
    %c0_i32 = arith.constant 0 : i32
    %c0_i32_0 = arith.constant 0 : i32
    %c0_i32_1 = arith.constant 0 : i32
    %c0_i32_2 = arith.constant 0 : i32
    return %c0_i32, %c0_i32_0, %c0_i32_1 : i32, i32, i32
  }
  func.func @transform_35(%arg0: i32) -> (i32, i32, i32) {
    %c0_i32 = arith.constant 0 : i32
    %c0_i32_0 = arith.constant 0 : i32
    %c0_i32_1 = arith.constant 0 : i32
    %c0_i32_2 = arith.constant 0 : i32
    return %c0_i32, %c0_i32_0, %c0_i32_1 : i32, i32, i32
  }
}

</mosaic_0001>

<bundles_post_ra>
// kernel: _device_forward.1
= control target key start
LH: loop header
LB: loop body
LE: loop exit
PB: predicated region body
PF: predicated region fallthrough
CT: control target
= control target key end

     0   :  { %s9631_s6 = smov 1   ;;  %s9632_s10 = smov 2   ;;  %s12504_s0 = inlined_call_operand.smem [shape: u32[36], index: -1, kind: input, shape index: {}] }
   0x1   :  { %s9703_s5 = sld [smem:[%s12504_s0]]   ;;  %s9633_s14 = smov 3  }
   0x2   :  { %s9708_s9 = sld [smem:[%s12504_s0 + %s9631_s6]]   ;;  %s9634_s18 = smov 4  }
   0x3   :  { %s9713_s13 = sld [smem:[%s12504_s0 + %s9632_s10]]   ;;  %s9635_s22 = smov 5  }
   0x4   :  { %s9718_s17 = sld [smem:[%s12504_s0 + %s9633_s14]]   ;;  %s9636_s26 = smov 6  }
   0x5   :  { %s9723_s21 = sld [smem:[%s12504_s0 + %s9634_s18]]   ;;  %s9637_s30 = smov 7  }
   0x6   :  { %s9728_s25 = sld [smem:[%s12504_s0 + %s9635_s22]]   ;;  %s9638_s4 = smov 8  }
   0x7   :  { %12521 = sst [smem:[#allocation46_spill]] %s9703_s5  ;;  %s9639_s10 = smov 9  }
   0x8   :  { %s9733_s29 = sld [smem:[%s12504_s0 + %s9636_s26]]   ;;  %s9640_s15 = smov 10  }
   0x9   :  { %s9738_s3 = sld [smem:[%s12504_s0 + %s9637_s30]]   ;;  %s9641_s20 = smov 11  }
   0xa   :  { %s9743_s8 = sld [smem:[%s12504_s0 + %s9638_s4]]   ;;  %s9642_s26 = smov 12  }
   0xb   :  { %12522 = sst [smem:[#allocation47_spill]] %s9723_s21  ;;  %s9643_s1 = smov 13  }
   0xc   :  { %12523 = sst [smem:[#allocation48_spill]] %s9728_s25  ;;  %s9644_s7 = smov 14  }
   0xd   :  { %s9748_s14 = sld [smem:[%s12504_s0 + %s9639_s10]]   ;;  %s9646_s22 = smov 16  }
   0xe   :  { %12524 = sst [smem:[#allocation49_spill]] %s9733_s29  ;;  %s9647_s28 = smov 17  }
   0xf   :  { %s9753_s19 = sld [smem:[%s12504_s0 + %s9640_s15]]   ;;  %s9645_s15 = smov 15  }
  0x10   :  { %12525 = sst [smem:[#allocation50_spill]] %s9743_s8 }
  0x11   :  { %s9758_s24 = sld [smem:[%s12504_s0 + %s9641_s20]]  }
  0x12   :  { %s9763_s30 = sld [smem:[%s12504_s0 + %s9642_s26]]  }
  0x13   :  { %12526 = sst [smem:[#allocation51_spill]] %s9748_s14 }
  0x14   :  { %s9768_s6 = sld [smem:[%s12504_s0 + %s9643_s1]]  }
  0x15   :  { %12527 = sst [smem:[#allocation52_spill]] %s9753_s19 }
  0x16   :  { %s9773_s12 = sld [smem:[%s12504_s0 + %s9644_s7]]   ;;  %s9648_s7 = smov 18  }
  0x17   :  { %s9778_s20 = sld [smem:[%s12504_s0 + %s9645_s15]]   ;;  %s9649_s15 = smov 19  }
  0x18   :  { %s9783_s27 = sld [smem:[%s12504_s0 + %s9646_s22]]   ;;  %s9650_s22 = smov 20  }
  0x19   :  { %s9788_s4 = sld [smem:[%s12504_s0 + %s9647_s28]]   ;;  %s9651_s28 = smov 21  }
  0x1a   :  { %s9793_s29 = sld [smem:[%s12504_s0 + %s9648_s7]]   ;;  %s9652_s7 = smov 22  }
  0x1b   :  { %s9798_s25 = sld [smem:[%s12504_s0 + %s9649_s15]]   ;;  %s9653_s15 = smov 23  }
  0x1c   :  { %s9803_s21 = sld [smem:[%s12504_s0 + %s9650_s22]]   ;;  %s9654_s22 = smov 24  }
  0x1d   :  { %12528 = sst [smem:[#allocation53_spill]] %s9778_s20 }
  0x1e   :  { %s9808_s20 = sld [smem:[%s12504_s0 + %s9651_s28]]   ;;  %s9655_s28 = smov 25  }
  0x1f   :  { %s9813_s19 = sld [smem:[%s12504_s0 + %s9652_s7]]   ;;  %s9656_s7 = smov 26  }
  0x20   :  { %s9818_s14 = sld [smem:[%s12504_s0 + %s9653_s15]]   ;;  %s9657_s15 = smov 27  }
  0x21   :  { %s9823_s8 = sld [smem:[%s12504_s0 + %s9654_s22]]   ;;  %s9658_s22 = smov 28  }
  0x22   :  { %12529 = sst [smem:[#allocation54_spill]] %s9803_s21 }
  0x23   :  { %s9833_s5 = sld [smem:[%s12504_s0 + %s9656_s7]]   ;;  %s9660_s7 = smov 30  }
  0x24   :  { %12530 = sst [smem:[#allocation55_spill]] %s9808_s20 }
  0x25   :  { %s9828_s20 = sld [smem:[%s12504_s0 + %s9655_s28]]   ;;  %s9659_s28 = smov 29  }
  0x26   :  { %12531 = sst [smem:[#allocation56_spill]] %s9818_s14 }
  0x27   :  { %12532 = sst [smem:[#allocation57_spill]] %s9823_s8 }
  0x28   :  { %s9838_s14 = sld [smem:[%s12504_s0 + %s9657_s15]]   ;;  %s9661_s15 = smov 31  }
  0x29   :  { %12534 = sst [smem:[#allocation59_spill]] %s9833_s5 }
  0x2a   :  { %s9843_s8 = sld [smem:[%s12504_s0 + %s9658_s22]]   ;;  %s9662_s22 = smov 32  }
  0x2b   :  { %12533 = sst [smem:[#allocation58_spill]] %s9828_s20 }
  0x2c   :  { %s9848_s20 = sld [smem:[%s12504_s0 + %s9659_s28]]   ;;  %s9663_s28 = smov 33  }
  0x2d   :  { %s9853_s5 = sld [smem:[%s12504_s0 + %s9660_s7]]   ;;  %s9664_s7 = smov 34  }
  0x2e   :  { %12535 = sst [smem:[#allocation60_spill]] %s9838_s14 }
  0x2f   :  { %s9858_s14 = sld [smem:[%s12504_s0 + %s9661_s15]]   ;;  %s9665_s15 = smov 35  }
  0x30   :  { %s9863_s21 = sld [smem:[%s12504_s0 + %s9662_s22]]  }
  0x32   :  { %12536 = sst [smem:[#allocation61_spill]] %s9848_s20 }
  0x33   :  { %12537 = sst [smem:[#allocation62_spill]] %s9853_s5 }
  0x34   :  { %s9868_s20 = sld [smem:[%s12504_s0 + %s9663_s28]]  }
  0x35   :  { %12538 = sst [smem:[#allocation63_spill]] %s9858_s14 }
  0x36   :  { %s9873_s5 = sld [smem:[%s12504_s0 + %s9664_s7]]  }
  0x37   :  { %s9878_s14 = sld [smem:[%s12504_s0 + %s9665_s15]]  }
  0x38   :  { %77 = vsyncpa [#allocation3], 0 }
  0x39   :  { %78 = vsyncpa [#allocation6], 0 }
  0x3a   :  { %79 = vsyncpa [#allocation9], 0 }
  0x3b   :  { %80 = vsyncpa [#allocation12], 0 }
  0x3c   :  { %81 = vsyncpa [#allocation15], 0 }
  0x3d   :  { %82 = vsyncpa [#allocation18], 0 }
  0x3e   :  { %83 = vsyncpa [#allocation21], 0 }
  0x3f   :  { %84 = vsyncpa [#allocation24], 0 }
  0x40   :  { %85 = vsyncpa [#allocation27], 0 }
  0x41   :  { %86 = vsyncpa [#allocation30], 0 }
  0x42   :  { %87 = vsyncpa [#allocation4], 0 }
  0x43   :  { %88 = vsyncpa [#allocation33], 0  ;;  %s108_s22 = sshll.u32 %s9713_s13, 4  ;;  %s9666_s0 = smov [#allocation5]   ;;  %s109_s22 = int_to_ptr.hbm [resolvable:$true] %s108_s22 }
  0x44   :  { %s110_s23 = sshll.u32 %s9666_s0, 4  ;;  %s140_s26 = sshll.u32 %s9738_s3, 4  ;;  %s111_s23 = int_to_ptr.vmem [resolvable:$true] %s110_s23  ;;  %s141_s26 = int_to_ptr.hbm [resolvable:$true] %s140_s26 }
  0x45   :  { %s9127_s28 = sshra.s32 %s109_s22, 4  ;;  %s9131_s2 = scalar_lea.hbm %s9713_s13, 16  ;;  %s9128_s28 = int_to_ptr.hbm [resolvable:$true] %s9127_s28 }
  0x46   :  { %s9129_s1 = scalar_lea.hbm %s9128_s28, 16  ;;  %p9132_p1 = scmp.lt.s32.totalorder %s9128_s28, %s9713_s13 }
  0x47   :  { %p9130_p0 = scmp.ne.s32.totalorder %s9128_s28, %s9129_s1  ;;  %p9133_p2 = scmp.lt.s32.totalorder %s9131_s2, %s9129_s1 }
  0x49   :  { %p9134_p3 = por %p9133_p2, %p9132_p1 }
  0x4b   :  { %p9135_p4 = pnand %p9134_p3, %p9130_p0 }
  0x4d   :  { %9138 = shalt.err (!%p9135_p4)
}
  0x4e   :  { %s9667_s7 = smov 128   ;;  %s9668_s10 = smov 8  }
  0x4f   :  { %116 = dma.hbm_to_vmem [thread:$0]  %s109_s22, 256, %s111_s23, [#allocation6], %s9667_s7, %s9667_s7, %s9668_s10  }
  0x50   :  { %s9669_s11 = smov [#allocation8]   ;;  %s171_s16 = sshll.u32 %s9763_s30, 4  ;;  %s172_s16 = int_to_ptr.hbm [resolvable:$true] %s171_s16 }
  0x51   :  { %s142_s15 = sshll.u32 %s9669_s11, 4  ;;  %s9151_s13 = sshra.s32 %s141_s26, 4  ;;  %s143_s15 = int_to_ptr.vmem [resolvable:$true] %s142_s15  ;;  %s9152_s13 = int_to_ptr.hbm [resolvable:$true] %s9151_s13 }
  0x52   :  { %s9153_s18 = scalar_lea.hbm %s9152_s13, 16  ;;  %s9155_s0 = scalar_lea.hbm %s9738_s3, 16 }
  0x53   :  { %p9154_p5 = scmp.ne.s32.totalorder %s9152_s13, %s9153_s18  ;;  %p9156_p6 = scmp.lt.s32.totalorder %s9152_s13, %s9738_s3 }
  0x54   :  { %p9157_p7 = scmp.lt.s32.totalorder %s9155_s0, %s9153_s18 }
  0x56   :  { %p9158_p8 = por %p9157_p7, %p9156_p6 }
  0x58   :  { %p9159_p9 = pnand %p9158_p8, %p9154_p5 }
  0x5a   :  { %9162 = shalt.err (!%p9159_p9)
}
  0x5b   :  { %148 = dma.hbm_to_vmem [thread:$0]  %s141_s26, 256, %s143_s15, [#allocation9], %s9667_s7, %s9667_s7, %s9668_s10  }
  0x5c   :  { %s192_s22 = sshll.u32 %s9773_s12, 4  ;;  %s9670_s23 = smov [#allocation11]   ;;  %s9894_s22 = int_to_ptr.hbm [resolvable:$true] %s192_s22 }
  0x5d   :  { %s173_s28 = sshll.u32 %s9670_s23, 4  ;;  %s9175_s1 = sshra.s32 %s172_s16, 4  ;;  %s174_s28 = int_to_ptr.vmem [resolvable:$true] %s173_s28  ;;  %s9176_s1 = int_to_ptr.hbm [resolvable:$true] %s9175_s1 }
  0x5e   :  { %s9177_s3 = scalar_lea.hbm %s9176_s1, 1  ;;  %s9179_s2 = scalar_lea.hbm %s9763_s30, 1 }
  0x5f   :  { %p9178_p10 = scmp.ne.s32.totalorder %s9176_s1, %s9177_s3  ;;  %p9180_p11 = scmp.lt.s32.totalorder %s9176_s1, %s9763_s30 }
  0x60   :  { %p9181_p12 = scmp.lt.s32.totalorder %s9179_s2, %s9177_s3 }
  0x62   :  { %p9182_p13 = por %p9181_p12, %p9180_p11 }
  0x64   :  { %p9183_p0 = pnand %p9182_p13, %p9178_p10 }
  0x66   :  { %9186 = shalt.err (!%p9183_p0)
}
  0x67   :  { %176 = dma.hbm_to_vmem [thread:$0]  %s172_s16, 16, %s174_s28, [#allocation12]  }
  0x68   :  { %s9671_s26 = smov [#allocation14]   ;;  %s221_s15 = sshll.u32 %s9788_s4, 4  ;;  %s222_s15 = int_to_ptr.hbm [resolvable:$true] %s221_s15 }
  0x69   :  { %s194_s11 = sshll.u32 %s9671_s26, 4  ;;  %s9199_s13 = sshra.s32 %s9894_s22, 4  ;;  %s195_s11 = int_to_ptr.vmem [resolvable:$true] %s194_s11  ;;  %s9200_s13 = int_to_ptr.hbm [resolvable:$true] %s9199_s13 }
  0x6a   :  { %s9201_s18 = scalar_lea.hbm %s9200_s13, 128  ;;  %s9203_s0 = scalar_lea.hbm %s9773_s12, 128 }
  0x6b   :  { %p9202_p1 = scmp.ne.s32.totalorder %s9200_s13, %s9201_s18  ;;  %p9204_p2 = scmp.lt.s32.totalorder %s9200_s13, %s9773_s12 }
  0x6c   :  { %p9205_p3 = scmp.lt.s32.totalorder %s9203_s0, %s9201_s18 }
  0x6e   :  { %p9206_p4 = por %p9205_p3, %p9204_p2 }
  0x70   :  { %p9207_p5 = pnand %p9206_p4, %p9202_p1 }
  0x72   :  { %9210 = shalt.err (!%p9207_p5)
}
  0x73   :  { %200 = dma.hbm_to_vmem [thread:$0]  %s9894_s22, 2048, %s195_s11, [#allocation15], %s9667_s7, %s9667_s7, %s9668_s10  }
  0x74   :  { %s243_s30 = sshll.u32 %s9798_s25, 4  ;;  %s9672_s16 = smov [#allocation17]   ;;  %s244_s30 = int_to_ptr.hbm [resolvable:$true] %s243_s30 }
  0x75   :  { %s223_s23 = sshll.u32 %s9672_s16, 4  ;;  %s9223_s28 = sshra.s32 %s222_s15, 4  ;;  %s224_s23 = int_to_ptr.vmem [resolvable:$true] %s223_s23  ;;  %s9224_s28 = int_to_ptr.hbm [resolvable:$true] %s9223_s28 }
  0x76   :  { %s9225_s12 = scalar_lea.hbm %s9224_s28, 1  ;;  %s9227_s1 = scalar_lea.hbm %s9788_s4, 1 }
  0x77   :  { %p9226_p6 = scmp.ne.s32.totalorder %s9224_s28, %s9225_s12  ;;  %p9228_p7 = scmp.lt.s32.totalorder %s9224_s28, %s9788_s4 }
  0x78   :  { %p9229_p8 = scmp.lt.s32.totalorder %s9227_s1, %s9225_s12 }
  0x7a   :  { %p9230_p9 = por %p9229_p8, %p9228_p7 }
  0x7c   :  { %p9231_p10 = pnand %p9230_p9, %p9226_p6 }
  0x7e   :  { %9234 = shalt.err (!%p9231_p10)
}
  0x7f   :  { %226 = dma.hbm_to_vmem [thread:$0]  %s222_s15, 16, %s224_s23, [#allocation18]  }
  0x80   :  { %s9673_s3 = smov [#allocation20]   ;;  %s9247_s2 = sshra.s32 %s244_s30, 4  ;;  %s9248_s2 = int_to_ptr.hbm [resolvable:$true] %s9247_s2 }
  0x81   :  { %s245_s22 = sshll.u32 %s9673_s3, 4  ;;  %s9249_s26 = scalar_lea.hbm %s9248_s2, 1  ;;  %s246_s22 = int_to_ptr.vmem [resolvable:$true] %s245_s22 }
  0x82   :  { %p9250_p11 = scmp.ne.s32.totalorder %s9248_s2, %s9249_s26  ;;  %s9251_s11 = scalar_lea.hbm %s9798_s25, 1 }
  0x83   :  { %p9252_p12 = scmp.lt.s32.totalorder %s9248_s2, %s9798_s25  ;;  %p9253_p13 = scmp.lt.s32.totalorder %s9251_s11, %s9249_s26 }
  0x85   :  { %p9254_p0 = por %p9253_p13, %p9252_p12 }
  0x87   :  { %p9255_p1 = pnand %p9254_p0, %p9250_p11 }
  0x89   :  { %9258 = shalt.err (!%p9255_p1)
}
  0x8a   :  { %248 = dma.hbm_to_vmem [thread:$0]  %s244_s30, 16, %s246_s22, [#allocation21]  }
  0x8b   :  { %s268_s4 = sshll.u32 %s9813_s19, 4  ;;  %s9674_s15 = smov [#allocation23]   ;;  %s269_s4 = int_to_ptr.hbm [resolvable:$true] %s268_s4 }
  0x8c   :  { %s270_s13 = sshll.u32 %s9674_s15, 4  ;;  %s302_s18 = sshll.u32 %s9843_s8, 4  ;;  %s271_s13 = int_to_ptr.vmem [resolvable:$true] %s270_s13  ;;  %s303_s18 = int_to_ptr.hbm [resolvable:$true] %s302_s18 }
  0x8d   :  { %s9271_s0 = sshra.s32 %s269_s4, 4  ;;  %s9275_s25 = scalar_lea.hbm %s9813_s19, 192  ;;  %s9272_s0 = int_to_ptr.hbm [resolvable:$true] %s9271_s0 }
  0x8e   :  { %s9273_s16 = scalar_lea.hbm %s9272_s0, 192  ;;  %p9276_p3 = scmp.lt.s32.totalorder %s9272_s0, %s9813_s19 }
  0x8f   :  { %p9274_p2 = scmp.ne.s32.totalorder %s9272_s0, %s9273_s16  ;;  %p9277_p4 = scmp.lt.s32.totalorder %s9275_s25, %s9273_s16 }
  0x91   :  { %p9278_p5 = por %p9277_p4, %p9276_p3 }
  0x93   :  { %p9279_p6 = pnand %p9278_p5, %p9274_p2 }
  0x95   :  { %9282 = shalt.err (!%p9279_p6)
}
  0x96   :  { %s9675_s30 = smov 64   ;;  %s9676_s23 = smov 4  }
  0x97   :  { %276 = dma.hbm_to_vmem [thread:$0]  %s269_s4, 3072, %s271_s13, [#allocation24], %s9675_s30, %s9675_s30, %s9676_s23  }
  0x98   :  { %s9677_s28 = smov [#allocation26]   ;;  %s95_s1 = sshll.u32 %s9708_s9, 4  ;;  %s9919_s1 = int_to_ptr.hbm [resolvable:$true] %s95_s1 }
  0x99   :  { %s304_s12 = sshll.u32 %s9677_s28, 4  ;;  %s9295_s19 = sshra.s32 %s303_s18, 4  ;;  %s305_s12 = int_to_ptr.vmem [resolvable:$true] %s304_s12  ;;  %s9296_s19 = int_to_ptr.hbm [resolvable:$true] %s9295_s19 }
  0x9a   :  { %s9297_s3 = scalar_lea.hbm %s9296_s19, 384  ;;  %s9299_s22 = scalar_lea.hbm %s9843_s8, 384 }
  0x9b   :  { %p9298_p7 = scmp.ne.s32.totalorder %s9296_s19, %s9297_s3  ;;  %p9300_p8 = scmp.lt.s32.totalorder %s9296_s19, %s9843_s8 }
  0x9c   :  { %p9301_p9 = scmp.lt.s32.totalorder %s9299_s22, %s9297_s3 }
  0x9e   :  { %p9302_p10 = por %p9301_p9, %p9300_p8 }
  0xa0   :  { %p9303_p11 = pnand %p9302_p10, %p9298_p7 }
  0xa2   :  { %9306 = shalt.err (!%p9303_p11)
}
  0xa3   :  { %310 = dma.hbm_to_vmem [thread:$0]  %s303_s18, 6144, %s305_s12, [#allocation27], %s9667_s7, %s9667_s7, %s9668_s10  }
  0xa4   :  { %s121_s2 = sshll.u32 %s9718_s17, 4  ;;  %s9678_s26 = smov [#allocation2]   ;;  %s9927_s2 = int_to_ptr.hbm [resolvable:$true] %s121_s2 }
  0xa5   :  { %s97_s11 = sshll.u32 %s9678_s26, 4  ;;  %s9319_s4 = sshra.s32 %s9919_s1, 4  ;;  %s98_s11 = int_to_ptr.vmem [resolvable:$true] %s97_s11  ;;  %s9320_s4 = int_to_ptr.hbm [resolvable:$true] %s9319_s4 }
  0xa6   :  { %s9321_s8 = scalar_lea.hbm %s9320_s4, 16  ;;  %s9323_s15 = scalar_lea.hbm %s9708_s9, 16 }
  0xa7   :  { %p9322_p12 = scmp.ne.s32.totalorder %s9320_s4, %s9321_s8  ;;  %p9324_p13 = scmp.lt.s32.totalorder %s9320_s4, %s9708_s9 }
  0xa8   :  { %p9325_p0 = scmp.lt.s32.totalorder %s9323_s15, %s9321_s8 }
  0xaa   :  { %p9326_p1 = por %p9325_p0, %p9324_p13 }
  0xac   :  { %p9327_p2 = pnand %p9326_p1, %p9322_p12 }
  0xae   :  { %9330 = shalt.err (!%p9327_p2)
}
  0xaf   :  { %103 = dma.hbm_to_vmem [thread:$0]  %s9919_s1, 256, %s98_s11, [#allocation3], %s9667_s7, %s9667_s7, %s9668_s10  }
  0xb0   :  { %s9679_s13 = smov [#allocation7]   ;;  %s160_s0 = sshll.u32 %s9758_s24, 4  ;;  %s161_s0 = int_to_ptr.hbm [resolvable:$true] %s160_s0 }
  0xb1   :  { %s123_s18 = sshll.u32 %s9679_s13, 4  ;;  %s9343_s16 = sshra.s32 %s9927_s2, 4  ;;  %s124_s18 = int_to_ptr.vmem [resolvable:$true] %s123_s18  ;;  %s9344_s16 = int_to_ptr.hbm [resolvable:$true] %s9343_s16 }
  0xb2   :  { %s9345_s9 = scalar_lea.hbm %s9344_s16, 16  ;;  %s9347_s25 = scalar_lea.hbm %s9718_s17, 16 }
  0xb3   :  { %p9346_p3 = scmp.ne.s32.totalorder %s9344_s16, %s9345_s9  ;;  %p9348_p4 = scmp.lt.s32.totalorder %s9344_s16, %s9718_s17 }
  0xb4   :  { %p9349_p5 = scmp.lt.s32.totalorder %s9347_s25, %s9345_s9 }
  0xb6   :  { %p9350_p6 = por %p9349_p5, %p9348_p4 }
  0xb8   :  { %p9351_p7 = pnand %p9350_p6, %p9346_p3 }
  0xba   :  { %9354 = shalt.err (!%p9351_p7)
}
  0xbb   :  { %129 = dma.hbm_to_vmem [thread:$0]  %s9927_s2, 256, %s124_s18, [#allocation6], %s9667_s7, %s9667_s7, %s9668_s10  }
  0xbc   :  { %s182_s28 = sshll.u32 %s9768_s6, 4  ;;  %s9680_s12 = smov [#allocation10]   ;;  %s183_s28 = int_to_ptr.hbm [resolvable:$true] %s182_s28 }
  0xbd   :  { %s162_s1 = sshll.u32 %s9680_s12, 4  ;;  %s9367_s19 = sshra.s32 %s161_s0, 4  ;;  %s163_s1 = int_to_ptr.vmem [resolvable:$true] %s162_s1  ;;  %s9368_s19 = int_to_ptr.hbm [resolvable:$true] %s9367_s19 }
  0xbe   :  { %s9369_s17 = scalar_lea.hbm %s9368_s19, 1  ;;  %s9371_s3 = scalar_lea.hbm %s9758_s24, 1 }
  0xbf   :  { %p9370_p8 = scmp.ne.s32.totalorder %s9368_s19, %s9369_s17  ;;  %p9372_p9 = scmp.lt.s32.totalorder %s9368_s19, %s9758_s24 }
  0xc0   :  { %p9373_p10 = scmp.lt.s32.totalorder %s9371_s3, %s9369_s17 }
  0xc2   :  { %p9374_p11 = por %p9373_p10, %p9372_p9 }
  0xc4   :  { %p9375_p12 = pnand %p9374_p11, %p9370_p8 }
  0xc6   :  { %9378 = shalt.err (!%p9375_p12)
}
  0xc7   :  { %165 = dma.hbm_to_vmem [thread:$0]  %s161_s0, 16, %s163_s1, [#allocation9]  }
  0xc8   :  { %s9681_s22 = smov [#allocation13]   ;;  %s207_s26 = sshll.u32 %s9783_s27, 4  ;;  %s9948_s26 = int_to_ptr.hbm [resolvable:$true] %s207_s26 }
  0xc9   :  { %s184_s2 = sshll.u32 %s9681_s22, 4  ;;  %s9391_s11 = sshra.s32 %s183_s28, 4  ;;  %s185_s2 = int_to_ptr.vmem [resolvable:$true] %s184_s2  ;;  %s9392_s11 = int_to_ptr.hbm [resolvable:$true] %s9391_s11 }
  0xca   :  { %s9393_s4 = scalar_lea.hbm %s9392_s11, 1  ;;  %s9395_s8 = scalar_lea.hbm %s9768_s6, 1 }
  0xcb   :  { %p9394_p13 = scmp.ne.s32.totalorder %s9392_s11, %s9393_s4  ;;  %p9396_p0 = scmp.lt.s32.totalorder %s9392_s11, %s9768_s6 }
  0xcc   :  { %p9397_p1 = scmp.lt.s32.totalorder %s9395_s8, %s9393_s4 }
  0xce   :  { %p9398_p2 = por %p9397_p1, %p9396_p0 }
  0xd0   :  { %p9399_p3 = pnand %p9398_p2, %p9394_p13 }
  0xd2   :  { %9402 = shalt.err (!%p9399_p3)
}
  0xd3   :  { %187 = dma.hbm_to_vmem [thread:$0]  %s183_s28, 16, %s185_s2, [#allocation12]  }
  0xd4   :  { %s232_s24 = sshll.u32 %s9793_s29, 4  ;;  %s9682_s15 = smov [#allocation16]   ;;  %s233_s24 = int_to_ptr.hbm [resolvable:$true] %s232_s24 }
  0xd5   :  { %s209_s13 = sshll.u32 %s9682_s15, 4  ;;  %s9415_s18 = sshra.s32 %s9948_s26, 4  ;;  %s210_s13 = int_to_ptr.vmem [resolvable:$true] %s209_s13  ;;  %s9416_s18 = int_to_ptr.hbm [resolvable:$true] %s9415_s18 }
  0xd6   :  { %s9417_s0 = scalar_lea.hbm %s9416_s18, 128  ;;  %s9419_s16 = scalar_lea.hbm %s9783_s27, 128 }
  0xd7   :  { %p9418_p4 = scmp.ne.s32.totalorder %s9416_s18, %s9417_s0  ;;  %p9420_p5 = scmp.lt.s32.totalorder %s9416_s18, %s9783_s27 }
  0xd8   :  { %p9421_p6 = scmp.lt.s32.totalorder %s9419_s16, %s9417_s0 }
  0xda   :  { %p9422_p7 = por %p9421_p6, %p9420_p5 }
  0xdc   :  { %p9423_p8 = pnand %p9422_p7, %p9418_p4 }
  0xde   :  { %9426 = shalt.err (!%p9423_p8)
}
  0xdf   :  { %s12539_s6 = sld [smem:[#allocation54_spill]]  ;;  %s9683_s9 = smov [#allocation19]  }
  0xe0   :  { %215 = dma.hbm_to_vmem [thread:$0]  %s9948_s26, 2048, %s210_s13, [#allocation15], %s9675_s30, %s9675_s30, %s9676_s23  }
  0xe1   :  { %s234_s25 = sshll.u32 %s9683_s9, 4  ;;  %s9439_s12 = sshra.s32 %s233_s24, 4  ;;  %s235_s25 = int_to_ptr.vmem [resolvable:$true] %s234_s25  ;;  %s9440_s12 = int_to_ptr.hbm [resolvable:$true] %s9439_s12 }
  0xe2   :  { %s9441_s27 = scalar_lea.hbm %s9440_s12, 1  ;;  %s9443_s1 = scalar_lea.hbm %s9793_s29, 1 }
  0xe3   :  { %p9442_p9 = scmp.ne.s32.totalorder %s9440_s12, %s9441_s27  ;;  %p9444_p10 = scmp.lt.s32.totalorder %s9440_s12, %s9793_s29 }
  0xe4   :  { %p9445_p11 = scmp.lt.s32.totalorder %s9443_s1, %s9441_s27 }
  0xe5   :  { %s253_s28 = sshll.u32 %s12539_s6, 4  ;;  %s9961_s28 = int_to_ptr.hbm [resolvable:$true] %s253_s28 }
  0xe6   :  { %p9446_p12 = por %p9445_p11, %p9444_p10 }
  0xe8   :  { %p9447_p13 = pnand %p9446_p12, %p9442_p9 }
  0xea   :  { %9450 = shalt.err (!%p9447_p13)
}
  0xeb   :  { %237 = dma.hbm_to_vmem [thread:$0]  %s233_s24, 16, %s235_s25, [#allocation18]  }
  0xec   :  { %s12540_s19 = sld [smem:[#allocation57_spill]]  ;;  %s9684_s3 = smov [#allocation22]  }
  0xed   :  { %s255_s22 = sshll.u32 %s9684_s3, 4  ;;  %s9463_s2 = sshra.s32 %s9961_s28, 4  ;;  %s256_s22 = int_to_ptr.vmem [resolvable:$true] %s255_s22  ;;  %s9464_s2 = int_to_ptr.hbm [resolvable:$true] %s9463_s2 }
  0xee   :  { %s9465_s26 = scalar_lea.hbm %s9464_s2, 384  ;;  %s9467_s29 = scalar_lea.hbm %s12539_s6, 384 }
  0xef   :  { %p9466_p0 = scmp.ne.s32.totalorder %s9464_s2, %s9465_s26  ;;  %p9468_p1 = scmp.lt.s32.totalorder %s9464_s2, %s12539_s6 }
  0xf0   :  { %p9469_p2 = scmp.lt.s32.totalorder %s9467_s29, %s9465_s26 }
  0xf2   :  { %s283_s17 = sshll.u32 %s12540_s19, 4  ;;  %p9470_p3 = por %p9469_p2, %p9468_p1  ;;  %s9966_s17 = int_to_ptr.hbm [resolvable:$true] %s283_s17 }
  0xf4   :  { %p9471_p4 = pnand %p9470_p3, %p9466_p0 }
  0xf6   :  { %9474 = shalt.err (!%p9471_p4)
}
  0xf7   :  { %s12541_s11 = sld [smem:[#allocation62_spill]]  ;;  %s9685_s4 = smov [#allocation25]  }
  0xf8   :  { %261 = dma.hbm_to_vmem [thread:$0]  %s9961_s28, 6144, %s256_s22, [#allocation21], %s9667_s7, %s9667_s7, %s9668_s10  }
  0xf9   :  { %s285_s8 = sshll.u32 %s9685_s4, 4  ;;  %s9487_s15 = sshra.s32 %s9966_s17, 4  ;;  %s286_s8 = int_to_ptr.vmem [resolvable:$true] %s285_s8  ;;  %s9488_s15 = int_to_ptr.hbm [resolvable:$true] %s9487_s15 }
  0xfa   :  { %s9489_s13 = scalar_lea.hbm %s9488_s15, 192  ;;  %s9491_s18 = scalar_lea.hbm %s12540_s19, 192 }
  0xfb   :  { %p9490_p5 = scmp.ne.s32.totalorder %s9488_s15, %s9489_s13  ;;  %p9492_p6 = scmp.lt.s32.totalorder %s9488_s15, %s12540_s19 }
  0xfc   :  { %p9493_p7 = scmp.lt.s32.totalorder %s9491_s18, %s9489_s13 }
  0xfd   :  { %s317_s24 = sshll.u32 %s12541_s11, 4  ;;  %s9976_s24 = int_to_ptr.hbm [resolvable:$true] %s317_s24 }
  0xfe   :  { %p9494_p8 = por %p9493_p7, %p9492_p6 }
 0x100   :  { %p9495_p9 = pnand %p9494_p8, %p9490_p5 }
 0x102   :  { %9498 = shalt.err (!%p9495_p9)
}
 0x103   :  { %s12542_s0 = sld [smem:[#allocation63_spill]]  ;;  %s9686_s6 = smov [#allocation28]  }
 0x104   :  { %291 = dma.hbm_to_vmem [thread:$0]  %s9966_s17, 3072, %s286_s8, [#allocation24], %s9675_s30, %s9675_s30, %s9676_s23  }
 0x105   :  { %s319_s9 = sshll.u32 %s9686_s6, 4  ;;  %s9511_s25 = sshra.s32 %s9976_s24, 4  ;;  %s320_s9 = int_to_ptr.vmem [resolvable:$true] %s319_s9  ;;  %s9512_s25 = int_to_ptr.hbm [resolvable:$true] %s9511_s25 }
 0x106   :  { %s9513_s28 = scalar_lea.hbm %s9512_s25, 384  ;;  %s9515_s12 = scalar_lea.hbm %s12541_s11, 384 }
 0x107   :  { %p9514_p10 = scmp.ne.s32.totalorder %s9512_s25, %s9513_s28  ;;  %p9516_p11 = scmp.lt.s32.totalorder %s9512_s25, %s12541_s11 }
 0x108   :  { %p9517_p12 = scmp.lt.s32.totalorder %s9515_s12, %s9513_s28 }
 0x109   :  { %s330_s16 = sshll.u32 %s12542_s0, 4  ;;  %s9986_s16 = int_to_ptr.hbm [resolvable:$true] %s330_s16 }
 0x10a   :  { %p9518_p13 = por %p9517_p12, %p9516_p11 }
 0x10c   :  { %p9519_p0 = pnand %p9518_p13, %p9514_p10 }
 0x10e   :  { %9522 = shalt.err (!%p9519_p0)
}
 0x10f   :  { %325 = dma.hbm_to_vmem [thread:$0]  %s9976_s24, 6144, %s320_s9, [#allocation27], %s9675_s30, %s9675_s30, %s9676_s23  }
 0x110   :  { %s9687_s27 = smov [#allocation29]   ;;  %s9535_s19 = sshra.s32 %s9986_s16, 4  ;;  %s9536_s19 = int_to_ptr.hbm [resolvable:$true] %s9535_s19 }
 0x111   :  { %s332_s1 = sshll.u32 %s9687_s27, 4  ;;  %s9537_s17 = scalar_lea.hbm %s9536_s19, 3  ;;  %s333_s1 = int_to_ptr.vmem [resolvable:$true] %s332_s1 }
 0x112   :  { %p9538_p1 = scmp.ne.s32.totalorder %s9536_s19, %s9537_s17  ;;  %s9539_s3 = scalar_lea.hbm %s12542_s0, 3 }
 0x113   :  { %p9540_p2 = scmp.lt.s32.totalorder %s9536_s19, %s12542_s0  ;;  %p9541_p3 = scmp.lt.s32.totalorder %s9539_s3, %s9537_s17 }
 0x115   :  { %p9542_p4 = por %p9541_p3, %p9540_p2 }
 0x117   :  { %p9543_p5 = pnand %p9542_p4, %p9538_p1 }
 0x119   :  { %9546 = shalt.err (!%p9543_p5)
}
 0x11a   :  { %s9688_s22 = smov 16   ;;  %s9689_s2 = smov 1  }
 0x11b   :  { %338 = dma.hbm_to_vmem [thread:$0]  %s9986_s16, 48, %s333_s1, [#allocation30], %s9688_s22, %s9688_s22, %s9689_s2  }
 0x11c   :  { %9607 = dma.done.wait [#allocation3], 256  }
 0x11d   :  { %9608 = vsyncadd [#allocation3], 4294967040 }
 0x11e   :  { %9609 = dma.done.wait [#allocation6], 512  }
 0x11f   :  { %9610 = vsyncadd [#allocation6], 4294966784 }
 0x120   :  { %9611 = dma.done.wait [#allocation9], 272  }
 0x121   :  { %9612 = vsyncadd [#allocation9], 4294967024 }
 0x122   :  { %9613 = dma.done.wait [#allocation12], 32  }
 0x123   :  { %9614 = vsyncadd [#allocation12], 4294967264 }
 0x124   :  { %9615 = dma.done.wait [#allocation15], 4096  }
 0x125   :  { %9616 = vsyncadd [#allocation15], 4294963200 }
 0x126   :  { %9617 = dma.done.wait [#allocation18], 32  }
 0x127   :  { %9618 = vsyncadd [#allocation18], 4294967264 }
 0x128   :  { %9619 = dma.done.wait [#allocation21], 6160  }
 0x129   :  { %9620 = vsyncadd [#allocation21], 4294961136 }
 0x12a   :  { %9621 = dma.done.wait [#allocation24], 6144  }
 0x12b   :  { %9622 = vsyncadd [#allocation24], 4294961152 }
 0x12c   :  { %9623 = dma.done.wait [#allocation27], 12288  }
 0x12d   :  { %9624 = vsyncadd [#allocation27], 4294955008 }
 0x12e   :  { %9625 = dma.done.wait [#allocation30], 48  }
 0x12f   :  { %9626 = vsyncadd [#allocation30], 4294967248  ;;  %s12543_s30 = sld [smem:[#allocation46_spill]]  ;;  %vm423_vm0 = vcmask 1043456   ;;  %v414_v2 = vld [vmem:[#allocation2] sm:$0xff]  ;;  %vm416_vm1 = vcmask 97280  }
 0x130   :  { %s12544_s23 = sld [smem:[#allocation50_spill]]  ;;  %v415_v27 = vld [vmem:[#allocation2 + $0x8] sm:$0xff]  ;;  %vm846_vm5 = vcmask 130048   ;;  %s7223_s9 = sshll.u32 %s9868_s20, 4  ;;  %s7224_s9 = int_to_ptr.hbm [resolvable:$true] %s7223_s9 }
 0x131   :  { %s12545_s26 = sld [smem:[#allocation51_spill]]  ;;  %s9571_s25 = sshra.s32 %s7224_s9, 4  ;;  %s9572_s25 = int_to_ptr.hbm [resolvable:$true] %s9571_s25 }
 0x132   :  { %s12556_s29 = sld [smem:[#allocation52_spill]]  ;;  %s9573_s28 = scalar_lea.hbm %s9572_s25, 16 }
 0x133   :  { %s12558_s11 = sld [smem:[#allocation47_spill]]  ;;  %p9574_p6 = scmp.ne.s32.totalorder %s9572_s25, %s9573_s28 }
 0x134   :  { %s12559_s4 = sld [smem:[#allocation48_spill]]  ;;  %s9575_s12 = scalar_lea.hbm %s9868_s20, 16 }
 0x135   :  { %v413_v0 = vld [vmem:[%s12543_s30 + $0x8] sm:$0xf]  ;;  %v412_v1 = vld [vmem:[%s12543_s30] sm:$0xff]  ;;  %s12560_s8 = sld [smem:[#allocation55_spill]]  ;;  %p9576_p7 = scmp.lt.s32.totalorder %s9572_s25, %s9868_s20 }
 0x136   :  { %7293 = vmatpush.msk.msra.mxu3 %vm423_vm0, %v413_v0  ;;  %v7383_v3 = vld [vmem:[%s12544_s23 + $0xa8] sm:$0xf]  ;;  %v8412_v4 = vld [vmem:[%s12544_s23 + $0xb0] sm:$0xf0]  ;;  %v8411_v6 = vld [vmem:[%s12544_s23 + $0xac] sm:$0xf]  ;;  %p9577_p8 = scmp.lt.s32.totalorder %s9575_s12, %s9573_s28 }
 0x137   :  { %v7384_v5 = vor.u32 %v8412_v4, %v7383_v3  ;;  %v7385_v7 = vld [vmem:[%s12544_s23 + $0xb4] sm:$0xf0]  ;;  %v7391_v8 = vld [vmem:[%s12544_s23 + $0xb0] sm:$0xf]  ;;  %v8413_v10 = vld [vmem:[%s12544_s23 + $0xb8] sm:$0xf0] }
 0x138   :  { %442 = vmatpush.msra.mxu3 %v412_v1  ;;  %v7388_v9 = vor.u32 %v8411_v6, %v7385_v7  ;;  %v7371_v11 = vld [vmem:[%s12544_s23 + $0x90] sm:$0xf]  ;;  %v8409_v12 = vld [vmem:[%s12544_s23 + $0x98] sm:$0xf0]  ;;  %v7392_v13 = vor.u32 %v8413_v10, %v7391_v8  ;;  %v8408_v15 = vld [vmem:[%s12544_s23 + $0x94] sm:$0xf]  ;;  %p9578_p9 = por %p9577_p8, %p9576_p7 }
 0x139   :  { %7294 = vmatmul.msk.f32.vlgmr.msra.gmra.mxu3 %vm416_vm1, %v414_v2  ;;  %641 = vmatpush.bf16.msra.mxu1 %v7384_v5  ;;  %v7372_v14 = vor.u32 %v8409_v12, %v7371_v11  ;;  %v7373_v16 = vld [vmem:[%s12544_s23 + $0x9c] sm:$0xf0]  ;;  %v7379_v17 = vld [vmem:[%s12544_s23 + $0x98] sm:$0xf]  ;;  %v8410_v19 = vld [vmem:[%s12544_s23 + $0xa0] sm:$0xf0] }
 0x13a   :  { %655 = vmatpush.bf16.msra.mxu2 %v7388_v9  ;;  %v7376_v18 = vor.u32 %v8408_v15, %v7373_v16  ;;  %v7359_v20 = vld [vmem:[%s12544_s23 + $0x78] sm:$0xf]  ;;  %v8406_v21 = vld [vmem:[%s12544_s23 + $0x80] sm:$0xf0]  ;;  %669 = vmatpush.bf16.msrb.mxu3 %v7392_v13  ;;  %v7380_v22 = vor.u32 %v8410_v19, %v7379_v17  ;;  %v8405_v23 = vld [vmem:[%s12544_s23 + $0x7c] sm:$0xf]  ;;  %v452_v15 = vlaneseq  ;;  %p9579_p10 = pnand %p9578_p9, %p9574_p6 }
 0x13b   :  { %v7361_v24 = vld [vmem:[%s12544_s23 + $0x84] sm:$0xf0]  ;;  %v7367_v25 = vld [vmem:[%s12544_s23 + $0x80] sm:$0xf]  ;;  %v8407_v26 = vld [vmem:[%s12544_s23 + $0x88] sm:$0xf0]  ;;  %v7360_v28 = vor.u32 %v8406_v21, %v7359_v20 }
 0x13c   :  { %v7364_v29 = vor.u32 %v8405_v23, %v7361_v24  ;;  %v7347_v30 = vld [vmem:[%s12544_s23 + $0x60] sm:$0xf]  ;;  %v8403_v31 = vld [vmem:[%s12544_s23 + $0x68] sm:$0xf0]  ;;  %v8402_v32 = vld [vmem:[%s12544_s23 + $0x64] sm:$0xf]  ;;  %v7368_v33 = vor.u32 %v8407_v26, %v7367_v25 }
 0x13d   :  { %642 = vmatpush.bf16.msra.mxu1 %v7372_v14  ;;  %v7349_v34 = vld [vmem:[%s12544_s23 + $0x6c] sm:$0xf0]  ;;  %v7355_v35 = vld [vmem:[%s12544_s23 + $0x68] sm:$0xf]  ;;  %v8404_v36 = vld [vmem:[%s12544_s23 + $0x70] sm:$0xf0]  ;;  %v7348_v39 = vor.u32 %v8403_v31, %v7347_v30 }
 0x13e   :  { %656 = vmatpush.bf16.msra.mxu2 %v7376_v18  ;;  %670 = vmatpush.bf16.msrb.mxu3 %v7380_v22  ;;  %v7335_v37 = vld [vmem:[%s12544_s23 + $0x48] sm:$0xf]  ;;  %v8400_v38 = vld [vmem:[%s12544_s23 + $0x50] sm:$0xf0]  ;;  %v8399_v40 = vld [vmem:[%s12544_s23 + $0x4c] sm:$0xf]  ;;  %v7352_v42 = vor.u32 %v8402_v32, %v7349_v34  ;;  %v7356_v45 = vor.u32 %v8404_v36, %v7355_v35 }
 0x13f   :  { %v7337_v41 = vld [vmem:[%s12544_s23 + $0x54] sm:$0xf0]  ;;  %v7343_v43 = vld [vmem:[%s12544_s23 + $0x50] sm:$0xf]  ;;  %v8401_v44 = vld [vmem:[%s12544_s23 + $0x58] sm:$0xf0]  ;;  %v7336_v46 = vor.u32 %v8400_v38, %v7335_v37 }
 0x140   :  { %v7340_v47 = vor.u32 %v8399_v40, %v7337_v41  ;;  %v7344_v48 = vor.u32 %v8401_v44, %v7343_v43  ;;  %v7323_v49 = vld [vmem:[%s12544_s23 + $0x30] sm:$0xf]  ;;  %v8397_v50 = vld [vmem:[%s12544_s23 + $0x38] sm:$0xf0]  ;;  %v8396_v51 = vld [vmem:[%s12544_s23 + $0x34] sm:$0xf] }
 0x141   :  { %7295 = vmatmul.msk.f32.gmra.mxu3 %vm416_vm1, %v415_v27  ;;  %643 = vmatpush.bf16.msra.mxu1 %v7360_v28  ;;  %v7324_v52 = vor.u32 %v8397_v50, %v7323_v49  ;;  %v7325_v53 = vld [vmem:[%s12544_s23 + $0x3c] sm:$0xf0]  ;;  %v7331_v54 = vld [vmem:[%s12544_s23 + $0x38] sm:$0xf]  ;;  %v8398_v55 = vld [vmem:[%s12544_s23 + $0x40] sm:$0xf0] }
 0x142   :  { %657 = vmatpush.bf16.msra.mxu2 %v7364_v29  ;;  %671 = vmatpush.bf16.msrb.mxu3 %v7368_v33  ;;  %v7328_v56 = vor.u32 %v8396_v51, %v7325_v53  ;;  %v7332_v57 = vor.u32 %v8398_v55, %v7331_v54  ;;  %v7311_v58 = vld [vmem:[%s12544_s23 + $0x18] sm:$0xf]  ;;  %v8394_v59 = vld [vmem:[%s12544_s23 + $0x20] sm:$0xf0]  ;;  %v8393_v60 = vld [vmem:[%s12544_s23 + $0x1c] sm:$0xf] }
 0x143   :  { %v7312_v61 = vor.u32 %v8394_v59, %v7311_v58  ;;  %v7313_v62 = vld [vmem:[%s12544_s23 + $0x24] sm:$0xf0]  ;;  %v7319_v63 = vld [vmem:[%s12544_s23 + $0x20] sm:$0xf]  ;;  %v8395_v0 = vld [vmem:[%s12544_s23 + $0x28] sm:$0xf0] }
 0x144   :  { %v7316_v1 = vor.u32 %v8393_v60, %v7313_v62  ;;  %v7320_v2 = vor.u32 %v8395_v0, %v7319_v63  ;;  %v7299_v3 = vld [vmem:[%s12544_s23] sm:$0xf]  ;;  %v8391_v4 = vld [vmem:[%s12544_s23 + $0x8] sm:$0xf0]  ;;  %v8390_v5 = vld [vmem:[%s12544_s23 + $0x4] sm:$0xf] }
 0x145   :  { %644 = vmatpush.bf16.msra.mxu1 %v7348_v39  ;;  %v7300_v6 = vor.u32 %v8391_v4, %v7299_v3  ;;  %v7301_v7 = vld [vmem:[%s12544_s23 + $0xc] sm:$0xf0]  ;;  %v7307_v8 = vld [vmem:[%s12544_s23 + $0x8] sm:$0xf]  ;;  %v8392_v9 = vld [vmem:[%s12544_s23 + $0x10] sm:$0xf0] }
 0x146   :  { %658 = vmatpush.bf16.msra.mxu2 %v7352_v42  ;;  %672 = vmatpush.bf16.msrb.mxu3 %v7356_v45  ;;  %v7304_v10 = vor.u32 %v8390_v5, %v7301_v7  ;;  %v7308_v11 = vor.u32 %v8392_v9, %v7307_v8  ;;  %v455_v16 = vshrl.u32 %v452_v15, 7  ;;  %v453_v18 = vand.u32 127, %v452_v15  ;;  %v505_v21 = vld [vmem:[%s12545_s26] sm:$0x7]  ;;  %s12561_s24 = sld [smem:[#allocation56_spill]] }
 0x147   :  { %v9690_v23 = vmov 0.0   ;;  %v507_v25 = vperm.slane %v505_v21, 0  ;;  %v508_v36 = vperm.slane %v505_v21, 1  ;;  %v509_v38 = vperm.slane %v505_v21, 2  ;;  %s12562_s15 = sld [smem:[#allocation49_spill]] }
 0x148   :  { %v458_v17 = vadd.s32 1, %v455_v16  ;;  %v456_v19 = vmul.u32 16, %v455_v16  ;;  %s12573_s13 = sld [smem:[#allocation58_spill]] }
 0x149   :  { %645 = vmatpush.bf16.msra.mxu1 %v7336_v46  ;;  %s12574_s18 = sld [smem:[#allocation59_spill]] }
 0x14a   :  { %659 = vmatpush.bf16.msra.mxu2 %v7340_v47  ;;  %673 = vmatpush.bf16.msrb.mxu3 %v7344_v48  ;;  %v459_v20 = vmul.u32 16, %v458_v17  ;;  %vm457_vm2 = vcmp.ge.s32.totalorder %v453_v18, %v456_v19  ;;  %s12575_s0 = sld [smem:[#allocation60_spill]] }
 0x14b   :  { %s12576_s16 = sld [smem:[#allocation61_spill]] }
 0x14c   :  { %vm460_vm3 = vcmp.lt.s32.totalorder %v453_v18, %v459_v20 }
 0x14d   :  { %646 = vmatpush.bf16.msra.mxu1 %v7324_v52  ;;  %vm461_vm4 = vmand %vm457_vm2, %vm460_vm3 }
 0x14e   :  { %660 = vmatpush.bf16.msra.mxu2 %v7328_v56  ;;  %674 = vmatpush.bf16.msrb.mxu3 %v7332_v57  ;;  %v10059_v24 = vsel %vm461_vm4, 1.0, %v9690_v23 }
 0x14f   :  { %v468_v26 = vrot.slane %v10059_v24, 4  ;;  %v469_v28 = vrot.slane %v10059_v24, 5  ;;  %v10070_v34 = vperm.slane %v10059_v24, 0  ;;  %v466_v21 = vrot.slane %v10059_v24, 2 }
 0x151   :  { %647 = vmatpush.bf16.msra.mxu1 %v7312_v61  ;;  %v10065_v31 = vperm.slane %v468_v26, 0  ;;  %v10072_v35 = vperm.slane %v469_v28, 0  ;;  %v10105_v26 = vperm.slane %v466_v21, 0 }
 0x152   :  { %661 = vmatpush.bf16.msra.mxu2 %v7316_v1  ;;  %675 = vmatpush.bf16.msrb.mxu3 %v7320_v2  ;;  %v465_v1 = vrot.slane %v10059_v24, 1  ;;  %v470_v2 = vrot.slane %v10059_v24, 6 }
 0x154   :  { %v10091_v5 = vperm.slane %v465_v1, 0 }
 0x155   :  { %648 = vmatpush.bf16.msra.mxu1 %v7300_v6  ;;  %v10093_v6 = vperm.slane %v470_v2, 0 }
 0x156   :  { %662 = vmatpush.bf16.msra.mxu2 %v7304_v10  ;;  %676 = vmatpush.bf16.msrb.mxu3 %v7308_v11 }
 0x1bc   :  { %v10052_v12 = vpop.f32.mrf.mxu3 }
 0x1c4   :  { %v10054_v13 = vpop.f32.mrf.mxu3 }
 0x1c5   :  { %v472_v14 = vpack.c.bf16 %v10054_v13, %v10052_v12 }
 0x1c7   :  { %649 = vmatmul.bf16.vlgmr.msra.gmra.mxu1 %v472_v14  ;;  %663 = vmatmul.bf16.vlgmr.msra.gmra.mxu2 %v472_v14 }
 0x1c8   :  { %677 = vmatmul.bf16.vlgmr.msrb.gmra.mxu3 %v472_v14 }
 0x244   :  { %v650_v22 = vpop.f32.mrf.mxu1 }
 0x245   :  { %v10063_v29 = vadd.f32 %v650_v22, %v507_v25  ;;  %v471_v22 = vrot.slane %v10059_v24, 7 }
 0x247   :  { %v707_v37 = vmul.f32 %v10065_v31, %v10063_v29  ;;  %v699_v43 = vmul.f32 %v10070_v34, %v10063_v29  ;;  %v709_v44 = vmul.f32 %v10072_v35, %v10063_v29  ;;  %v701_v9 = vmul.f32 %v10091_v5, %v10063_v29 }
 0x248   :  { %v711_v10 = vmul.f32 %v10093_v6, %v10063_v29 }
 0x249   :  { %v723_v48 = vpack.c.bf16 %v707_v37, %v707_v37  ;;  %v715_v56 = vpack.c.bf16 %v699_v43, %v699_v43  ;;  %v725_v57 = vpack.c.bf16 %v709_v44, %v709_v44  ;;  %v717_v15 = vpack.c.bf16 %v701_v9, %v701_v9 }
 0x24a   :  { %v664_v27 = vpop.f32.mrf.mxu2  ;;  %v727_v16 = vpack.c.bf16 %v711_v10, %v711_v10 }
 0x24b   :  { %v678_v30 = vpop.f32.mrf.mxu3  ;;  %v665_v45 = vadd.f32 %v664_v27, %v508_v36  ;;  %v10086_v58 = vunpack.c.l.b16 %v723_v48  ;;  %v749_v63 = vunpack.c.l.b16 %v715_v56  ;;  %v759_v0 = vunpack.c.l.b16 %v725_v57 }
 0x24c   :  { %v652_v32 = vpop.f32.mrf.mxu1  ;;  %v679_v50 = vadd.f32 %v678_v30, %v509_v38  ;;  %v751_v19 = vunpack.c.l.b16 %v717_v15  ;;  %v761_v20 = vunpack.c.l.b16 %v727_v16  ;;  %v10107_v27 = vperm.slane %v471_v22, 0 }
 0x24d   :  { %v10067_v33 = vadd.f32 %v652_v32, %v507_v25  ;;  %v703_v32 = vmul.f32 %v10105_v26, %v10063_v29 }
 0x24f   :  { %v700_v39 = vmul.f32 %v10070_v34, %v10067_v33  ;;  %v710_v40 = vmul.f32 %v10072_v35, %v10067_v33  ;;  %v708_v41 = vmul.f32 %v10065_v31, %v10067_v33  ;;  %v702_v7 = vmul.f32 %v10091_v5, %v10067_v33 }
 0x250   :  { %v712_v8 = vmul.f32 %v10093_v6, %v10067_v33  ;;  %v704_v28 = vmul.f32 %v10105_v26, %v10067_v33  ;;  %v714_v30 = vmul.f32 %v10107_v27, %v10067_v33 }
 0x251   :  { %v724_v49 = vpack.c.bf16 %v708_v41, %v708_v41  ;;  %v716_v52 = vpack.c.bf16 %v700_v39, %v700_v39  ;;  %v726_v53 = vpack.c.bf16 %v710_v40, %v710_v40  ;;  %v718_v11 = vpack.c.bf16 %v702_v7, %v702_v7 }
 0x252   :  { %v666_v42 = vpop.f32.mrf.mxu2  ;;  %v728_v14 = vpack.c.bf16 %v712_v8, %v712_v8  ;;  %v720_v37 = vpack.c.bf16 %v704_v28, %v704_v28  ;;  %v719_v39 = vpack.c.bf16 %v703_v32, %v703_v32 }
 0x253   :  { %v667_v46 = vadd.f32 %v666_v42, %v508_v36  ;;  %v680_v47 = vpop.f32.mrf.mxu3  ;;  %v758_v59 = vunpack.c.l.b16 %v724_v49  ;;  %v750_v60 = vunpack.c.l.b16 %v716_v52  ;;  %v760_v61 = vunpack.c.l.b16 %v726_v53 }
 0x254   :  { %v681_v51 = vadd.f32 %v680_v47, %v509_v38  ;;  %v752_v17 = vunpack.c.l.b16 %v718_v11  ;;  %v762_v18 = vunpack.c.l.b16 %v728_v14  ;;  %v713_v36 = vmul.f32 %v10107_v27, %v10063_v29 }
 0x255   :  { %v731_v54 = vpack.c.bf16 %v667_v46, %v665_v45  ;;  %v769_v62 = vpack.c.b16 %v758_v59, %v10086_v58  ;;  %v765_v3 = vpack.c.b16 %v750_v60, %v749_v63  ;;  %v770_v4 = vpack.c.b16 %v760_v61, %v759_v0 }
 0x256   :  { %v732_v55 = vpack.c.bf16 %v681_v51, %v679_v50  ;;  %v766_v23 = vpack.c.b16 %v752_v17, %v751_v19  ;;  %v771_v25 = vpack.c.b16 %v762_v18, %v761_v20  ;;  %v730_v38 = vpack.c.bf16 %v714_v30, %v714_v30 }
 0x257   :  { %788 = vmatpush.bf16.xpose.msra.mxu0 %v731_v54  ;;  %8646 = vmatpush.bf16.xpose.msra.mxu3 %v731_v54  ;;  %v729_v40 = vpack.c.bf16 %v713_v36, %v713_v36  ;;  %v754_v41 = vunpack.c.l.b16 %v720_v37  ;;  %v753_v43 = vunpack.c.l.b16 %v719_v39  ;;  %v467_v45 = vrot.slane %v10059_v24, 3  ;;  %v10124_v24 = vld [vmem:[#allocation5] sm:$0xff] }
 0x258   :  { %1270 = vmatpush.bf16.msrb.mxu1 %v732_v55  ;;  %8647 = vmatpush.bf16.msrb.mxu2 %v732_v55  ;;  %v764_v42 = vunpack.c.l.b16 %v730_v38 }
 0x259   :  { %v763_v44 = vunpack.c.l.b16 %v729_v40  ;;  %v767_v46 = vpack.c.b16 %v754_v41, %v753_v43  ;;  %v10118_v48 = vperm.slane %v467_v45, 0 }
 0x25b   :  { %v772_v47 = vpack.c.b16 %v764_v42, %v763_v44  ;;  %v706_v49 = vmul.f32 %v10118_v48, %v10067_v33  ;;  %v705_v50 = vmul.f32 %v10118_v48, %v10063_v29  ;;  %v10128_v33 = vld [vmem:[#allocation5 + $0x8] sm:$0xff] }
 0x25d   :  { %v722_v51 = vpack.c.bf16 %v706_v49, %v706_v49  ;;  %v721_v52 = vpack.c.bf16 %v705_v50, %v705_v50 }
 0x25e   :  { %789 = vmatmul.bf16.vlgmr.msra.gmra.mxu0 %v765_v3  ;;  %814 = vmatmul.bf16.vlgmr.msra.gmra.mxu3 %v770_v4 }
 0x25f   :  { %v756_v53 = vunpack.c.l.b16 %v722_v51  ;;  %v755_v54 = vunpack.c.l.b16 %v721_v52 }
 0x261   :  { %v768_v55 = vpack.c.b16 %v756_v53, %v755_v54 }
 0x26e   :  { %794 = vmatmul.bf16.gmra.mxu0 %v766_v23  ;;  %819 = vmatmul.bf16.gmra.mxu3 %v771_v25 }
 0x27e   :  { %799 = vmatmul.bf16.gmra.mxu0 %v767_v46  ;;  %824 = vmatmul.bf16.gmra.mxu3 %v772_v47 }
 0x28e   :  { %804 = vmatmul.bf16.gmra.mxu0 %v768_v55 }
 0x29e   :  { %809 = vmatmul.bf16.gmra.mxu0 %v769_v62 }
 0x2db   :  { %v790_v56 = vpop.f32.mrf.mxu0 }
 0x2dc   :  { %v830_v57 = vadd.f32 %v790_v56, %v10124_v24 }
 0x2de   :  { %v847_v58 = vsel %vm846_vm5, %v830_v57, -inf }
 0x2df   :  { %848 = vmax.xlane.f32.xlu0 %v847_v58 }
 0x2e1   :  { %v815_v61 = vpop.f32.mrf.mxu3 }
 0x2e2   :  { %v10133_v62 = vadd.f32 %v815_v61, %v10124_v24 }
 0x2e3   :  { %v792_v59 = vpop.f32.mrf.mxu0 }
 0x2e4   :  { %v831_v29 = vadd.f32 %v792_v59, %v10128_v33  ;;  %v877_v1 = vsel %vm846_vm5, %v10133_v62, -inf }
 0x2e6   :  { %v850_v60 = vsel %vm846_vm5, %v831_v29, -inf }
 0x2e7   :  { %851 = vmax.xlane.f32.xlu0 %v850_v60 }
 0x2e9   :  { %v817_v3 = vpop.f32.mrf.mxu3 }
 0x2ea   :  { %v10145_v9 = vadd.f32 %v817_v3, %v10128_v33 }
 0x2eb   :  { %v795_v63 = vpop.f32.mrf.mxu0 }
 0x2ec   :  { %v832_v0 = vadd.f32 %v795_v63, %v10124_v24  ;;  %v880_v15 = vsel %vm846_vm5, %v10145_v9, -inf }
 0x2ee   :  { %v853_v2 = vsel %vm846_vm5, %v832_v0, -inf }
 0x2ef   :  { %878 = vmax.xlane.f32.xlu0 %v877_v1  ;;  %854 = vmax.xlane.f32.xlu1 %v853_v2 }
 0x2f1   :  { %v820_v14 = vpop.f32.mrf.mxu3 }
 0x2f2   :  { %v10155_v17 = vadd.f32 %v820_v14, %v10124_v24 }
 0x2f3   :  { %v797_v4 = vpop.f32.mrf.mxu0 }
 0x2f4   :  { %v10140_v7 = vadd.f32 %v797_v4, %v10128_v33  ;;  %v883_v20 = vsel %vm846_vm5, %v10155_v17, -inf }
 0x2f6   :  { %v856_v8 = vsel %vm846_vm5, %v10140_v7, -inf }
 0x2f7   :  { %857 = vmax.xlane.f32.xlu1 %v856_v8 }
 0x2f9   :  { %v822_v22 = vpop.f32.mrf.mxu3 }
 0x2fa   :  { %v10165_v23 = vadd.f32 %v822_v22, %v10128_v33 }
 0x2fb   :  { %v800_v10 = vpop.f32.mrf.mxu0 }
 0x2fc   :  { %v10148_v11 = vadd.f32 %v800_v10, %v10124_v24  ;;  %v886_v28 = vsel %vm846_vm5, %v10165_v23, -inf }
 0x2fe   :  { %v859_v16 = vsel %vm846_vm5, %v10148_v11, -inf }
 0x2ff   :  { %881 = vmax.xlane.f32.xlu1 %v880_v15  ;;  %860 = vmax.xlane.f32.xlu2 %v859_v16 }
 0x301   :  { %v825_v37 = vpop.f32.mrf.mxu3 }
 0x302   :  { %v10203_v63 = vadd.f32 %v825_v37, %v10124_v24 }
 0x303   :  { %v802_v18 = vpop.f32.mrf.mxu0 }
 0x304   :  { %v10158_v19 = vadd.f32 %v802_v18, %v10128_v33  ;;  %v889_v8 = vsel %vm846_vm5, %v10203_v63, -inf }
 0x306   :  { %v862_v21 = vsel %vm846_vm5, %v10158_v19, -inf }
 0x307   :  { %884 = vmax.xlane.f32.xlu1 %v883_v20  ;;  %863 = vmax.xlane.f32.xlu2 %v862_v21 }
 0x309   :  { %v827_v43 = vpop.f32.mrf.mxu3 }
 0x30a   :  { %v10185_v44 = vadd.f32 %v827_v43, %v10128_v33 }
 0x30b   :  { %v805_v25 = vpop.f32.mrf.mxu0 }
 0x30c   :  { %v10170_v30 = vadd.f32 %v805_v25, %v10124_v24  ;;  %v892_v45 = vsel %vm846_vm5, %v10185_v44, -inf }
 0x30e   :  { %v865_v38 = vsel %vm846_vm5, %v10170_v30, -inf }
 0x30f   :  { %887 = vmax.xlane.f32.xlu2 %v886_v28 }
 0x313   :  { %v807_v32 = vpop.f32.mrf.mxu0 }
 0x314   :  { %v10173_v36 = vadd.f32 %v807_v32, %v10128_v33 }
 0x316   :  { %v868_v39 = vsel %vm846_vm5, %v10173_v36, -inf }
 0x317   :  { %866 = vmax.xlane.f32.xlu2 %v865_v38  ;;  %869 = vmax.xlane.f32.xlu0 %v868_v39 }
 0x31b   :  { %v810_v40 = vpop.f32.mrf.mxu0 }
 0x31c   :  { %v10180_v41 = vadd.f32 %v810_v40, %v10124_v24 }
 0x31e   :  { %v871_v42 = vsel %vm846_vm5, %v10180_v41, -inf }
 0x31f   :  { %872 = vmax.xlane.f32.xlu2 %v871_v42 }
 0x323   :  { %v812_v55 = vpop.f32.mrf.mxu0 }
 0x324   :  { %v10194_v56 = vadd.f32 %v812_v55, %v10128_v33 }
 0x326   :  { %v874_v61 = vsel %vm846_vm5, %v10194_v56, -inf }
 0x327   :  { %893 = vmax.xlane.f32.xlu2 %v892_v45 }
 0x352   :  { %v849_v46 = vpop.xlane.xlu0 %848 }
 0x353   :  { %v895_v47 = vsub.f32 %v830_v57, %v849_v46 }
 0x355   :  { %v911_v49 = vmul.f32 1.442695, %v895_v47 }
 0x357   :  { %8733 = vpow2.f32 %v911_v49 }
 0x35a   :  { %v852_v50 = vpop.xlane.xlu0 %851 }
 0x35b   :  { %v896_v51 = vsub.f32 %v831_v29, %v852_v50 }
 0x35d   :  { %v10189_v52 = vpop.eup %8733  ;;  %v913_v53 = vmul.f32 1.442695, %v896_v51 }
 0x35e   :  { %v943_v54 = vsel %vm846_vm5, %v10189_v52, 0.0 }
 0x35f   :  { %8735 = vpow2.f32 %v913_v53  ;;  %944 = vadd.xlane.f32.xlu0 %v943_v54 }
 0x362   :  { %v855_v58 = vpop.xlane.xlu1 %854  ;;  %v879_v1 = vpop.xlane.xlu0 %878 }
 0x363   :  { %v897_v59 = vsub.f32 %v832_v0, %v855_v58  ;;  %v905_v0 = vsub.f32 %v10133_v62, %v879_v1 }
 0x365   :  { %v10196_v60 = vpop.eup %8735  ;;  %v915_v57 = vmul.f32 1.442695, %v897_v59  ;;  %v931_v24 = vmul.f32 1.442695, %v905_v0 }
 0x366   :  { %v946_v29 = vsel %vm846_vm5, %v10196_v60, 0.0 }
 0x367   :  { %947 = vadd.xlane.f32.xlu1 %v946_v29  ;;  %875 = vmax.xlane.f32.xlu0 %v874_v61  ;;  %8737 = vpow2.f32 %v915_v57 }
 0x36a   :  { %v858_v33 = vpop.xlane.xlu1 %857 }
 0x36b   :  { %v898_v2 = vsub.f32 %v10140_v7, %v858_v33 }
 0x36d   :  { %v917_v3 = vmul.f32 1.442695, %v898_v2  ;;  %v10207_v4 = vpop.eup %8737 }
 0x36e   :  { %v949_v10 = vsel %vm846_vm5, %v10207_v4, 0.0 }
 0x36f   :  { %8739 = vpow2.f32 %v917_v3  ;;  %890 = vmax.xlane.f32.xlu1 %v889_v8  ;;  %950 = vadd.xlane.f32.xlu0 %v949_v10 }
 0x370   :  { %8741 = vpow2.f32 %v931_v24 }
 0x372   :  { %v882_v14 = vpop.xlane.xlu1 %881  ;;  %v861_v15 = vpop.xlane.xlu2 %860 }
 0x373   :  { %v899_v16 = vsub.f32 %v10148_v11, %v861_v15  ;;  %v906_v18 = vsub.f32 %v10145_v9, %v882_v14 }
 0x375   :  { %v10214_v7 = vpop.eup %8739  ;;  %v919_v62 = vmul.f32 1.442695, %v899_v16  ;;  %v933_v21 = vmul.f32 1.442695, %v906_v18 }
 0x376   :  { %v952_v20 = vsel %vm846_vm5, %v10214_v7, 0.0  ;;  %v10219_v25 = vpop.eup %8741 }
 0x377   :  { %953 = vadd.xlane.f32.xlu1 %v952_v20  ;;  %8743 = vpow2.f32 %v919_v62  ;;  %v973_v9 = vsel %vm846_vm5, %v10219_v25, 0.0 }
 0x378   :  { %8745 = vpow2.f32 %v933_v21 }
 0x37a   :  { %v864_v22 = vpop.xlane.xlu2 %863  ;;  %v885_v28 = vpop.xlane.xlu1 %884 }
 0x37b   :  { %v900_v32 = vsub.f32 %v10158_v19, %v864_v22  ;;  %v907_v38 = vsub.f32 %v10155_v17, %v885_v28 }
 0x37d   :  { %v921_v37 = vmul.f32 1.442695, %v900_v32  ;;  %v10222_v11 = vpop.eup %8743  ;;  %v935_v40 = vmul.f32 1.442695, %v907_v38 }
 0x37e   :  { %v955_v39 = vsel %vm846_vm5, %v10222_v11, 0.0  ;;  %v10229_v43 = vpop.eup %8745 }
 0x37f   :  { %974 = vadd.xlane.f32.xlu1 %v973_v9  ;;  %8747 = vpow2.f32 %v921_v37  ;;  %956 = vadd.xlane.f32.xlu2 %v955_v39  ;;  %v976_v45 = vsel %vm846_vm5, %v10229_v43, 0.0 }
 0x380   :  { %8749 = vpow2.f32 %v935_v40 }
 0x382   :  { %v888_v42 = vpop.xlane.xlu2 %887 }
 0x383   :  { %v908_v53 = vsub.f32 %v10165_v23, %v888_v42 }
 0x385   :  { %v10231_v19 = vpop.eup %8747  ;;  %v937_v59 = vmul.f32 1.442695, %v908_v53 }
 0x386   :  { %v958_v17 = vsel %vm846_vm5, %v10231_v19, 0.0  ;;  %v10239_v51 = vpop.eup %8749 }
 0x387   :  { %977 = vadd.xlane.f32.xlu2 %v976_v45  ;;  %959 = vadd.xlane.f32.xlu0 %v958_v17  ;;  %v979_v58 = vsel %vm846_vm5, %v10239_v51, 0.0 }
 0x38a   :  { %v867_v46 = vpop.xlane.xlu2 %866  ;;  %v870_v47 = vpop.xlane.xlu0 %869 }
 0x38b   :  { %v901_v49 = vsub.f32 %v10170_v30, %v867_v46  ;;  %v902_v50 = vsub.f32 %v10173_v36, %v870_v47 }
 0x38d   :  { %v923_v54 = vmul.f32 1.442695, %v901_v49  ;;  %v925_v55 = vmul.f32 1.442695, %v902_v50 }
 0x38f   :  { %8751 = vpow2.f32 %v923_v54  ;;  %980 = vadd.xlane.f32.xlu2 %v979_v58 }
 0x390   :  { %8753 = vpow2.f32 %v925_v55 }
 0x391   :  { %8755 = vpow2.f32 %v937_v59 }
 0x392   :  { %v873_v57 = vpop.xlane.xlu2 %872 }
 0x393   :  { %v903_v29 = vsub.f32 %v10180_v41, %v873_v57 }
 0x395   :  { %v10245_v61 = vpop.eup %8751  ;;  %v927_v30 = vmul.f32 1.442695, %v903_v29 }
 0x396   :  { %v10247_v36 = vpop.eup %8753  ;;  %v961_v23 = vsel %vm846_vm5, %v10245_v61, 0.0 }
 0x397   :  { %8757 = vpow2.f32 %v927_v30  ;;  %v964_v1 = vsel %vm846_vm5, %v10247_v36, 0.0  ;;  %962 = vadd.xlane.f32.xlu0 %v961_v23  ;;  %v10253_v2 = vpop.eup %8755 }
 0x398   :  { %965 = vadd.xlane.f32.xlu1 %v964_v1  ;;  %v982_v10 = vsel %vm846_vm5, %v10253_v2, 0.0 }
 0x39a   :  { %v894_v33 = vpop.xlane.xlu2 %893 }
 0x39b   :  { %v910_v41 = vsub.f32 %v10185_v44, %v894_v33 }
 0x39d   :  { %v10256_v0 = vpop.eup %8757  ;;  %v941_v3 = vmul.f32 1.442695, %v910_v41 }
 0x39e   :  { %v967_v8 = vsel %vm846_vm5, %v10256_v0, 0.0 }
 0x39f   :  { %8759 = vpow2.f32 %v941_v3  ;;  %983 = vadd.xlane.f32.xlu0 %v982_v10 }
 0x3a0   :  { %968 = vadd.xlane.f32.xlu1 %v967_v8 }
 0x3a5   :  { %v10262_v24 = vpop.eup %8759 }
 0x3a6   :  { %v988_v14 = vsel %vm846_vm5, %v10262_v24, 0.0 }
 0x3a8   :  { %989 = vadd.xlane.f32.xlu1 %v988_v14 }
 0x3d2   :  { %v945_v15 = vpop.xlane.xlu0 %944 }
 0x3d3   :  { %8761 = vrcp.f32 %v945_v15  ;;  %v1002_v42 = vand.u32 2147483648, %v945_v15  ;;  %vm996_vm7 = vweird.f32 %v945_v15  ;;  %v1000_v17 = vand.u32 2147483647, %v945_v15 }
 0x3d5   :  { %v1003_v55 = vor.u32 1.1754944e-38, %v1002_v42  ;;  %vm1001_vm11 = vcmp.eq.f32.partialorder %v1000_v17, 8.507059e+37 }
 0x3d9   :  { %v8762_v44 = vpop.eup %8761 }
 0x3da   :  { %v992_v16 = vmul.f32 %v8762_v44, %v945_v15  ;;  %v948_v62 = vpop.xlane.xlu1 %947  ;;  %v876_v18 = vpop.xlane.xlu0 %875  ;;  %vm997_vm6 = vweird.f32 %v8762_v44 }
 0x3db   :  { %8763 = vrcp.f32 %v948_v62  ;;  %v904_v21 = vsub.f32 %v10194_v56, %v876_v18  ;;  %vm10270_vm8 = vmor %vm996_vm7, %vm997_vm6  ;;  %v1017_v50 = vand.u32 2147483648, %v948_v62  ;;  %v1015_v53 = vand.u32 2147483647, %v948_v62 }
 0x3dc   :  { %v993_v20 = vsub.f32 1.0, %v992_v16  ;;  %vm1011_vm10 = vweird.f32 %v948_v62 }
 0x3dd   :  { %v929_v22 = vmul.f32 1.442695, %v904_v21  ;;  %v1018_v57 = vor.u32 1.1754944e-38, %v1017_v50  ;;  %vm1016_vm13 = vcmp.eq.f32.partialorder %v1015_v53, 8.507059e+37 }
 0x3de   :  { %v994_v28 = vmul.f32 %v8762_v44, %v993_v20 }
 0x3df   :  { %8765 = vpow2.f32 %v929_v22 }
 0x3e0   :  { %v995_v9 = vadd.f32 %v8762_v44, %v994_v28 }
 0x3e1   :  { %v8764_v32 = vpop.eup %8763 }
 0x3e2   :  { %v1007_v37 = vmul.f32 %v8764_v32, %v948_v62  ;;  %v891_v38 = vpop.xlane.xlu1 %890  ;;  %v951_v40 = vpop.xlane.xlu0 %950  ;;  %vm1012_vm9 = vweird.f32 %v8764_v32  ;;  %v999_v54 = vsel %vm10270_vm8, %v8762_v44, %v995_v9 }
 0x3e3   :  { %v909_v39 = vsub.f32 %v10203_v63, %v891_v38  ;;  %8767 = vrcp.f32 %v951_v40  ;;  %vm1013_vm12 = vmor %vm1011_vm10, %vm1012_vm9  ;;  %v1004_v30 = vsel %vm1001_vm11, %v1003_v55, %v999_v54  ;;  %v1032_v16 = vand.u32 2147483648, %v951_v40 }
 0x3e4   :  { %v1008_v45 = vsub.f32 1.0, %v1007_v37  ;;  %v1005_v8 = vmul.f32 %v10189_v52, %v1004_v30  ;;  %v1030_v20 = vand.u32 2147483647, %v951_v40  ;;  %vm1026_vm15 = vweird.f32 %v951_v40 }
 0x3e5   :  { %v939_v46 = vmul.f32 1.442695, %v909_v39  ;;  %v10268_v47 = vpop.eup %8765  ;;  %v1033_v28 = vor.u32 1.1754944e-38, %v1032_v16 }
 0x3e6   :  { %v1009_v49 = vmul.f32 %v8764_v32, %v1008_v45  ;;  %v970_v63 = vsel %vm846_vm5, %v10268_v47, 0.0  ;;  %vm1031_vm2 = vcmp.eq.f32.partialorder %v1030_v20, 8.507059e+37 }
 0x3e7   :  { %8769 = vpow2.f32 %v939_v46  ;;  %971 = vadd.xlane.f32.xlu2 %v970_v63  ;;  %v1837_v46 = vsel %vm846_vm5, %v1005_v8, 0.0 }
 0x3e8   :  { %v1010_v58 = vadd.f32 %v8764_v32, %v1009_v49 }
 0x3e9   :  { %v8768_v59 = vpop.eup %8767 }
 0x3ea   :  { %v954_v29 = vpop.xlane.xlu1 %953  ;;  %v1014_v23 = vsel %vm1013_vm12, %v8764_v32, %v1010_v58  ;;  %v1022_v1 = vmul.f32 %v8768_v59, %v951_v40  ;;  %vm1027_vm14 = vweird.f32 %v8768_v59 }
 0x3eb   :  { %8771 = vrcp.f32 %v954_v29  ;;  %v1019_v33 = vsel %vm1016_vm13, %v1018_v57, %v1014_v23  ;;  %vm1028_vm1 = vmor %vm1026_vm15, %vm1027_vm14  ;;  %v1047_v32 = vand.u32 2147483648, %v954_v29  ;;  %v1045_v39 = vand.u32 2147483647, %v954_v29 }
 0x3ec   :  { %v1023_v3 = vsub.f32 1.0, %v1022_v1  ;;  %v1020_v10 = vmul.f32 %v10196_v60, %v1019_v33  ;;  %vm1041_vm4 = vweird.f32 %v954_v29 }
 0x3ed   :  { %v10278_v41 = vpop.eup %8769  ;;  %v1048_v40 = vor.u32 1.1754944e-38, %v1047_v32  ;;  %vm1046_vm7 = vcmp.eq.f32.partialorder %v1045_v39, 8.507059e+37 }
 0x3ee   :  { %v985_v14 = vsel %vm846_vm5, %v10278_v41, 0.0  ;;  %v1024_v15 = vmul.f32 %v8768_v59, %v1023_v3  ;;  %v1231_v44 = vpack.c.bf16 %v1020_v10, %v1005_v8  ;;  %v1852_v33 = vsel %vm846_vm5, %v1020_v10, 0.0 }
 0x3ef   :  { %986 = vadd.xlane.f32.xlu0 %v985_v14 }
 0x3f0   :  { %7393 = vmatmul.msk.bf16.vlgmr.msrb.gmra.mxu1 %vm846_vm5, %v1231_v44  ;;  %v1025_v18 = vadd.f32 %v8768_v59, %v1024_v15 }
 0x3f1   :  { %v8772_v62 = vpop.eup %8771 }
 0x3f2   :  { %v1037_v21 = vmul.f32 %v8772_v62, %v954_v29  ;;  %v10285_v22 = vpop.xlane.xlu1 %974  ;;  %v957_v52 = vpop.xlane.xlu2 %956  ;;  %v1029_v37 = vsel %vm1028_vm1, %v8768_v59, %v1025_v18  ;;  %vm1042_vm3 = vweird.f32 %v8772_v62 }
 0x3f3   :  { %8773 = vrcp.f32 %v10285_v22  ;;  %v1034_v9 = vsel %vm1031_vm2, %v1033_v28, %v1029_v37  ;;  %vm1043_vm6 = vmor %vm1041_vm4, %vm1042_vm3  ;;  %v1062_v23 = vand.u32 2147483648, %v957_v52  ;;  %v1060_v8 = vand.u32 2147483647, %v957_v52 }
 0x3f4   :  { %v1038_v60 = vsub.f32 1.0, %v1037_v21  ;;  %8775 = vrcp.f32 %v957_v52  ;;  %v1035_v42 = vmul.f32 %v10207_v4, %v1034_v9  ;;  %vm1056_vm9 = vweird.f32 %v957_v52 }
 0x3f5   :  { %v1063_v10 = vor.u32 1.1754944e-38, %v1062_v23  ;;  %vm1146_vm11 = vweird.f32 %v10285_v22  ;;  %vm1061_vm12 = vcmp.eq.f32.partialorder %v1060_v8, 8.507059e+37  ;;  %v1150_v32 = vand.u32 2147483647, %v10285_v22 }
 0x3f6   :  { %v1039_v38 = vmul.f32 %v8772_v62, %v1038_v60  ;;  %v1838_v56 = vsel %vm846_vm5, %v1035_v42, 0.0  ;;  %v1152_v37 = vand.u32 2147483648, %v10285_v22 }
 0x3f7   :  { %v1839_v63 = vadd.f32 %v1838_v56, %v1837_v46  ;;  %vm1151_vm2 = vcmp.eq.f32.partialorder %v1150_v32, 8.507059e+37 }
 0x3f8   :  { %v1040_v45 = vadd.f32 %v8772_v62, %v1039_v38 }
 0x3f9   :  { %v10289_v17 = vpop.eup %8773 }
 0x3fa   :  { %v8776_v49 = vpop.eup %8775  ;;  %v1142_v50 = vmul.f32 %v10289_v17, %v10285_v22  ;;  %v1044_v53 = vsel %vm1043_vm6, %v8772_v62, %v1040_v45  ;;  %v10295_v55 = vpop.xlane.xlu2 %977  ;;  %vm1147_vm13 = vweird.f32 %v10289_v17  ;;  %v1153_v22 = vor.u32 1.1754944e-38, %v1152_v37 }
 0x3fb   :  { %v1052_v54 = vmul.f32 %v8776_v49, %v957_v52  ;;  %v10297_v4 = vpop.xlane.xlu0 %959  ;;  %v1049_v58 = vsel %vm1046_vm7, %v1048_v40, %v1044_v53  ;;  %8777 = vrcp.f32 %v10295_v55  ;;  %vm1057_vm8 = vweird.f32 %v8776_v49  ;;  %vm10324_vm14 = vmor %vm1146_vm11, %vm1147_vm13 }
 0x3fc   :  { %v1143_v59 = vsub.f32 1.0, %v1142_v50  ;;  %8779 = vrcp.f32 %v10297_v4  ;;  %v1050_v29 = vmul.f32 %v10214_v7, %v1049_v58  ;;  %vm1058_vm10 = vmor %vm1056_vm9, %vm1057_vm8  ;;  %v1167_v45 = vand.u32 2147483648, %v10295_v55 }
 0x3fd   :  { %v1053_v57 = vsub.f32 1.0, %v1052_v54  ;;  %v1077_v40 = vand.u32 2147483648, %v10297_v4  ;;  %vm1071_vm3 = vweird.f32 %v10297_v4  ;;  %vm1161_vm4 = vweird.f32 %v10295_v55 }
 0x3fe   :  { %v1232_v1 = vpack.c.bf16 %v1050_v29, %v1035_v42  ;;  %v1853_v3 = vsel %vm846_vm5, %v1050_v29, 0.0  ;;  %v1144_v14 = vmul.f32 %v10289_v17, %v1143_v59  ;;  %v1165_v42 = vand.u32 2147483647, %v10295_v55 }
 0x3ff   :  { %v1054_v30 = vmul.f32 %v8776_v49, %v1053_v57  ;;  %v10305_v15 = vadd.f32 %v1853_v3, %v1852_v33  ;;  %v1168_v29 = vor.u32 1.1754944e-38, %v1167_v45 }
 0x400   :  { %7394 = vmatmul.msk.bf16.gmra.mxu1 %vm846_vm5, %v1232_v1  ;;  %v1145_v52 = vadd.f32 %v10289_v17, %v1144_v14  ;;  %vm1166_vm9 = vcmp.eq.f32.partialorder %v1165_v42, 8.507059e+37 }
 0x401   :  { %v1055_v44 = vadd.f32 %v8776_v49, %v1054_v30  ;;  %v8778_v16 = vpop.eup %8777 }
 0x402   :  { %v8780_v7 = vpop.eup %8779  ;;  %v1157_v62 = vmul.f32 %v8778_v16, %v10295_v55  ;;  %v10309_v18 = vpop.xlane.xlu2 %980  ;;  %vm1162_vm1 = vweird.f32 %v8778_v16  ;;  %v1149_v54 = vsel %vm10324_vm14, %v10289_v17, %v1145_v52 }
 0x403   :  { %v1059_v20 = vsel %vm1058_vm10, %v8776_v49, %v1055_v44  ;;  %v1067_v21 = vmul.f32 %v8780_v7, %v10297_v4  ;;  %8781 = vrcp.f32 %v10309_v18  ;;  %vm1072_vm15 = vweird.f32 %v8780_v7  ;;  %vm1163_vm7 = vmor %vm1161_vm4, %vm1162_vm1 }
 0x404   :  { %v1158_v60 = vsub.f32 1.0, %v1157_v62  ;;  %v1064_v28 = vsel %vm1061_vm12, %v1063_v10, %v1059_v20  ;;  %v1075_v49 = vand.u32 2147483647, %v10297_v4  ;;  %vm1073_vm6 = vmor %vm1071_vm3, %vm1072_vm15  ;;  %v1154_v23 = vsel %vm1151_vm2, %v1153_v22, %v1149_v54 }
 0x405   :  { %v1068_v38 = vsub.f32 1.0, %v1067_v21  ;;  %v1065_v9 = vmul.f32 %v10222_v11, %v1064_v28  ;;  %v10348_v8 = vmul.f32 %v10219_v25, %v1154_v23  ;;  %v1180_v32 = vand.u32 2147483647, %v10309_v18 }
 0x406   :  { %v1159_v39 = vmul.f32 %v8778_v16, %v1158_v60  ;;  %vm1076_vm8 = vcmp.eq.f32.partialorder %v1075_v49, 8.507059e+37  ;;  %vm1176_vm11 = vweird.f32 %v10309_v18 }
 0x407   :  { %v1069_v56 = vmul.f32 %v8780_v7, %v1068_v38  ;;  %v1840_v50 = vsel %vm846_vm5, %v1065_v9, 0.0  ;;  %vm10375_vm15 = vcmp.eq.f32.partialorder %v1180_v32, 8.507059e+37 }
 0x408   :  { %v1160_v11 = vadd.f32 %v8778_v16, %v1159_v39  ;;  %v10330_v53 = vadd.f32 %v1840_v50, %v1839_v63  ;;  %v1078_v63 = vor.u32 1.1754944e-38, %v1077_v40 }
 0x409   :  { %v10335_v58 = vpop.eup %8781  ;;  %v1070_v57 = vadd.f32 %v8780_v7, %v1069_v56 }
 0x40a   :  { %v963_v59 = vpop.xlane.xlu0 %962  ;;  %v1172_v4 = vmul.f32 %v10335_v58, %v10309_v18  ;;  %v1164_v55 = vsel %vm1163_vm7, %v8778_v16, %v1160_v11  ;;  %vm1177_vm3 = vweird.f32 %v10335_v58 }
 0x40b   :  { %v10339_v30 = vpop.xlane.xlu1 %965  ;;  %8783 = vrcp.f32 %v963_v59  ;;  %v1074_v17 = vsel %vm1073_vm6, %v8780_v7, %v1070_v57  ;;  %v1169_v3 = vsel %vm1166_vm9, %v1168_v29, %v1164_v55  ;;  %v1092_v28 = vand.u32 2147483648, %v963_v59  ;;  %vm10392_vm9 = vmor %vm1176_vm11, %vm1177_vm3 }
 0x40c   :  { %8785 = vrcp.f32 %v10339_v30  ;;  %v1079_v1 = vsel %vm1076_vm8, %v1078_v63, %v1074_v17  ;;  %v10351_v14 = vmul.f32 %v10229_v43, %v1169_v3  ;;  %v1173_v20 = vsub.f32 1.0, %v1172_v4 }
 0x40d   :  { %v1080_v33 = vmul.f32 %v10231_v19, %v1079_v1  ;;  %v1182_v43 = vand.u32 2147483648, %v10309_v18  ;;  %v1107_v39 = vand.u32 2147483648, %v10339_v30  ;;  %v1105_v45 = vand.u32 2147483647, %v10339_v30 }
 0x40e   :  { %v1236_v16 = vpack.c.bf16 %v10351_v14, %v10348_v8  ;;  %v1174_v37 = vmul.f32 %v10335_v58, %v1173_v20  ;;  %vm1101_vm13 = vweird.f32 %v10339_v30  ;;  %vm1086_vm14 = vweird.f32 %v963_v59 }
 0x40f   :  { %v1233_v44 = vpack.c.bf16 %v1080_v33, %v1065_v9  ;;  %v1855_v7 = vsel %vm846_vm5, %v1080_v33, 0.0  ;;  %v1090_v9 = vand.u32 2147483647, %v963_v59  ;;  %v1183_v46 = vor.u32 1.1754944e-38, %v1182_v43 }
 0x410   :  { %v10355_v10 = vadd.f32 %v1855_v7, %v10305_v15  ;;  %7398 = vmatmul.msk.bf16.vlgmr.msrb.gmra.mxu2 %vm846_vm5, %v1236_v16  ;;  %v1093_v49 = vor.u32 1.1754944e-38, %v1092_v28  ;;  %v1175_v22 = vadd.f32 %v10335_v58, %v1174_v37  ;;  %vm1106_vm6 = vcmp.eq.f32.partialorder %v1105_v45, 8.507059e+37 }
 0x411   :  { %v8784_v62 = vpop.eup %8783  ;;  %7395 = vmatmul.msk.bf16.gmra.mxu1 %vm846_vm5, %v1233_v44  ;;  %vm1091_vm2 = vcmp.eq.f32.partialorder %v1090_v9, 8.507059e+37 }
 0x412   :  { %v8786_v21 = vpop.eup %8785  ;;  %v1082_v19 = vmul.f32 %v8784_v62, %v963_v59  ;;  %v10360_v25 = vpop.xlane.xlu0 %983  ;;  %vm1087_vm10 = vweird.f32 %v8784_v62  ;;  %v1108_v59 = vor.u32 1.1754944e-38, %v1107_v39 }
 0x413   :  { %v1097_v52 = vmul.f32 %v8786_v21, %v10339_v30  ;;  %v10365_v60 = vpop.xlane.xlu1 %968  ;;  %8787 = vrcp.f32 %v10360_v25  ;;  %vm1102_vm12 = vweird.f32 %v8786_v21  ;;  %vm1088_vm1 = vmor %vm1086_vm14, %vm1087_vm10  ;;  %vm1191_vm7 = vweird.f32 %v10360_v25 }
 0x414   :  { %v1083_v15 = vsub.f32 1.0, %v1082_v19  ;;  %8789 = vrcp.f32 %v10365_v60  ;;  %vm1103_vm4 = vmor %vm1101_vm13, %vm1102_vm12  ;;  %vm1116_vm8 = vweird.f32 %v10365_v60  ;;  %v1122_v4 = vand.u32 2147483648, %v10365_v60 }
 0x415   :  { %v1098_v38 = vsub.f32 1.0, %v1097_v52  ;;  %v1197_v55 = vand.u32 2147483648, %v10360_v25  ;;  %v1120_v43 = vand.u32 2147483647, %v10365_v60 }
 0x416   :  { %v1084_v42 = vmul.f32 %v8784_v62, %v1083_v15 }
 0x417   :  { %v1099_v40 = vmul.f32 %v8786_v21, %v1098_v38  ;;  %v1198_v32 = vor.u32 1.1754944e-38, %v1197_v55 }
 0x418   :  { %v1085_v56 = vadd.f32 %v8784_v62, %v1084_v42 }
 0x419   :  { %v8788_v11 = vpop.eup %8787  ;;  %v1100_v54 = vadd.f32 %v8786_v21, %v1099_v40 }
 0x41a   :  { %v8790_v57 = vpop.eup %8789  ;;  %v1187_v29 = vmul.f32 %v8788_v11, %v10360_v25  ;;  %v1089_v63 = vsel %vm1088_vm1, %v8784_v62, %v1085_v56  ;;  %v1179_v62 = vsel %vm10392_vm9, %v10335_v58, %v1175_v22  ;;  %vm1192_vm10 = vweird.f32 %v8788_v11 }
 0x41b   :  { %v1112_v30 = vmul.f32 %v8790_v57, %v10365_v60  ;;  %v1094_v17 = vsel %vm1091_vm2, %v1093_v49, %v1089_v63  ;;  %v1104_v23 = vsel %vm1103_vm4, %v8786_v21, %v1100_v54  ;;  %v1195_v21 = vand.u32 2147483647, %v10360_v25  ;;  %vm1193_vm12 = vmor %vm1191_vm7, %vm1192_vm10  ;;  %v990_v50 = vpop.xlane.xlu1 %989 }
 0x41c   :  { %v1188_v1 = vsub.f32 1.0, %v1187_v29  ;;  %v1095_v44 = vmul.f32 %v10245_v61, %v1094_v17  ;;  %v1109_v7 = vsel %vm1106_vm6, %v1108_v59, %v1104_v23  ;;  %vm1117_vm11 = vweird.f32 %v8790_v57 }
 0x41d   :  { %v1113_v3 = vsub.f32 1.0, %v1112_v30  ;;  %v1110_v16 = vmul.f32 %v10247_v36, %v1109_v7  ;;  %v1184_v36 = vsel %vm10375_vm15, %v1183_v46, %v1179_v62  ;;  %vm1196_vm13 = vcmp.eq.f32.partialorder %v1195_v21, 8.507059e+37  ;;  %vm1118_vm14 = vmor %vm1116_vm8, %vm1117_vm11  ;;  %v8416_v62 = vld [vmem:[%s12556_s29 + $0x10] sm:$0xff] }
 0x41e   :  { %v1189_v20 = vmul.f32 %v8788_v11, %v1188_v1  ;;  %v1842_v18 = vsel %vm846_vm5, %v1095_v44, 0.0  ;;  %vm1121_vm1 = vcmp.eq.f32.partialorder %v1120_v43, 8.507059e+37  ;;  %v1846_v56 = vsel %vm846_vm5, %v10348_v8, 0.0 }
 0x41f   :  { %v1114_v19 = vmul.f32 %v8790_v57, %v1113_v3  ;;  %v1234_v52 = vpack.c.bf16 %v1110_v16, %v1095_v44  ;;  %v1843_v61 = vadd.f32 %v1842_v18, %v10330_v53  ;;  %v1857_v15 = vsel %vm846_vm5, %v1110_v16, 0.0 }
 0x420   :  { %v1190_v28 = vadd.f32 %v8788_v11, %v1189_v20  ;;  %v10407_v58 = vadd.f32 %v1857_v15, %v10355_v10  ;;  %v1123_v53 = vor.u32 1.1754944e-38, %v1122_v4  ;;  %v1185_v10 = vmul.f32 %v10239_v51, %v1184_v36 }
 0x421   :  { %v1115_v37 = vadd.f32 %v8790_v57, %v1114_v19  ;;  %7396 = vmatmul.msk.bf16.gmra.mxu1 %vm846_vm5, %v1234_v52  ;;  %8791 = vrcp.f32 %v990_v50  ;;  %v9691_v22 = vmov 8.0   ;;  %vm1221_vm3 = vweird.f32 %v990_v50 }
 0x422   :  { %v1194_v38 = vsel %vm1193_vm12, %v8788_v11, %v1190_v28  ;;  %v1848_v51 = vsel %vm846_vm5, %v1185_v10, 0.0  ;;  %8793 = vrcp.f32 %v9691_v22  ;;  %v1227_v3 = vand.u32 2147483648, %v990_v50 }
 0x423   :  { %v1199_v9 = vsel %vm1196_vm13, %v1198_v32, %v1194_v38  ;;  %v1119_v39 = vsel %vm1118_vm14, %v8790_v57, %v1115_v37  ;;  %v1225_v20 = vand.u32 2147483647, %v990_v50 }
 0x424   :  { %v10418_v42 = vmul.f32 %v10253_v2, %v1199_v9  ;;  %v1124_v25 = vsel %vm1121_vm1, %v1123_v53, %v1119_v39  ;;  %v1228_v15 = vor.u32 1.1754944e-38, %v1227_v3 }
 0x425   :  { %v10421_v45 = vmul.f32 %v10256_v0, %v1124_v25  ;;  %vm1226_vm9 = vcmp.eq.f32.partialorder %v1225_v20, 8.507059e+37 }
 0x426   :  { %v1237_v40 = vpack.c.bf16 %v10418_v42, %v1185_v10 }
 0x427   :  { %v1844_v46 = vsel %vm846_vm5, %v10421_v45, 0.0  ;;  %v8792_v0 = vpop.eup %8791 }
 0x428   :  { %7399 = vmatmul.msk.bf16.gmra.mxu2 %vm846_vm5, %v1237_v40  ;;  %v1845_v60 = vadd.f32 %v1844_v46, %v1843_v61  ;;  %v1217_v11 = vmul.f32 %v8792_v0, %v990_v50  ;;  %v8794_v29 = vpop.eup %8793  ;;  %vm1222_vm15 = vweird.f32 %v8792_v0  ;;  %v1861_v40 = vsel %vm846_vm5, %v10351_v14, 0.0 }
 0x429   :  { %v1868_v23 = vmul.f32 8.0, %v8794_v29  ;;  %vm10432_vm6 = vmor %vm1221_vm3, %vm1222_vm15  ;;  %vm1872_vm14 = vweird.f32 %v8794_v29 }
 0x42a   :  { %v1847_v49 = vadd.f32 %v1846_v56, %v1845_v60  ;;  %v1218_v57 = vsub.f32 1.0, %v1217_v11 }
 0x42b   :  { %v1869_v16 = vsub.f32 1.0, %v1868_v23 }
 0x42c   :  { %v10430_v2 = vadd.f32 %v1848_v51, %v1847_v49  ;;  %v1219_v30 = vmul.f32 %v8792_v0, %v1218_v57 }
 0x42d   :  { %v1870_v32 = vmul.f32 %v8794_v29, %v1869_v16  ;;  %v8415_v16 = vld [vmem:[%s12556_s29 + $0x8] sm:$0xff] }
 0x42e   :  { %v1220_v33 = vadd.f32 %v8792_v0, %v1219_v30 }
 0x42f   :  { %v1871_v60 = vadd.f32 %v8794_v29, %v1870_v32 }
 0x430   :  { %v1224_v43 = vsel %vm10432_vm6, %v8792_v0, %v1220_v33  ;;  %v8418_v33 = vld [vmem:[%s12556_s29 + $0x20] sm:$0xff] }
 0x431   :  { %v1229_v53 = vsel %vm1226_vm9, %v1228_v15, %v1224_v43  ;;  %v10450_v0 = vsel %vm1872_vm14, %v8794_v29, %v1871_v60  ;;  %v8421_v29 = vld [vmem:[%s12556_s29 + $0x38] sm:$0xff] }
 0x432   :  { %v1230_v46 = vmul.f32 %v10262_v24, %v1229_v53  ;;  %1411 = vmatpush.bf16.msra.mxu2 %v8421_v29 }
 0x434   :  { %v1865_v50 = vsel %vm846_vm5, %v1230_v46, 0.0 }
 0x45a   :  { %v972_v54 = vpop.xlane.xlu2 %971 }
 0x45b   :  { %8795 = vrcp.f32 %v972_v54  ;;  %v1137_v4 = vand.u32 2147483648, %v972_v54  ;;  %v1135_v55 = vand.u32 2147483647, %v972_v54  ;;  %vm1131_vm4 = vweird.f32 %v972_v54 }
 0x45d   :  { %v1138_v19 = vor.u32 1.1754944e-38, %v1137_v4  ;;  %vm1136_vm8 = vcmp.eq.f32.partialorder %v1135_v55, 8.507059e+37  ;;  %v8420_v4 = vld [vmem:[%s12556_s29 + $0x30] sm:$0xff] }
 0x45e   :  { %1412 = vmatpush.bf16.msra.mxu2 %v8420_v4 }
 0x461   :  { %v8796_v63 = vpop.eup %8795 }
 0x462   :  { %v987_v59 = vpop.xlane.xlu0 %986  ;;  %v1127_v17 = vmul.f32 %v8796_v63, %v972_v54  ;;  %vm1132_vm2 = vweird.f32 %v8796_v63 }
 0x463   :  { %8797 = vrcp.f32 %v987_v59  ;;  %vm1133_vm7 = vmor %vm1131_vm4, %vm1132_vm2  ;;  %v1212_v28 = vand.u32 2147483648, %v987_v59  ;;  %v1210_v38 = vand.u32 2147483647, %v987_v59  ;;  %vm1206_vm11 = vweird.f32 %v987_v59 }
 0x464   :  { %v1128_v8 = vsub.f32 1.0, %v1127_v17 }
 0x465   :  { %vm1211_vm13 = vcmp.eq.f32.partialorder %v1210_v38, 8.507059e+37 }
 0x466   :  { %v1129_v1 = vmul.f32 %v8796_v63, %v1128_v8 }
 0x468   :  { %v1130_v7 = vadd.f32 %v8796_v63, %v1129_v1  ;;  %v8419_v1 = vld [vmem:[%s12556_s29 + $0x28] sm:$0xff] }
 0x469   :  { %v8798_v44 = vpop.eup %8797  ;;  %1413 = vmatpush.bf16.msra.mxu2 %v8419_v1 }
 0x46a   :  { %v1202_v21 = vmul.f32 %v8798_v44, %v987_v59  ;;  %v1134_v18 = vsel %vm1133_vm7, %v8796_v63, %v1130_v7  ;;  %vm1207_vm10 = vweird.f32 %v8798_v44 }
 0x46b   :  { %v1139_v61 = vsel %vm1136_vm8, %v1138_v19, %v1134_v18  ;;  %vm1208_vm12 = vmor %vm1206_vm11, %vm1207_vm10  ;;  %v8414_v19 = vld [vmem:[%s12556_s29] sm:$0xff] }
 0x46c   :  { %v1203_v52 = vsub.f32 1.0, %v1202_v21  ;;  %v1140_v36 = vmul.f32 %v10268_v47, %v1139_v61  ;;  %v1213_v47 = vor.u32 1.1754944e-38, %v1212_v28 }
 0x46d   :  { %v1272_v59 = vpop.f32.mrf.mxu1  ;;  %1414 = vmatpush.bf16.msra.mxu2 %v8418_v33 }
 0x46e   :  { %v1204_v37 = vmul.f32 %v8798_v44, %v1203_v52  ;;  %v1235_v9 = vpack.c.bf16 %v1140_v36, %v10421_v45  ;;  %v1859_v39 = vsel %vm846_vm5, %v1140_v36, 0.0  ;;  %v1863_v45 = vsel %vm846_vm5, %v10418_v42, 0.0 }
 0x46f   :  { %v1860_v10 = vadd.f32 %v1859_v39, %v10407_v58  ;;  %v1312_v15 = vmul.f32 %v1272_v59, %v10070_v34 }
 0x470   :  { %v1205_v25 = vadd.f32 %v8798_v44, %v1204_v37  ;;  %7397 = vmatmul.msk.bf16.gmra.mxu1 %vm846_vm5, %v1235_v9 }
 0x471   :  { %v1862_v56 = vadd.f32 %v1861_v40, %v1860_v10 }
 0x472   :  { %v1209_v49 = vsel %vm1208_vm12, %v8798_v44, %v1205_v25  ;;  %v8417_v44 = vld [vmem:[%s12556_s29 + $0x18] sm:$0xff] }
 0x473   :  { %v1214_v58 = vsel %vm1211_vm13, %v1213_v47, %v1209_v49  ;;  %v1864_v51 = vadd.f32 %v1863_v45, %v1862_v56  ;;  %1415 = vmatpush.bf16.msra.mxu2 %v8417_v44 }
 0x474   :  { %v1215_v14 = vmul.f32 %v10278_v41, %v1214_v58 }
 0x475   :  { %v1866_v54 = vadd.f32 %v1865_v50, %v1864_v51 }
 0x476   :  { %v1238_v24 = vpack.c.bf16 %v1230_v46, %v1215_v14  ;;  %v1850_v11 = vsel %vm846_vm5, %v1215_v14, 0.0 }
 0x477   :  { %v1851_v22 = vadd.f32 %v1850_v11, %v10430_v2  ;;  %v1875_v42 = vmul.f32 %v10450_v0, %v1866_v54  ;;  %v1274_v2 = vpop.f32.mrf.mxu1  ;;  %1416 = vmatpush.bf16.msra.mxu2 %v8416_v62 }
 0x478   :  { %7400 = vmatmul.msk.bf16.gmra.mxu2 %vm846_vm5, %v1238_v24  ;;  %v1313_v28 = vmul.f32 %v1274_v2, %v10070_v34  ;;  %v8712_v2 = vld [vmem:[#allocation10] ss:$0 sm:$0xff] }
 0x479   :  { %v1874_v57 = vmul.f32 %v10450_v0, %v1851_v22  ;;  %v1877_v41 = vsel %vm846_vm5, %v1875_v42, 0.0 }
 0x47a   :  { %1879 = vst [vmem:[%s9873_s5 + $0x8] sm:$0xff] %v1877_v41 }
 0x47b   :  { %v1876_v63 = vsel %vm846_vm5, %v1874_v57, 0.0  ;;  %1417 = vmatpush.bf16.msra.mxu2 %v8415_v16 }
 0x47c   :  { %1878 = vst [vmem:[%s9873_s5] sm:$0xff] %v1876_v63  ;;  %s12557_s5 = sld [smem:[#allocation53_spill]] }
 0x47f   :  { %v1277_v30 = vpop.f32.mrf.mxu1  ;;  %1418 = vmatpush.bf16.msra.mxu2 %v8414_v19 }
 0x480   :  { %v1314_v43 = vmul.f32 %v1277_v30, %v10091_v5 }
 0x482   :  { %v1328_v37 = vadd.f32 %v1314_v43, %v1312_v15  ;;  %v8437_v15 = vld [vmem:[#allocation14 + $0x74] sm:$0xf0] }
 0x487   :  { %v1279_v17 = vpop.f32.mrf.mxu1 }
 0x488   :  { %v1315_v52 = vmul.f32 %v1279_v17, %v10091_v5 }
 0x48a   :  { %v1335_v38 = vadd.f32 %v1315_v52, %v1313_v28  ;;  %v8436_v28 = vld [vmem:[#allocation14 + $0x74] sm:$0xf] }
 0x48f   :  { %v1282_v8 = vpop.f32.mrf.mxu1 }
 0x490   :  { %v1316_v36 = vmul.f32 %v1282_v8, %v10105_v26 }
 0x492   :  { %v1329_v10 = vadd.f32 %v1328_v37, %v1316_v36 }
 0x493   :  { %v1297_v55 = vpop.f32.mrf.mxu2 }
 0x494   :  { %v1322_v58 = vmul.f32 %v1297_v55, %v10072_v35  ;;  %v9692_v55 = vmov 128.0  }
 0x495   :  { %8799 = vrcp.f32 %v9692_v55  ;;  %v8424_v55 = vld [vmem:[#allocation14 + $0x14] sm:$0xf] }
 0x497   :  { %v1284_v23 = vpop.f32.mrf.mxu1 }
 0x498   :  { %v1317_v32 = vmul.f32 %v1284_v23, %v10105_v26 }
 0x49a   :  { %v1336_v25 = vadd.f32 %v1335_v38, %v1317_v32  ;;  %v7493_v32 = vld [vmem:[#allocation14 + $0x78] sm:$0xf0]  ;;  %v7483_v38 = vld [vmem:[#allocation14 + $0x60] sm:$0xf] }
 0x49b   :  { %v1299_v7 = vpop.f32.mrf.mxu2  ;;  %v8800_v33 = vpop.eup %8799  ;;  %v7496_v37 = vor.u32 %v8436_v28, %v7493_v32 }
 0x49c   :  { %v1323_v14 = vmul.f32 %v1299_v7, %v10072_v35  ;;  %vm1438_vm1 = vweird.f32 %v8800_v33 }
 0x49d   :  { %1603 = vmatpush.bf16.msrb.mxu2 %v7496_v37  ;;  %v8444_v37 = vld [vmem:[#allocation16 + $0x30] sm:$0xff] }
 0x49f   :  { %v1287_v3 = vpop.f32.mrf.mxu1 }
 0x4a0   :  { %v1318_v53 = vmul.f32 %v1287_v3, %v10118_v48  ;;  %v1434_v3 = vmul.f32 128.0, %v8800_v33 }
 0x4a2   :  { %v1330_v46 = vadd.f32 %v1329_v10, %v1318_v53  ;;  %v1435_v44 = vsub.f32 1.0, %v1434_v3  ;;  %v8435_v53 = vld [vmem:[#allocation14 + $0x64] sm:$0xf0]  ;;  %v7485_v10 = vld [vmem:[#allocation14 + $0x68] sm:$0xf0] }
 0x4a4   :  { %v1436_v7 = vmul.f32 %v8800_v33, %v1435_v44 }
 0x4a6   :  { %v1437_v62 = vadd.f32 %v8800_v33, %v1436_v7 }
 0x4a7   :  { %v1289_v20 = vpop.f32.mrf.mxu1 }
 0x4a8   :  { %v1319_v9 = vmul.f32 %v1289_v20, %v10118_v48  ;;  %v10487_v20 = vsel %vm1438_vm1, %v8800_v33, %v1437_v62  ;;  %v7445_v33 = vld [vmem:[#allocation14 + $0x18] sm:$0xf0]  ;;  %v7435_v62 = vld [vmem:[#allocation14] sm:$0xf] }
 0x4a9   :  { %v7448_v7 = vor.u32 %v8424_v55, %v7445_v33 }
 0x4aa   :  { %v1337_v60 = vadd.f32 %v1336_v25, %v1319_v9  ;;  %v8434_v9 = vld [vmem:[#allocation14 + $0x64] sm:$0xf] }
 0x4ab   :  { %v1302_v21 = vpop.f32.mrf.mxu2  ;;  %v7488_v25 = vor.u32 %v8434_v9, %v7485_v10 }
 0x4ac   :  { %v1324_v24 = vmul.f32 %v1302_v21, %v10093_v6 }
 0x4ad   :  { %1604 = vmatpush.bf16.msrb.mxu2 %v7488_v25  ;;  %v8451_v25 = vld [vmem:[#allocation16 + $0x68] sm:$0xff] }
 0x4b3   :  { %v1304_v61 = vpop.f32.mrf.mxu2 }
 0x4b4   :  { %v1325_v11 = vmul.f32 %v1304_v61, %v10093_v6  ;;  %v7491_v61 = vld [vmem:[#allocation14 + $0x70] sm:$0xf] }
 0x4b5   :  { %v7492_v36 = vor.u32 %v8437_v15, %v7491_v61  ;;  %v8453_v15 = vld [vmem:[#allocation16 + $0x78] sm:$0xff] }
 0x4b7   :  { %1589 = vmatpush.bf16.msrb.mxu3 %v7492_v36 }
 0x4ed   :  { %v1292_v18 = vpop.f32.mrf.mxu1 }
 0x4ee   :  { %v1320_v40 = vmul.f32 %v1292_v18, %v10065_v31 }
 0x4f0   :  { %v1331_v49 = vadd.f32 %v1330_v46, %v1320_v40  ;;  %v7475_v40 = vld [vmem:[#allocation14 + $0x50] sm:$0xf]  ;;  %v8432_v46 = vld [vmem:[#allocation14 + $0x54] sm:$0xf] }
 0x4f2   :  { %v1332_v51 = vadd.f32 %v1331_v49, %v1322_v58  ;;  %v8431_v58 = vld [vmem:[#allocation14 + $0x44] sm:$0xf0] }
 0x4f4   :  { %v1333_v42 = vadd.f32 %v1332_v51, %v1324_v24 }
 0x4f5   :  { %v1294_v39 = vpop.f32.mrf.mxu1 }
 0x4f6   :  { %v1321_v47 = vmul.f32 %v1294_v39, %v10065_v31  ;;  %v7484_v39 = vor.u32 %v8435_v53, %v7483_v38  ;;  %v8452_v53 = vld [vmem:[#allocation16 + $0x70] sm:$0xff] }
 0x4f8   :  { %v1338_v45 = vadd.f32 %v1337_v60, %v1321_v47  ;;  %1590 = vmatpush.bf16.msrb.mxu3 %v7484_v39  ;;  %v8433_v47 = vld [vmem:[#allocation14 + $0x54] sm:$0xf0]  ;;  %v8443_v39 = vld [vmem:[#allocation16 + $0x28] sm:$0xff] }
 0x4f9   :  { %v7476_v60 = vor.u32 %v8433_v47, %v7475_v40 }
 0x4fa   :  { %v1339_v50 = vadd.f32 %v1338_v45, %v1323_v14  ;;  %v7467_v45 = vld [vmem:[#allocation14 + $0x40] sm:$0xf]  ;;  %v8430_v14 = vld [vmem:[#allocation14 + $0x44] sm:$0xf] }
 0x4fb   :  { %v1307_v56 = vpop.f32.mrf.mxu2  ;;  %v7468_v51 = vor.u32 %v8431_v58, %v7467_v45 }
 0x4fc   :  { %v1326_v54 = vmul.f32 %v1307_v56, %v10107_v27  ;;  %v1340_v41 = vadd.f32 %v1339_v50, %v1325_v11  ;;  %v7477_v56 = vld [vmem:[#allocation14 + $0x58] sm:$0xf0]  ;;  %1591 = vmatpush.bf16.msrb.mxu3 %v7476_v60  ;;  %v7469_v50 = vld [vmem:[#allocation14 + $0x48] sm:$0xf0]  ;;  %v7459_v11 = vld [vmem:[#allocation14 + $0x30] sm:$0xf] }
 0x4fd   :  { %v7480_v49 = vor.u32 %v8432_v46, %v7477_v56  ;;  %v7472_v24 = vor.u32 %v8430_v14, %v7469_v50  ;;  %v8442_v46 = vld [vmem:[#allocation16 + $0x20] sm:$0xff] }
 0x4fe   :  { %v1334_v63 = vadd.f32 %v1333_v42, %v1326_v54  ;;  %v8429_v54 = vld [vmem:[#allocation14 + $0x34] sm:$0xf0] }
 0x4ff   :  { %1605 = vmatpush.bf16.msrb.mxu2 %v7480_v49  ;;  %v7460_v42 = vor.u32 %v8429_v54, %v7459_v11  ;;  %v8450_v49 = vld [vmem:[#allocation16 + $0x60] sm:$0xff] }
 0x500   :  { %1592 = vmatpush.bf16.msrb.mxu3 %v7468_v51 }
 0x503   :  { %v1309_v22 = vpop.f32.mrf.mxu2  ;;  %1606 = vmatpush.bf16.msrb.mxu2 %v7472_v24  ;;  %v8713_v24 = vld [vmem:[#allocation11] ss:$0 sm:$0xff] }
 0x504   :  { %v1327_v57 = vmul.f32 %v1309_v22, %v10107_v27  ;;  %v8428_v22 = vld [vmem:[#allocation14 + $0x34] sm:$0xf]  ;;  %1593 = vmatpush.bf16.msrb.mxu3 %v7460_v42 }
 0x506   :  { %v1341_v29 = vadd.f32 %v1340_v41, %v1327_v57  ;;  %v7461_v57 = vld [vmem:[#allocation14 + $0x38] sm:$0xf0] }
 0x507   :  { %v7464_v41 = vor.u32 %v8428_v22, %v7461_v57  ;;  %v8714_v57 = vld [vmem:[#allocation13] ss:$0 sm:$0xff] }
 0x508   :  { %v1342_v59 = vpack.c.bf16 %v1341_v29, %v1334_v63  ;;  %v7451_v63 = vld [vmem:[#allocation14 + $0x20] sm:$0xf]  ;;  %v8427_v29 = vld [vmem:[#allocation14 + $0x24] sm:$0xf0] }
 0x509   :  { %1607 = vmatpush.bf16.msrb.mxu2 %v7464_v41 }
 0x50a   :  { %1419 = vmatmul.bf16.vlgmr.msra.gmra.mxu2 %v1342_v59  ;;  %v8426_v59 = vld [vmem:[#allocation14 + $0x24] sm:$0xf] }
 0x58d   :  { %v1420_v30 = vpop.f32.mrf.mxu2 }
 0x58e   :  { %v1421_v17 = vadd.f32 %v8712_v2, %v1420_v30  ;;  %v7452_v30 = vor.u32 %v8427_v29, %v7451_v63 }
 0x590   :  { %v1425_v8 = vadd.f32 %v1421_v17, %v10052_v12  ;;  %v7453_v17 = vld [vmem:[#allocation14 + $0x28] sm:$0xf0]  ;;  %1594 = vmatpush.bf16.msrb.mxu3 %v7452_v30  ;;  %v8449_v30 = vld [vmem:[#allocation16 + $0x58] sm:$0xff] }
 0x592   :  { %1429 = vadd.xlane.f32.xlu2 %v1425_v8 }
 0x595   :  { %v1422_v23 = vpop.f32.mrf.mxu2 }
 0x596   :  { %v1423_v4 = vadd.f32 %v8712_v2, %v1422_v23  ;;  %v8425_v23 = vld [vmem:[#allocation14 + $0x14] sm:$0xf0] }
 0x598   :  { %v1426_v1 = vadd.f32 %v1423_v4, %v10054_v13 }
 0x59a   :  { %1431 = vadd.xlane.f32.xlu0 %v1426_v1 }
 0x605   :  { %v1430_v16 = vpop.xlane.xlu2 %1429 }
 0x606   :  { %v1440_v21 = vmul.f32 %v10487_v20, %v1430_v16  ;;  %v8423_v16 = vld [vmem:[#allocation14 + $0x4] sm:$0xf0] }
 0x608   :  { %v10490_v12 = vsub.f32 %v1425_v8, %v1440_v21  ;;  %v7443_v8 = vld [vmem:[#allocation14 + $0x10] sm:$0xf]  ;;  %v8422_v21 = vld [vmem:[#allocation14 + $0x4] sm:$0xf] }
 0x609   :  { %v7444_v3 = vor.u32 %v8425_v23, %v7443_v8  ;;  %v8439_v8 = vld [vmem:[#allocation16 + $0x8] sm:$0xff] }
 0x60a   :  { %v1444_v19 = vmul.f32 %v10490_v12, %v10490_v12  ;;  %v8447_v23 = vld [vmem:[#allocation16 + $0x48] sm:$0xff] }
 0x60b   :  { %1595 = vmatpush.bf16.msrb.mxu3 %v7444_v3 }
 0x60c   :  { %1446 = vadd.xlane.f32.xlu1 %v1444_v19  ;;  %v7437_v19 = vld [vmem:[#allocation14 + $0x8] sm:$0xf0] }
 0x60d   :  { %v1432_v13 = vpop.xlane.xlu0 %1431 }
 0x60e   :  { %v1441_v18 = vmul.f32 %v10487_v20, %v1432_v13  ;;  %v7436_v13 = vor.u32 %v8423_v16, %v7435_v62 }
 0x610   :  { %v10495_v43 = vsub.f32 %v1426_v1, %v1441_v18  ;;  %v7456_v1 = vor.u32 %v8426_v59, %v7453_v17  ;;  %v7440_v18 = vor.u32 %v8422_v21, %v7437_v19  ;;  %1596 = vmatpush.bf16.msrb.mxu3 %v7436_v13  ;;  %v8448_v17 = vld [vmem:[#allocation16 + $0x50] sm:$0xff] }
 0x612   :  { %v1445_v52 = vmul.f32 %v10495_v43, %v10495_v43  ;;  %1608 = vmatpush.bf16.msrb.mxu2 %v7456_v1  ;;  %v1503_v1 = vld [vmem:[%s12557_s5] sm:$0x3] }
 0x613   :  { %v1505_v3 = vperm.slane %v1503_v1, 0 }
 0x614   :  { %1448 = vadd.xlane.f32.xlu2 %v1445_v52  ;;  %v8445_v52 = vld [vmem:[#allocation16 + $0x38] sm:$0xff] }
 0x615   :  { %1755 = vmatpush.bf16.msra.mxu3 %v8445_v52 }
 0x616   :  { %1609 = vmatpush.bf16.msrb.mxu2 %v7448_v7 }
 0x619   :  { %1756 = vmatpush.bf16.msra.mxu3 %v8444_v37 }
 0x61a   :  { %1610 = vmatpush.bf16.msrb.mxu2 %v7440_v18 }
 0x61d   :  { %1757 = vmatpush.bf16.msra.mxu3 %v8443_v39 }
 0x61e   :  { %1769 = vmatpush.bf16.msra.mxu2 %v8453_v15 }
 0x621   :  { %1758 = vmatpush.bf16.msra.mxu3 %v8442_v46 }
 0x622   :  { %1770 = vmatpush.bf16.msra.mxu2 %v8452_v53 }
 0x626   :  { %1771 = vmatpush.bf16.msra.mxu2 %v8451_v25 }
 0x62a   :  { %1772 = vmatpush.bf16.msra.mxu2 %v8450_v49 }
 0x62e   :  { %1773 = vmatpush.bf16.msra.mxu2 %v8449_v30 }
 0x632   :  { %1774 = vmatpush.bf16.msra.mxu2 %v8448_v17 }
 0x636   :  { %1775 = vmatpush.bf16.msra.mxu2 %v8447_v23 }
 0x67f   :  { %v1447_v2 = vpop.xlane.xlu1 %1446 }
 0x680   :  { %v1450_v4 = vmul.f32 %v1447_v2, %v10487_v20  ;;  %v8441_v2 = vld [vmem:[#allocation16 + $0x18] sm:$0xff] }
 0x681   :  { %1759 = vmatpush.bf16.msra.mxu3 %v8441_v2 }
 0x682   :  { %v1452_v44 = vadd.f32 1e-05, %v1450_v4  ;;  %v8446_v4 = vld [vmem:[#allocation16 + $0x40] sm:$0xff] }
 0x683   :  { %1776 = vmatpush.bf16.msra.mxu2 %v8446_v4 }
 0x684   :  { %8801 = vrsqrt.f32 %v1452_v44  ;;  %vm1460_vm2 = vweird.f32 %v1452_v44 }
 0x687   :  { %v1449_v61 = vpop.xlane.xlu2 %1448 }
 0x688   :  { %v1451_v28 = vmul.f32 %v1449_v61, %v10487_v20 }
 0x68a   :  { %v8802_v36 = vpop.eup %8801  ;;  %v1453_v32 = vadd.f32 1e-05, %v1451_v28 }
 0x68b   :  { %v1455_v38 = vmul.f32 %v8802_v36, %v1452_v44  ;;  %vm1461_vm15 = vweird.f32 %v8802_v36  ;;  %v1506_v44 = vperm.slane %v1503_v1, 1 }
 0x68c   :  { %8803 = vrsqrt.f32 %v1453_v32  ;;  %vm1462_vm3 = vmor %vm1460_vm2, %vm1461_vm15  ;;  %vm1470_vm6 = vweird.f32 %v1453_v32 }
 0x68d   :  { %v1456_v9 = vmul.f32 %v8802_v36, %v1455_v38 }
 0x68f   :  { %v1457_v10 = vmul.f32 0.5, %v1456_v9 }
 0x691   :  { %v1458_v40 = vsub.f32 1.5, %v1457_v10 }
 0x692   :  { %v8804_v47 = vpop.eup %8803 }
 0x693   :  { %v1459_v60 = vmul.f32 %v8802_v36, %v1458_v40  ;;  %v1465_v56 = vmul.f32 %v8804_v47, %v1453_v32  ;;  %vm1471_vm4 = vweird.f32 %v8804_v47  ;;  %v8715_v32 = vld [vmem:[#allocation17] ss:$0 sm:$0xff] }
 0x694   :  { %vm1472_vm7 = vmor %vm1470_vm6, %vm1471_vm4 }
 0x695   :  { %v1466_v45 = vmul.f32 %v8804_v47, %v1465_v56  ;;  %v1463_v58 = vsel %vm1462_vm3, %v8802_v36, %v1459_v60 }
 0x696   :  { %v1474_v50 = vmul.f32 %v1463_v58, %v10490_v12  ;;  %v8440_v12 = vld [vmem:[#allocation16 + $0x10] sm:$0xff] }
 0x697   :  { %v1467_v14 = vmul.f32 0.5, %v1466_v45  ;;  %1760 = vmatpush.bf16.msra.mxu3 %v8440_v12 }
 0x698   :  { %v1479_v42 = vmul.f32 %v8713_v24, %v1474_v50 }
 0x699   :  { %v1468_v51 = vsub.f32 1.5, %v1467_v14 }
 0x69a   :  { %v1484_v63 = vadd.f32 %v8714_v57, %v1479_v42 }
 0x69b   :  { %v1469_v11 = vmul.f32 %v8804_v47, %v1468_v51  ;;  %1761 = vmatpush.bf16.msra.mxu3 %v8439_v8 }
 0x69d   :  { %v1473_v54 = vsel %vm1472_vm7, %v8804_v47, %v1469_v11 }
 0x69e   :  { %v1475_v22 = vmul.f32 %v1473_v54, %v10495_v43  ;;  %v8438_v43 = vld [vmem:[#allocation16] sm:$0xff] }
 0x69f   :  { %1762 = vmatpush.bf16.msra.mxu3 %v8438_v43 }
 0x6a0   :  { %v1480_v41 = vmul.f32 %v8713_v24, %v1475_v22 }
 0x6a2   :  { %v1485_v29 = vadd.f32 %v8714_v57, %v1480_v41 }
 0x6a4   :  { %v1486_v59 = vpack.c.bf16 %v1485_v29, %v1484_v63 }
 0x6a6   :  { %1597 = vmatmul.bf16.vlgmr.msrb.gmra.mxu3 %v1486_v59  ;;  %1611 = vmatmul.bf16.vlgmr.msrb.gmra.mxu2 %v1486_v59 }
 0x729   :  { %v1598_v55 = vpop.f32.mrf.mxu3  ;;  %v1612_v33 = vpop.f32.mrf.mxu2 }
 0x72a   :  { %v1599_v7 = vadd.f32 %v1598_v55, %v1505_v3  ;;  %v1613_v62 = vadd.f32 %v1612_v33, %v1506_v44  ;;  %v8716_v55 = vld [vmem:[#allocation19] ss:$0 sm:$0xff] }
 0x72c   :  { %v1617_v18 = vmax.f32 %v1599_v7, 0.0  ;;  %v1618_v52 = vmax.f32 %v1613_v62, 0.0  ;;  %v8717_v62 = vld [vmem:[#allocation20] ss:$0 sm:$0xff] }
 0x731   :  { %v1600_v16 = vpop.f32.mrf.mxu3  ;;  %v1614_v21 = vpop.f32.mrf.mxu2 }
 0x732   :  { %v1601_v19 = vadd.f32 %v1600_v16, %v1505_v3  ;;  %v1615_v13 = vadd.f32 %v1614_v21, %v1506_v44 }
 0x734   :  { %v1619_v61 = vmax.f32 %v1601_v19, 0.0  ;;  %v1620_v15 = vmax.f32 %v1615_v13, 0.0  ;;  %v1880_v13 = vld [vmem:[#allocation7] sm:$0xff] }
 0x736   :  { %v1621_v28 = vpack.c.bf16 %v1619_v61, %v1617_v18  ;;  %v1622_v36 = vpack.c.bf16 %v1620_v15, %v1618_v52  ;;  %v8477_v18 = vld [vmem:[#allocation23 + $0x38] sm:$0xff]  ;;  %v7624_v52 = vld [vmem:[#allocation22 + $0x70] sm:$0xf] }
 0x737   :  { %v8469_v61 = vld [vmem:[#allocation22 + $0x74] sm:$0xf0] }
 0x738   :  { %1763 = vmatmul.bf16.vlgmr.msra.gmra.mxu3 %v1621_v28  ;;  %1777 = vmatmul.bf16.vlgmr.msra.gmra.mxu2 %v1622_v36  ;;  %v7625_v15 = vor.u32 %v8469_v61, %v7624_v52  ;;  %v8468_v28 = vld [vmem:[#allocation22 + $0x74] sm:$0xf]  ;;  %v7626_v36 = vld [vmem:[#allocation22 + $0x78] sm:$0xf0]  ;;  %v8455_v52 = vld [vmem:[#allocation22 + $0x4] sm:$0xf0] }
 0x73a   :  { %2064 = vmatpush.bf16.msrb.mxu0 %v7625_v15  ;;  %v8454_v15 = vld [vmem:[#allocation22 + $0x4] sm:$0xf] }
 0x7bb   :  { %v1764_v37 = vpop.f32.mrf.mxu3  ;;  %v1778_v38 = vpop.f32.mrf.mxu2 }
 0x7bc   :  { %v1765_v53 = vadd.f32 %v8715_v32, %v1764_v37  ;;  %v1881_v37 = vld [vmem:[#allocation7 + $0x8] sm:$0xf] }
 0x7be   :  { %v1779_v9 = vadd.f32 %v1778_v38, %v1765_v53  ;;  %v1913_v38 = vld [vmem:[%s12558_s11] sm:$0xff]  ;;  %v1914_v53 = vld [vmem:[%s12558_s11 + $0x8] sm:$0xff] }
 0x7c0   :  { %v1783_v39 = vadd.f32 %v1779_v9, %v1484_v63  ;;  %v1915_v9 = vld [vmem:[%s12558_s11 + $0x10] sm:$0xff] }
 0x7c2   :  { %1787 = vadd.xlane.f32.xlu1 %v1783_v39 }
 0x7c3   :  { %v1766_v10 = vpop.f32.mrf.mxu3  ;;  %v1780_v40 = vpop.f32.mrf.mxu2 }
 0x7c4   :  { %v1767_v25 = vadd.f32 %v8715_v32, %v1766_v10  ;;  %v7629_v32 = vor.u32 %v8468_v28, %v7626_v36  ;;  %v7616_v10 = vld [vmem:[#allocation22 + $0x60] sm:$0xf]  ;;  %v7570_v28 = vld [vmem:[#allocation22 + $0x8] sm:$0xf0] }
 0x7c5   :  { %v7573_v36 = vor.u32 %v8454_v15, %v7570_v28 }
 0x7c6   :  { %v1781_v47 = vadd.f32 %v1780_v40, %v1767_v25  ;;  %2082 = vmatpush.bf16.msrb.mxu2 %v7629_v32  ;;  %v8467_v25 = vld [vmem:[#allocation22 + $0x64] sm:$0xf0] }
 0x7c7   :  { %v7617_v40 = vor.u32 %v8467_v25, %v7616_v10 }
 0x7c8   :  { %v1784_v46 = vadd.f32 %v1781_v47, %v1485_v29  ;;  %v8466_v47 = vld [vmem:[#allocation22 + $0x64] sm:$0xf] }
 0x7c9   :  { %2065 = vmatpush.bf16.msrb.mxu0 %v7617_v40 }
 0x7ca   :  { %1789 = vadd.xlane.f32.xlu0 %v1784_v46 }
 0x835   :  { %v1788_v60 = vpop.xlane.xlu1 %1787 }
 0x836   :  { %v1791_v56 = vmul.f32 %v1788_v60, %v10487_v20  ;;  %v8475_v60 = vld [vmem:[#allocation23 + $0x28] sm:$0xff] }
 0x838   :  { %v1793_v49 = vsub.f32 %v1783_v39, %v1791_v56  ;;  %v8476_v39 = vld [vmem:[#allocation23 + $0x30] sm:$0xff] }
 0x83a   :  { %v1795_v45 = vmul.f32 %v1793_v49, %v1793_v49 }
 0x83c   :  { %1797 = vadd.xlane.f32.xlu0 %v1795_v45  ;;  %v8465_v45 = vld [vmem:[#allocation22 + $0x54] sm:$0xf0] }
 0x83d   :  { %v1790_v58 = vpop.xlane.xlu0 %1789 }
 0x83e   :  { %v1792_v14 = vmul.f32 %v1790_v58, %v10487_v20  ;;  %v8464_v58 = vld [vmem:[#allocation22 + $0x54] sm:$0xf] }
 0x840   :  { %v1794_v51 = vsub.f32 %v1784_v46, %v1792_v14  ;;  %v7618_v46 = vld [vmem:[#allocation22 + $0x68] sm:$0xf0] }
 0x841   :  { %v7621_v56 = vor.u32 %v8466_v47, %v7618_v46 }
 0x842   :  { %v1796_v50 = vmul.f32 %v1794_v51, %v1794_v51 }
 0x843   :  { %2083 = vmatpush.bf16.msrb.mxu2 %v7621_v56 }
 0x844   :  { %1799 = vadd.xlane.f32.xlu2 %v1796_v50 }
 0x8af   :  { %v1798_v24 = vpop.xlane.xlu0 %1797 }
 0x8b0   :  { %v1801_v11 = vmul.f32 %v1798_v24, %v10487_v20  ;;  %v8474_v24 = vld [vmem:[#allocation23 + $0x20] sm:$0xff] }
 0x8b2   :  { %v1803_v54 = vadd.f32 1e-05, %v1801_v11  ;;  %v7600_v11 = vld [vmem:[#allocation22 + $0x40] sm:$0xf] }
 0x8b4   :  { %8805 = vrsqrt.f32 %v1803_v54  ;;  %vm1811_vm9 = vweird.f32 %v1803_v54 }
 0x8b7   :  { %v1800_v22 = vpop.xlane.xlu2 %1799 }
 0x8b8   :  { %v1802_v42 = vmul.f32 %v1800_v22, %v10487_v20 }
 0x8ba   :  { %v8806_v57 = vpop.eup %8805  ;;  %v1804_v41 = vadd.f32 1e-05, %v1802_v42  ;;  %v8462_v42 = vld [vmem:[#allocation22 + $0x44] sm:$0xf] }
 0x8bb   :  { %v1806_v63 = vmul.f32 %v8806_v57, %v1803_v54  ;;  %vm1812_vm8 = vweird.f32 %v8806_v57  ;;  %v8463_v54 = vld [vmem:[#allocation22 + $0x44] sm:$0xf0] }
 0x8bc   :  { %8807 = vrsqrt.f32 %v1804_v41  ;;  %vm1813_vm10 = vmor %vm1811_vm9, %vm1812_vm8  ;;  %vm1821_vm12 = vweird.f32 %v1804_v41  ;;  %v7601_v22 = vor.u32 %v8463_v54, %v7600_v11 }
 0x8bd   :  { %v1807_v29 = vmul.f32 %v8806_v57, %v1806_v63 }
 0x8bf   :  { %v1808_v59 = vmul.f32 0.5, %v1807_v29  ;;  %v7592_v29 = vld [vmem:[#allocation22 + $0x30] sm:$0xf] }
 0x8c1   :  { %v1809_v2 = vsub.f32 1.5, %v1808_v59  ;;  %v8461_v59 = vld [vmem:[#allocation22 + $0x34] sm:$0xf0] }
 0x8c2   :  { %v8808_v30 = vpop.eup %8807 }
 0x8c3   :  { %v1816_v12 = vmul.f32 %v8808_v30, %v1804_v41  ;;  %v1810_v17 = vmul.f32 %v8806_v57, %v1809_v2  ;;  %vm1822_vm11 = vweird.f32 %v8808_v30  ;;  %v8473_v41 = vld [vmem:[#allocation23 + $0x18] sm:$0xff]  ;;  %v8460_v2 = vld [vmem:[#allocation22 + $0x34] sm:$0xf] }
 0x8c4   :  { %vm1823_vm13 = vmor %vm1821_vm12, %vm1822_vm11 }
 0x8c5   :  { %v1817_v8 = vmul.f32 %v8808_v30, %v1816_v12  ;;  %v1814_v4 = vsel %vm1813_vm10, %v8806_v57, %v1810_v17  ;;  %v7602_v57 = vld [vmem:[#allocation22 + $0x48] sm:$0xf0]  ;;  %v7594_v12 = vld [vmem:[#allocation22 + $0x38] sm:$0xf0] }
 0x8c6   :  { %v1825_v33 = vmul.f32 %v1814_v4, %v1793_v49  ;;  %v7608_v49 = vld [vmem:[#allocation22 + $0x50] sm:$0xf]  ;;  %v7605_v63 = vor.u32 %v8462_v42, %v7602_v57  ;;  %v7597_v17 = vor.u32 %v8460_v2, %v7594_v12 }
 0x8c7   :  { %v1818_v23 = vmul.f32 0.5, %v1817_v8  ;;  %v7609_v14 = vor.u32 %v8465_v45, %v7608_v49  ;;  %v8472_v8 = vld [vmem:[#allocation23 + $0x10] sm:$0xff] }
 0x8c8   :  { %v1830_v16 = vmul.f32 %v8716_v55, %v1825_v33  ;;  %v8471_v33 = vld [vmem:[#allocation23 + $0x8] sm:$0xff] }
 0x8c9   :  { %v1819_v43 = vsub.f32 1.5, %v1818_v23  ;;  %2066 = vmatpush.bf16.msrb.mxu0 %v7609_v14  ;;  %v7584_v23 = vld [vmem:[#allocation22 + $0x20] sm:$0xf] }
 0x8ca   :  { %v1835_v19 = vadd.f32 %v8717_v62, %v1830_v16 }
 0x8cb   :  { %v1820_v1 = vmul.f32 %v8808_v30, %v1819_v43  ;;  %v8459_v43 = vld [vmem:[#allocation22 + $0x24] sm:$0xf0] }
 0x8cc   :  { %v7585_v4 = vor.u32 %v8459_v43, %v7584_v23 }
 0x8cd   :  { %v1824_v3 = vsel %vm1823_vm13, %v8808_v30, %v1820_v1  ;;  %2067 = vmatpush.bf16.msrb.mxu0 %v7601_v22  ;;  %v7593_v30 = vor.u32 %v8461_v59, %v7592_v29  ;;  %v8458_v1 = vld [vmem:[#allocation22 + $0x24] sm:$0xf] }
 0x8ce   :  { %v1826_v44 = vmul.f32 %v1824_v3, %v1794_v51  ;;  %v7610_v51 = vld [vmem:[#allocation22 + $0x58] sm:$0xf0] }
 0x8cf   :  { %v7613_v50 = vor.u32 %v8464_v58, %v7610_v51  ;;  %v1978_v58 = vld [vmem:[%s12560_s8] sm:$0x3] }
 0x8d0   :  { %v1831_v7 = vmul.f32 %v8716_v55, %v1826_v44  ;;  %v7586_v55 = vld [vmem:[#allocation22 + $0x28] sm:$0xf0]  ;;  %v7576_v44 = vld [vmem:[#allocation22 + $0x10] sm:$0xf]  ;;  %v1980_v14 = vperm.slane %v1978_v58, 0 }
 0x8d1   :  { %2084 = vmatpush.bf16.msrb.mxu2 %v7613_v50  ;;  %2068 = vmatpush.bf16.msrb.mxu0 %v7593_v30  ;;  %v7589_v3 = vor.u32 %v8458_v1, %v7586_v55 }
 0x8d2   :  { %v1836_v21 = vadd.f32 %v8717_v62, %v1831_v7  ;;  %v8457_v7 = vld [vmem:[#allocation22 + $0x14] sm:$0xf0]  ;;  %v8456_v62 = vld [vmem:[#allocation22 + $0x14] sm:$0xf] }
 0x8d3   :  { %v7577_v16 = vor.u32 %v8457_v7, %v7576_v44 }
 0x8d4   :  { %1902 = vmatpush.msrb.mxu3 %v1836_v21 }
 0x8d5   :  { %2085 = vmatpush.bf16.msrb.mxu2 %v7605_v63  ;;  %2069 = vmatpush.bf16.msrb.mxu0 %v7585_v4 }
 0x8d6   :  { %1903 = vmatpush.msrb.mxu3 %v1835_v19 }
 0x8d7   :  { %7561 = vmatmul.msk.f32.vlgmr.msrb.gmra.mxu3 %vm846_vm5, %v1880_v13  ;;  %v8470_v13 = vld [vmem:[#allocation23] sm:$0xff] }
 0x8d8   :  { %1939 = vmatpush.msra.mxu3 %v1836_v21  ;;  %v7578_v21 = vld [vmem:[#allocation22 + $0x18] sm:$0xf0] }
 0x8d9   :  { %2086 = vmatpush.bf16.msrb.mxu2 %v7597_v17  ;;  %2070 = vmatpush.bf16.msrb.mxu0 %v7577_v16 }
 0x8da   :  { %1940 = vmatpush.msra.mxu3 %v1835_v19  ;;  %v7581_v19 = vor.u32 %v8456_v62, %v7578_v21 }
 0x8dc   :  { %2170 = vmatpush.bf16.msrb.mxu3 %v8477_v18  ;;  %v7568_v18 = vld [vmem:[#allocation22] sm:$0xf] }
 0x8dd   :  { %2087 = vmatpush.bf16.msrb.mxu2 %v7589_v3  ;;  %v7569_v61 = vor.u32 %v8455_v52, %v7568_v18 }
 0x8df   :  { %7562 = vmatmul.msk.f32.gmra.mxu3 %vm846_vm5, %v1881_v37  ;;  %2071 = vmatpush.bf16.msrb.mxu0 %v7569_v61 }
 0x8e0   :  { %2171 = vmatpush.bf16.msrb.mxu3 %v8476_v39 }
 0x8e1   :  { %2088 = vmatpush.bf16.msrb.mxu2 %v7581_v19  ;;  %v8718_v19 = vld [vmem:[%s12561_s24] ss:$0 sm:$0xff] }
 0x8e4   :  { %2172 = vmatpush.bf16.msrb.mxu3 %v8475_v60  ;;  %v1953_v60 = vld [vmem:[%s12559_s4 + $0x10] sm:$0xff] }
 0x8e5   :  { %2089 = vmatpush.bf16.msrb.mxu2 %v7573_v36 }
 0x8e7   :  { %7563 = vmatmul.msk.f32.vlgmr.msra.gmra.mxu3 %vm846_vm5, %v1913_v38 }
 0x8e8   :  { %2173 = vmatpush.bf16.msrb.mxu3 %v8474_v24 }
 0x8ec   :  { %2174 = vmatpush.bf16.msrb.mxu3 %v8473_v41 }
 0x8ef   :  { %7564 = vmatmul.msk.f32.gmra.mxu3 %vm846_vm5, %v1914_v53  ;;  %v1951_v53 = vld [vmem:[%s12559_s4] sm:$0xff] }
 0x8f0   :  { %2175 = vmatpush.bf16.msrb.mxu3 %v8472_v8 }
 0x8f4   :  { %2176 = vmatpush.bf16.msrb.mxu3 %v8471_v33 }
 0x8f7   :  { %7565 = vmatmul.msk.f32.gmra.mxu3 %vm846_vm5, %v1915_v9  ;;  %v1952_v9 = vld [vmem:[%s12559_s4 + $0x8] sm:$0xff]  ;;  %vm2405_vm5 = vcmask 195584  }
 0x8f8   :  { %2177 = vmatpush.bf16.msrb.mxu3 %v8470_v13  ;;  %v1981_v13 = vperm.slane %v1978_v58, 1 }
 0x95a   :  { %v1905_v32 = vpop.f32.mrf.mxu3 }
 0x95b   :  { %1911 = vst [vmem:[#allocation32] sm:$0xff] %v1905_v32 }
 0x962   :  { %v1908_v37 = vpop.f32.mrf.mxu3 }
 0x963   :  { %1912 = vst [vmem:[#allocation32 + $0x8] sm:$0xf] %v1908_v37 }
 0x96a   :  { %v10516_v38 = vpop.f32.mrf.mxu3 }
 0x96b   :  { %v1957_v10 = vadd.f32 %v1951_v53, %v10516_v38 }
 0x972   :  { %v10520_v39 = vpop.f32.mrf.mxu3 }
 0x973   :  { %v1958_v25 = vadd.f32 %v1952_v9, %v10520_v39  ;;  %v2100_v40 = vpack.c.bf16 %v10520_v39, %v10516_v38 }
 0x975   :  { %2178 = vmatmul.bf16.vlgmr.msrb.gmra.mxu3 %v2100_v40  ;;  %v1960_v47 = vpack.c.bf16 %v1958_v25, %v1957_v10 }
 0x977   :  { %2072 = vmatmul.bf16.vlgmr.msrb.gmra.mxu0 %v1960_v47  ;;  %2090 = vmatmul.bf16.vlgmr.msrb.gmra.mxu2 %v1960_v47 }
 0x97a   :  { %v10526_v46 = vpop.f32.mrf.mxu3 }
 0x97b   :  { %v1959_v56 = vadd.f32 %v1953_v60, %v10526_v46  ;;  %v2101_v49 = vpack.c.bf16 %v10526_v46, %v10526_v46 }
 0x97d   :  { %v1961_v45 = vpack.c.bf16 %v1959_v56, %v1959_v56 }
 0x985   :  { %2183 = vmatmul.bf16.gmra.mxu3 %v2101_v49 }
 0x987   :  { %2077 = vmatmul.bf16.gmra.mxu0 %v1961_v45  ;;  %2095 = vmatmul.bf16.gmra.mxu2 %v1961_v45 }
 0x9f4   :  { %v2073_v51 = vpop.f32.mrf.mxu0 }
 0x9f5   :  { %v10533_v50 = vadd.f32 %v2073_v51, %v1980_v14 }
 0x9f7   :  { %v2200_v22 = vmul.f32 %v10533_v50, %v10065_v31  ;;  %v2206_v57 = vmul.f32 %v10533_v50, %v10093_v6  ;;  %v2203_v2 = vmul.f32 %v10533_v50, %v10072_v35  ;;  %v2209_v7 = vmul.f32 %v10533_v50, %v10107_v27 }
 0x9f8   :  { %v2179_v24 = vpop.f32.mrf.mxu3 }
 0x9f9   :  { %v2224_v29 = vpack.c.bf16 %v2200_v22, %v2200_v22  ;;  %v2230_v8 = vpack.c.bf16 %v2206_v57, %v2206_v57  ;;  %v2227_v3 = vpack.c.bf16 %v2203_v2, %v2203_v2  ;;  %v2233_v10 = vpack.c.bf16 %v2209_v7, %v2209_v7 }
 0x9fa   :  { %v10535_v11 = vpop.f32.mrf.mxu2 }
 0x9fb   :  { %v10553_v1 = vunpack.c.l.b16 %v2224_v29  ;;  %v10565_v21 = vunpack.c.l.b16 %v2230_v8  ;;  %v10578_v9 = vunpack.c.l.b16 %v2227_v3 }
 0x9fc   :  { %v2075_v54 = vpop.f32.mrf.mxu0 }
 0x9fd   :  { %v10539_v42 = vadd.f32 %v2075_v54, %v1980_v14 }
 0x9ff   :  { %v2201_v63 = vmul.f32 %v10539_v42, %v10065_v31  ;;  %v2207_v59 = vmul.f32 %v10539_v42, %v10093_v6  ;;  %v2198_v12 = vmul.f32 %v10539_v42, %v10118_v48  ;;  %v2204_v43 = vmul.f32 %v10539_v42, %v10072_v35 }
 0xa00   :  { %v2181_v41 = vpop.f32.mrf.mxu3  ;;  %v2189_v7 = vmul.f32 %v10539_v42, %v10070_v34 }
 0xa01   :  { %v2225_v17 = vpack.c.bf16 %v2201_v63, %v2201_v63  ;;  %v2231_v23 = vpack.c.bf16 %v2207_v59, %v2207_v59  ;;  %v2222_v62 = vpack.c.bf16 %v2198_v12, %v2198_v12  ;;  %v2228_v52 = vpack.c.bf16 %v2204_v43, %v2204_v43 }
 0xa02   :  { %v2093_v30 = vpop.f32.mrf.mxu2  ;;  %v2182_v37 = vadd.f32 %v8718_v19, %v2181_v41  ;;  %v2180_v59 = vadd.f32 %v8718_v19, %v2179_v24 }
 0xa03   :  { %v10555_v55 = vunpack.c.l.b16 %v2225_v17  ;;  %v10559_v44 = vunpack.c.l.b16 %v2231_v23  ;;  %v10580_v47 = vunpack.c.l.b16 %v2222_v62  ;;  %v10588_v57 = vunpack.c.l.b16 %v2228_v52 }
 0xa04   :  { %v2078_v4 = vpop.f32.mrf.mxu0  ;;  %v10601_v23 = vunpack.c.l.b16 %v2233_v10  ;;  %v2238_v24 = vpack.c.bf16 %v2182_v37, %v2180_v59  ;;  %v2094_v62 = vadd.f32 %v2093_v30, %v1981_v13  ;;  %v2213_v37 = vpack.c.bf16 %v2189_v7, %v2189_v7 }
 0xa05   :  { %v10557_v33 = vadd.f32 %v2078_v4, %v1980_v14  ;;  %v2294_v16 = vpack.c.b16 %v10555_v55, %v10553_v1  ;;  %v2297_v36 = vpack.c.b16 %v10559_v44, %v10565_v21  ;;  %v2210_v14 = vmul.f32 %v10539_v42, %v10107_v27 }
 0xa06   :  { %v2265_v10 = vunpack.c.l.b16 %v2213_v37  ;;  %v2195_v59 = vmul.f32 %v10539_v42, %v10105_v26 }
 0xa07   :  { %v2199_v18 = vmul.f32 %v10557_v33, %v10118_v48  ;;  %v2202_v15 = vmul.f32 %v10557_v33, %v10065_v31  ;;  %v2205_v28 = vmul.f32 %v10557_v33, %v10072_v35  ;;  %v2208_v32 = vmul.f32 %v10557_v33, %v10093_v6 }
 0xa08   :  { %v2184_v61 = vpop.f32.mrf.mxu3  ;;  %v2211_v43 = vmul.f32 %v10557_v33, %v10107_v27  ;;  %v2234_v4 = vpack.c.bf16 %v2210_v14, %v2210_v14  ;;  %v2192_v14 = vmul.f32 %v10539_v42, %v10091_v5 }
 0xa09   :  { %v2185_v53 = vadd.f32 %v8718_v19, %v2184_v61  ;;  %v2223_v40 = vpack.c.bf16 %v2199_v18, %v2199_v18  ;;  %v2226_v60 = vpack.c.bf16 %v2202_v15, %v2202_v15  ;;  %v2229_v56 = vpack.c.bf16 %v2205_v28, %v2205_v28 }
 0xa0a   :  { %v2096_v25 = vpop.f32.mrf.mxu2  ;;  %v2232_v58 = vpack.c.bf16 %v2208_v32, %v2208_v32  ;;  %v2235_v18 = vpack.c.bf16 %v2211_v43, %v2211_v43  ;;  %v2188_v61 = vmul.f32 %v10533_v50, %v10070_v34  ;;  %v2092_v15 = vadd.f32 %v10535_v11, %v1981_v13 }
 0xa0b   :  { %v2239_v49 = vpack.c.bf16 %v2185_v53, %v2185_v53  ;;  %v2097_v45 = vadd.f32 %v2096_v25, %v1981_v13  ;;  %v10584_v54 = vunpack.c.l.b16 %v2223_v40  ;;  %v10586_v22 = vunpack.c.l.b16 %v2226_v60 }
 0xa0c   :  { %v2080_v51 = vpop.f32.mrf.mxu0  ;;  %v10590_v41 = vunpack.c.l.b16 %v2229_v56  ;;  %v10599_v8 = vunpack.c.l.b16 %v2232_v58  ;;  %v10612_v28 = vunpack.c.l.b16 %v2234_v4  ;;  %v10614_v32 = vunpack.c.l.b16 %v2235_v18 }
 0xa0d   :  { %v3031_v63 = vsel %vm423_vm0, %v2239_v49, 0  ;;  %v2237_v29 = vpack.c.bf16 %v2097_v45, %v2097_v45  ;;  %v2293_v2 = vpack.c.b16 %v10584_v54, %v10580_v47  ;;  %v2295_v12 = vpack.c.b16 %v10578_v9, %v10586_v22 }
 0xa0e   :  { %3039 = vmatpush.bf16.msra.mxu0 %v3031_v63  ;;  %v2296_v17 = vpack.c.b16 %v10590_v41, %v10588_v57  ;;  %v2298_v19 = vpack.c.b16 %v10601_v23, %v10599_v8  ;;  %v2236_v53 = vpack.c.bf16 %v2094_v62, %v2092_v15  ;;  %v2299_v30 = vpack.c.b16 %v10614_v32, %v10612_v28 }
 0xa0f   :  { %2318 = vmatpush.bf16.xpose.msra.mxu1 %v2237_v29  ;;  %v2212_v9 = vpack.c.bf16 %v2188_v61, %v2188_v61  ;;  %v2190_v47 = vmul.f32 %v10557_v33, %v10070_v34  ;;  %v2191_v11 = vmul.f32 %v10533_v50, %v10091_v5  ;;  %v2193_v58 = vmul.f32 %v10557_v33, %v10091_v5 }
 0xa10   :  { %v2186_v3 = vpop.f32.mrf.mxu3  ;;  %v2216_v54 = vpack.c.bf16 %v2192_v14, %v2192_v14  ;;  %v2194_v43 = vmul.f32 %v10533_v50, %v10105_v26  ;;  %v2219_v4 = vpack.c.bf16 %v2195_v59, %v2195_v59  ;;  %v2196_v18 = vmul.f32 %v10557_v33, %v10105_v26 }
 0xa11   :  { %v2264_v25 = vunpack.c.l.b16 %v2212_v9  ;;  %v2214_v13 = vpack.c.bf16 %v2190_v47, %v2190_v47  ;;  %v2215_v60 = vpack.c.bf16 %v2191_v11, %v2191_v11  ;;  %v2217_v51 = vpack.c.bf16 %v2193_v58, %v2193_v58  ;;  %v10638_v9 = vld [vmem:[%s12562_s15] sm:$0xff] }
 0xa12   :  { %v2098_v52 = vpop.f32.mrf.mxu2  ;;  %3040 = vmatpush.bf16.msra.mxu0 %v2238_v24  ;;  %v2268_v63 = vunpack.c.l.b16 %v2216_v54  ;;  %v2218_v24 = vpack.c.bf16 %v2194_v43, %v2194_v43  ;;  %v2271_v3 = vunpack.c.l.b16 %v2219_v4  ;;  %v2220_v61 = vpack.c.bf16 %v2196_v18, %v2196_v18 }
 0xa13   :  { %v2288_v40 = vpack.c.b16 %v2265_v10, %v2264_v25  ;;  %v2266_v56 = vunpack.c.l.b16 %v2214_v13  ;;  %v2267_v49 = vunpack.c.l.b16 %v2215_v60  ;;  %v2269_v22 = vunpack.c.l.b16 %v2217_v51  ;;  %v10646_v25 = vld [vmem:[%s12562_s15 + $0x8] sm:$0xff] }
 0xa14   :  { %v2270_v7 = vunpack.c.l.b16 %v2218_v24  ;;  %v2197_v52 = vmul.f32 %v10533_v50, %v10118_v48  ;;  %v2272_v42 = vunpack.c.l.b16 %v2220_v61 }
 0xa15   :  { %v2289_v45 = vpack.c.b16 %v2267_v49, %v2266_v56  ;;  %v2290_v29 = vpack.c.b16 %v2269_v22, %v2268_v63 }
 0xa16   :  { %v2291_v62 = vpack.c.b16 %v2271_v3, %v2270_v7  ;;  %v2221_v15 = vpack.c.bf16 %v2197_v52, %v2197_v52 }
 0xa17   :  { %2319 = vmatpush.bf16.xpose.msra.mxu1 %v2236_v53 }
 0xa18   :  { %v2273_v37 = vunpack.c.l.b16 %v2221_v15 }
 0xa1a   :  { %v2292_v53 = vpack.c.b16 %v2273_v37, %v2272_v42 }
 0xa1e   :  { %2320 = vmatmul.bf16.vlgmr.msra.gmra.mxu1 %v2288_v40 }
 0xa2e   :  { %2325 = vmatmul.bf16.gmra.mxu1 %v2289_v45 }
 0xa3e   :  { %2330 = vmatmul.bf16.gmra.mxu1 %v2290_v29 }
 0xa4e   :  { %2335 = vmatmul.bf16.gmra.mxu1 %v2291_v62 }
 0xa5e   :  { %2340 = vmatmul.bf16.gmra.mxu1 %v2292_v53 }
 0xa6e   :  { %2345 = vmatmul.bf16.gmra.mxu1 %v2293_v2 }
 0xa7e   :  { %2350 = vmatmul.bf16.gmra.mxu1 %v2294_v16  ;;  %v10651_v16 = vld [vmem:[%s12562_s15 + $0x10] sm:$0xff] }
 0xa8e   :  { %2355 = vmatmul.bf16.gmra.mxu1 %v2295_v12 }
 0xa9b   :  { %v2321_v33 = vpop.f32.mrf.mxu1 }
 0xa9c   :  { %v2381_v50 = vadd.f32 %v2321_v33, %v10638_v9 }
 0xa9e   :  { %2360 = vmatmul.bf16.gmra.mxu1 %v2296_v17  ;;  %v2406_v10 = vsel %vm2405_vm5, %v2381_v50, -inf }
 0xa9f   :  { %2407 = vmax.xlane.f32.xlu1 %v2406_v10 }
 0xaa3   :  { %v2323_v2 = vpop.f32.mrf.mxu1 }
 0xaa4   :  { %v2382_v1 = vadd.f32 %v2323_v2, %v10646_v25 }
 0xaa6   :  { %v2409_v55 = vsel %vm2405_vm5, %v2382_v1, -inf }
 0xaa7   :  { %2410 = vmax.xlane.f32.xlu2 %v2409_v55 }
 0xaab   :  { %v2326_v12 = vpop.f32.mrf.mxu1 }
 0xaac   :  { %v2383_v40 = vadd.f32 %v2326_v12, %v10651_v16 }
 0xaae   :  { %2365 = vmatmul.bf16.gmra.mxu1 %v2297_v36  ;;  %v2412_v57 = vsel %vm2405_vm5, %v2383_v40, -inf }
 0xaaf   :  { %2413 = vmax.xlane.f32.xlu0 %v2412_v57 }
 0xab3   :  { %v2328_v41 = vpop.f32.mrf.mxu1 }
 0xab4   :  { %v2384_v17 = vadd.f32 %v2328_v41, %v10638_v9 }
 0xab6   :  { %v2415_v47 = vsel %vm2405_vm5, %v2384_v17, -inf }
 0xab7   :  { %2416 = vmax.xlane.f32.xlu1 %v2415_v47 }
 0xabb   :  { %v2331_v11 = vpop.f32.mrf.mxu1 }
 0xabc   :  { %v2385_v13 = vadd.f32 %v2331_v11, %v10646_v25 }
 0xabe   :  { %2370 = vmatmul.bf16.gmra.mxu1 %v2298_v19  ;;  %v2418_v60 = vsel %vm2405_vm5, %v2385_v13, -inf }
 0xabf   :  { %2419 = vmax.xlane.f32.xlu2 %v2418_v60 }
 0xac3   :  { %v2333_v44 = vpop.f32.mrf.mxu1 }
 0xac4   :  { %v10666_v21 = vadd.f32 %v2333_v44, %v10651_v16 }
 0xac6   :  { %v2421_v36 = vsel %vm2405_vm5, %v10666_v21, -inf }
 0xac7   :  { %2422 = vmax.xlane.f32.xlu0 %v2421_v36 }
 0xacb   :  { %v2336_v56 = vpop.f32.mrf.mxu1 }
 0xacc   :  { %v10671_v49 = vadd.f32 %v2336_v56, %v10638_v9 }
 0xace   :  { %2375 = vmatmul.bf16.gmra.mxu1 %v2299_v30  ;;  %v2424_v8 = vsel %vm2405_vm5, %v10671_v49, -inf }
 0xacf   :  { %2425 = vmax.xlane.f32.xlu1 %v2424_v8 }
 0xad3   :  { %v2338_v23 = vpop.f32.mrf.mxu1 }
 0xad4   :  { %v10679_v19 = vadd.f32 %v2338_v23, %v10646_v25 }
 0xad6   :  { %v2427_v45 = vsel %vm2405_vm5, %v10679_v19, -inf }
 0xad7   :  { %2428 = vmax.xlane.f32.xlu2 %v2427_v45 }
 0xadb   :  { %v2341_v58 = vpop.f32.mrf.mxu1 }
 0xadc   :  { %v10684_v14 = vadd.f32 %v2341_v58, %v10651_v16 }
 0xade   :  { %v2430_v28 = vsel %vm2405_vm5, %v10684_v14, -inf }
 0xadf   :  { %2431 = vmax.xlane.f32.xlu2 %v2430_v28 }
 0xae3   :  { %v2343_v32 = vpop.f32.mrf.mxu1 }
 0xae4   :  { %v10693_v3 = vadd.f32 %v2343_v32, %v10638_v9 }
 0xae6   :  { %v2433_v15 = vsel %vm2405_vm5, %v10693_v3, -inf }
 0xaeb   :  { %v2346_v22 = vpop.f32.mrf.mxu1 }
 0xaec   :  { %v10702_v42 = vadd.f32 %v2346_v22, %v10646_v25 }
 0xaf3   :  { %v2348_v24 = vpop.f32.mrf.mxu1 }
 0xaf4   :  { %v10711_v55 = vadd.f32 %v2348_v24, %v10651_v16 }
 0xaf6   :  { %v2439_v11 = vsel %vm2405_vm5, %v10711_v55, -inf }
 0xafb   :  { %v2351_v53 = vpop.f32.mrf.mxu1 }
 0xafc   :  { %v10720_v60 = vadd.f32 %v2351_v53, %v10638_v9 }
 0xafe   :  { %v2442_v23 = vsel %vm2405_vm5, %v10720_v60, -inf }
 0xb03   :  { %v2353_v41 = vpop.f32.mrf.mxu1 }
 0xb04   :  { %v10730_v58 = vadd.f32 %v2353_v41, %v10646_v25 }
 0xb0b   :  { %v2356_v45 = vpop.f32.mrf.mxu1 }
 0xb12   :  { %v2408_v30 = vpop.xlane.xlu1 %2407 }
 0xb13   :  { %v2478_v51 = vsub.f32 %v2381_v50, %v2408_v30  ;;  %v2358_v22 = vpop.f32.mrf.mxu1 }
 0xb15   :  { %v2502_v54 = vmul.f32 1.442695, %v2478_v51 }
 0xb17   :  { %8809 = vpow2.f32 %v2502_v54  ;;  %v2445_v54 = vsel %vm2405_vm5, %v10730_v58, -inf }
 0xb1a   :  { %v2411_v63 = vpop.xlane.xlu2 %2410 }
 0xb1b   :  { %v2479_v29 = vsub.f32 %v2382_v1, %v2411_v63  ;;  %v2436_v1 = vsel %vm2405_vm5, %v10702_v42, -inf  ;;  %v10740_v63 = vadd.f32 %v2356_v45, %v10651_v16 }
 0xb1d   :  { %v10688_v59 = vpop.eup %8809  ;;  %v2504_v43 = vmul.f32 1.442695, %v2479_v29 }
 0xb1e   :  { %v2550_v4 = vsel %vm2405_vm5, %v10688_v59, 0.0 }
 0xb1f   :  { %8811 = vpow2.f32 %v2504_v43  ;;  %2551 = vadd.xlane.f32.xlu0 %v2550_v4 }
 0xb22   :  { %v2414_v7 = vpop.xlane.xlu0 %2413 }
 0xb23   :  { %v2480_v62 = vsub.f32 %v2383_v40, %v2414_v7  ;;  %v2448_v7 = vsel %vm2405_vm5, %v10740_v63, -inf }
 0xb25   :  { %v10695_v18 = vpop.eup %8811  ;;  %v2506_v52 = vmul.f32 1.442695, %v2480_v62  ;;  %v10750_v62 = vadd.f32 %v2358_v22, %v10638_v9 }
 0xb26   :  { %v2553_v61 = vsel %vm2405_vm5, %v10695_v18, 0.0 }
 0xb27   :  { %8813 = vpow2.f32 %v2506_v52  ;;  %2554 = vadd.xlane.f32.xlu1 %v2553_v61  ;;  %2434 = vmax.xlane.f32.xlu0 %v2433_v15  ;;  %v2361_v61 = vpop.f32.mrf.mxu1 }
 0xb2a   :  { %v2417_v37 = vpop.xlane.xlu1 %2416 }
 0xb2b   :  { %v2481_v33 = vsub.f32 %v2384_v17, %v2417_v37 }
 0xb2d   :  { %v10704_v50 = vpop.eup %8813  ;;  %v2508_v10 = vmul.f32 1.442695, %v2481_v33  ;;  %v2451_v33 = vsel %vm2405_vm5, %v10750_v62, -inf }
 0xb2e   :  { %v2556_v2 = vsel %vm2405_vm5, %v10704_v50, 0.0 }
 0xb2f   :  { %8815 = vpow2.f32 %v2508_v10  ;;  %2557 = vadd.xlane.f32.xlu1 %v2556_v2  ;;  %2437 = vmax.xlane.f32.xlu0 %v2436_v1  ;;  %v10760_v10 = vadd.f32 %v2361_v61, %v10646_v25  ;;  %v2363_v1 = vpop.f32.mrf.mxu1 }
 0xb32   :  { %v2420_v12 = vpop.xlane.xlu2 %2419 }
 0xb33   :  { %v2482_v40 = vsub.f32 %v2385_v13, %v2420_v12  ;;  %v2454_v12 = vsel %vm2405_vm5, %v10760_v10, -inf }
 0xb35   :  { %v10713_v57 = vpop.eup %8815  ;;  %v2510_v17 = vmul.f32 1.442695, %v2482_v40  ;;  %v10769_v40 = vadd.f32 %v2363_v1, %v10651_v16 }
 0xb36   :  { %v2559_v47 = vsel %vm2405_vm5, %v10713_v57, 0.0 }
 0xb37   :  { %8817 = vpow2.f32 %v2510_v17  ;;  %2560 = vadd.xlane.f32.xlu2 %v2559_v47  ;;  %2440 = vmax.xlane.f32.xlu1 %v2439_v11  ;;  %v2457_v41 = vsel %vm2405_vm5, %v10769_v40, -inf  ;;  %v2366_v17 = vpop.f32.mrf.mxu1 }
 0xb38   :  { %v10774_v47 = vadd.f32 %v2366_v17, %v10638_v9 }
 0xb3a   :  { %v2423_v44 = vpop.xlane.xlu0 %2422  ;;  %v2460_v11 = vsel %vm2405_vm5, %v10774_v47, -inf }
 0xb3b   :  { %v2483_v36 = vsub.f32 %v10666_v21, %v2423_v44 }
 0xb3d   :  { %v10723_v13 = vpop.eup %8817  ;;  %v2512_v56 = vmul.f32 1.442695, %v2483_v36 }
 0xb3e   :  { %v2562_v8 = vsel %vm2405_vm5, %v10723_v13, 0.0 }
 0xb3f   :  { %8819 = vpow2.f32 %v2512_v56  ;;  %2563 = vadd.xlane.f32.xlu2 %v2562_v8  ;;  %2443 = vmax.xlane.f32.xlu1 %v2442_v23 }
 0xb42   :  { %v2426_v28 = vpop.xlane.xlu1 %2425 }
 0xb43   :  { %v2484_v32 = vsub.f32 %v10671_v49, %v2426_v28 }
 0xb45   :  { %v10733_v21 = vpop.eup %8819  ;;  %v2514_v30 = vmul.f32 1.442695, %v2484_v32 }
 0xb46   :  { %v2565_v51 = vsel %vm2405_vm5, %v10733_v21, 0.0 }
 0xb47   :  { %8821 = vpow2.f32 %v2514_v30  ;;  %2566 = vadd.xlane.f32.xlu0 %v2565_v51  ;;  %2446 = vmax.xlane.f32.xlu2 %v2445_v54 }
 0xb4a   :  { %v2429_v29 = vpop.xlane.xlu2 %2428 }
 0xb4b   :  { %v2485_v43 = vsub.f32 %v10679_v19, %v2429_v29 }
 0xb4d   :  { %v10743_v49 = vpop.eup %8821  ;;  %v2516_v4 = vmul.f32 1.442695, %v2485_v43 }
 0xb4e   :  { %v2568_v24 = vsel %vm2405_vm5, %v10743_v49, 0.0 }
 0xb4f   :  { %8823 = vpow2.f32 %v2516_v4  ;;  %2569 = vadd.xlane.f32.xlu0 %v2568_v24  ;;  %2449 = vmax.xlane.f32.xlu2 %v2448_v7 }
 0xb52   :  { %v2432_v52 = vpop.xlane.xlu2 %2431 }
 0xb53   :  { %v2486_v15 = vsub.f32 %v10684_v14, %v2432_v52 }
 0xb55   :  { %v10753_v19 = vpop.eup %8823  ;;  %v2518_v37 = vmul.f32 1.442695, %v2486_v15 }
 0xb56   :  { %v2571_v53 = vsel %vm2405_vm5, %v10753_v19, 0.0 }
 0xb57   :  { %8825 = vpow2.f32 %v2518_v37  ;;  %2572 = vadd.xlane.f32.xlu1 %v2571_v53  ;;  %2452 = vmax.xlane.f32.xlu0 %v2451_v33 }
 0xb5d   :  { %v10762_v2 = vpop.eup %8825 }
 0xb5e   :  { %v2574_v14 = vsel %vm2405_vm5, %v10762_v2, 0.0 }
 0xb5f   :  { %2575 = vadd.xlane.f32.xlu1 %v2574_v14  ;;  %2455 = vmax.xlane.f32.xlu0 %v2454_v12  ;;  %v2368_v14 = vpop.f32.mrf.mxu1 }
 0xb67   :  { %2458 = vmax.xlane.f32.xlu1 %v2457_v41 }
 0xb6f   :  { %2461 = vmax.xlane.f32.xlu1 %v2460_v11 }
 0xb92   :  { %v2552_v44 = vpop.xlane.xlu0 %2551 }
 0xb93   :  { %8827 = vrcp.f32 %v2552_v44  ;;  %v2633_v4 = vand.u32 2147483648, %v2552_v44  ;;  %vm2627_vm1 = vweird.f32 %v2552_v44  ;;  %v2631_v24 = vand.u32 2147483647, %v2552_v44 }
 0xb95   :  { %v2634_v12 = vor.u32 1.1754944e-38, %v2633_v4  ;;  %vm2632_vm3 = vcmp.eq.f32.partialorder %v2631_v24, 8.507059e+37 }
 0xb99   :  { %v8828_v36 = vpop.eup %8827 }
 0xb9a   :  { %v2623_v56 = vmul.f32 %v8828_v36, %v2552_v44  ;;  %v2555_v8 = vpop.xlane.xlu1 %2554  ;;  %v2435_v23 = vpop.xlane.xlu0 %2434  ;;  %vm2628_vm14 = vweird.f32 %v8828_v36 }
 0xb9b   :  { %8829 = vrcp.f32 %v2555_v8  ;;  %v2487_v28 = vsub.f32 %v10693_v3, %v2435_v23  ;;  %vm10783_vm15 = vmor %vm2627_vm1, %vm2628_vm14  ;;  %v2646_v61 = vand.u32 2147483647, %v2555_v8  ;;  %v2648_v15 = vand.u32 2147483648, %v2555_v8 }
 0xb9c   :  { %v2624_v45 = vsub.f32 1.0, %v2623_v56  ;;  %vm2642_vm4 = vweird.f32 %v2555_v8  ;;  %v10808_v3 = vadd.f32 %v2368_v14, %v10646_v25 }
 0xb9d   :  { %v2520_v30 = vmul.f32 1.442695, %v2487_v28  ;;  %v2649_v44 = vor.u32 1.1754944e-38, %v2648_v15  ;;  %vm2647_vm7 = vcmp.eq.f32.partialorder %v2646_v61, 8.507059e+37 }
 0xb9e   :  { %v2625_v32 = vmul.f32 %v8828_v36, %v2624_v45 }
 0xb9f   :  { %8831 = vpow2.f32 %v2520_v30 }
 0xba0   :  { %v2626_v54 = vadd.f32 %v8828_v36, %v2625_v32 }
 0xba1   :  { %v8830_v51 = vpop.eup %8829 }
 0xba2   :  { %v2638_v22 = vmul.f32 %v8830_v51, %v2555_v8  ;;  %v10779_v29 = vpop.xlane.xlu1 %2557  ;;  %v2438_v43 = vpop.xlane.xlu0 %2437  ;;  %v2630_v53 = vsel %vm10783_vm15, %v8828_v36, %v2626_v54  ;;  %vm2643_vm2 = vweird.f32 %v8830_v51 }
 0xba3   :  { %8833 = vrcp.f32 %v10779_v29  ;;  %v2488_v52 = vsub.f32 %v10702_v42, %v2438_v43  ;;  %v2635_v11 = vsel %vm2632_vm3, %v2634_v12, %v2630_v53  ;;  %vm2644_vm6 = vmor %vm2642_vm4, %vm2643_vm2  ;;  %v2663_v15 = vand.u32 2147483648, %v10779_v29 }
 0xba4   :  { %v2639_v7 = vsub.f32 1.0, %v2638_v22  ;;  %v2636_v54 = vmul.f32 %v10688_v59, %v2635_v11  ;;  %vm2657_vm9 = vweird.f32 %v10779_v29 }
 0xba5   :  { %v10787_v37 = vpop.eup %8831  ;;  %v2522_v1 = vmul.f32 1.442695, %v2488_v52 }
 0xba6   :  { %v2640_v33 = vmul.f32 %v8830_v51, %v2639_v7  ;;  %v2577_v41 = vsel %vm2405_vm5, %v10787_v37, 0.0 }
 0xba7   :  { %8835 = vpow2.f32 %v2522_v1  ;;  %2578 = vadd.xlane.f32.xlu2 %v2577_v41  ;;  %v2661_v1 = vand.u32 2147483647, %v10779_v29 }
 0xba8   :  { %v2641_v42 = vadd.f32 %v8830_v51, %v2640_v33 }
 0xba9   :  { %v8834_v17 = vpop.eup %8833  ;;  %vm2662_vm13 = vcmp.eq.f32.partialorder %v2661_v1, 8.507059e+37 }
 0xbaa   :  { %v2645_v56 = vsel %vm2644_vm6, %v8830_v51, %v2641_v42  ;;  %v2653_v36 = vmul.f32 %v8834_v17, %v10779_v29  ;;  %v2561_v23 = vpop.xlane.xlu2 %2560  ;;  %v2441_v45 = vpop.xlane.xlu1 %2440  ;;  %vm2658_vm8 = vweird.f32 %v8834_v17 }
 0xbab   :  { %v2650_v28 = vsel %vm2647_vm7, %v2649_v44, %v2645_v56  ;;  %8837 = vrcp.f32 %v2561_v23  ;;  %v2489_v30 = vsub.f32 %v10711_v55, %v2441_v45  ;;  %v2371_v55 = vpop.f32.mrf.mxu1  ;;  %v2678_v42 = vand.u32 2147483648, %v2561_v23  ;;  %vm10817_vm10 = vmor %vm2657_vm9, %vm2658_vm8 }
 0xbac   :  { %v2654_v32 = vsub.f32 1.0, %v2653_v36  ;;  %v10797_v8 = vmul.f32 %v10695_v18, %v2650_v28  ;;  %v2676_v29 = vand.u32 2147483647, %v2561_v23  ;;  %vm2672_vm12 = vweird.f32 %v2561_v23 }
 0xbad   :  { %v10799_v22 = vpop.eup %8835  ;;  %v2524_v43 = vmul.f32 1.442695, %v2489_v30  ;;  %v2664_v36 = vor.u32 1.1754944e-38, %v2663_v15 }
 0xbae   :  { %v2982_v51 = vpack.c.bf16 %v10797_v8, %v2636_v54  ;;  %v2655_v4 = vmul.f32 %v8834_v17, %v2654_v32  ;;  %v2580_v24 = vsel %vm2405_vm5, %v10799_v22, 0.0  ;;  %v10828_v32 = vadd.f32 %v2371_v55, %v10651_v16 }
 0xbaf   :  { %8839 = vpow2.f32 %v2524_v43  ;;  %2581 = vadd.xlane.f32.xlu2 %v2580_v24  ;;  %v2679_v24 = vor.u32 1.1754944e-38, %v2678_v42  ;;  %vm2677_vm1 = vcmp.eq.f32.partialorder %v2676_v29, 8.507059e+37 }
 0xbb0   :  { %7662 = vmatmul.msk.bf16.vlgmr.msra.gmra.mxu0 %vm2405_vm5, %v2982_v51  ;;  %v2656_v61 = vadd.f32 %v8834_v17, %v2655_v4  ;;  %v2466_v55 = vsel %vm2405_vm5, %v10828_v32, -inf }
 0xbb1   :  { %v8838_v7 = vpop.eup %8837 }
 0xbb2   :  { %v2668_v52 = vmul.f32 %v8838_v7, %v2561_v23  ;;  %v10805_v59 = vpop.xlane.xlu2 %2563  ;;  %v2444_v18 = vpop.xlane.xlu1 %2443  ;;  %vm2673_vm11 = vweird.f32 %v8838_v7  ;;  %v2660_v56 = vsel %vm10817_vm10, %v8834_v17, %v2656_v61 }
 0xbb3   :  { %8841 = vrcp.f32 %v10805_v59  ;;  %v2490_v33 = vsub.f32 %v10720_v60, %v2444_v18  ;;  %v2463_v60 = vsel %vm2405_vm5, %v10808_v3, -inf  ;;  %vm2674_vm14 = vmor %vm2672_vm12, %vm2673_vm11  ;;  %v2665_v4 = vsel %vm2662_vm13, %v2664_v36, %v2660_v56  ;;  %v2373_v23 = vpop.f32.mrf.mxu1 }
 0xbb4   :  { %v2669_v53 = vsub.f32 1.0, %v2668_v52  ;;  %v10838_v15 = vmul.f32 %v10704_v50, %v2665_v4  ;;  %vm2687_vm2 = vweird.f32 %v10805_v59 }
 0xbb5   :  { %v10815_v12 = vpop.eup %8839  ;;  %v2526_v11 = vmul.f32 1.442695, %v2490_v33  ;;  %v3633_v33 = vsel %vm2405_vm5, %v2636_v54, 0.0 }
 0xbb6   :  { %v2670_v41 = vmul.f32 %v8838_v7, %v2669_v53  ;;  %v2583_v44 = vsel %vm2405_vm5, %v10815_v12, 0.0 }
 0xbb7   :  { %8843 = vpow2.f32 %v2526_v11  ;;  %2584 = vadd.xlane.f32.xlu0 %v2583_v44  ;;  %2464 = vmax.xlane.f32.xlu2 %v2463_v60  ;;  %v10854_v60 = vadd.f32 %v2373_v23, %v10638_v9 }
 0xbb8   :  { %v2671_v45 = vadd.f32 %v8838_v7, %v2670_v41  ;;  %v2693_v41 = vand.u32 2147483648, %v10805_v59 }
 0xbb9   :  { %v8842_v28 = vpop.eup %8841  ;;  %v2469_v9 = vsel %vm2405_vm5, %v10854_v60, -inf }
 0xbba   :  { %v2683_v30 = vmul.f32 %v8842_v28, %v10805_v59  ;;  %v10831_v43 = vpop.xlane.xlu0 %2566  ;;  %v2447_v51 = vpop.xlane.xlu2 %2446  ;;  %v2675_v17 = vsel %vm2674_vm14, %v8838_v7, %v2671_v45  ;;  %vm2688_vm15 = vweird.f32 %v8842_v28  ;;  %v2694_v56 = vor.u32 1.1754944e-38, %v2693_v41 }
 0xbbb   :  { %8845 = vrcp.f32 %v10831_v43  ;;  %v2491_v18 = vsub.f32 %v10730_v58, %v2447_v51  ;;  %v2680_v61 = vsel %vm2677_vm1, %v2679_v24, %v2675_v17  ;;  %v2691_v58 = vand.u32 2147483647, %v10805_v59  ;;  %vm2689_vm3 = vmor %vm2687_vm2, %vm2688_vm15  ;;  %v2376_v23 = vpop.f32.mrf.mxu1 }
 0xbbc   :  { %v2684_v52 = vsub.f32 1.0, %v2683_v30  ;;  %v2681_v53 = vmul.f32 %v10713_v57, %v2680_v61  ;;  %v2706_v61 = vand.u32 2147483647, %v10831_v43  ;;  %vm2702_vm7 = vweird.f32 %v10831_v43 }
 0xbbd   :  { %v10842_v7 = vpop.eup %8843  ;;  %v2528_v42 = vmul.f32 1.442695, %v2491_v18  ;;  %vm2692_vm4 = vcmp.eq.f32.partialorder %v2691_v58, 8.507059e+37  ;;  %v2708_v18 = vand.u32 2147483648, %v10831_v43  ;;  %v10879_v41 = vadd.f32 %v2376_v23, %v10646_v25 }
 0xbbe   :  { %v2685_v1 = vmul.f32 %v8842_v28, %v2684_v52  ;;  %v2586_v11 = vsel %vm2405_vm5, %v10842_v7, 0.0  ;;  %v2983_v14 = vpack.c.bf16 %v2681_v53, %v10838_v15  ;;  %v3634_v50 = vsel %vm2405_vm5, %v2681_v53, 0.0 }
 0xbbf   :  { %8847 = vpow2.f32 %v2528_v42  ;;  %2587 = vadd.xlane.f32.xlu0 %v2586_v11  ;;  %2467 = vmax.xlane.f32.xlu2 %v2466_v55  ;;  %v10851_v57 = vadd.f32 %v3634_v50, %v3633_v33  ;;  %v2709_v42 = vor.u32 1.1754944e-38, %v2708_v18  ;;  %vm2707_vm9 = vcmp.eq.f32.partialorder %v2706_v61, 8.507059e+37 }
 0xbc0   :  { %v2686_v44 = vadd.f32 %v8842_v28, %v2685_v1  ;;  %7663 = vmatmul.msk.bf16.gmra.mxu0 %vm2405_vm5, %v2983_v14  ;;  %v2472_v25 = vsel %vm2405_vm5, %v10879_v41, -inf }
 0xbc1   :  { %v8846_v54 = vpop.eup %8845 }
 0xbc2   :  { %v2698_v29 = vmul.f32 %v8846_v54, %v10831_v43  ;;  %v10859_v36 = vpop.xlane.xlu0 %2569  ;;  %v2450_v45 = vpop.xlane.xlu2 %2449  ;;  %v2690_v59 = vsel %vm2689_vm3, %v8842_v28, %v2686_v44  ;;  %vm2703_vm6 = vweird.f32 %v8846_v54 }
 0xbc3   :  { %8849 = vrcp.f32 %v10859_v36  ;;  %v2492_v51 = vsub.f32 %v10740_v63, %v2450_v45  ;;  %v2695_v4 = vsel %vm2692_vm4, %v2694_v56, %v2690_v59  ;;  %v3648_v63 = vsel %vm2405_vm5, %v10797_v8, 0.0  ;;  %vm2704_vm8 = vmor %vm2702_vm7, %vm2703_vm6 }
 0xbc4   :  { %v2699_v30 = vsub.f32 1.0, %v2698_v29  ;;  %v2696_v17 = vmul.f32 %v10723_v13, %v2695_v4  ;;  %v3663_v56 = vsel %vm2405_vm5, %v10838_v15, 0.0  ;;  %vm2717_vm11 = vweird.f32 %v10859_v36 }
 0xbc5   :  { %v10866_v24 = vpop.eup %8847  ;;  %v2530_v28 = vmul.f32 1.442695, %v2492_v51  ;;  %v2721_v51 = vand.u32 2147483647, %v10859_v36 }
 0xbc6   :  { %v2700_v52 = vmul.f32 %v8846_v54, %v2699_v30  ;;  %v2589_v55 = vsel %vm2405_vm5, %v10866_v24, 0.0  ;;  %v3649_v53 = vsel %vm2405_vm5, %v2696_v17, 0.0 }
 0xbc7   :  { %8851 = vpow2.f32 %v2530_v28  ;;  %2590 = vadd.xlane.f32.xlu1 %v2589_v55  ;;  %2470 = vmax.xlane.f32.xlu0 %v2469_v9  ;;  %v10876_v13 = vadd.f32 %v3649_v53, %v3648_v63  ;;  %v2378_v9 = vpop.f32.mrf.mxu1  ;;  %vm2722_vm13 = vcmp.eq.f32.partialorder %v2721_v51, 8.507059e+37 }
 0xbc8   :  { %v2701_v33 = vadd.f32 %v8846_v54, %v2700_v52  ;;  %v10904_v63 = vadd.f32 %v2378_v9, %v10651_v16 }
 0xbc9   :  { %v8850_v1 = vpop.eup %8849 }
 0xbca   :  { %v2713_v58 = vmul.f32 %v8850_v1, %v10859_v36  ;;  %v2573_v8 = vpop.xlane.xlu1 %2572  ;;  %v2453_v11 = vpop.xlane.xlu0 %2452  ;;  %v2705_v14 = vsel %vm2704_vm8, %v8846_v54, %v2701_v33  ;;  %vm2718_vm10 = vweird.f32 %v8850_v1  ;;  %v2723_v54 = vand.u32 2147483648, %v10859_v36 }
 0xbcb   :  { %8853 = vrcp.f32 %v2573_v8  ;;  %v2493_v50 = vsub.f32 %v10750_v62, %v2453_v11  ;;  %v2710_v44 = vsel %vm2707_vm9, %v2709_v42, %v2705_v14  ;;  %vm2719_vm12 = vmor %vm2717_vm11, %vm2718_vm10  ;;  %v2738_v42 = vand.u32 2147483648, %v2573_v8 }
 0xbcc   :  { %v2714_v43 = vsub.f32 1.0, %v2713_v58  ;;  %v2711_v29 = vmul.f32 %v10733_v21, %v2710_v44  ;;  %v2724_v18 = vor.u32 1.1754944e-38, %v2723_v54  ;;  %v2475_v16 = vsel %vm2405_vm5, %v10904_v63, -inf }
 0xbcd   :  { %v10889_v45 = vpop.eup %8851  ;;  %v2532_v30 = vmul.f32 1.442695, %v2493_v50  ;;  %vm2732_vm1 = vweird.f32 %v2573_v8 }
 0xbce   :  { %v2715_v59 = vmul.f32 %v8850_v1, %v2714_v43  ;;  %v2592_v62 = vsel %vm2405_vm5, %v10889_v45, 0.0  ;;  %v2984_v4 = vpack.c.bf16 %v2711_v29, %v2696_v17  ;;  %v3664_v15 = vsel %vm2405_vm5, %v2711_v29, 0.0 }
 0xbcf   :  { %8855 = vpow2.f32 %v2532_v30  ;;  %2593 = vadd.xlane.f32.xlu1 %v2592_v62  ;;  %2473 = vmax.xlane.f32.xlu0 %v2472_v25  ;;  %v10897_v21 = vadd.f32 %v3664_v15, %v3663_v56  ;;  %v2736_v43 = vand.u32 2147483647, %v2573_v8 }
 0xbd0   :  { %v2716_v23 = vadd.f32 %v8850_v1, %v2715_v59  ;;  %7664 = vmatmul.msk.bf16.gmra.mxu0 %vm2405_vm5, %v2984_v4 }
 0xbd1   :  { %v8854_v52 = vpop.eup %8853  ;;  %vm2737_vm2 = vcmp.eq.f32.partialorder %v2736_v43, 8.507059e+37 }
 0xbd2   :  { %v2728_v28 = vmul.f32 %v8854_v52, %v2573_v8  ;;  %v10901_v61 = vpop.xlane.xlu1 %2575  ;;  %v2456_v17 = vpop.xlane.xlu0 %2455  ;;  %v2720_v55 = vsel %vm2719_vm12, %v8850_v1, %v2716_v23  ;;  %vm2733_vm14 = vweird.f32 %v8854_v52 }
 0xbd3   :  { %v2494_v53 = vsub.f32 %v10760_v10, %v2456_v17  ;;  %v2725_v33 = vsel %vm2722_vm13, %v2724_v18, %v2720_v55  ;;  %vm2734_vm15 = vmor %vm2732_vm1, %vm2733_vm14  ;;  %v2739_v10 = vor.u32 1.1754944e-38, %v2738_v42  ;;  %vm2747_vm4 = vweird.f32 %v10901_v61 }
 0xbd4   :  { %v2729_v36 = vsub.f32 1.0, %v2728_v28  ;;  %v2726_v58 = vmul.f32 %v10743_v49, %v2725_v33 }
 0xbd5   :  { %v10908_v11 = vpop.eup %8855  ;;  %v2534_v50 = vmul.f32 1.442695, %v2494_v53 }
 0xbd6   :  { %v2730_v14 = vmul.f32 %v8854_v52, %v2729_v36  ;;  %v2595_v1 = vsel %vm2405_vm5, %v10908_v11, 0.0  ;;  %v3636_v44 = vsel %vm2405_vm5, %v2726_v58, 0.0 }
 0xbd7   :  { %8857 = vpow2.f32 %v2534_v50  ;;  %2596 = vadd.xlane.f32.xlu2 %v2595_v1  ;;  %2476 = vmax.xlane.f32.xlu1 %v2475_v16  ;;  %v10916_v49 = vadd.f32 %v3636_v44, %v10851_v57  ;;  %v2751_v50 = vand.u32 2147483647, %v10901_v61 }
 0xbd8   :  { %v2731_v56 = vadd.f32 %v8854_v52, %v2730_v14  ;;  %v2753_v14 = vand.u32 2147483648, %v10901_v61 }
 0xbd9   :  { %vm2752_vm9 = vcmp.eq.f32.partialorder %v2751_v50, 8.507059e+37 }
 0xbda   :  { %v2459_v25 = vpop.xlane.xlu1 %2458  ;;  %v2735_v29 = vsel %vm2734_vm15, %v8854_v52, %v2731_v56 }
 0xbdb   :  { %v2495_v59 = vsub.f32 %v10769_v40, %v2459_v25  ;;  %v2740_v54 = vsel %vm2737_vm2, %v2739_v10, %v2735_v29  ;;  %v2754_v25 = vor.u32 1.1754944e-38, %v2753_v14 }
 0xbdc   :  { %v2741_v30 = vmul.f32 %v10753_v19, %v2740_v54 }
 0xbdd   :  { %v2536_v51 = vmul.f32 1.442695, %v2495_v59  ;;  %v10920_v62 = vpop.eup %8857 }
 0xbde   :  { %v2985_v8 = vpack.c.bf16 %v2741_v30, %v2726_v58  ;;  %v3651_v4 = vsel %vm2405_vm5, %v2741_v30, 0.0  ;;  %v2598_v57 = vsel %vm2405_vm5, %v10920_v62, 0.0 }
 0xbdf   :  { %8859 = vpow2.f32 %v2536_v51  ;;  %v10926_v15 = vadd.f32 %v3651_v4, %v10876_v13  ;;  %2599 = vadd.xlane.f32.xlu2 %v2598_v57 }
 0xbe0   :  { %7665 = vmatmul.msk.bf16.gmra.mxu0 %vm2405_vm5, %v2985_v8 }
 0xbe2   :  { %v2462_v40 = vpop.xlane.xlu1 %2461 }
 0xbe3   :  { %v2496_v9 = vsub.f32 %v10774_v47, %v2462_v40 }
 0xbe5   :  { %v10930_v19 = vpop.eup %8859  ;;  %v2538_v23 = vmul.f32 1.442695, %v2496_v9 }
 0xbe6   :  { %v2601_v52 = vsel %vm2405_vm5, %v10930_v19, 0.0 }
 0xbe7   :  { %8861 = vpow2.f32 %v2538_v23  ;;  %2602 = vadd.xlane.f32.xlu0 %v2601_v52 }
 0xbe8   :  { %8863 = vrcp.f32 %v10901_v61 }
 0xbed   :  { %v10934_v18 = vpop.eup %8861 }
 0xbee   :  { %v2604_v13 = vsel %vm2405_vm5, %v10934_v18, 0.0  ;;  %v8864_v28 = vpop.eup %8863 }
 0xbef   :  { %2605 = vadd.xlane.f32.xlu1 %v2604_v13  ;;  %v2743_v17 = vmul.f32 %v8864_v28, %v10901_v61  ;;  %vm2748_vm3 = vweird.f32 %v8864_v28 }
 0xbf0   :  { %vm10943_vm6 = vmor %vm2747_vm4, %vm2748_vm3 }
 0xbf1   :  { %v2744_v55 = vsub.f32 1.0, %v2743_v17 }
 0xbf3   :  { %v2745_v36 = vmul.f32 %v8864_v28, %v2744_v55 }
 0xbf5   :  { %v2746_v58 = vadd.f32 %v8864_v28, %v2745_v36 }
 0xbf7   :  { %v2750_v10 = vsel %vm10943_vm6, %v8864_v28, %v2746_v58 }
 0xbf8   :  { %v2755_v8 = vsel %vm2752_vm9, %v2754_v25, %v2750_v10 }
 0xbf9   :  { %v2756_v52 = vmul.f32 %v10762_v2, %v2755_v8 }
 0xc1a   :  { %v2579_v47 = vpop.xlane.xlu2 %2578 }
 0xc1b   :  { %8865 = vrcp.f32 %v2579_v47  ;;  %v2768_v44 = vand.u32 2147483648, %v2579_v47  ;;  %v2766_v56 = vand.u32 2147483647, %v2579_v47  ;;  %vm2762_vm8 = vweird.f32 %v2579_v47 }
 0xc1d   :  { %v2769_v54 = vor.u32 1.1754944e-38, %v2768_v44  ;;  %vm2767_vm11 = vcmp.eq.f32.partialorder %v2766_v56, 8.507059e+37 }
 0xc21   :  { %v8866_v53 = vpop.eup %8865 }
 0xc22   :  { %v2758_v33 = vmul.f32 %v8866_v53, %v2579_v47  ;;  %v2582_v42 = vpop.xlane.xlu2 %2581  ;;  %vm2763_vm7 = vweird.f32 %v8866_v53 }
 0xc23   :  { %8867 = vrcp.f32 %v2582_v42  ;;  %vm2764_vm10 = vmor %vm2762_vm8, %vm2763_vm7  ;;  %v2783_v17 = vand.u32 2147483648, %v2582_v42  ;;  %v2781_v55 = vand.u32 2147483647, %v2582_v42  ;;  %vm2777_vm13 = vweird.f32 %v2582_v42 }
 0xc24   :  { %v2759_v43 = vsub.f32 1.0, %v2758_v33 }
 0xc25   :  { %vm2782_vm1 = vcmp.eq.f32.partialorder %v2781_v55, 8.507059e+37 }
 0xc26   :  { %v2760_v16 = vmul.f32 %v8866_v53, %v2759_v43 }
 0xc28   :  { %v2761_v29 = vadd.f32 %v8866_v53, %v2760_v16 }
 0xc29   :  { %v8868_v59 = vpop.eup %8867 }
 0xc2a   :  { %v2773_v30 = vmul.f32 %v8868_v59, %v2582_v42  ;;  %v2585_v61 = vpop.xlane.xlu0 %2584  ;;  %v2465_v51 = vpop.xlane.xlu2 %2464  ;;  %v2765_v4 = vsel %vm2764_vm10, %v8866_v53, %v2761_v29  ;;  %vm2778_vm12 = vweird.f32 %v8868_v59 }
 0xc2b   :  { %8869 = vrcp.f32 %v2585_v61  ;;  %v2497_v40 = vsub.f32 %v10808_v3, %v2465_v51  ;;  %v2770_v23 = vsel %vm2767_vm11, %v2769_v54, %v2765_v4  ;;  %vm2779_vm14 = vmor %vm2777_vm13, %vm2778_vm12  ;;  %v2798_v25 = vand.u32 2147483648, %v2585_v61 }
 0xc2c   :  { %v2774_v57 = vsub.f32 1.0, %v2773_v30  ;;  %v2771_v13 = vmul.f32 %v10787_v37, %v2770_v23  ;;  %v2784_v37 = vor.u32 1.1754944e-38, %v2783_v17  ;;  %vm2792_vm2 = vweird.f32 %v2585_v61 }
 0xc2d   :  { %v10950_v9 = vpop.f32.mrf.mxu0  ;;  %v2540_v47 = vmul.f32 1.442695, %v2497_v40  ;;  %v2799_v4 = vor.u32 1.1754944e-38, %v2798_v25 }
 0xc2e   :  { %v2775_v28 = vmul.f32 %v8868_v59, %v2774_v57  ;;  %v2986_v36 = vpack.c.bf16 %v2771_v13, %v2756_v52  ;;  %v3638_v53 = vsel %vm2405_vm5, %v2771_v13, 0.0  ;;  %v3666_v57 = vsel %vm2405_vm5, %v2756_v52, 0.0 }
 0xc2f   :  { %8871 = vpow2.f32 %v2540_v47  ;;  %v10956_v3 = vadd.f32 %v3638_v53, %v10916_v49  ;;  %v3667_v47 = vadd.f32 %v3666_v57, %v10897_v21 }
 0xc30   :  { %v2776_v33 = vadd.f32 %v8868_v59, %v2775_v28  ;;  %7666 = vmatmul.msk.bf16.gmra.mxu0 %vm2405_vm5, %v2986_v36 }
 0xc31   :  { %v8870_v58 = vpop.eup %8869 }
 0xc32   :  { %v2780_v2 = vsel %vm2779_vm14, %v8868_v59, %v2776_v33  ;;  %v2788_v14 = vmul.f32 %v8870_v58, %v2585_v61  ;;  %v2588_v43 = vpop.xlane.xlu0 %2587  ;;  %v2468_v50 = vpop.xlane.xlu2 %2467  ;;  %vm2793_vm15 = vweird.f32 %v8870_v58  ;;  %v2796_v59 = vand.u32 2147483647, %v2585_v61 }
 0xc33   :  { %8873 = vrcp.f32 %v2588_v43  ;;  %v2498_v16 = vsub.f32 %v10828_v32, %v2468_v50  ;;  %v2785_v42 = vsel %vm2782_vm1, %v2784_v37, %v2780_v2  ;;  %vm2794_vm3 = vmor %vm2792_vm2, %vm2793_vm15  ;;  %v2813_v52 = vand.u32 2147483648, %v2588_v43 }
 0xc34   :  { %v2789_v1 = vsub.f32 1.0, %v2788_v14  ;;  %v2786_v49 = vmul.f32 %v10799_v22, %v2785_v42  ;;  %vm2797_vm4 = vcmp.eq.f32.partialorder %v2796_v59, 8.507059e+37  ;;  %vm2807_vm7 = vweird.f32 %v2588_v43 }
 0xc35   :  { %v10960_v44 = vpop.f32.mrf.mxu0  ;;  %v10963_v56 = vpop.eup %8871  ;;  %v2542_v29 = vmul.f32 1.442695, %v2498_v16 }
 0xc36   :  { %v2790_v10 = vmul.f32 %v8870_v58, %v2789_v1  ;;  %v2607_v54 = vsel %vm2405_vm5, %v10963_v56, 0.0  ;;  %v3653_v30 = vsel %vm2405_vm5, %v2786_v49, 0.0  ;;  %v2814_v1 = vor.u32 1.1754944e-38, %v2813_v52 }
 0xc37   :  { %8875 = vpow2.f32 %v2542_v29  ;;  %2608 = vadd.xlane.f32.xlu2 %v2607_v54  ;;  %v10969_v32 = vadd.f32 %v3653_v30, %v10926_v15 }
 0xc38   :  { %v2791_v51 = vadd.f32 %v8870_v58, %v2790_v10 }
 0xc39   :  { %v8874_v22 = vpop.eup %8873 }
 0xc3a   :  { %v2795_v8 = vsel %vm2794_vm3, %v8870_v58, %v2791_v51  ;;  %v2803_v40 = vmul.f32 %v8874_v22, %v2588_v43  ;;  %v2591_v23 = vpop.xlane.xlu1 %2590  ;;  %v2471_v13 = vpop.xlane.xlu0 %2470  ;;  %vm2808_vm6 = vweird.f32 %v8874_v22  ;;  %v2811_v58 = vand.u32 2147483647, %v2588_v43 }
 0xc3b   :  { %8877 = vrcp.f32 %v2591_v23  ;;  %v2499_v17 = vsub.f32 %v10854_v60, %v2471_v13  ;;  %v2800_v61 = vsel %vm2797_vm4, %v2799_v4, %v2795_v8  ;;  %vm2809_vm8 = vmor %vm2807_vm7, %vm2808_vm6  ;;  %v2828_v51 = vand.u32 2147483648, %v2591_v23 }
 0xc3c   :  { %v2804_v28 = vsub.f32 1.0, %v2803_v40  ;;  %v2801_v15 = vmul.f32 %v10815_v12, %v2800_v61  ;;  %vm2812_vm9 = vcmp.eq.f32.partialorder %v2811_v58, 8.507059e+37  ;;  %v2826_v8 = vand.u32 2147483647, %v2591_v23 }
 0xc3d   :  { %v10974_v55 = vpop.f32.mrf.mxu0  ;;  %v10977_v36 = vpop.eup %8875  ;;  %v2544_v33 = vmul.f32 1.442695, %v2499_v17  ;;  %vm2822_vm11 = vweird.f32 %v2591_v23 }
 0xc3e   :  { %v2805_v53 = vmul.f32 %v8874_v22, %v2804_v28  ;;  %v2610_v2 = vsel %vm2405_vm5, %v10977_v36, 0.0  ;;  %v2987_v37 = vpack.c.bf16 %v2801_v15, %v2786_v49  ;;  %v3668_v60 = vsel %vm2405_vm5, %v2801_v15, 0.0 }
 0xc3f   :  { %8879 = vpow2.f32 %v2544_v33  ;;  %2611 = vadd.xlane.f32.xlu0 %v2610_v2  ;;  %v10982_v21 = vadd.f32 %v3668_v60, %v3667_v47  ;;  %v2829_v28 = vor.u32 1.1754944e-38, %v2828_v51  ;;  %vm2827_vm13 = vcmp.eq.f32.partialorder %v2826_v8, 8.507059e+37 }
 0xc40   :  { %v2806_v14 = vadd.f32 %v8874_v22, %v2805_v53  ;;  %7667 = vmatmul.msk.bf16.gmra.mxu0 %vm2405_vm5, %v2987_v37 }
 0xc41   :  { %v8878_v12 = vpop.eup %8877 }
 0xc42   :  { %v2810_v50 = vsel %vm2809_vm8, %v8874_v22, %v2806_v14  ;;  %v2818_v16 = vmul.f32 %v8878_v12, %v2591_v23  ;;  %v2594_v42 = vpop.xlane.xlu1 %2593  ;;  %v2474_v10 = vpop.xlane.xlu0 %2473  ;;  %vm2823_vm10 = vweird.f32 %v8878_v12 }
 0xc43   :  { %8881 = vrcp.f32 %v2594_v42  ;;  %v2500_v25 = vsub.f32 %v10879_v41, %v2474_v10  ;;  %v2815_v29 = vsel %vm2812_vm9, %v2814_v1, %v2810_v50  ;;  %vm2824_vm12 = vmor %vm2822_vm11, %vm2823_vm10  ;;  %v2843_v2 = vand.u32 2147483648, %v2594_v42 }
 0xc44   :  { %v2819_v49 = vsub.f32 1.0, %v2818_v16  ;;  %v2816_v59 = vmul.f32 %v10842_v7, %v2815_v29  ;;  %v2841_v60 = vand.u32 2147483647, %v2594_v42  ;;  %vm2837_vm1 = vweird.f32 %v2594_v42 }
 0xc45   :  { %v10986_v43 = vpop.f32.mrf.mxu0  ;;  %v10989_v54 = vpop.eup %8879  ;;  %v2546_v22 = vmul.f32 1.442695, %v2500_v25  ;;  %v2844_v10 = vor.u32 1.1754944e-38, %v2843_v2 }
 0xc46   :  { %v2820_v30 = vmul.f32 %v8878_v12, %v2819_v49  ;;  %v2613_v4 = vsel %vm2405_vm5, %v10989_v54, 0.0  ;;  %v3640_v57 = vsel %vm2405_vm5, %v2816_v59, 0.0  ;;  %vm2842_vm2 = vcmp.eq.f32.partialorder %v2841_v60, 8.507059e+37 }
 0xc47   :  { %8883 = vpow2.f32 %v2546_v22  ;;  %2614 = vadd.xlane.f32.xlu1 %v2613_v4  ;;  %v10995_v41 = vadd.f32 %v3640_v57, %v10956_v3 }
 0xc48   :  { %v2821_v40 = vadd.f32 %v8878_v12, %v2820_v30 }
 0xc49   :  { %v8882_v7 = vpop.eup %8881 }
 0xc4a   :  { %v2825_v13 = vsel %vm2824_vm12, %v8878_v12, %v2821_v40  ;;  %v2833_v17 = vmul.f32 %v8882_v7, %v2594_v42  ;;  %v2597_v61 = vpop.xlane.xlu2 %2596  ;;  %v2477_v47 = vpop.xlane.xlu1 %2476  ;;  %vm2838_vm14 = vweird.f32 %v8882_v7 }
 0xc4b   :  { %8885 = vrcp.f32 %v2597_v61  ;;  %v2501_v53 = vsub.f32 %v10904_v63, %v2477_v47  ;;  %v2830_v52 = vsel %vm2827_vm13, %v2829_v28, %v2825_v13  ;;  %vm2839_vm15 = vmor %vm2837_vm1, %vm2838_vm14  ;;  %v2858_v30 = vand.u32 2147483648, %v2597_v61 }
 0xc4c   :  { %v2834_v15 = vsub.f32 1.0, %v2833_v17  ;;  %v2831_v23 = vmul.f32 %v10866_v24, %v2830_v52  ;;  %v2856_v8 = vand.u32 2147483647, %v2597_v61  ;;  %vm2852_vm4 = vweird.f32 %v2597_v61 }
 0xc4d   :  { %v10998_v33 = vpop.f32.mrf.mxu0  ;;  %v11001_v58 = vpop.eup %8883  ;;  %v2548_v37 = vmul.f32 1.442695, %v2501_v53  ;;  %v3105_v28 = vmul.f32 %v10986_v43, %v10091_v5  ;;  %v3102_v53 = vmul.f32 %v10950_v9, %v10070_v34 }
 0xc4e   :  { %v2835_v3 = vmul.f32 %v8882_v7, %v2834_v15  ;;  %v2616_v14 = vsel %vm2405_vm5, %v11001_v58, 0.0  ;;  %v2988_v12 = vpack.c.bf16 %v2831_v23, %v2816_v59  ;;  %v3655_v50 = vsel %vm2405_vm5, %v2831_v23, 0.0 }
 0xc4f   :  { %8887 = vpow2.f32 %v2548_v37  ;;  %2617 = vadd.xlane.f32.xlu2 %v2616_v14  ;;  %v11007_v63 = vadd.f32 %v3655_v50, %v10969_v32  ;;  %vm2857_vm7 = vcmp.eq.f32.partialorder %v2856_v8, 8.507059e+37 }
 0xc50   :  { %v2836_v1 = vadd.f32 %v8882_v7, %v2835_v3  ;;  %7668 = vmatmul.msk.bf16.gmra.mxu0 %vm2405_vm5, %v2988_v12  ;;  %v3126_v3 = vadd.f32 %v3105_v28, %v3102_v53 }
 0xc51   :  { %v8886_v24 = vpop.eup %8885 }
 0xc52   :  { %v2840_v16 = vsel %vm2839_vm15, %v8882_v7, %v2836_v1  ;;  %v2848_v49 = vmul.f32 %v8886_v24, %v2597_v61  ;;  %v2600_v25 = vpop.xlane.xlu2 %2599  ;;  %vm2853_vm3 = vweird.f32 %v8886_v24 }
 0xc53   :  { %8889 = vrcp.f32 %v2600_v25  ;;  %v2845_v59 = vsel %vm2842_vm2, %v2844_v10, %v2840_v16  ;;  %vm2854_vm6 = vmor %vm2852_vm4, %vm2853_vm3  ;;  %v2873_v2 = vand.u32 2147483648, %v2600_v25  ;;  %vm2867_vm9 = vweird.f32 %v2600_v25 }
 0xc54   :  { %v2849_v29 = vsub.f32 1.0, %v2848_v49  ;;  %v2846_v42 = vmul.f32 %v10889_v45, %v2845_v59  ;;  %v2859_v45 = vor.u32 1.1754944e-38, %v2858_v30 }
 0xc55   :  { %v11010_v51 = vpop.f32.mrf.mxu0  ;;  %v11013_v22 = vpop.eup %8887 }
 0xc56   :  { %v2850_v32 = vmul.f32 %v8886_v24, %v2849_v29  ;;  %v2619_v4 = vsel %vm2405_vm5, %v11013_v22, 0.0  ;;  %v3670_v57 = vsel %vm2405_vm5, %v2846_v42, 0.0  ;;  %v3107_v53 = vmul.f32 %v11010_v51, %v10091_v5 }
 0xc57   :  { %2620 = vadd.xlane.f32.xlu0 %v2619_v4  ;;  %v3671_v7 = vadd.f32 %v3670_v57, %v10982_v21  ;;  %v2871_v21 = vand.u32 2147483647, %v2600_v25 }
 0xc58   :  { %v2851_v40 = vadd.f32 %v8886_v24, %v2850_v32 }
 0xc59   :  { %v8890_v13 = vpop.eup %8889  ;;  %vm2872_vm11 = vcmp.eq.f32.partialorder %v2871_v21, 8.507059e+37 }
 0xc5a   :  { %v2603_v17 = vpop.xlane.xlu0 %2602  ;;  %v2855_v47 = vsel %vm2854_vm6, %v8886_v24, %v2851_v40  ;;  %v2863_v15 = vmul.f32 %v8890_v13, %v2600_v25  ;;  %vm2868_vm8 = vweird.f32 %v8890_v13 }
 0xc5b   :  { %8891 = vrcp.f32 %v2603_v17  ;;  %v2860_v52 = vsel %vm2857_vm7, %v2859_v45, %v2855_v47  ;;  %vm2869_vm10 = vmor %vm2867_vm9, %vm2868_vm8  ;;  %v2888_v59 = vand.u32 2147483648, %v2603_v17  ;;  %vm2882_vm13 = vweird.f32 %v2603_v17 }
 0xc5c   :  { %v2864_v23 = vsub.f32 1.0, %v2863_v15  ;;  %v2861_v61 = vmul.f32 %v10908_v11, %v2860_v52  ;;  %v2874_v11 = vor.u32 1.1754944e-38, %v2873_v2 }
 0xc5d   :  { %v3057_v37 = vpop.f32.mrf.mxu0  ;;  %v2889_v4 = vor.u32 1.1754944e-38, %v2888_v59 }
 0xc5e   :  { %v2865_v43 = vmul.f32 %v8890_v13, %v2864_v23  ;;  %v3108_v60 = vmul.f32 %v3057_v37, %v10105_v26  ;;  %v2989_v14 = vpack.c.bf16 %v2861_v61, %v2846_v42  ;;  %v3642_v12 = vsel %vm2405_vm5, %v2861_v61, 0.0 }
 0xc5f   :  { %v11027_v50 = vadd.f32 %v3642_v12, %v10995_v41  ;;  %v2886_v41 = vand.u32 2147483647, %v2603_v17 }
 0xc60   :  { %v2866_v9 = vadd.f32 %v8890_v13, %v2865_v43  ;;  %v11029_v24 = vadd.f32 %v3126_v3, %v3108_v60  ;;  %7669 = vmatmul.msk.bf16.gmra.mxu0 %vm2405_vm5, %v2989_v14 }
 0xc61   :  { %v8892_v1 = vpop.eup %8891  ;;  %vm2887_vm1 = vcmp.eq.f32.partialorder %v2886_v41, 8.507059e+37  ;;  %v3103_v41 = vmul.f32 %v10960_v44, %v10070_v34 }
 0xc62   :  { %v2878_v16 = vmul.f32 %v8892_v1, %v2603_v17  ;;  %v2870_v10 = vsel %vm2869_vm10, %v8890_v13, %v2866_v9  ;;  %vm2883_vm12 = vweird.f32 %v8892_v1  ;;  %v2606_v47 = vpop.xlane.xlu1 %2605 }
 0xc63   :  { %v2875_v29 = vsel %vm2872_vm11, %v2874_v11, %v2870_v10  ;;  %vm2884_vm14 = vmor %vm2882_vm13, %vm2883_vm12  ;;  %8893 = vrcp.f32 %v2606_v47  ;;  %v2903_v51 = vand.u32 2147483648, %v2606_v47  ;;  %vm2897_vm2 = vweird.f32 %v2606_v47 }
 0xc64   :  { %v2879_v49 = vsub.f32 1.0, %v2878_v16  ;;  %v2876_v30 = vmul.f32 %v10920_v62, %v2875_v29  ;;  %v3106_v29 = vmul.f32 %v10998_v33, %v10091_v5 }
 0xc65   :  { %v3059_v15 = vpop.f32.mrf.mxu0  ;;  %v2904_v59 = vor.u32 1.1754944e-38, %v2903_v51 }
 0xc66   :  { %v2880_v42 = vmul.f32 %v8892_v1, %v2879_v49  ;;  %v3657_v32 = vsel %vm2405_vm5, %v2876_v30, 0.0  ;;  %v3133_v33 = vadd.f32 %v3106_v29, %v3103_v41 }
 0xc67   :  { %v11035_v8 = vadd.f32 %v3657_v32, %v11007_v63  ;;  %v3109_v32 = vmul.f32 %v3059_v15, %v10105_v26 }
 0xc68   :  { %v2881_v25 = vadd.f32 %v8892_v1, %v2880_v42 }
 0xc69   :  { %v8894_v17 = vpop.eup %8893 }
 0xc6a   :  { %v2885_v57 = vsel %vm2884_vm14, %v8892_v1, %v2881_v25  ;;  %v2893_v63 = vmul.f32 %v8894_v17, %v2606_v47  ;;  %vm2898_vm15 = vweird.f32 %v8894_v17  ;;  %v2901_v1 = vand.u32 2147483647, %v2606_v47 }
 0xc6b   :  { %v2890_v40 = vsel %vm2887_vm1, %v2889_v4, %v2885_v57  ;;  %vm11052_vm3 = vmor %vm2897_vm2, %vm2898_vm15 }
 0xc6c   :  { %v2891_v13 = vmul.f32 %v10930_v19, %v2890_v40  ;;  %v2894_v23 = vsub.f32 1.0, %v2893_v63  ;;  %v3104_v19 = vmul.f32 %v10974_v55, %v10070_v34  ;;  %vm2902_vm7 = vcmp.eq.f32.partialorder %v2901_v1, 8.507059e+37 }
 0xc6d   :  { %v3134_v63 = vadd.f32 %v3133_v33, %v3109_v32 }
 0xc6e   :  { %v2990_v28 = vpack.c.bf16 %v2891_v13, %v2876_v30  ;;  %v3672_v62 = vsel %vm2405_vm5, %v2891_v13, 0.0  ;;  %v3140_v3 = vadd.f32 %v3107_v53, %v3104_v19  ;;  %v2895_v21 = vmul.f32 %v8894_v17, %v2894_v23 }
 0xc6f   :  { %v11039_v45 = vadd.f32 %v3672_v62, %v3671_v7 }
 0xc70   :  { %7670 = vmatmul.msk.bf16.gmra.mxu0 %vm2405_vm5, %v2990_v28  ;;  %v2896_v14 = vadd.f32 %v8894_v17, %v2895_v21 }
 0xc72   :  { %v2900_v10 = vsel %vm11052_vm3, %v8894_v17, %v2896_v14 }
 0xc73   :  { %v2905_v13 = vsel %vm2902_vm7, %v2904_v59, %v2900_v10 }
 0xc74   :  { %v2906_v17 = vmul.f32 %v10934_v18, %v2905_v13 }
 0xc76   :  { %v3644_v10 = vsel %vm2405_vm5, %v2906_v17, 0.0 }
 0xcaa   :  { %v2609_v52 = vpop.xlane.xlu2 %2608 }
 0xcab   :  { %8895 = vrcp.f32 %v2609_v52  ;;  %v2918_v16 = vand.u32 2147483648, %v2609_v52  ;;  %v2916_v49 = vand.u32 2147483647, %v2609_v52  ;;  %vm2912_vm6 = vweird.f32 %v2609_v52 }
 0xcad   :  { %v3062_v61 = vpop.f32.mrf.mxu0  ;;  %v2919_v4 = vor.u32 1.1754944e-38, %v2918_v16  ;;  %vm2917_vm9 = vcmp.eq.f32.partialorder %v2916_v49, 8.507059e+37 }
 0xcae   :  { %v3110_v7 = vmul.f32 %v3062_v61, %v10105_v26 }
 0xcb0   :  { %v11047_v2 = vadd.f32 %v3140_v3, %v3110_v7 }
 0xcb1   :  { %v8896_v37 = vpop.eup %8895 }
 0xcb2   :  { %v2908_v43 = vmul.f32 %v8896_v37, %v2609_v52  ;;  %v11049_v60 = vpop.xlane.xlu0 %2611  ;;  %vm2913_vm4 = vweird.f32 %v8896_v37 }
 0xcb3   :  { %8897 = vrcp.f32 %v11049_v60  ;;  %vm2914_vm8 = vmor %vm2912_vm6, %vm2913_vm4  ;;  %v2933_v21 = vand.u32 2147483648, %v11049_v60  ;;  %vm2927_vm11 = vweird.f32 %v11049_v60 }
 0xcb4   :  { %v2909_v12 = vsub.f32 1.0, %v2908_v43 }
 0xcb5   :  { %v3064_v55 = vpop.f32.mrf.mxu0  ;;  %v2934_v9 = vor.u32 1.1754944e-38, %v2933_v21 }
 0xcb6   :  { %v2910_v11 = vmul.f32 %v8896_v37, %v2909_v12 }
 0xcb8   :  { %v2911_v30 = vadd.f32 %v8896_v37, %v2910_v11 }
 0xcb9   :  { %v8898_v42 = vpop.eup %8897 }
 0xcba   :  { %v2915_v25 = vsel %vm2914_vm8, %v8896_v37, %v2911_v30  ;;  %v2923_v57 = vmul.f32 %v8898_v42, %v11049_v60  ;;  %v2615_v40 = vpop.xlane.xlu1 %2614  ;;  %vm2928_vm10 = vweird.f32 %v8898_v42 }
 0xcbb   :  { %8899 = vrcp.f32 %v2615_v40  ;;  %v2920_v62 = vsel %vm2917_vm9, %v2919_v4, %v2915_v25  ;;  %vm11075_vm12 = vmor %vm2927_vm11, %vm2928_vm10  ;;  %v2948_v51 = vand.u32 2147483648, %v2615_v40  ;;  %v2946_v1 = vand.u32 2147483647, %v2615_v40 }
 0xcbc   :  { %v2924_v28 = vsub.f32 1.0, %v2923_v57  ;;  %v2921_v44 = vmul.f32 %v10963_v56, %v2920_v62  ;;  %v2931_v56 = vand.u32 2147483647, %v11049_v60  ;;  %vm2942_vm14 = vweird.f32 %v2615_v40 }
 0xcbd   :  { %v3067_v47 = vpop.f32.mrf.mxu0  ;;  %v3111_v60 = vmul.f32 %v3064_v55, %v10118_v48  ;;  %v2949_v29 = vor.u32 1.1754944e-38, %v2948_v51  ;;  %vm2947_vm2 = vcmp.eq.f32.partialorder %v2946_v1, 8.507059e+37 }
 0xcbe   :  { %v3112_v15 = vmul.f32 %v3067_v47, %v10118_v48  ;;  %v2925_v53 = vmul.f32 %v8898_v42, %v2924_v28  ;;  %v2991_v52 = vpack.c.bf16 %v2921_v44, %v2906_v17  ;;  %vm2932_vm1 = vcmp.eq.f32.partialorder %v2931_v56, 8.507059e+37 }
 0xcbf   :  { %v3128_v4 = vadd.f32 %v11029_v24, %v3111_v60 }
 0xcc0   :  { %v11067_v23 = vadd.f32 %v3134_v63, %v3112_v15  ;;  %7671 = vmatmul.msk.bf16.gmra.mxu0 %vm2405_vm5, %v2991_v52  ;;  %v2926_v7 = vadd.f32 %v8898_v42, %v2925_v53  ;;  %v3659_v53 = vsel %vm2405_vm5, %v2921_v44, 0.0 }
 0xcc1   :  { %v8900_v19 = vpop.eup %8899 }
 0xcc2   :  { %v2938_v61 = vmul.f32 %v8900_v19, %v2615_v40  ;;  %v2618_v3 = vpop.xlane.xlu2 %2617  ;;  %vm2943_vm13 = vweird.f32 %v8900_v19  ;;  %v2930_v12 = vsel %vm11075_vm12, %v8898_v42, %v2926_v7  ;;  %v3645_v42 = vadd.f32 %v3644_v10, %v11027_v50 }
 0xcc3   :  { %8901 = vrcp.f32 %v2618_v3  ;;  %vm2944_vm15 = vmor %vm2942_vm14, %vm2943_vm13  ;;  %v2935_v41 = vsel %vm2932_vm1, %v2934_v9, %v2930_v12  ;;  %v2963_v57 = vand.u32 2147483648, %v2618_v3  ;;  %v2961_v28 = vand.u32 2147483647, %v2618_v3 }
 0xcc4   :  { %v2939_v18 = vsub.f32 1.0, %v2938_v61  ;;  %v2936_v55 = vmul.f32 %v10977_v36, %v2935_v41  ;;  %vm2957_vm4 = vweird.f32 %v2618_v3 }
 0xcc5   :  { %v11073_v37 = vpop.f32.mrf.mxu0  ;;  %v2964_v36 = vor.u32 1.1754944e-38, %v2963_v57  ;;  %vm2962_vm7 = vcmp.eq.f32.partialorder %v2961_v28, 8.507059e+37  ;;  %v8481_v28 = vld [vmem:[#allocation25 + $0x18] sm:$0xff] }
 0xcc6   :  { %v2940_v14 = vmul.f32 %v8900_v19, %v2939_v18  ;;  %v3660_v18 = vadd.f32 %v3659_v53, %v11035_v8 }
 0xcc8   :  { %v2941_v11 = vadd.f32 %v8900_v19, %v2940_v14 }
 0xcc9   :  { %v8902_v16 = vpop.eup %8901 }
 0xcca   :  { %v2945_v49 = vsel %vm2944_vm15, %v8900_v19, %v2941_v11  ;;  %v2953_v59 = vmul.f32 %v8902_v16, %v2618_v3  ;;  %v2621_v30 = vpop.xlane.xlu0 %2620  ;;  %vm2958_vm3 = vweird.f32 %v8902_v16 }
 0xccb   :  { %8903 = vrcp.f32 %v2621_v30  ;;  %v2950_v25 = vsel %vm2947_vm2, %v2949_v29, %v2945_v49  ;;  %vm2959_vm6 = vmor %vm2957_vm4, %vm2958_vm3  ;;  %v2978_v56 = vand.u32 2147483648, %v2621_v30  ;;  %v2976_v14 = vand.u32 2147483647, %v2621_v30 }
 0xccc   :  { %v2954_v32 = vsub.f32 1.0, %v2953_v59  ;;  %v2951_v13 = vmul.f32 %v10989_v54, %v2950_v25  ;;  %vm2972_vm9 = vweird.f32 %v2621_v30 }
 0xccd   :  { %v3072_v40 = vpop.f32.mrf.mxu0  ;;  %v2979_v9 = vor.u32 1.1754944e-38, %v2978_v56  ;;  %vm2977_vm11 = vcmp.eq.f32.partialorder %v2976_v14, 8.507059e+37 }
 0xcce   :  { %v2955_v33 = vmul.f32 %v8902_v16, %v2954_v32  ;;  %v3114_v62 = vmul.f32 %v3072_v40, %v10065_v31  ;;  %v2992_v47 = vpack.c.bf16 %v2951_v13, %v2936_v55  ;;  %v3646_v17 = vsel %vm2405_vm5, %v2951_v13, 0.0  ;;  %v8485_v40 = vld [vmem:[#allocation25 + $0x38] sm:$0xff]  ;;  %v8482_v13 = vld [vmem:[#allocation25 + $0x20] sm:$0xff] }
 0xccf   :  { %v3647_v15 = vadd.f32 %v3646_v17, %v3645_v42  ;;  %3217 = vmatpush.bf16.msra.mxu2 %v8485_v40  ;;  %v8479_v17 = vld [vmem:[#allocation25 + $0x8] sm:$0xff] }
 0xcd0   :  { %v2956_v63 = vadd.f32 %v8902_v16, %v2955_v33  ;;  %v11089_v50 = vadd.f32 %v3128_v4, %v3114_v62  ;;  %7672 = vmatmul.msk.bf16.gmra.mxu0 %vm2405_vm5, %v2992_v47  ;;  %v8480_v62 = vld [vmem:[#allocation25 + $0x10] sm:$0xff] }
 0xcd1   :  { %v8904_v24 = vpop.eup %8903  ;;  %v3678_v19 = vmul.f32 %v3647_v15, %v10450_v0 }
 0xcd2   :  { %v2960_v54 = vsel %vm2959_vm6, %v8902_v16, %v2956_v63  ;;  %v2968_v52 = vmul.f32 %v8904_v24, %v2621_v30  ;;  %vm2973_vm8 = vweird.f32 %v8904_v24  ;;  %v3674_v16 = vsel %vm2405_vm5, %v2936_v55, 0.0  ;;  %v8478_v63 = vld [vmem:[#allocation25] sm:$0xff] }
 0xcd3   :  { %v2965_v61 = vsel %vm2962_vm7, %v2964_v36, %v2960_v54  ;;  %v3681_v3 = vsel %vm2405_vm5, %v3678_v19, 0.0  ;;  %vm2974_vm10 = vmor %vm2972_vm9, %vm2973_vm8  ;;  %v3675_v29 = vadd.f32 %v3674_v16, %v11039_v45  ;;  %v8484_v45 = vld [vmem:[#allocation25 + $0x30] sm:$0xff] }
 0xcd4   :  { %v2969_v7 = vsub.f32 1.0, %v2968_v52  ;;  %v2966_v21 = vmul.f32 %v11001_v58, %v2965_v61  ;;  %3684 = vst [vmem:[%s9878_s14] sm:$0xff] %v3681_v3  ;;  %v3113_v58 = vmul.f32 %v11073_v37, %v10118_v48  ;;  %3218 = vmatpush.bf16.msra.mxu2 %v8484_v45 }
 0xcd5   :  { %v3074_v44 = vpop.f32.mrf.mxu0 }
 0xcd6   :  { %v2970_v43 = vmul.f32 %v8904_v24, %v2969_v7  ;;  %v3661_v51 = vsel %vm2405_vm5, %v2966_v21, 0.0  ;;  %v3142_v30 = vadd.f32 %v11047_v2, %v3113_v58  ;;  %v8483_v2 = vld [vmem:[#allocation25 + $0x28] sm:$0xff]  ;;  %v3115_v36 = vmul.f32 %v3074_v44, %v10065_v31 }
 0xcd7   :  { %v3662_v12 = vadd.f32 %v3661_v51, %v3660_v18 }
 0xcd8   :  { %v2971_v1 = vadd.f32 %v8904_v24, %v2970_v43  ;;  %3219 = vmatpush.bf16.msra.mxu2 %v8483_v2  ;;  %v3136_v19 = vadd.f32 %v11067_v23, %v3115_v36  ;;  %v8499_v36 = vld [vmem:[#allocation26 + $0x64] sm:$0xf0] }
 0xcd9   :  { %v3679_v11 = vmul.f32 %v3662_v12, %v10450_v0 }
 0xcda   :  { %v2975_v8 = vsel %vm2974_vm10, %v8904_v24, %v2971_v1 }
 0xcdb   :  { %v2980_v60 = vsel %vm2977_vm11, %v2979_v9, %v2975_v8  ;;  %v3682_v10 = vsel %vm2405_vm5, %v3679_v11, 0.0 }
 0xcdc   :  { %v2981_v49 = vmul.f32 %v11013_v22, %v2980_v60  ;;  %3685 = vst [vmem:[%s9878_s14 + $0x8] sm:$0xff] %v3682_v10  ;;  %3220 = vmatpush.bf16.msra.mxu2 %v8482_v13  ;;  %v8719_v10 = vld [vmem:[%s12573_s13] ss:$0 sm:$0xff] }
 0xcdd   :  { %v3077_v59 = vpop.f32.mrf.mxu0 }
 0xcde   :  { %v3116_v41 = vmul.f32 %v3077_v59, %v10065_v31  ;;  %v2993_v42 = vpack.c.bf16 %v2981_v49, %v2966_v21  ;;  %v3676_v37 = vsel %vm2405_vm5, %v2981_v49, 0.0 }
 0xcdf   :  { %v3677_v32 = vadd.f32 %v3676_v37, %v3675_v29 }
 0xce0   :  { %v3143_v25 = vadd.f32 %v3142_v30, %v3116_v41  ;;  %7673 = vmatmul.msk.bf16.gmra.mxu0 %vm2405_vm5, %v2993_v42  ;;  %3221 = vmatpush.bf16.msra.mxu2 %v8481_v28 }
 0xce1   :  { %v3680_v4 = vmul.f32 %v3677_v32, %v10450_v0 }
 0xce3   :  { %v3683_v57 = vsel %vm2405_vm5, %v3680_v4, 0.0 }
 0xce4   :  { %3686 = vst [vmem:[%s9878_s14 + $0x10] sm:$0xff] %v3683_v57  ;;  %3222 = vmatpush.bf16.msra.mxu2 %v8480_v62  ;;  %v7764_v62 = vld [vmem:[#allocation26 + $0x70] sm:$0xf] }
 0xce5   :  { %v3079_v22 = vpop.f32.mrf.mxu0 }
 0xce6   :  { %v3117_v54 = vmul.f32 %v3079_v22, %v10072_v35 }
 0xce8   :  { %3223 = vmatpush.bf16.msra.mxu2 %v8479_v17  ;;  %v3130_v3 = vadd.f32 %v11089_v50, %v3117_v54  ;;  %v8500_v17 = vld [vmem:[#allocation26 + $0x74] sm:$0xf]  ;;  %v8498_v54 = vld [vmem:[#allocation26 + $0x64] sm:$0xf] }
 0xcec   :  { %3224 = vmatpush.bf16.msra.mxu2 %v8478_v63 }
 0xced   :  { %v3082_v55 = vpop.f32.mrf.mxu0 }
 0xcee   :  { %v3118_v52 = vmul.f32 %v3082_v55, %v10072_v35 }
 0xcf0   :  { %v3137_v21 = vadd.f32 %v3136_v19, %v3118_v52  ;;  %v7758_v19 = vld [vmem:[#allocation26 + $0x68] sm:$0xf0] }
 0xcf5   :  { %v3084_v33 = vpop.f32.mrf.mxu0 }
 0xcf6   :  { %v3119_v23 = vmul.f32 %v3084_v33, %v10072_v35 }
 0xcf8   :  { %v3144_v58 = vadd.f32 %v3143_v25, %v3119_v23 }
 0xd3d   :  { %v3087_v47 = vpop.f32.mrf.mxu0 }
 0xd3e   :  { %v3120_v61 = vmul.f32 %v3087_v47, %v10093_v6  ;;  %v8501_v47 = vld [vmem:[#allocation26 + $0x74] sm:$0xf0] }
 0xd3f   :  { %v7765_v63 = vor.u32 %v8501_v47, %v7764_v62 }
 0xd40   :  { %v3131_v43 = vadd.f32 %v3130_v3, %v3120_v61  ;;  %v7761_v61 = vor.u32 %v8498_v54, %v7758_v19  ;;  %v8497_v3 = vld [vmem:[#allocation26 + $0x54] sm:$0xf0] }
 0xd41   :  { %3416 = vmatpush.bf16.msra.mxu3 %v7765_v63 }
 0xd45   :  { %v3089_v15 = vpop.f32.mrf.mxu0 }
 0xd46   :  { %v3121_v7 = vmul.f32 %v3089_v15, %v10093_v6  ;;  %v7766_v15 = vld [vmem:[#allocation26 + $0x78] sm:$0xf0] }
 0xd48   :  { %v3138_v14 = vadd.f32 %v3137_v21, %v3121_v7  ;;  %v7748_v7 = vld [vmem:[#allocation26 + $0x50] sm:$0xf]  ;;  %v8496_v21 = vld [vmem:[#allocation26 + $0x54] sm:$0xf] }
 0xd4d   :  { %v3092_v24 = vpop.f32.mrf.mxu0 }
 0xd4e   :  { %v3122_v11 = vmul.f32 %v3092_v24, %v10093_v6  ;;  %v7769_v24 = vor.u32 %v8500_v17, %v7766_v15 }
 0xd50   :  { %v3145_v8 = vadd.f32 %v3144_v58, %v3122_v11  ;;  %3434 = vmatpush.bf16.msrb.mxu2 %v7769_v24  ;;  %v7732_v11 = vld [vmem:[#allocation26 + $0x30] sm:$0xf]  ;;  %v8493_v58 = vld [vmem:[#allocation26 + $0x34] sm:$0xf0] }
 0xd54   :  { %3435 = vmatpush.bf16.msrb.mxu2 %v7761_v61 }
 0xd55   :  { %v3094_v53 = vpop.f32.mrf.mxu0 }
 0xd56   :  { %v3123_v18 = vmul.f32 %v3094_v53, %v10107_v27  ;;  %v7756_v53 = vld [vmem:[#allocation26 + $0x60] sm:$0xf] }
 0xd57   :  { %v7757_v52 = vor.u32 %v8499_v36, %v7756_v53 }
 0xd58   :  { %v3132_v51 = vadd.f32 %v3131_v43, %v3123_v18  ;;  %v7749_v18 = vor.u32 %v8497_v3, %v7748_v7 }
 0xd59   :  { %3417 = vmatpush.bf16.msra.mxu3 %v7757_v52 }
 0xd5d   :  { %v3097_v56 = vpop.f32.mrf.mxu0  ;;  %3418 = vmatpush.bf16.msra.mxu3 %v7749_v18  ;;  %v8509_v18 = vld [vmem:[#allocation28 + $0x38] sm:$0xff] }
 0xd5e   :  { %v3124_v44 = vmul.f32 %v3097_v56, %v10107_v27  ;;  %v7750_v56 = vld [vmem:[#allocation26 + $0x58] sm:$0xf0] }
 0xd5f   :  { %v7753_v43 = vor.u32 %v8496_v21, %v7750_v56  ;;  %v8517_v56 = vld [vmem:[#allocation28 + $0x78] sm:$0xff] }
 0xd60   :  { %v3139_v12 = vadd.f32 %v3138_v14, %v3124_v44  ;;  %v7740_v14 = vld [vmem:[#allocation26 + $0x40] sm:$0xf]  ;;  %v8495_v44 = vld [vmem:[#allocation26 + $0x44] sm:$0xf0] }
 0xd61   :  { %3436 = vmatpush.bf16.msrb.mxu2 %v7753_v43 }
 0xd62   :  { %v3147_v1 = vpack.c.bf16 %v3139_v12, %v3132_v51  ;;  %v8494_v51 = vld [vmem:[#allocation26 + $0x44] sm:$0xf]  ;;  %v7741_v12 = vor.u32 %v8495_v44, %v7740_v14  ;;  %v8508_v44 = vld [vmem:[#allocation28 + $0x30] sm:$0xff] }
 0xd64   :  { %3225 = vmatmul.bf16.vlgmr.msra.gmra.mxu2 %v3147_v1  ;;  %v7742_v1 = vld [vmem:[#allocation26 + $0x48] sm:$0xf0]  ;;  %3419 = vmatpush.bf16.msra.mxu3 %v7741_v12 }
 0xd65   :  { %v3099_v9 = vpop.f32.mrf.mxu0  ;;  %v7745_v23 = vor.u32 %v8494_v51, %v7742_v1  ;;  %v8516_v51 = vld [vmem:[#allocation28 + $0x70] sm:$0xff] }
 0xd66   :  { %v3125_v50 = vmul.f32 %v3099_v9, %v10107_v27 }
 0xd67   :  { %3437 = vmatpush.bf16.msrb.mxu2 %v7745_v23  ;;  %v8720_v23 = vld [vmem:[%s12574_s18] ss:$0 sm:$0xff] }
 0xd68   :  { %v3146_v16 = vadd.f32 %v3145_v8, %v3125_v50  ;;  %v8492_v50 = vld [vmem:[#allocation26 + $0x34] sm:$0xf] }
 0xd6a   :  { %v3148_v60 = vpack.c.bf16 %v3146_v16, %v3146_v16  ;;  %v7733_v16 = vor.u32 %v8493_v58, %v7732_v11 }
 0xd6c   :  { %3420 = vmatpush.bf16.msra.mxu3 %v7733_v16 }
 0xd74   :  { %3230 = vmatmul.bf16.gmra.mxu2 %v3148_v60  ;;  %v7734_v60 = vld [vmem:[#allocation26 + $0x38] sm:$0xf0] }
 0xde7   :  { %v3226_v49 = vpop.f32.mrf.mxu2 }
 0xde8   :  { %v3227_v29 = vadd.f32 %v8719_v10, %v3226_v49 }
 0xdea   :  { %v3235_v59 = vadd.f32 %v3227_v29, %v10516_v38  ;;  %v7724_v29 = vld [vmem:[#allocation26 + $0x20] sm:$0xf] }
 0xdec   :  { %3240 = vadd.xlane.f32.xlu1 %v3235_v59 }
 0xdef   :  { %v3228_v30 = vpop.f32.mrf.mxu2 }
 0xdf0   :  { %v3229_v41 = vadd.f32 %v8719_v10, %v3228_v30  ;;  %v8490_v30 = vld [vmem:[#allocation26 + $0x24] sm:$0xf] }
 0xdf2   :  { %v3236_v42 = vadd.f32 %v3229_v41, %v10520_v39 }
 0xdf4   :  { %3242 = vadd.xlane.f32.xlu2 %v3236_v42 }
 0xdf7   :  { %v3231_v37 = vpop.f32.mrf.mxu2 }
 0xdf8   :  { %v3232_v32 = vadd.f32 %v8719_v10, %v3231_v37  ;;  %v7737_v10 = vor.u32 %v8492_v50, %v7734_v60  ;;  %v8507_v50 = vld [vmem:[#allocation28 + $0x28] sm:$0xff] }
 0xdfa   :  { %v3237_v25 = vadd.f32 %v3232_v32, %v10526_v46  ;;  %3438 = vmatpush.bf16.msrb.mxu2 %v7737_v10  ;;  %v7716_v32 = vld [vmem:[#allocation26 + $0x10] sm:$0xf]  ;;  %v8721_v10 = vld [vmem:[%s12575_s0] ss:$0 sm:$0xff] }
 0xdfc   :  { %3244 = vadd.xlane.f32.xlu0 %v3237_v25 }
 0xdff   :  { %v3233_v4 = vpop.f32.mrf.mxu2 }
 0xe00   :  { %v8488_v4 = vld [vmem:[#allocation26 + $0x14] sm:$0xf] }
 0xe5f   :  { %v3241_v57 = vpop.xlane.xlu1 %3240 }
 0xe60   :  { %v3246_v22 = vmul.f32 %v3241_v57, %v10487_v20 }
 0xe62   :  { %v11131_v40 = vsub.f32 %v3235_v59, %v3246_v22  ;;  %v8491_v59 = vld [vmem:[#allocation26 + $0x24] sm:$0xf0] }
 0xe63   :  { %v7725_v41 = vor.u32 %v8491_v59, %v7724_v29 }
 0xe64   :  { %v3252_v38 = vmul.f32 %v11131_v40, %v11131_v40 }
 0xe65   :  { %3421 = vmatpush.bf16.msra.mxu3 %v7725_v41  ;;  %v8506_v41 = vld [vmem:[#allocation28 + $0x20] sm:$0xff] }
 0xe66   :  { %3255 = vadd.xlane.f32.xlu1 %v3252_v38  ;;  %v7718_v38 = vld [vmem:[#allocation26 + $0x18] sm:$0xf0] }
 0xe67   :  { %v3243_v45 = vpop.xlane.xlu2 %3242 }
 0xe68   :  { %v3247_v55 = vmul.f32 %v3243_v45, %v10487_v20  ;;  %v7708_v45 = vld [vmem:[#allocation26] sm:$0xf] }
 0xe6a   :  { %v11136_v39 = vsub.f32 %v3236_v42, %v3247_v55  ;;  %v7726_v42 = vld [vmem:[#allocation26 + $0x28] sm:$0xf0]  ;;  %v8487_v55 = vld [vmem:[#allocation26 + $0x4] sm:$0xf0] }
 0xe6b   :  { %v7729_v37 = vor.u32 %v8490_v30, %v7726_v42  ;;  %v7709_v17 = vor.u32 %v8487_v55, %v7708_v45  ;;  %v8505_v55 = vld [vmem:[#allocation28 + $0x18] sm:$0xff] }
 0xe6c   :  { %v3253_v2 = vmul.f32 %v11136_v39, %v11136_v39 }
 0xe6d   :  { %3439 = vmatpush.bf16.msrb.mxu2 %v7729_v37 }
 0xe6e   :  { %3257 = vadd.xlane.f32.xlu2 %v3253_v2 }
 0xe6f   :  { %v3245_v46 = vpop.xlane.xlu0 %3244 }
 0xe70   :  { %v3248_v13 = vmul.f32 %v3245_v46, %v10487_v20  ;;  %v7721_v46 = vor.u32 %v8488_v4, %v7718_v38 }
 0xe72   :  { %v11141_v33 = vsub.f32 %v3237_v25, %v3248_v13  ;;  %v8489_v25 = vld [vmem:[#allocation26 + $0x14] sm:$0xf0]  ;;  %v8486_v13 = vld [vmem:[#allocation26 + $0x4] sm:$0xf]  ;;  %3440 = vmatpush.bf16.msrb.mxu2 %v7721_v46  ;;  %v8504_v46 = vld [vmem:[#allocation28 + $0x10] sm:$0xff] }
 0xe73   :  { %v7717_v22 = vor.u32 %v8489_v25, %v7716_v32 }
 0xe74   :  { %v3254_v28 = vmul.f32 %v11141_v33, %v11141_v33 }
 0xe75   :  { %3422 = vmatpush.bf16.msra.mxu3 %v7717_v22 }
 0xe76   :  { %3259 = vadd.xlane.f32.xlu0 %v3254_v28  ;;  %v7710_v28 = vld [vmem:[#allocation26 + $0x8] sm:$0xf0] }
 0xe77   :  { %v7713_v15 = vor.u32 %v8486_v13, %v7710_v28  ;;  %v8512_v13 = vld [vmem:[#allocation28 + $0x50] sm:$0xff]  ;;  %v8503_v28 = vld [vmem:[#allocation28 + $0x8] sm:$0xff] }
 0xe79   :  { %3423 = vmatpush.bf16.msra.mxu3 %v7709_v17  ;;  %3441 = vmatpush.bf16.msrb.mxu2 %v7713_v15  ;;  %v3330_v17 = vld [vmem:[%s12576_s16] sm:$0x3]  ;;  %v8533_v15 = vld [vmem:[#allocation22 + $0xf4] sm:$0xf0] }
 0xe7d   :  { %3594 = vmatpush.bf16.msrb.mxu3 %v8509_v18  ;;  %3612 = vmatpush.bf16.msra.mxu2 %v8517_v56  ;;  %v3332_v56 = vperm.slane %v3330_v17, 0 }
 0xe81   :  { %3595 = vmatpush.bf16.msrb.mxu3 %v8508_v44  ;;  %3613 = vmatpush.bf16.msra.mxu2 %v8516_v51  ;;  %v7877_v44 = vld [vmem:[#allocation22 + $0xd0] sm:$0xf]  ;;  %v8529_v51 = vld [vmem:[#allocation22 + $0xd4] sm:$0xf0] }
 0xe85   :  { %3596 = vmatpush.bf16.msrb.mxu3 %v8507_v50 }
 0xe89   :  { %3597 = vmatpush.bf16.msrb.mxu3 %v8506_v41 }
 0xe8d   :  { %3598 = vmatpush.bf16.msrb.mxu3 %v8505_v55 }
 0xe91   :  { %3599 = vmatpush.bf16.msrb.mxu3 %v8504_v46  ;;  %v7869_v46 = vld [vmem:[#allocation22 + $0xc0] sm:$0xf] }
 0xe95   :  { %3600 = vmatpush.bf16.msrb.mxu3 %v8503_v28  ;;  %v8526_v28 = vld [vmem:[#allocation22 + $0xc4] sm:$0xf] }
 0xed9   :  { %v3256_v9 = vpop.xlane.xlu1 %3255 }
 0xeda   :  { %v3261_v8 = vmul.f32 %v3256_v9, %v10487_v20 }
 0xedc   :  { %v3264_v49 = vadd.f32 1e-05, %v3261_v8  ;;  %v8515_v8 = vld [vmem:[#allocation28 + $0x68] sm:$0xff] }
 0xedd   :  { %3614 = vmatpush.bf16.msra.mxu2 %v8515_v8 }
 0xede   :  { %8905 = vrsqrt.f32 %v3264_v49  ;;  %vm3273_vm13 = vweird.f32 %v3264_v49 }
 0xee1   :  { %v3258_v57 = vpop.xlane.xlu2 %3257 }
 0xee2   :  { %v3262_v2 = vmul.f32 %v3258_v57, %v10487_v20 }
 0xee4   :  { %v8906_v62 = vpop.eup %8905  ;;  %v3265_v47 = vadd.f32 1e-05, %v3262_v2  ;;  %v8513_v2 = vld [vmem:[#allocation28 + $0x58] sm:$0xff] }
 0xee5   :  { %v3268_v63 = vmul.f32 %v8906_v62, %v3264_v49  ;;  %vm3274_vm12 = vweird.f32 %v8906_v62 }
 0xee6   :  { %8907 = vrsqrt.f32 %v3265_v47  ;;  %vm3275_vm14 = vmor %vm3273_vm13, %vm3274_vm12  ;;  %vm3283_vm15 = vweird.f32 %v3265_v47 }
 0xee7   :  { %v3269_v24 = vmul.f32 %v8906_v62, %v3268_v63  ;;  %v7893_v63 = vld [vmem:[#allocation22 + $0xf0] sm:$0xf] }
 0xee9   :  { %v3270_v53 = vmul.f32 0.5, %v3269_v24  ;;  %v3260_v36 = vpop.xlane.xlu0 %3259  ;;  %v8532_v24 = vld [vmem:[#allocation22 + $0xf4] sm:$0xf] }
 0xeea   :  { %v3263_v54 = vmul.f32 %v3260_v36, %v10487_v20 }
 0xeeb   :  { %v3271_v52 = vsub.f32 1.5, %v3270_v53 }
 0xeec   :  { %v8908_v19 = vpop.eup %8907  ;;  %v3266_v61 = vadd.f32 1e-05, %v3263_v54  ;;  %v7894_v54 = vor.u32 %v8533_v15, %v7893_v63  ;;  %v8524_v15 = vld [vmem:[#allocation22 + $0xb4] sm:$0xf] }
 0xeed   :  { %v3272_v7 = vmul.f32 %v8906_v62, %v3271_v52  ;;  %v3278_v3 = vmul.f32 %v8908_v19, %v3265_v47  ;;  %vm3284_vm1 = vweird.f32 %v8908_v19  ;;  %v8510_v47 = vld [vmem:[#allocation28 + $0x40] sm:$0xff]  ;;  %v7895_v52 = vld [vmem:[#allocation22 + $0xf8] sm:$0xf0] }
 0xeee   :  { %8909 = vrsqrt.f32 %v3266_v61  ;;  %vm3285_vm2 = vmor %vm3283_vm15, %vm3284_vm1  ;;  %vm3293_vm4 = vweird.f32 %v3266_v61 }
 0xeef   :  { %v3279_v21 = vmul.f32 %v8908_v19, %v3278_v3  ;;  %v3276_v43 = vsel %vm3275_vm14, %v8906_v62, %v3272_v7  ;;  %v8511_v62 = vld [vmem:[#allocation28 + $0x48] sm:$0xff]  ;;  %v7898_v7 = vor.u32 %v8532_v24, %v7895_v52  ;;  %v8530_v3 = vld [vmem:[#allocation22 + $0xe4] sm:$0xf]  ;;  %v7863_v24 = vld [vmem:[#allocation22 + $0xb8] sm:$0xf0] }
 0xef0   :  { %v3297_v9 = vmul.f32 %v3276_v43, %v11131_v40  ;;  %v8514_v40 = vld [vmem:[#allocation28 + $0x60] sm:$0xff]  ;;  %v3333_v43 = vperm.slane %v3330_v17, 1  ;;  %v8525_v17 = vld [vmem:[#allocation22 + $0xb4] sm:$0xf0]  ;;  %v8523_v52 = vld [vmem:[#allocation22 + $0xa4] sm:$0xf0] }
 0xef1   :  { %v3280_v14 = vmul.f32 0.5, %v3279_v21  ;;  %3615 = vmatpush.bf16.msra.mxu2 %v8514_v40  ;;  %v7887_v21 = vld [vmem:[#allocation22 + $0xe8] sm:$0xf0] }
 0xef2   :  { %v3303_v49 = vmul.f32 %v8720_v23, %v3297_v9 }
 0xef3   :  { %v3281_v12 = vsub.f32 1.5, %v3280_v14  ;;  %v7890_v14 = vor.u32 %v8530_v3, %v7887_v21  ;;  %v7845_v3 = vld [vmem:[#allocation22 + $0x90] sm:$0xf]  ;;  %v8521_v21 = vld [vmem:[#allocation22 + $0x94] sm:$0xf0] }
 0xef4   :  { %v8910_v1 = vpop.eup %8909  ;;  %v11152_v37 = vadd.f32 %v8721_v10, %v3303_v49 }
 0xef5   :  { %v3282_v11 = vmul.f32 %v8908_v19, %v3281_v12  ;;  %v3288_v58 = vmul.f32 %v8910_v1, %v3266_v61  ;;  %vm3294_vm3 = vweird.f32 %v8910_v1  ;;  %3616 = vmatpush.bf16.msra.mxu2 %v8513_v2  ;;  %v8531_v61 = vld [vmem:[#allocation22 + $0xe4] sm:$0xf0]  ;;  %v8528_v12 = vld [vmem:[#allocation22 + $0xd4] sm:$0xf] }
 0xef6   :  { %vm3295_vm6 = vmor %vm3293_vm4, %vm3294_vm3 }
 0xef7   :  { %v3286_v16 = vsel %vm3285_vm2, %v8908_v19, %v3282_v11  ;;  %v3289_v60 = vmul.f32 %v8910_v1, %v3288_v58  ;;  %v7885_v19 = vld [vmem:[#allocation22 + $0xe0] sm:$0xf] }
 0xef8   :  { %v3298_v29 = vmul.f32 %v3286_v16, %v11136_v39  ;;  %v7886_v18 = vor.u32 %v8531_v61, %v7885_v19  ;;  %v8522_v19 = vld [vmem:[#allocation22 + $0xa4] sm:$0xf] }
 0xef9   :  { %v3290_v59 = vmul.f32 0.5, %v3289_v60  ;;  %3617 = vmatpush.bf16.msra.mxu2 %v8512_v13  ;;  %v8527_v13 = vld [vmem:[#allocation22 + $0xc4] sm:$0xf0] }
 0xefa   :  { %v3304_v30 = vmul.f32 %v8720_v23, %v3298_v29 }
 0xefb   :  { %v3291_v42 = vsub.f32 1.5, %v3290_v59 }
 0xefc   :  { %v11154_v32 = vadd.f32 %v8721_v10, %v3304_v30 }
 0xefd   :  { %v3292_v25 = vmul.f32 %v8910_v1, %v3291_v42  ;;  %3618 = vmatpush.bf16.msra.mxu2 %v8511_v62  ;;  %v7870_v62 = vor.u32 %v8527_v13, %v7869_v46 }
 0xefe   :  { %v3312_v4 = vpack.c.bf16 %v11154_v32, %v11152_v37 }
 0xeff   :  { %v3296_v39 = vsel %vm3295_vm6, %v8910_v1, %v3292_v25  ;;  %v7879_v1 = vld [vmem:[#allocation22 + $0xd8] sm:$0xf0] }
 0xf00   :  { %3424 = vmatmul.bf16.vlgmr.msra.gmra.mxu3 %v3312_v4  ;;  %3442 = vmatmul.bf16.vlgmr.msrb.gmra.mxu2 %v3312_v4  ;;  %v3299_v57 = vmul.f32 %v3296_v39, %v11141_v33  ;;  %v8502_v33 = vld [vmem:[#allocation28] sm:$0xff]  ;;  %v7882_v58 = vor.u32 %v8528_v12, %v7879_v1  ;;  %v8519_v12 = vld [vmem:[#allocation22 + $0x84] sm:$0xf0] }
 0xf01   :  { %3601 = vmatpush.bf16.msrb.mxu3 %v8502_v33  ;;  %3619 = vmatpush.bf16.msra.mxu2 %v8510_v47  ;;  %v7871_v33 = vld [vmem:[#allocation22 + $0xc8] sm:$0xf0]  ;;  %v7861_v47 = vld [vmem:[#allocation22 + $0xb0] sm:$0xf]  ;;  %v8518_v1 = vld [vmem:[#allocation22 + $0x84] sm:$0xf] }
 0xf02   :  { %v3305_v22 = vmul.f32 %v8720_v23, %v3299_v57  ;;  %v7878_v23 = vor.u32 %v8529_v51, %v7877_v44  ;;  %v7874_v63 = vor.u32 %v8526_v28, %v7871_v33  ;;  %v7837_v51 = vld [vmem:[#allocation22 + $0x80] sm:$0xf]  ;;  %v8535_v28 = vld [vmem:[#allocation23 + $0x48] sm:$0xff] }
 0xf03   :  { %v8534_v33 = vld [vmem:[#allocation23 + $0x40] sm:$0xff] }
 0xf04   :  { %v11159_v38 = vadd.f32 %v8721_v10, %v3305_v22 }
 0xf05   :  { %3796 = vmatpush.bf16.msra.mxu3 %v7894_v54  ;;  %3814 = vmatpush.bf16.msrb.mxu2 %v7898_v7  ;;  %v7853_v54 = vld [vmem:[#allocation22 + $0xa0] sm:$0xf]  ;;  %v7855_v7 = vld [vmem:[#allocation22 + $0xa8] sm:$0xf0] }
 0xf06   :  { %v3313_v45 = vpack.c.bf16 %v11159_v38, %v11159_v38  ;;  %v7854_v61 = vor.u32 %v8523_v52, %v7853_v54  ;;  %v7834_v52 = vld [vmem:[%s12560_s8 + $0x2] sm:$0x3] }
 0xf09   :  { %3797 = vmatpush.bf16.msra.mxu3 %v7886_v18  ;;  %3815 = vmatpush.bf16.msrb.mxu2 %v7890_v14  ;;  %v7858_v18 = vor.u32 %v8522_v19, %v7855_v7  ;;  %v7846_v14 = vor.u32 %v8521_v21, %v7845_v3  ;;  %v3712_v19 = vperm.slane %v7834_v52, 0 }
 0xf0d   :  { %3798 = vmatpush.bf16.msra.mxu3 %v7878_v23  ;;  %3816 = vmatpush.bf16.msrb.mxu2 %v7882_v58  ;;  %v7839_v23 = vld [vmem:[#allocation22 + $0x88] sm:$0xf0]  ;;  %v8541_v58 = vld [vmem:[#allocation23 + $0x78] sm:$0xff] }
 0xf10   :  { %3429 = vmatmul.bf16.gmra.mxu3 %v3313_v45  ;;  %3447 = vmatmul.bf16.gmra.mxu2 %v3313_v45 }
 0xf11   :  { %3799 = vmatpush.bf16.msra.mxu3 %v7870_v62  ;;  %3817 = vmatpush.bf16.msrb.mxu2 %v7874_v63 }
 0xf83   :  { %v3425_v53 = vpop.f32.mrf.mxu3  ;;  %v3443_v36 = vpop.f32.mrf.mxu2 }
 0xf84   :  { %v3426_v9 = vadd.f32 %v3425_v53, %v3332_v56  ;;  %v3444_v11 = vadd.f32 %v3443_v36, %v3333_v43  ;;  %v7862_v53 = vor.u32 %v8525_v17, %v7861_v47  ;;  %v7866_v36 = vor.u32 %v8524_v15, %v7863_v24  ;;  %v9117_v15 = vld [vmem:[%s12559_s4 + $0x10] sm:$0xff] }
 0xf86   :  { %v3452_v10 = vmax.f32 %v3426_v9, 0.0  ;;  %v3453_v49 = vmax.f32 %v3444_v11, 0.0  ;;  %3800 = vmatpush.bf16.msra.mxu3 %v7862_v53  ;;  %3818 = vmatpush.bf16.msrb.mxu2 %v7866_v36  ;;  %v7838_v9 = vor.u32 %v8519_v12, %v7837_v51  ;;  %v7842_v11 = vor.u32 %v8518_v1, %v7839_v23 }
 0xf8a   :  { %3801 = vmatpush.bf16.msra.mxu3 %v7854_v61  ;;  %3819 = vmatpush.bf16.msrb.mxu2 %v7858_v18 }
 0xf8b   :  { %v3427_v50 = vpop.f32.mrf.mxu3  ;;  %v3445_v8 = vpop.f32.mrf.mxu2 }
 0xf8c   :  { %v3428_v16 = vadd.f32 %v3427_v50, %v3332_v56  ;;  %v3446_v60 = vadd.f32 %v3445_v8, %v3333_v43  ;;  %v8540_v50 = vld [vmem:[#allocation23 + $0x70] sm:$0xff]  ;;  %v8722_v8 = vld [vmem:[#allocation29] ss:$0 sm:$0xff] }
 0xf8e   :  { %v3454_v29 = vmax.f32 %v3428_v16, 0.0  ;;  %v3455_v59 = vmax.f32 %v3446_v60, 0.0  ;;  %3802 = vmatpush.bf16.msra.mxu3 %v7846_v14 }
 0xf90   :  { %v3458_v30 = vpack.c.bf16 %v3454_v29, %v3452_v10  ;;  %v3459_v41 = vpack.c.bf16 %v3455_v59, %v3453_v49  ;;  %v8539_v10 = vld [vmem:[#allocation23 + $0x68] sm:$0xff]  ;;  %v8538_v29 = vld [vmem:[#allocation23 + $0x60] sm:$0xff] }
 0xf92   :  { %3602 = vmatmul.bf16.vlgmr.msrb.gmra.mxu3 %v3458_v30  ;;  %3620 = vmatmul.bf16.vlgmr.msra.gmra.mxu2 %v3459_v41 }
 0xf93   :  { %v3430_v40 = vpop.f32.mrf.mxu3  ;;  %v3448_v42 = vpop.f32.mrf.mxu2  ;;  %3803 = vmatpush.bf16.msra.mxu3 %v7838_v9 }
 0xf94   :  { %v3431_v25 = vadd.f32 %v3430_v40, %v3332_v56  ;;  %v3449_v4 = vadd.f32 %v3448_v42, %v3333_v43  ;;  %v8520_v56 = vld [vmem:[#allocation22 + $0x94] sm:$0xf]  ;;  %v7847_v43 = vld [vmem:[#allocation22 + $0x98] sm:$0xf0] }
 0xf95   :  { %v7850_v44 = vor.u32 %v8520_v56, %v7847_v43  ;;  %v8537_v40 = vld [vmem:[#allocation23 + $0x58] sm:$0xff] }
 0xf96   :  { %v3456_v22 = vmax.f32 %v3431_v25, 0.0  ;;  %v3457_v45 = vmax.f32 %v3449_v4, 0.0 }
 0xf97   :  { %3820 = vmatpush.bf16.msrb.mxu2 %v7850_v44  ;;  %3904 = vmatpush.bf16.msrb.mxu3 %v8541_v58  ;;  %v3713_v58 = vperm.slane %v7834_v52, 1 }
 0xf98   :  { %v3460_v55 = vpack.c.bf16 %v3456_v22, %v3456_v22  ;;  %v3461_v2 = vpack.c.bf16 %v3457_v45, %v3457_v45  ;;  %v9115_v22 = vld [vmem:[%s12559_s4] sm:$0xff] }
 0xf9b   :  { %v3432_v39 = vpop.f32.mrf.mxu3  ;;  %v3450_v57 = vpop.f32.mrf.mxu2  ;;  %3821 = vmatpush.bf16.msrb.mxu2 %v7842_v11  ;;  %3905 = vmatpush.bf16.msrb.mxu3 %v8540_v50 }
 0xf9c   :  { %v8536_v39 = vld [vmem:[#allocation23 + $0x50] sm:$0xff] }
 0xf9f   :  { %3906 = vmatpush.bf16.msrb.mxu3 %v8539_v10 }
 0xfa2   :  { %3607 = vmatmul.bf16.gmra.mxu3 %v3460_v55  ;;  %3625 = vmatmul.bf16.gmra.mxu2 %v3461_v2  ;;  %v9116_v55 = vld [vmem:[%s12559_s4 + $0x8] sm:$0xff] }
 0xfa3   :  { %3907 = vmatpush.bf16.msrb.mxu3 %v8538_v29 }
 0xfa7   :  { %3908 = vmatpush.bf16.msrb.mxu3 %v8537_v40 }
 0xfab   :  { %3909 = vmatpush.bf16.msrb.mxu3 %v8536_v39 }
 0xfaf   :  { %3910 = vmatpush.bf16.msrb.mxu3 %v8535_v28 }
 0xfb3   :  { %3911 = vmatpush.bf16.msrb.mxu3 %v8534_v33 }
0x1015   :  { %v3603_v16 = vpop.f32.mrf.mxu3  ;;  %v3621_v60 = vpop.f32.mrf.mxu2 }
0x1016   :  { %v3604_v49 = vadd.f32 %v8722_v8, %v3603_v16 }
0x1018   :  { %v3622_v59 = vadd.f32 %v3621_v60, %v3604_v49 }
0x101a   :  { %v11165_v25 = vadd.f32 %v3622_v59, %v11152_v37 }
0x101c   :  { %v3687_v45 = vadd.f32 %v9115_v22, %v11165_v25 }
0x101d   :  { %v3605_v30 = vpop.f32.mrf.mxu3  ;;  %v3623_v41 = vpop.f32.mrf.mxu2 }
0x101e   :  { %v3606_v42 = vadd.f32 %v8722_v8, %v3605_v30 }
0x1020   :  { %v3624_v4 = vadd.f32 %v3623_v41, %v3606_v42 }
0x1022   :  { %v11168_v57 = vadd.f32 %v3624_v4, %v11154_v32 }
0x1024   :  { %v3688_v2 = vadd.f32 %v9116_v55, %v11168_v57  ;;  %v3832_v36 = vpack.c.bf16 %v11168_v57, %v11165_v25 }
0x1025   :  { %v3608_v46 = vpop.f32.mrf.mxu3  ;;  %v3626_v13 = vpop.f32.mrf.mxu2 }
0x1026   :  { %v3690_v62 = vpack.c.bf16 %v3688_v2, %v3687_v45  ;;  %v3609_v37 = vadd.f32 %v8722_v8, %v3608_v46 }
0x1028   :  { %3804 = vmatmul.bf16.vlgmr.msra.gmra.mxu3 %v3690_v62  ;;  %3822 = vmatmul.bf16.vlgmr.msrb.gmra.mxu2 %v3690_v62  ;;  %v3627_v32 = vadd.f32 %v3626_v13, %v3609_v37 }
0x102a   :  { %v11175_v63 = vadd.f32 %v3627_v32, %v11159_v38 }
0x102c   :  { %v3689_v24 = vadd.f32 %v9117_v15, %v11175_v63  ;;  %v3833_v54 = vpack.c.bf16 %v11175_v63, %v11175_v63 }
0x102d   :  { %v3610_v47 = vpop.f32.mrf.mxu3  ;;  %v3628_v17 = vpop.f32.mrf.mxu2 }
0x102e   :  { %v3691_v53 = vpack.c.bf16 %v3689_v24, %v3689_v24 }
0x1038   :  { %3809 = vmatmul.bf16.gmra.mxu3 %v3691_v53  ;;  %3827 = vmatmul.bf16.gmra.mxu2 %v3691_v53 }
0x1048   :  { %3912 = vmatmul.bf16.vlgmr.msrb.gmra.mxu3 %v3832_v36 }
0x1058   :  { %3917 = vmatmul.bf16.gmra.mxu3 %v3833_v54 }
0x10ab   :  { %v3805_v61 = vpop.f32.mrf.mxu3  ;;  %v3823_v7 = vpop.f32.mrf.mxu2 }
0x10ac   :  { %v11184_v38 = vadd.f32 %v3805_v61, %v3712_v19 }
0x10ae   :  { %v3934_v18 = vmul.f32 %v11184_v38, %v10065_v31  ;;  %v3940_v56 = vmul.f32 %v11184_v38, %v10093_v6  ;;  %v3937_v14 = vmul.f32 %v11184_v38, %v10072_v35  ;;  %v3943_v23 = vmul.f32 %v11184_v38, %v10107_v27 }
0x10af   :  { %v3922_v39 = vmul.f32 %v11184_v38, %v10070_v34 }
0x10b0   :  { %v3958_v51 = vpack.c.bf16 %v3934_v18, %v3934_v18  ;;  %v3964_v1 = vpack.c.bf16 %v3940_v56, %v3940_v56  ;;  %v3961_v8 = vpack.c.bf16 %v3937_v14, %v3937_v14  ;;  %v3967_v42 = vpack.c.bf16 %v3943_v23, %v3943_v23 }
0x10b2   :  { %v11204_v49 = vunpack.c.l.b16 %v3958_v51  ;;  %v11208_v59 = vunpack.c.l.b16 %v3964_v1  ;;  %v11222_v46 = vunpack.c.l.b16 %v3961_v8  ;;  %v11234_v47 = vunpack.c.l.b16 %v3967_v42 }
0x10b3   :  { %v3807_v3 = vpop.f32.mrf.mxu3  ;;  %v3825_v21 = vpop.f32.mrf.mxu2  ;;  %v3824_v1 = vadd.f32 %v3823_v7, %v3713_v58 }
0x10b4   :  { %v11190_v43 = vadd.f32 %v3807_v3, %v3712_v19  ;;  %v3826_v52 = vadd.f32 %v3825_v21, %v3713_v58 }
0x10b6   :  { %v3935_v44 = vmul.f32 %v11190_v43, %v10065_v31  ;;  %v3941_v12 = vmul.f32 %v11190_v43, %v10093_v6  ;;  %v3932_v50 = vmul.f32 %v11190_v43, %v10118_v48  ;;  %v3938_v16 = vmul.f32 %v11190_v43, %v10072_v35 }
0x10b7   :  { %v3944_v4 = vmul.f32 %v11190_v43, %v10107_v27  ;;  %v3923_v32 = vmul.f32 %v11190_v43, %v10070_v34 }
0x10b8   :  { %v3959_v9 = vpack.c.bf16 %v3935_v44, %v3935_v44  ;;  %v3965_v11 = vpack.c.bf16 %v3941_v12, %v3941_v12  ;;  %v3956_v2 = vpack.c.bf16 %v3932_v50, %v3932_v50  ;;  %v3962_v13 = vpack.c.bf16 %v3938_v16, %v3938_v16 }
0x10b9   :  { %v3968_v15 = vpack.c.bf16 %v3944_v4, %v3944_v4  ;;  %v3947_v23 = vpack.c.bf16 %v3923_v32, %v3923_v32 }
0x10ba   :  { %v11206_v29 = vunpack.c.l.b16 %v3959_v9  ;;  %v11210_v30 = vunpack.c.l.b16 %v3965_v11  ;;  %v11240_v61 = vunpack.c.l.b16 %v3962_v13 }
0x10bb   :  { %v3810_v60 = vpop.f32.mrf.mxu3  ;;  %v3828_v10 = vpop.f32.mrf.mxu2  ;;  %v11250_v9 = vunpack.c.l.b16 %v3968_v15 }
0x10bc   :  { %v11212_v41 = vadd.f32 %v3810_v60, %v3712_v19  ;;  %v3829_v40 = vadd.f32 %v3828_v10, %v3713_v58  ;;  %v4028_v22 = vpack.c.b16 %v11206_v29, %v11204_v49  ;;  %v4031_v45 = vpack.c.b16 %v11210_v30, %v11208_v59  ;;  %v11299_v29 = vld [vmem:[%s12562_s15 + $0x10] sm:$0xff] }
0x10bd   :  { %v11238_v19 = vunpack.c.l.b16 %v3956_v2  ;;  %v3970_v60 = vpack.c.bf16 %v3826_v52, %v3824_v1  ;;  %v3946_v58 = vpack.c.bf16 %v3922_v39, %v3922_v39  ;;  %v3999_v10 = vunpack.c.l.b16 %v3947_v23 }
0x10be   :  { %v3971_v55 = vpack.c.bf16 %v3829_v40, %v3829_v40  ;;  %v3933_v28 = vmul.f32 %v11212_v41, %v10118_v48  ;;  %v3936_v62 = vmul.f32 %v11212_v41, %v10065_v31  ;;  %v3939_v37 = vmul.f32 %v11212_v41, %v10072_v35 }
0x10bf   :  { %v3942_v33 = vmul.f32 %v11212_v41, %v10093_v6  ;;  %v3945_v17 = vmul.f32 %v11212_v41, %v10107_v27  ;;  %v3998_v42 = vunpack.c.l.b16 %v3946_v58  ;;  %v3928_v1 = vmul.f32 %v11184_v38, %v10105_v26 }
0x10c0   :  { %4052 = vmatpush.bf16.xpose.msra.mxu2 %v3971_v55  ;;  %v3957_v24 = vpack.c.bf16 %v3933_v28, %v3933_v28  ;;  %v3960_v53 = vpack.c.bf16 %v3936_v62, %v3936_v62  ;;  %v3963_v36 = vpack.c.bf16 %v3939_v37, %v3939_v37  ;;  %v3924_v55 = vmul.f32 %v11212_v41, %v10070_v34  ;;  %v8723_v37 = vld [vmem:[%s12561_s24 + $0x1] ss:$0 sm:$0xff] }
0x10c1   :  { %v3966_v54 = vpack.c.bf16 %v3942_v33, %v3942_v33  ;;  %v3969_v3 = vpack.c.bf16 %v3945_v17, %v3945_v17  ;;  %v4022_v4 = vpack.c.b16 %v3999_v10, %v3998_v42  ;;  %v3930_v42 = vmul.f32 %v11212_v41, %v10105_v26 }
0x10c2   :  { %v11242_v14 = vunpack.c.l.b16 %v3957_v24  ;;  %v11244_v44 = vunpack.c.l.b16 %v3960_v53  ;;  %v11246_v51 = vunpack.c.l.b16 %v3963_v36  ;;  %v3948_v13 = vpack.c.bf16 %v3924_v55, %v3924_v55 }
0x10c3   :  { %v3812_v18 = vpop.f32.mrf.mxu3  ;;  %v3830_v56 = vpop.f32.mrf.mxu2  ;;  %v11248_v12 = vunpack.c.l.b16 %v3966_v54  ;;  %v11252_v21 = vunpack.c.l.b16 %v3969_v3  ;;  %v3927_v54 = vmul.f32 %v11212_v41, %v10091_v5  ;;  %v3954_v55 = vpack.c.bf16 %v3930_v42, %v3930_v42  ;;  %v11286_v41 = vld [vmem:[%s12562_s15] sm:$0xff] }
0x10c4   :  { %v4027_v11 = vpack.c.b16 %v11242_v14, %v11238_v19  ;;  %v4029_v50 = vpack.c.b16 %v11222_v46, %v11244_v44  ;;  %v4030_v8 = vpack.c.b16 %v11246_v51, %v11240_v61  ;;  %v3925_v46 = vmul.f32 %v11184_v38, %v10091_v5 }
0x10c5   :  { %v4032_v16 = vpack.c.b16 %v11234_v47, %v11248_v12  ;;  %v4033_v7 = vpack.c.b16 %v11252_v21, %v11250_v9  ;;  %v4000_v62 = vunpack.c.l.b16 %v3948_v13  ;;  %v3926_v61 = vmul.f32 %v11190_v43, %v10091_v5 }
0x10c6   :  { %v3949_v28 = vpack.c.bf16 %v3925_v46, %v3925_v46  ;;  %v3951_v3 = vpack.c.bf16 %v3927_v54, %v3927_v54  ;;  %v3929_v51 = vmul.f32 %v11190_v43, %v10105_v26  ;;  %v4006_v43 = vunpack.c.l.b16 %v3954_v55 }
0x10c7   :  { %v3950_v18 = vpack.c.bf16 %v3926_v61, %v3926_v61 }
0x10c8   :  { %4053 = vmatpush.bf16.xpose.msra.mxu2 %v3970_v60  ;;  %v4001_v32 = vunpack.c.l.b16 %v3949_v28  ;;  %v4003_v56 = vunpack.c.l.b16 %v3951_v3  ;;  %v3953_v23 = vpack.c.bf16 %v3929_v51, %v3929_v51  ;;  %v3952_v60 = vpack.c.bf16 %v3928_v1, %v3928_v1 }
0x10c9   :  { %v4002_v14 = vunpack.c.l.b16 %v3950_v18 }
0x10ca   :  { %v4023_v17 = vpack.c.b16 %v4001_v32, %v4000_v62  ;;  %v4005_v58 = vunpack.c.l.b16 %v3953_v23  ;;  %v4004_v10 = vunpack.c.l.b16 %v3952_v60 }
0x10cb   :  { %v3913_v40 = vpop.f32.mrf.mxu3  ;;  %v4024_v44 = vpack.c.b16 %v4003_v56, %v4002_v14 }
0x10cc   :  { %v3914_v36 = vadd.f32 %v8723_v37, %v3913_v40  ;;  %v4025_v40 = vpack.c.b16 %v4005_v58, %v4004_v10 }
0x10cf   :  { %4054 = vmatmul.bf16.vlgmr.msra.gmra.mxu2 %v4022_v4  ;;  %v3931_v4 = vmul.f32 %v11184_v38, %v10118_v48 }
0x10d3   :  { %v3915_v2 = vpop.f32.mrf.mxu3 }
0x10d4   :  { %v3916_v24 = vadd.f32 %v8723_v37, %v3915_v2  ;;  %v3955_v2 = vpack.c.bf16 %v3931_v4, %v3931_v4 }
0x10d6   :  { %v3972_v52 = vpack.c.bf16 %v3916_v24, %v3914_v36  ;;  %v4007_v46 = vunpack.c.l.b16 %v3955_v2 }
0x10d8   :  { %v4026_v13 = vpack.c.b16 %v4007_v46, %v4006_v43 }
0x10db   :  { %v3918_v33 = vpop.f32.mrf.mxu3 }
0x10dc   :  { %v3919_v39 = vadd.f32 %v8723_v37, %v3918_v33  ;;  %v11291_v33 = vld [vmem:[%s12562_s15 + $0x8] sm:$0xff] }
0x10de   :  { %v3973_v15 = vpack.c.bf16 %v3919_v39, %v3919_v39 }
0x10df   :  { %4059 = vmatmul.bf16.gmra.mxu2 %v4023_v17 }
0x10e0   :  { %v4764_v53 = vsel %vm423_vm0, %v3973_v15, 0 }
0x10e1   :  { %4772 = vmatpush.bf16.msra.mxu3 %v4764_v53 }
0x10e3   :  { %v3920_v19 = vpop.f32.mrf.mxu3 }
0x10e5   :  { %4773 = vmatpush.bf16.msra.mxu3 %v3972_v52 }
0x10ef   :  { %4064 = vmatmul.bf16.gmra.mxu2 %v4024_v44 }
0x10ff   :  { %4069 = vmatmul.bf16.gmra.mxu2 %v4025_v40 }
0x110f   :  { %4074 = vmatmul.bf16.gmra.mxu2 %v4026_v13 }
0x111f   :  { %4079 = vmatmul.bf16.gmra.mxu2 %v4027_v11 }
0x112f   :  { %4084 = vmatmul.bf16.gmra.mxu2 %v4028_v22 }
0x113f   :  { %4089 = vmatmul.bf16.gmra.mxu2 %v4029_v50 }
0x114f   :  { %4094 = vmatmul.bf16.gmra.mxu2 %v4030_v8 }
0x1152   :  { %v4055_v28 = vpop.f32.mrf.mxu2 }
0x1153   :  { %v4115_v38 = vadd.f32 %v11286_v41, %v4055_v28 }
0x1155   :  { %v4139_v62 = vsel %vm2405_vm5, %v4115_v38, -inf }
0x1156   :  { %4140 = vmax.xlane.f32.xlu1 %v4139_v62 }
0x115a   :  { %v4057_v37 = vpop.f32.mrf.mxu2 }
0x115b   :  { %v4116_v11 = vadd.f32 %v11291_v33, %v4057_v37 }
0x115d   :  { %v4142_v32 = vsel %vm2405_vm5, %v4116_v11, -inf }
0x115e   :  { %4143 = vmax.xlane.f32.xlu2 %v4142_v32 }
0x115f   :  { %4099 = vmatmul.bf16.gmra.mxu2 %v4031_v45 }
0x1162   :  { %v4060_v49 = vpop.f32.mrf.mxu2 }
0x1163   :  { %v4117_v22 = vadd.f32 %v11299_v29, %v4060_v49 }
0x1165   :  { %v4145_v50 = vsel %vm2405_vm5, %v4117_v22, -inf }
0x1166   :  { %4146 = vmax.xlane.f32.xlu0 %v4145_v50 }
0x116a   :  { %v4062_v8 = vpop.f32.mrf.mxu2 }
0x116b   :  { %v4118_v39 = vadd.f32 %v11286_v41, %v4062_v8 }
0x116d   :  { %v4148_v17 = vsel %vm2405_vm5, %v4118_v39, -inf }
0x116e   :  { %4149 = vmax.xlane.f32.xlu1 %v4148_v17 }
0x116f   :  { %4104 = vmatmul.bf16.gmra.mxu2 %v4032_v16 }
0x1172   :  { %v4065_v59 = vpop.f32.mrf.mxu2 }
0x1173   :  { %v4119_v30 = vadd.f32 %v11291_v33, %v4065_v59 }
0x1175   :  { %v4151_v45 = vsel %vm2405_vm5, %v4119_v30, -inf }
0x1176   :  { %4152 = vmax.xlane.f32.xlu2 %v4151_v45 }
0x117a   :  { %v4067_v15 = vpop.f32.mrf.mxu2 }
0x117b   :  { %v11311_v24 = vadd.f32 %v11299_v29, %v4067_v15 }
0x117d   :  { %v4154_v53 = vsel %vm2405_vm5, %v11311_v24, -inf }
0x117e   :  { %4155 = vmax.xlane.f32.xlu0 %v4154_v53 }
0x117f   :  { %4109 = vmatmul.bf16.gmra.mxu2 %v4033_v7 }
0x1182   :  { %v4070_v47 = vpop.f32.mrf.mxu2 }
0x1183   :  { %v11319_v12 = vadd.f32 %v11286_v41, %v4070_v47 }
0x1185   :  { %v4157_v16 = vsel %vm2405_vm5, %v11319_v12, -inf }
0x1186   :  { %4158 = vmax.xlane.f32.xlu1 %v4157_v16 }
0x118a   :  { %v4072_v36 = vpop.f32.mrf.mxu2 }
0x118b   :  { %v11324_v54 = vadd.f32 %v11291_v33, %v4072_v36 }
0x118d   :  { %v4160_v52 = vsel %vm2405_vm5, %v11324_v54, -inf }
0x118e   :  { %4161 = vmax.xlane.f32.xlu2 %v4160_v52 }
0x1192   :  { %v4075_v19 = vpop.f32.mrf.mxu2 }
0x1193   :  { %v11329_v9 = vadd.f32 %v11299_v29, %v4075_v19 }
0x1195   :  { %v4163_v21 = vsel %vm2405_vm5, %v11329_v9, -inf }
0x1196   :  { %4164 = vmax.xlane.f32.xlu2 %v4163_v21 }
0x119a   :  { %v4077_v7 = vpop.f32.mrf.mxu2 }
0x119b   :  { %v11338_v58 = vadd.f32 %v11286_v41, %v4077_v7 }
0x119d   :  { %v4166_v2 = vsel %vm2405_vm5, %v11338_v58, -inf }
0x11a2   :  { %v4080_v56 = vpop.f32.mrf.mxu2 }
0x11a3   :  { %v11347_v43 = vadd.f32 %v11291_v33, %v4080_v56 }
0x11aa   :  { %v4082_v60 = vpop.f32.mrf.mxu2 }
0x11ab   :  { %v11356_v32 = vadd.f32 %v11299_v29, %v4082_v60 }
0x11ad   :  { %v4172_v59 = vsel %vm2405_vm5, %v11356_v32, -inf }
0x11b2   :  { %v4085_v13 = vpop.f32.mrf.mxu2 }
0x11b3   :  { %v11365_v45 = vadd.f32 %v11286_v41, %v4085_v13 }
0x11b5   :  { %v4175_v36 = vsel %vm2405_vm5, %v11365_v45, -inf }
0x11ba   :  { %v4087_v8 = vpop.f32.mrf.mxu2 }
0x11bb   :  { %v11375_v19 = vadd.f32 %v11291_v33, %v4087_v8 }
0x11c2   :  { %v4090_v52 = vpop.f32.mrf.mxu2 }
0x11c9   :  { %v4141_v61 = vpop.xlane.xlu1 %4140 }
0x11ca   :  { %v4211_v3 = vsub.f32 %v4115_v38, %v4141_v61  ;;  %v4092_v56 = vpop.f32.mrf.mxu2 }
0x11cc   :  { %v4235_v18 = vmul.f32 1.442695, %v4211_v3 }
0x11ce   :  { %8911 = vpow2.f32 %v4235_v18  ;;  %v4178_v18 = vsel %vm2405_vm5, %v11375_v19, -inf }
0x11d1   :  { %v4144_v14 = vpop.xlane.xlu2 %4143 }
0x11d2   :  { %v4212_v44 = vsub.f32 %v4116_v11, %v4144_v14  ;;  %v4169_v11 = vsel %vm2405_vm5, %v11347_v43, -inf  ;;  %v11385_v14 = vadd.f32 %v11299_v29, %v4090_v52 }
0x11d4   :  { %v11333_v51 = vpop.eup %8911  ;;  %v4237_v1 = vmul.f32 1.442695, %v4212_v44 }
0x11d5   :  { %v4283_v23 = vsel %vm2405_vm5, %v11333_v51, 0.0 }
0x11d6   :  { %8913 = vpow2.f32 %v4237_v1  ;;  %4284 = vadd.xlane.f32.xlu0 %v4283_v23 }
0x11d9   :  { %v4147_v10 = vpop.xlane.xlu0 %4146 }
0x11da   :  { %v4213_v40 = vsub.f32 %v4117_v22, %v4147_v10  ;;  %v4181_v10 = vsel %vm2405_vm5, %v11385_v14, -inf }
0x11dc   :  { %v11340_v42 = vpop.eup %8913  ;;  %v4239_v4 = vmul.f32 1.442695, %v4213_v40  ;;  %v11395_v40 = vadd.f32 %v11286_v41, %v4092_v56 }
0x11dd   :  { %v4286_v55 = vsel %vm2405_vm5, %v11340_v42, 0.0 }
0x11de   :  { %8915 = vpow2.f32 %v4239_v4  ;;  %4287 = vadd.xlane.f32.xlu1 %v4286_v55  ;;  %4167 = vmax.xlane.f32.xlu0 %v4166_v2  ;;  %v4095_v55 = vpop.f32.mrf.mxu2 }
0x11e1   :  { %v4150_v46 = vpop.xlane.xlu1 %4149 }
0x11e2   :  { %v4214_v28 = vsub.f32 %v4118_v39, %v4150_v46 }
0x11e4   :  { %v11349_v38 = vpop.eup %8915  ;;  %v4241_v62 = vmul.f32 1.442695, %v4214_v28  ;;  %v4184_v28 = vsel %vm2405_vm5, %v11395_v40, -inf }
0x11e5   :  { %v4289_v37 = vsel %vm2405_vm5, %v11349_v38, 0.0 }
0x11e6   :  { %8917 = vpow2.f32 %v4241_v62  ;;  %4290 = vadd.xlane.f32.xlu1 %v4289_v37  ;;  %4170 = vmax.xlane.f32.xlu0 %v4169_v11  ;;  %v11405_v62 = vadd.f32 %v11291_v33, %v4095_v55  ;;  %v4097_v11 = vpop.f32.mrf.mxu2 }
0x11e9   :  { %v4153_v49 = vpop.xlane.xlu2 %4152 }
0x11ea   :  { %v4215_v22 = vsub.f32 %v4119_v30, %v4153_v49  ;;  %v4187_v49 = vsel %vm2405_vm5, %v11405_v62, -inf }
0x11ec   :  { %v11358_v50 = vpop.eup %8917  ;;  %v4243_v39 = vmul.f32 1.442695, %v4215_v22  ;;  %v11414_v22 = vadd.f32 %v11299_v29, %v4097_v11 }
0x11ed   :  { %v4292_v17 = vsel %vm2405_vm5, %v11358_v50, 0.0 }
0x11ee   :  { %8919 = vpow2.f32 %v4243_v39  ;;  %4293 = vadd.xlane.f32.xlu2 %v4292_v17  ;;  %4173 = vmax.xlane.f32.xlu1 %v4172_v59  ;;  %v4190_v8 = vsel %vm2405_vm5, %v11414_v22, -inf  ;;  %v4100_v39 = vpop.f32.mrf.mxu2 }
0x11ef   :  { %v11419_v17 = vadd.f32 %v11286_v41, %v4100_v39 }
0x11f1   :  { %v4156_v15 = vpop.xlane.xlu0 %4155  ;;  %v4193_v59 = vsel %vm2405_vm5, %v11419_v17, -inf }
0x11f2   :  { %v4216_v53 = vsub.f32 %v11311_v24, %v4156_v15 }
0x11f4   :  { %v11368_v30 = vpop.eup %8919  ;;  %v4245_v47 = vmul.f32 1.442695, %v4216_v53 }
0x11f5   :  { %v4295_v16 = vsel %vm2405_vm5, %v11368_v30, 0.0 }
0x11f6   :  { %8921 = vpow2.f32 %v4245_v47  ;;  %4296 = vadd.xlane.f32.xlu2 %v4295_v16  ;;  %4176 = vmax.xlane.f32.xlu1 %v4175_v36 }
0x11f9   :  { %v4159_v21 = vpop.xlane.xlu1 %4158 }
0x11fa   :  { %v4217_v7 = vsub.f32 %v11319_v12, %v4159_v21 }
0x11fc   :  { %v11378_v24 = vpop.eup %8921  ;;  %v4247_v61 = vmul.f32 1.442695, %v4217_v7 }
0x11fd   :  { %v4298_v3 = vsel %vm2405_vm5, %v11378_v24, 0.0 }
0x11fe   :  { %8923 = vpow2.f32 %v4247_v61  ;;  %4299 = vadd.xlane.f32.xlu0 %v4298_v3  ;;  %4179 = vmax.xlane.f32.xlu2 %v4178_v18 }
0x1201   :  { %v4162_v44 = vpop.xlane.xlu2 %4161 }
0x1202   :  { %v4218_v1 = vsub.f32 %v11324_v54, %v4162_v44 }
0x1204   :  { %v11388_v12 = vpop.eup %8923  ;;  %v4249_v23 = vmul.f32 1.442695, %v4218_v1 }
0x1205   :  { %v4301_v60 = vsel %vm2405_vm5, %v11388_v12, 0.0 }
0x1206   :  { %8925 = vpow2.f32 %v4249_v23  ;;  %4302 = vadd.xlane.f32.xlu0 %v4301_v60  ;;  %4182 = vmax.xlane.f32.xlu2 %v4181_v10 }
0x1209   :  { %v4165_v4 = vpop.xlane.xlu2 %4164 }
0x120a   :  { %v4219_v2 = vsub.f32 %v11329_v9, %v4165_v4 }
0x120c   :  { %v11398_v54 = vpop.eup %8925  ;;  %v4251_v46 = vmul.f32 1.442695, %v4219_v2 }
0x120d   :  { %v4304_v13 = vsel %vm2405_vm5, %v11398_v54, 0.0 }
0x120e   :  { %8927 = vpow2.f32 %v4251_v46  ;;  %4305 = vadd.xlane.f32.xlu1 %v4304_v13  ;;  %4185 = vmax.xlane.f32.xlu0 %v4184_v28 }
0x1214   :  { %v11407_v37 = vpop.eup %8927 }
0x1215   :  { %v4307_v9 = vsel %vm2405_vm5, %v11407_v37, 0.0 }
0x1216   :  { %4308 = vadd.xlane.f32.xlu1 %v4307_v9  ;;  %4188 = vmax.xlane.f32.xlu0 %v4187_v49  ;;  %v4102_v9 = vpop.f32.mrf.mxu2 }
0x121e   :  { %4191 = vmax.xlane.f32.xlu1 %v4190_v8 }
0x1226   :  { %4194 = vmax.xlane.f32.xlu1 %v4193_v59 }
0x1249   :  { %v4285_v15 = vpop.xlane.xlu0 %4284 }
0x124a   :  { %8929 = vrcp.f32 %v4285_v15  ;;  %v4366_v23 = vand.u32 2147483648, %v4285_v15  ;;  %vm4360_vm8 = vweird.f32 %v4285_v15  ;;  %v4364_v60 = vand.u32 2147483647, %v4285_v15 }
0x124c   :  { %v4367_v49 = vor.u32 1.1754944e-38, %v4366_v23  ;;  %vm4365_vm11 = vcmp.eq.f32.partialorder %v4364_v60, 8.507059e+37 }
0x1250   :  { %v8930_v53 = vpop.eup %8929 }
0x1251   :  { %v4356_v47 = vmul.f32 %v8930_v53, %v4285_v15  ;;  %v4288_v16 = vpop.xlane.xlu1 %4287  ;;  %v4168_v36 = vpop.xlane.xlu0 %4167  ;;  %vm4361_vm7 = vweird.f32 %v8930_v53 }
0x1252   :  { %8931 = vrcp.f32 %v4288_v16  ;;  %v4220_v21 = vsub.f32 %v11338_v58, %v4168_v36  ;;  %vm11428_vm9 = vmor %vm4360_vm8, %vm4361_vm7  ;;  %v4379_v55 = vand.u32 2147483647, %v4288_v16  ;;  %v4381_v2 = vand.u32 2147483648, %v4288_v16 }
0x1253   :  { %v4357_v52 = vsub.f32 1.0, %v4356_v47  ;;  %vm4375_vm12 = vweird.f32 %v4288_v16  ;;  %v11457_v58 = vadd.f32 %v11291_v33, %v4102_v9 }
0x1254   :  { %v4253_v61 = vmul.f32 1.442695, %v4220_v21  ;;  %v4382_v15 = vor.u32 1.1754944e-38, %v4381_v2  ;;  %vm4380_vm14 = vcmp.eq.f32.partialorder %v4379_v55, 8.507059e+37 }
0x1255   :  { %v4358_v7 = vmul.f32 %v8930_v53, %v4357_v52 }
0x1256   :  { %8933 = vpow2.f32 %v4253_v61 }
0x1257   :  { %v4359_v18 = vadd.f32 %v8930_v53, %v4358_v7 }
0x1258   :  { %v8932_v3 = vpop.eup %8931 }
0x1259   :  { %v4371_v56 = vmul.f32 %v8932_v3, %v4288_v16  ;;  %v11424_v44 = vpop.xlane.xlu1 %4290  ;;  %v4171_v1 = vpop.xlane.xlu0 %4170  ;;  %v4363_v13 = vsel %vm11428_vm9, %v8930_v53, %v4359_v18  ;;  %vm4376_vm10 = vweird.f32 %v8932_v3 }
0x125a   :  { %8935 = vrcp.f32 %v11424_v44  ;;  %v4221_v4 = vsub.f32 %v11347_v43, %v4171_v1  ;;  %v4368_v59 = vsel %vm4365_vm11, %v4367_v49, %v4363_v13  ;;  %vm4377_vm13 = vmor %vm4375_vm12, %vm4376_vm10  ;;  %v4396_v2 = vand.u32 2147483648, %v11424_v44 }
0x125b   :  { %v4372_v10 = vsub.f32 1.0, %v4371_v56  ;;  %v4369_v7 = vmul.f32 %v11333_v51, %v4368_v59  ;;  %vm4390_vm15 = vweird.f32 %v11424_v44 }
0x125c   :  { %v11432_v46 = vpop.eup %8933  ;;  %v4255_v11 = vmul.f32 1.442695, %v4221_v4 }
0x125d   :  { %v4373_v28 = vmul.f32 %v8932_v3, %v4372_v10  ;;  %v4310_v8 = vsel %vm2405_vm5, %v11432_v46, 0.0 }
0x125e   :  { %8937 = vpow2.f32 %v4255_v11  ;;  %4311 = vadd.xlane.f32.xlu2 %v4310_v8  ;;  %v4394_v11 = vand.u32 2147483647, %v11424_v44 }
0x125f   :  { %v4374_v43 = vadd.f32 %v8932_v3, %v4373_v28 }
0x1260   :  { %v11438_v39 = vpop.eup %8935  ;;  %vm4395_vm6 = vcmp.eq.f32.partialorder %v4394_v11, 8.507059e+37 }
0x1261   :  { %v4378_v47 = vsel %vm4377_vm13, %v8932_v3, %v4374_v43  ;;  %v4386_v53 = vmul.f32 %v11438_v39, %v11424_v44  ;;  %v4294_v36 = vpop.xlane.xlu2 %4293  ;;  %v4174_v52 = vpop.xlane.xlu1 %4173  ;;  %vm4391_vm1 = vweird.f32 %v11438_v39  ;;  %v4196_v44 = vsel %vm2405_vm5, %v11457_v58, -inf }
0x1262   :  { %v4383_v21 = vsel %vm4380_vm14, %v4382_v15, %v4378_v47  ;;  %8939 = vrcp.f32 %v4294_v36  ;;  %v4222_v18 = vsub.f32 %v11356_v32, %v4174_v52  ;;  %vm11468_vm2 = vmor %vm4390_vm15, %vm4391_vm1  ;;  %v4411_v43 = vand.u32 2147483648, %v4294_v36 }
0x1263   :  { %v11444_v16 = vmul.f32 %v11340_v42, %v4383_v21  ;;  %v4387_v61 = vsub.f32 1.0, %v4386_v53  ;;  %v4105_v42 = vpop.f32.mrf.mxu2  ;;  %v4409_v47 = vand.u32 2147483647, %v4294_v36  ;;  %v4397_v53 = vor.u32 1.1754944e-38, %v4396_v2 }
0x1264   :  { %v11447_v56 = vpop.eup %8937  ;;  %v4257_v1 = vmul.f32 1.442695, %v4222_v18  ;;  %vm4405_vm4 = vweird.f32 %v4294_v36  ;;  %v4412_v18 = vor.u32 1.1754944e-38, %v4411_v43 }
0x1265   :  { %v4715_v3 = vpack.c.bf16 %v11444_v16, %v4369_v7  ;;  %v4388_v23 = vmul.f32 %v11438_v39, %v4387_v61  ;;  %v4313_v60 = vsel %vm2405_vm5, %v11447_v56, 0.0  ;;  %v11480_v61 = vadd.f32 %v11299_v29, %v4105_v42 }
0x1266   :  { %8941 = vpow2.f32 %v4257_v1  ;;  %4314 = vadd.xlane.f32.xlu2 %v4313_v60  ;;  %vm4410_vm8 = vcmp.eq.f32.partialorder %v4409_v47, 8.507059e+37 }
0x1267   :  { %7932 = vmatmul.msk.bf16.vlgmr.msra.gmra.mxu3 %vm2405_vm5, %v4715_v3  ;;  %v4389_v55 = vadd.f32 %v11438_v39, %v4388_v23 }
0x1268   :  { %v8940_v51 = vpop.eup %8939 }
0x1269   :  { %v4401_v10 = vmul.f32 %v8940_v51, %v4294_v36  ;;  %v11454_v4 = vpop.xlane.xlu2 %4296  ;;  %v4177_v32 = vpop.xlane.xlu1 %4176  ;;  %vm4406_vm3 = vweird.f32 %v8940_v51  ;;  %v4393_v15 = vsel %vm11468_vm2, %v11438_v39, %v4389_v55  ;;  %v4199_v55 = vsel %vm2405_vm5, %v11480_v61, -inf }
0x126a   :  { %8943 = vrcp.f32 %v11454_v4  ;;  %v4223_v28 = vsub.f32 %v11365_v45, %v4177_v32  ;;  %vm4407_vm7 = vmor %vm4405_vm4, %vm4406_vm3  ;;  %v4398_v60 = vsel %vm4395_vm6, %v4397_v53, %v4393_v15  ;;  %v4426_v9 = vand.u32 2147483648, %v11454_v4 }
0x126b   :  { %v4402_v13 = vsub.f32 1.0, %v4401_v10  ;;  %v4107_v36 = vpop.f32.mrf.mxu2  ;;  %vm4420_vm10 = vweird.f32 %v11454_v4 }
0x126c   :  { %v11466_v49 = vpop.eup %8941  ;;  %v4259_v59 = vmul.f32 1.442695, %v4223_v28  ;;  %v11507_v47 = vadd.f32 %v11286_v41, %v4107_v36 }
0x126d   :  { %v4403_v8 = vmul.f32 %v8940_v51, %v4402_v13  ;;  %v4316_v45 = vsel %vm2405_vm5, %v11466_v49, 0.0  ;;  %v5374_v13 = vsel %vm2405_vm5, %v4369_v7, 0.0 }
0x126e   :  { %8945 = vpow2.f32 %v4259_v59  ;;  %4317 = vadd.xlane.f32.xlu0 %v4316_v45  ;;  %4197 = vmax.xlane.f32.xlu2 %v4196_v44  ;;  %v4427_v44 = vor.u32 1.1754944e-38, %v4426_v9  ;;  %v4202_v41 = vsel %vm2405_vm5, %v11507_v47, -inf }
0x126f   :  { %v4404_v52 = vadd.f32 %v8940_v51, %v4403_v8 }
0x1270   :  { %v8944_v21 = vpop.eup %8943 }
0x1271   :  { %v4408_v39 = vsel %vm4407_vm7, %v8940_v51, %v4404_v52  ;;  %v4416_v3 = vmul.f32 %v8944_v21, %v11454_v4  ;;  %v11484_v1 = vpop.xlane.xlu0 %4299  ;;  %v4180_v23 = vpop.xlane.xlu2 %4179  ;;  %v11491_v51 = vmul.f32 %v11349_v38, %v4398_v60  ;;  %vm4421_vm9 = vweird.f32 %v8944_v21 }
0x1272   :  { %8947 = vrcp.f32 %v11484_v1  ;;  %v4224_v32 = vsub.f32 %v11375_v19, %v4180_v23  ;;  %v4413_v42 = vsel %vm4410_vm8, %v4412_v18, %v4408_v39  ;;  %v4424_v19 = vand.u32 2147483647, %v11454_v4  ;;  %vm4422_vm11 = vmor %vm4420_vm10, %vm4421_vm9 }
0x1273   :  { %v4417_v10 = vsub.f32 1.0, %v4416_v3  ;;  %v4414_v2 = vmul.f32 %v11358_v50, %v4413_v42  ;;  %v4439_v42 = vand.u32 2147483647, %v11484_v1  ;;  %vm4435_vm14 = vweird.f32 %v11484_v1 }
0x1274   :  { %v11495_v28 = vpop.eup %8945  ;;  %v4261_v8 = vmul.f32 1.442695, %v4224_v32  ;;  %vm4425_vm12 = vcmp.eq.f32.partialorder %v4424_v19, 8.507059e+37 }
0x1275   :  { %v4418_v11 = vmul.f32 %v8944_v21, %v4417_v10  ;;  %v4319_v43 = vsel %vm2405_vm5, %v11495_v28, 0.0  ;;  %v4716_v59 = vpack.c.bf16 %v4414_v2, %v11491_v51  ;;  %v5375_v38 = vsel %vm2405_vm5, %v4414_v2, 0.0 }
0x1276   :  { %8949 = vpow2.f32 %v4261_v8  ;;  %4320 = vadd.xlane.f32.xlu0 %v4319_v43  ;;  %4200 = vmax.xlane.f32.xlu2 %v4199_v55  ;;  %v11504_v50 = vadd.f32 %v5375_v38, %v5374_v13  ;;  %v4441_v10 = vand.u32 2147483648, %v11484_v1  ;;  %vm4440_vm15 = vcmp.eq.f32.partialorder %v4439_v42, 8.507059e+37 }
0x1277   :  { %v4419_v15 = vadd.f32 %v8944_v21, %v4418_v11  ;;  %7933 = vmatmul.msk.bf16.gmra.mxu3 %vm2405_vm5, %v4716_v59 }
0x1278   :  { %v8948_v7 = vpop.eup %8947  ;;  %v4442_v19 = vor.u32 1.1754944e-38, %v4441_v10 }
0x1279   :  { %v4423_v45 = vsel %vm4422_vm11, %v8944_v21, %v4419_v15  ;;  %v4431_v53 = vmul.f32 %v8948_v7, %v11484_v1  ;;  %v11512_v52 = vpop.xlane.xlu0 %4302  ;;  %v4183_v4 = vpop.xlane.xlu2 %4182  ;;  %vm4436_vm13 = vweird.f32 %v8948_v7 }
0x127a   :  { %8951 = vrcp.f32 %v11512_v52  ;;  %v4225_v18 = vsub.f32 %v11385_v14, %v4183_v4  ;;  %v4428_v3 = vsel %vm4425_vm12, %v4427_v44, %v4423_v45  ;;  %v4110_v21 = vpop.f32.mrf.mxu2  ;;  %v5389_v14 = vsel %vm2405_vm5, %v11444_v16, 0.0  ;;  %vm4437_vm1 = vmor %vm4435_vm14, %vm4436_vm13 }
0x127b   :  { %v4432_v39 = vsub.f32 1.0, %v4431_v53  ;;  %v4429_v23 = vmul.f32 %v11368_v30, %v4428_v3  ;;  %v11532_v9 = vadd.f32 %v11291_v33, %v4110_v21  ;;  %v5404_v45 = vsel %vm2405_vm5, %v11491_v51, 0.0 }
0x127c   :  { %v11519_v60 = vpop.eup %8949  ;;  %v4263_v32 = vmul.f32 1.442695, %v4225_v18  ;;  %v4456_v4 = vand.u32 2147483648, %v11512_v52  ;;  %v4454_v18 = vand.u32 2147483647, %v11512_v52  ;;  %vm4450_vm3 = vweird.f32 %v11512_v52 }
0x127d   :  { %v4433_v36 = vmul.f32 %v8948_v7, %v4432_v39  ;;  %v4322_v55 = vsel %vm2405_vm5, %v11519_v60, 0.0  ;;  %v5390_v2 = vsel %vm2405_vm5, %v4429_v23, 0.0  ;;  %v4205_v33 = vsel %vm2405_vm5, %v11532_v9, -inf }
0x127e   :  { %8953 = vpow2.f32 %v4263_v32  ;;  %4323 = vadd.xlane.f32.xlu1 %v4322_v55  ;;  %4203 = vmax.xlane.f32.xlu0 %v4202_v41  ;;  %v11529_v30 = vadd.f32 %v5390_v2, %v5389_v14  ;;  %v4457_v32 = vor.u32 1.1754944e-38, %v4456_v4  ;;  %vm4455_vm6 = vcmp.eq.f32.partialorder %v4454_v18, 8.507059e+37 }
0x127f   :  { %v4434_v13 = vadd.f32 %v8948_v7, %v4433_v36 }
0x1280   :  { %v8952_v11 = vpop.eup %8951 }
0x1281   :  { %v4438_v8 = vsel %vm4437_vm1, %v8948_v7, %v4434_v13  ;;  %v4446_v16 = vmul.f32 %v8952_v11, %v11512_v52  ;;  %v4306_v43 = vpop.xlane.xlu1 %4305  ;;  %v4186_v59 = vpop.xlane.xlu0 %4185  ;;  %vm4451_vm2 = vweird.f32 %v8952_v11 }
0x1282   :  { %8955 = vrcp.f32 %v4306_v43  ;;  %v4226_v38 = vsub.f32 %v11395_v40, %v4186_v59  ;;  %v4443_v15 = vsel %vm4440_vm15, %v4442_v19, %v4438_v8  ;;  %v4112_v41 = vpop.f32.mrf.mxu2  ;;  %vm4452_vm4 = vmor %vm4450_vm3, %vm4451_vm2  ;;  %v4471_v8 = vand.u32 2147483648, %v4306_v43 }
0x1283   :  { %v4447_v1 = vsub.f32 1.0, %v4446_v16  ;;  %v4444_v44 = vmul.f32 %v11378_v24, %v4443_v15  ;;  %v11557_v14 = vadd.f32 %v11299_v29, %v4112_v41  ;;  %vm4465_vm8 = vweird.f32 %v4306_v43 }
0x1284   :  { %v11542_v7 = vpop.eup %8953  ;;  %v4265_v39 = vmul.f32 1.442695, %v4226_v38 }
0x1285   :  { %v4448_v53 = vmul.f32 %v8952_v11, %v4447_v1  ;;  %v4325_v40 = vsel %vm2405_vm5, %v11542_v7, 0.0  ;;  %v4717_v3 = vpack.c.bf16 %v4444_v44, %v4429_v23  ;;  %v5405_v51 = vsel %vm2405_vm5, %v4444_v44, 0.0 }
0x1286   :  { %8957 = vpow2.f32 %v4265_v39  ;;  %4326 = vadd.xlane.f32.xlu1 %v4325_v40  ;;  %4206 = vmax.xlane.f32.xlu0 %v4205_v33  ;;  %v11550_v24 = vadd.f32 %v5405_v51, %v5404_v45  ;;  %v4208_v29 = vsel %vm2405_vm5, %v11557_v14, -inf }
0x1287   :  { %v4449_v21 = vadd.f32 %v8952_v11, %v4448_v53  ;;  %7934 = vmatmul.msk.bf16.gmra.mxu3 %vm2405_vm5, %v4717_v3 }
0x1288   :  { %v8956_v36 = vpop.eup %8955 }
0x1289   :  { %v4453_v10 = vsel %vm4452_vm4, %v8952_v11, %v4449_v21  ;;  %v4461_v42 = vmul.f32 %v8956_v36, %v4306_v43  ;;  %v11554_v23 = vpop.xlane.xlu1 %4308  ;;  %v4189_v55 = vpop.xlane.xlu0 %4188  ;;  %vm4466_vm7 = vweird.f32 %v8956_v36  ;;  %v4469_v11 = vand.u32 2147483647, %v4306_v43 }
0x128a   :  { %v4227_v2 = vsub.f32 %v11405_v62, %v4189_v55  ;;  %v4458_v13 = vsel %vm4455_vm6, %v4457_v32, %v4453_v10  ;;  %vm4467_vm9 = vmor %vm4465_vm8, %vm4466_vm7  ;;  %v4472_v62 = vor.u32 1.1754944e-38, %v4471_v8  ;;  %vm4480_vm12 = vweird.f32 %v11554_v23 }
0x128b   :  { %v4462_v52 = vsub.f32 1.0, %v4461_v42  ;;  %v4459_v19 = vmul.f32 %v11388_v12, %v4458_v13  ;;  %vm4470_vm10 = vcmp.eq.f32.partialorder %v4469_v11, 8.507059e+37 }
0x128c   :  { %v11561_v16 = vpop.eup %8957  ;;  %v4267_v1 = vmul.f32 1.442695, %v4227_v2 }
0x128d   :  { %v4463_v59 = vmul.f32 %v8956_v36, %v4462_v52  ;;  %v4328_v38 = vsel %vm2405_vm5, %v11561_v16, 0.0  ;;  %v5377_v15 = vsel %vm2405_vm5, %v4459_v19, 0.0 }
0x128e   :  { %8959 = vpow2.f32 %v4267_v1  ;;  %4329 = vadd.xlane.f32.xlu2 %v4328_v38  ;;  %4209 = vmax.xlane.f32.xlu1 %v4208_v29  ;;  %v11569_v12 = vadd.f32 %v5377_v15, %v11504_v50  ;;  %v4484_v1 = vand.u32 2147483647, %v11554_v23 }
0x128f   :  { %v4464_v45 = vadd.f32 %v8956_v36, %v4463_v59  ;;  %v4486_v59 = vand.u32 2147483648, %v11554_v23 }
0x1290   :  { %vm4485_vm15 = vcmp.eq.f32.partialorder %v4484_v1, 8.507059e+37 }
0x1291   :  { %v4468_v33 = vsel %vm4467_vm9, %v8956_v36, %v4464_v45  ;;  %v4192_v44 = vpop.xlane.xlu1 %4191 }
0x1292   :  { %v4228_v53 = vsub.f32 %v11414_v22, %v4192_v44  ;;  %v4473_v4 = vsel %vm4470_vm10, %v4472_v62, %v4468_v33  ;;  %v4487_v33 = vor.u32 1.1754944e-38, %v4486_v59 }
0x1293   :  { %v4474_v39 = vmul.f32 %v11398_v54, %v4473_v4 }
0x1294   :  { %v4269_v18 = vmul.f32 1.442695, %v4228_v53  ;;  %v11573_v40 = vpop.eup %8959 }
0x1295   :  { %v4718_v43 = vpack.c.bf16 %v4474_v39, %v4459_v19  ;;  %v5392_v3 = vsel %vm2405_vm5, %v4474_v39, 0.0  ;;  %v4331_v50 = vsel %vm2405_vm5, %v11573_v40, 0.0 }
0x1296   :  { %8961 = vpow2.f32 %v4269_v18  ;;  %v11579_v51 = vadd.f32 %v5392_v3, %v11529_v30  ;;  %4332 = vadd.xlane.f32.xlu2 %v4331_v50 }
0x1297   :  { %7935 = vmatmul.msk.bf16.gmra.mxu3 %vm2405_vm5, %v4718_v43 }
0x1299   :  { %v4195_v22 = vpop.xlane.xlu1 %4194 }
0x129a   :  { %v4229_v41 = vsub.f32 %v11419_v17, %v4195_v22 }
0x129c   :  { %v11583_v54 = vpop.eup %8961  ;;  %v4271_v21 = vmul.f32 1.442695, %v4229_v41 }
0x129d   :  { %v4334_v36 = vsel %vm2405_vm5, %v11583_v54, 0.0 }
0x129e   :  { %8963 = vpow2.f32 %v4271_v21  ;;  %4335 = vadd.xlane.f32.xlu0 %v4334_v36 }
0x129f   :  { %8965 = vrcp.f32 %v11554_v23 }
0x12a4   :  { %v11587_v10 = vpop.eup %8963 }
0x12a5   :  { %v4337_v30 = vsel %vm2405_vm5, %v11587_v10, 0.0  ;;  %v8966_v32 = vpop.eup %8965 }
0x12a6   :  { %4338 = vadd.xlane.f32.xlu1 %v4337_v30  ;;  %v4476_v42 = vmul.f32 %v8966_v32, %v11554_v23  ;;  %vm4481_vm11 = vweird.f32 %v8966_v32 }
0x12a7   :  { %vm11596_vm13 = vmor %vm4480_vm12, %vm4481_vm11 }
0x12a8   :  { %v4477_v55 = vsub.f32 1.0, %v4476_v42 }
0x12aa   :  { %v4478_v52 = vmul.f32 %v8966_v32, %v4477_v55 }
0x12ac   :  { %v4479_v19 = vadd.f32 %v8966_v32, %v4478_v52 }
0x12ae   :  { %v4483_v45 = vsel %vm11596_vm13, %v8966_v32, %v4479_v19 }
0x12af   :  { %v4488_v3 = vsel %vm4485_vm15, %v4487_v33, %v4483_v45 }
0x12b0   :  { %v4489_v21 = vmul.f32 %v11407_v37, %v4488_v3 }
0x12b2   :  { %v5407_v3 = vsel %vm2405_vm5, %v4489_v21, 0.0 }
0x12d1   :  { %v4312_v17 = vpop.xlane.xlu2 %4311 }
0x12d2   :  { %8967 = vrcp.f32 %v4312_v17  ;;  %v4501_v15 = vand.u32 2147483648, %v4312_v17  ;;  %v4499_v62 = vand.u32 2147483647, %v4312_v17  ;;  %vm4495_vm1 = vweird.f32 %v4312_v17 }
0x12d4   :  { %v4502_v39 = vor.u32 1.1754944e-38, %v4501_v15  ;;  %vm4500_vm3 = vcmp.eq.f32.partialorder %v4499_v62, 8.507059e+37 }
0x12d8   :  { %v8968_v2 = vpop.eup %8967 }
0x12d9   :  { %v4491_v13 = vmul.f32 %v8968_v2, %v4312_v17  ;;  %v4315_v8 = vpop.xlane.xlu2 %4314  ;;  %vm4496_vm14 = vweird.f32 %v8968_v2 }
0x12da   :  { %8969 = vrcp.f32 %v4315_v8  ;;  %vm4497_vm2 = vmor %vm4495_vm1, %vm4496_vm14  ;;  %v4516_v32 = vand.u32 2147483648, %v4315_v8  ;;  %v4514_v17 = vand.u32 2147483647, %v4315_v8  ;;  %vm4510_vm6 = vweird.f32 %v4315_v8 }
0x12db   :  { %v4492_v11 = vsub.f32 1.0, %v4491_v13 }
0x12dc   :  { %vm4515_vm8 = vcmp.eq.f32.partialorder %v4514_v17, 8.507059e+37 }
0x12dd   :  { %v4493_v29 = vmul.f32 %v8968_v2, %v4492_v11 }
0x12df   :  { %v4494_v44 = vadd.f32 %v8968_v2, %v4493_v29 }
0x12e0   :  { %v8970_v53 = vpop.eup %8969 }
0x12e1   :  { %v4498_v4 = vsel %vm4497_vm2, %v8968_v2, %v4494_v44  ;;  %v4506_v23 = vmul.f32 %v8970_v53, %v4315_v8  ;;  %v4318_v18 = vpop.xlane.xlu0 %4317  ;;  %v4198_v43 = vpop.xlane.xlu2 %4197  ;;  %vm4511_vm4 = vweird.f32 %v8970_v53 }
0x12e2   :  { %8971 = vrcp.f32 %v4318_v18  ;;  %v4230_v22 = vsub.f32 %v11457_v58, %v4198_v43  ;;  %v4503_v41 = vsel %vm4500_vm3, %v4502_v39, %v4498_v4  ;;  %vm4512_vm7 = vmor %vm4510_vm6, %vm4511_vm4  ;;  %v4531_v62 = vand.u32 2147483648, %v4318_v18 }
0x12e3   :  { %v4507_v50 = vsub.f32 1.0, %v4506_v23  ;;  %v4504_v36 = vmul.f32 %v11432_v46, %v4503_v41  ;;  %v4517_v46 = vor.u32 1.1754944e-38, %v4516_v32  ;;  %v4529_v44 = vand.u32 2147483647, %v4318_v18 }
0x12e4   :  { %v4273_v42 = vmul.f32 1.442695, %v4230_v22  ;;  %vm4525_vm10 = vweird.f32 %v4318_v18  ;;  %v4532_v43 = vor.u32 1.1754944e-38, %v4531_v62 }
0x12e5   :  { %v4508_v30 = vmul.f32 %v8970_v53, %v4507_v50  ;;  %v4719_v55 = vpack.c.bf16 %v4504_v36, %v4489_v21  ;;  %v5379_v52 = vsel %vm2405_vm5, %v4504_v36, 0.0  ;;  %vm4530_vm12 = vcmp.eq.f32.partialorder %v4529_v44, 8.507059e+37 }
0x12e6   :  { %8973 = vpow2.f32 %v4273_v42  ;;  %v11607_v13 = vadd.f32 %v5379_v52, %v11569_v12 }
0x12e7   :  { %v4509_v2 = vadd.f32 %v8970_v53, %v4508_v30  ;;  %7936 = vmatmul.msk.bf16.gmra.mxu3 %vm2405_vm5, %v4719_v55 }
0x12e8   :  { %v8972_v58 = vpop.eup %8971 }
0x12e9   :  { %v4513_v37 = vsel %vm4512_vm7, %v8970_v53, %v4509_v2  ;;  %v4521_v19 = vmul.f32 %v8972_v58, %v4318_v18  ;;  %v4321_v59 = vpop.xlane.xlu0 %4320  ;;  %v4201_v11 = vpop.xlane.xlu2 %4200  ;;  %vm4526_vm9 = vweird.f32 %v8972_v58 }
0x12ea   :  { %8975 = vrcp.f32 %v4321_v59  ;;  %v11610_v1 = vpop.f32.mrf.mxu3  ;;  %v4231_v8 = vsub.f32 %v11480_v61, %v4201_v11  ;;  %v4518_v29 = vsel %vm4515_vm8, %v4517_v46, %v4513_v37  ;;  %vm4527_vm11 = vmor %vm4525_vm10, %vm4526_vm9  ;;  %v4546_v21 = vand.u32 2147483648, %v4321_v59 }
0x12eb   :  { %v4522_v38 = vsub.f32 1.0, %v4521_v19  ;;  %v4519_v12 = vmul.f32 %v11447_v56, %v4518_v29  ;;  %v4544_v2 = vand.u32 2147483647, %v4321_v59  ;;  %vm4540_vm14 = vweird.f32 %v4321_v59 }
0x12ec   :  { %v11614_v15 = vpop.eup %8973  ;;  %v4275_v33 = vmul.f32 1.442695, %v4231_v8  ;;  %v4547_v11 = vor.u32 1.1754944e-38, %v4546_v21 }
0x12ed   :  { %v4523_v45 = vmul.f32 %v8972_v58, %v4522_v38  ;;  %v4340_v53 = vsel %vm2405_vm5, %v11614_v15, 0.0  ;;  %v5394_v4 = vsel %vm2405_vm5, %v4519_v12, 0.0  ;;  %vm4545_vm15 = vcmp.eq.f32.partialorder %v4544_v2, 8.507059e+37 }
0x12ee   :  { %8977 = vpow2.f32 %v4275_v33  ;;  %4341 = vadd.xlane.f32.xlu2 %v4340_v53  ;;  %v11620_v61 = vadd.f32 %v5394_v4, %v11579_v51  ;;  %v5408_v51 = vadd.f32 %v5407_v3, %v11550_v24 }
0x12ef   :  { %v4524_v39 = vadd.f32 %v8972_v58, %v4523_v45 }
0x12f0   :  { %v8976_v56 = vpop.eup %8975 }
0x12f1   :  { %v4528_v23 = vsel %vm4527_vm11, %v8972_v58, %v4524_v39  ;;  %v4536_v50 = vmul.f32 %v8976_v56, %v4321_v59  ;;  %v4324_v22 = vpop.xlane.xlu1 %4323  ;;  %v4204_v41 = vpop.xlane.xlu0 %4203  ;;  %vm4541_vm13 = vweird.f32 %v8976_v56 }
0x12f2   :  { %8979 = vrcp.f32 %v4324_v22  ;;  %v11623_v36 = vpop.f32.mrf.mxu3  ;;  %v4232_v18 = vsub.f32 %v11507_v47, %v4204_v41  ;;  %v4533_v32 = vsel %vm4530_vm12, %v4532_v43, %v4528_v23  ;;  %vm4542_vm1 = vmor %vm4540_vm14, %vm4541_vm13  ;;  %v4561_v4 = vand.u32 2147483648, %v4324_v22 }
0x12f3   :  { %v4537_v30 = vsub.f32 1.0, %v4536_v50  ;;  %v4534_v42 = vmul.f32 %v11466_v49, %v4533_v32  ;;  %vm4555_vm3 = vweird.f32 %v4324_v22 }
0x12f4   :  { %v11628_v17 = vpop.eup %8977  ;;  %v4277_v52 = vmul.f32 1.442695, %v4232_v18  ;;  %v4562_v41 = vor.u32 1.1754944e-38, %v4561_v4 }
0x12f5   :  { %v4538_v55 = vmul.f32 %v8976_v56, %v4537_v30  ;;  %v4343_v58 = vsel %vm2405_vm5, %v11628_v17, 0.0  ;;  %v4720_v37 = vpack.c.bf16 %v4534_v42, %v4519_v12  ;;  %v5409_v46 = vsel %vm2405_vm5, %v4534_v42, 0.0 }
0x12f6   :  { %8981 = vpow2.f32 %v4277_v52  ;;  %4344 = vadd.xlane.f32.xlu0 %v4343_v58  ;;  %v11633_v47 = vadd.f32 %v5409_v46, %v5408_v51 }
0x12f7   :  { %v4539_v19 = vadd.f32 %v8976_v56, %v4538_v55  ;;  %7937 = vmatmul.msk.bf16.gmra.mxu3 %vm2405_vm5, %v4720_v37 }
0x12f8   :  { %v8980_v49 = vpop.eup %8979 }
0x12f9   :  { %v4543_v24 = vsel %vm4542_vm1, %v8976_v56, %v4539_v19  ;;  %v4551_v38 = vmul.f32 %v8980_v49, %v4324_v22  ;;  %v4327_v8 = vpop.xlane.xlu1 %4326  ;;  %v4207_v29 = vpop.xlane.xlu0 %4206  ;;  %vm4556_vm2 = vweird.f32 %v8980_v49  ;;  %v4559_v56 = vand.u32 2147483647, %v4324_v22 }
0x12fa   :  { %8983 = vrcp.f32 %v4327_v8  ;;  %v11636_v12 = vpop.f32.mrf.mxu3  ;;  %v4233_v59 = vsub.f32 %v11532_v9, %v4207_v29  ;;  %v4548_v62 = vsel %vm4545_vm15, %v4547_v11, %v4543_v24  ;;  %vm4557_vm4 = vmor %vm4555_vm3, %vm4556_vm2  ;;  %v4576_v2 = vand.u32 2147483648, %v4327_v8 }
0x12fb   :  { %v4552_v45 = vsub.f32 1.0, %v4551_v38  ;;  %v4549_v33 = vmul.f32 %v11495_v28, %v4548_v62  ;;  %vm4560_vm6 = vcmp.eq.f32.partialorder %v4559_v56, 8.507059e+37  ;;  %v4574_v37 = vand.u32 2147483647, %v4327_v8 }
0x12fc   :  { %v11640_v44 = vpop.eup %8981  ;;  %v4279_v39 = vmul.f32 1.442695, %v4233_v59  ;;  %vm4570_vm8 = vweird.f32 %v4327_v8  ;;  %v4577_v38 = vor.u32 1.1754944e-38, %v4576_v2 }
0x12fd   :  { %v4553_v53 = vmul.f32 %v8980_v49, %v4552_v45  ;;  %v4346_v23 = vsel %vm2405_vm5, %v11640_v44, 0.0  ;;  %v5381_v43 = vsel %vm2405_vm5, %v4549_v33, 0.0  ;;  %vm4575_vm10 = vcmp.eq.f32.partialorder %v4574_v37, 8.507059e+37 }
0x12fe   :  { %8985 = vpow2.f32 %v4279_v39  ;;  %4347 = vadd.xlane.f32.xlu1 %v4346_v23  ;;  %v11646_v9 = vadd.f32 %v5381_v43, %v11607_v13 }
0x12ff   :  { %v4554_v3 = vadd.f32 %v8980_v49, %v4553_v53 }
0x1300   :  { %v8984_v28 = vpop.eup %8983 }
0x1301   :  { %v4558_v50 = vsel %vm4557_vm4, %v8980_v49, %v4554_v3  ;;  %v4566_v30 = vmul.f32 %v8984_v28, %v4327_v8  ;;  %v4330_v18 = vpop.xlane.xlu2 %4329  ;;  %v4210_v32 = vpop.xlane.xlu1 %4209  ;;  %vm4571_vm7 = vweird.f32 %v8984_v28 }
0x1302   :  { %8987 = vrcp.f32 %v4330_v18  ;;  %v11648_v51 = vpop.f32.mrf.mxu3  ;;  %v4234_v55 = vsub.f32 %v11557_v14, %v4210_v32  ;;  %v4563_v22 = vsel %vm4560_vm6, %v4562_v41, %v4558_v50  ;;  %vm4572_vm9 = vmor %vm4570_vm8, %vm4571_vm7  ;;  %v4591_v8 = vand.u32 2147483648, %v4330_v18 }
0x1303   :  { %v4567_v42 = vsub.f32 1.0, %v4566_v30  ;;  %v4564_v21 = vmul.f32 %v11519_v60, %v4563_v22  ;;  %v4589_v39 = vand.u32 2147483647, %v4330_v18  ;;  %vm4585_vm12 = vweird.f32 %v4330_v18 }
0x1304   :  { %v11652_v52 = vpop.eup %8985  ;;  %v4281_v58 = vmul.f32 1.442695, %v4234_v55  ;;  %v4592_v50 = vor.u32 1.1754944e-38, %v4591_v8 }
0x1305   :  { %v4568_v13 = vmul.f32 %v8984_v28, %v4567_v42  ;;  %v4349_v46 = vsel %vm2405_vm5, %v11652_v52, 0.0  ;;  %v4721_v19 = vpack.c.bf16 %v4564_v21, %v4549_v33  ;;  %v5396_v49 = vsel %vm2405_vm5, %v4564_v21, 0.0 }
0x1306   :  { %8989 = vpow2.f32 %v4281_v58  ;;  %4350 = vadd.xlane.f32.xlu2 %v4349_v46  ;;  %v11658_v14 = vadd.f32 %v5396_v49, %v11620_v61  ;;  %vm4590_vm14 = vcmp.eq.f32.partialorder %v4589_v39, 8.507059e+37  ;;  %v4838_v46 = vmul.f32 %v11648_v51, %v10091_v5 }
0x1307   :  { %v4569_v24 = vadd.f32 %v8984_v28, %v4568_v13  ;;  %7938 = vmatmul.msk.bf16.gmra.mxu3 %vm2405_vm5, %v4721_v19 }
0x1308   :  { %v8988_v60 = vpop.eup %8987 }
0x1309   :  { %v4573_v11 = vsel %vm4572_vm9, %v8984_v28, %v4569_v24  ;;  %v4581_v29 = vmul.f32 %v8988_v60, %v4330_v18  ;;  %v4333_v45 = vpop.xlane.xlu2 %4332  ;;  %vm4586_vm11 = vweird.f32 %v8988_v60 }
0x130a   :  { %8991 = vrcp.f32 %v4333_v45  ;;  %v11661_v59 = vpop.f32.mrf.mxu3  ;;  %v4578_v33 = vsel %vm4575_vm10, %v4577_v38, %v4573_v11  ;;  %vm4587_vm13 = vmor %vm4585_vm12, %vm4586_vm11  ;;  %v4604_v21 = vand.u32 2147483647, %v4333_v45  ;;  %v4606_v13 = vand.u32 2147483648, %v4333_v45 }
0x130b   :  { %v4582_v62 = vsub.f32 1.0, %v4581_v29  ;;  %v4579_v53 = vmul.f32 %v11542_v7, %v4578_v33  ;;  %vm4600_vm15 = vweird.f32 %v4333_v45 }
0x130c   :  { %v11664_v4 = vpop.eup %8989  ;;  %v4607_v49 = vor.u32 1.1754944e-38, %v4606_v13  ;;  %vm4605_vm3 = vcmp.eq.f32.partialorder %v4604_v21, 8.507059e+37 }
0x130d   :  { %v4583_v61 = vmul.f32 %v8988_v60, %v4582_v62  ;;  %v4352_v56 = vsel %vm2405_vm5, %v11664_v4, 0.0  ;;  %v5411_v23 = vsel %vm2405_vm5, %v4579_v53, 0.0 }
0x130e   :  { %4353 = vadd.xlane.f32.xlu0 %v4352_v56  ;;  %v5412_v3 = vadd.f32 %v5411_v23, %v11633_v47 }
0x130f   :  { %v4584_v43 = vadd.f32 %v8988_v60, %v4583_v61 }
0x1310   :  { %v8992_v28 = vpop.eup %8991 }
0x1311   :  { %v4336_v41 = vpop.xlane.xlu0 %4335  ;;  %v4588_v7 = vsel %vm4587_vm13, %v8988_v60, %v4584_v43  ;;  %v4596_v30 = vmul.f32 %v8992_v28, %v4333_v45  ;;  %vm4601_vm1 = vweird.f32 %v8992_v28 }
0x1312   :  { %8993 = vrcp.f32 %v4336_v41  ;;  %v11670_v32 = vpop.f32.mrf.mxu3  ;;  %v4593_v42 = vsel %vm4590_vm14, %v4592_v50, %v4588_v7  ;;  %vm4602_vm2 = vmor %vm4600_vm15, %vm4601_vm1  ;;  %v4621_v62 = vand.u32 2147483648, %v4336_v41  ;;  %v4619_v8 = vand.u32 2147483647, %v4336_v41 }
0x1313   :  { %v4597_v55 = vsub.f32 1.0, %v4596_v30  ;;  %v4594_v22 = vmul.f32 %v11561_v16, %v4593_v42  ;;  %v4835_v16 = vmul.f32 %v11610_v1, %v10070_v34  ;;  %vm4615_vm6 = vweird.f32 %v4336_v41 }
0x1314   :  { %v4622_v56 = vor.u32 1.1754944e-38, %v4621_v62  ;;  %vm4620_vm8 = vcmp.eq.f32.partialorder %v4619_v8, 8.507059e+37 }
0x1315   :  { %v4598_v18 = vmul.f32 %v8992_v28, %v4597_v55  ;;  %v4722_v2 = vpack.c.bf16 %v4594_v22, %v4579_v53  ;;  %v5383_v47 = vsel %vm2405_vm5, %v4594_v22, 0.0  ;;  %v4859_v29 = vadd.f32 %v4838_v46, %v4835_v16 }
0x1316   :  { %v11675_v58 = vadd.f32 %v5383_v47, %v11646_v9 }
0x1317   :  { %v4599_v19 = vadd.f32 %v8992_v28, %v4598_v18  ;;  %7939 = vmatmul.msk.bf16.gmra.mxu3 %vm2405_vm5, %v4722_v2 }
0x1318   :  { %v8994_v37 = vpop.eup %8993 }
0x1319   :  { %v4611_v24 = vmul.f32 %v8994_v37, %v4336_v41  ;;  %v4603_v60 = vsel %vm4602_vm2, %v8992_v28, %v4599_v19  ;;  %vm4616_vm4 = vweird.f32 %v8994_v37  ;;  %v4339_v30 = vpop.xlane.xlu1 %4338  ;;  %v4837_v19 = vmul.f32 %v11636_v12, %v10070_v34 }
0x131a   :  { %v4790_v38 = vpop.f32.mrf.mxu3  ;;  %v4608_v9 = vsel %vm4605_vm3, %v4607_v49, %v4603_v60  ;;  %vm4617_vm7 = vmor %vm4615_vm6, %vm4616_vm4  ;;  %8995 = vrcp.f32 %v4339_v30  ;;  %v4636_v47 = vand.u32 2147483648, %v4339_v30  ;;  %vm4630_vm10 = vweird.f32 %v4339_v30 }
0x131b   :  { %v4612_v11 = vsub.f32 1.0, %v4611_v24  ;;  %v4841_v33 = vmul.f32 %v4790_v38, %v10105_v26  ;;  %v4609_v51 = vmul.f32 %v11573_v40, %v4608_v9  ;;  %v4634_v46 = vand.u32 2147483647, %v4339_v30 }
0x131d   :  { %v4613_v45 = vmul.f32 %v8994_v37, %v4612_v11  ;;  %v11684_v53 = vadd.f32 %v4859_v29, %v4841_v33  ;;  %v5398_v61 = vsel %vm2405_vm5, %v4609_v51, 0.0  ;;  %v4637_v11 = vor.u32 1.1754944e-38, %v4636_v47 }
0x131e   :  { %v11688_v1 = vadd.f32 %v5398_v61, %v11658_v14  ;;  %vm4635_vm14 = vcmp.eq.f32.partialorder %v4634_v46, 8.507059e+37 }
0x131f   :  { %v4614_v39 = vadd.f32 %v8994_v37, %v4613_v45 }
0x1320   :  { %v8996_v41 = vpop.eup %8995 }
0x1321   :  { %v4618_v23 = vsel %vm4617_vm7, %v8994_v37, %v4614_v39  ;;  %v4626_v42 = vmul.f32 %v8996_v41, %v4339_v30  ;;  %vm4631_vm9 = vweird.f32 %v8996_v41 }
0x1322   :  { %v4623_v43 = vsel %vm4620_vm8, %v4622_v56, %v4618_v23  ;;  %v4792_v22 = vpop.f32.mrf.mxu3  ;;  %vm11698_vm11 = vmor %vm4630_vm10, %vm4631_vm9 }
0x1323   :  { %v4624_v28 = vmul.f32 %v11583_v54, %v4623_v43  ;;  %v4627_v55 = vsub.f32 1.0, %v4626_v42  ;;  %v4839_v43 = vmul.f32 %v11661_v59, %v10091_v5  ;;  %v4842_v30 = vmul.f32 %v4792_v22, %v10105_v26 }
0x1324   :  { %v4840_v22 = vmul.f32 %v11670_v32, %v10091_v5 }
0x1325   :  { %v4723_v40 = vpack.c.bf16 %v4624_v28, %v4609_v51  ;;  %v5413_v50 = vsel %vm2405_vm5, %v4624_v28, 0.0  ;;  %v4628_v21 = vmul.f32 %v8996_v41, %v4627_v55 }
0x1326   :  { %v11692_v7 = vadd.f32 %v5413_v50, %v5412_v3  ;;  %v4836_v50 = vmul.f32 %v11623_v36, %v10070_v34 }
0x1327   :  { %7940 = vmatmul.msk.bf16.gmra.mxu3 %vm2405_vm5, %v4723_v40  ;;  %v4629_v54 = vadd.f32 %v8996_v41, %v4628_v21 }
0x1328   :  { %v4866_v42 = vadd.f32 %v4839_v43, %v4836_v50 }
0x1329   :  { %v4633_v16 = vsel %vm11698_vm11, %v8996_v41, %v4629_v54 }
0x132a   :  { %v4638_v45 = vsel %vm4635_vm14, %v4637_v11, %v4633_v16  ;;  %v4867_v55 = vadd.f32 %v4866_v42, %v4842_v30  ;;  %v4873_v11 = vadd.f32 %v4840_v22, %v4837_v19  ;;  %v8549_v42 = vld [vmem:[#allocation25 + $0x78] sm:$0xff] }
0x132b   :  { %v4639_v56 = vmul.f32 %v11587_v10, %v4638_v45  ;;  %4952 = vmatpush.bf16.msrb.mxu1 %v8549_v42  ;;  %v8545_v42 = vld [vmem:[#allocation25 + $0x58] sm:$0xff] }
0x1361   :  { %v4342_v14 = vpop.xlane.xlu2 %4341 }
0x1362   :  { %8997 = vrcp.f32 %v4342_v14  ;;  %v4651_v24 = vand.u32 2147483648, %v4342_v14  ;;  %v4649_v60 = vand.u32 2147483647, %v4342_v14  ;;  %vm4645_vm13 = vweird.f32 %v4342_v14 }
0x1364   :  { %v4652_v62 = vor.u32 1.1754944e-38, %v4651_v24  ;;  %vm4650_vm15 = vcmp.eq.f32.partialorder %v4649_v60, 8.507059e+37 }
0x1368   :  { %v8998_v13 = vpop.eup %8997 }
0x1369   :  { %v4641_v18 = vmul.f32 %v8998_v13, %v4342_v14  ;;  %v11695_v2 = vpop.xlane.xlu0 %4344  ;;  %vm4646_vm12 = vweird.f32 %v8998_v13 }
0x136a   :  { %8999 = vrcp.f32 %v11695_v2  ;;  %v4795_v3 = vpop.f32.mrf.mxu3  ;;  %vm4647_vm1 = vmor %vm4645_vm13, %vm4646_vm12  ;;  %v4666_v21 = vand.u32 2147483648, %v11695_v2  ;;  %vm4660_vm3 = vweird.f32 %v11695_v2 }
0x136b   :  { %v4642_v37 = vsub.f32 1.0, %v4641_v18  ;;  %v4664_v18 = vand.u32 2147483647, %v11695_v2  ;;  %v4843_v16 = vmul.f32 %v4795_v3, %v10105_v26 }
0x136c   :  { %v4667_v24 = vor.u32 1.1754944e-38, %v4666_v21 }
0x136d   :  { %v4643_v49 = vmul.f32 %v8998_v13, %v4642_v37  ;;  %vm4665_vm8 = vcmp.eq.f32.partialorder %v4664_v18, 8.507059e+37 }
0x136f   :  { %v4644_v38 = vadd.f32 %v8998_v13, %v4643_v49 }
0x1370   :  { %v9000_v9 = vpop.eup %8999 }
0x1371   :  { %v4648_v29 = vsel %vm4647_vm1, %v8998_v13, %v4644_v38  ;;  %v4656_v33 = vmul.f32 %v9000_v9, %v11695_v2  ;;  %v4348_v51 = vpop.xlane.xlu1 %4347  ;;  %vm4661_vm2 = vweird.f32 %v9000_v9  ;;  %v5385_v38 = vsel %vm2405_vm5, %v4639_v56, 0.0 }
0x1372   :  { %9001 = vrcp.f32 %v4348_v51  ;;  %v11705_v8 = vpop.f32.mrf.mxu3  ;;  %v4653_v39 = vsel %vm4650_vm15, %v4652_v62, %v4648_v29  ;;  %vm11727_vm4 = vmor %vm4660_vm3, %vm4661_vm2  ;;  %v4681_v37 = vand.u32 2147483648, %v4348_v51  ;;  %v4679_v32 = vand.u32 2147483647, %v4348_v51 }
0x1373   :  { %v4657_v61 = vsub.f32 1.0, %v4656_v33  ;;  %v11709_v23 = vmul.f32 %v11614_v15, %v4653_v39  ;;  %vm4675_vm7 = vweird.f32 %v4348_v51  ;;  %v5386_v43 = vadd.f32 %v5385_v38, %v11675_v58 }
0x1374   :  { %v4682_v62 = vor.u32 1.1754944e-38, %v4681_v37  ;;  %vm4680_vm10 = vcmp.eq.f32.partialorder %v4679_v32, 8.507059e+37 }
0x1375   :  { %v4658_v28 = vmul.f32 %v9000_v9, %v4657_v61  ;;  %v4724_v40 = vpack.c.bf16 %v11709_v23, %v4639_v56  ;;  %v4874_v61 = vadd.f32 %v4873_v11, %v4843_v16 }
0x1377   :  { %7941 = vmatmul.msk.bf16.gmra.mxu3 %vm2405_vm5, %v4724_v40  ;;  %v4659_v15 = vadd.f32 %v9000_v9, %v4658_v28 }
0x1378   :  { %v9002_v41 = vpop.eup %9001 }
0x1379   :  { %v4671_v14 = vmul.f32 %v9002_v41, %v4348_v51  ;;  %v11718_v10 = vpop.xlane.xlu2 %4350  ;;  %vm4676_vm6 = vweird.f32 %v9002_v41  ;;  %v4663_v49 = vsel %vm11727_vm4, %v9000_v9, %v4659_v15 }
0x137a   :  { %9003 = vrcp.f32 %v11718_v10  ;;  %v4800_v59 = vpop.f32.mrf.mxu3  ;;  %vm4677_vm9 = vmor %vm4675_vm7, %vm4676_vm6  ;;  %v4668_v45 = vsel %vm4665_vm8, %v4667_v24, %v4663_v49  ;;  %v4696_v28 = vand.u32 2147483648, %v11718_v10  ;;  %v4694_v30 = vand.u32 2147483647, %v11718_v10 }
0x137b   :  { %v4672_v13 = vsub.f32 1.0, %v4671_v14  ;;  %v4845_v36 = vmul.f32 %v4800_v59, %v10118_v48  ;;  %v4669_v56 = vmul.f32 %v11628_v17, %v4668_v45  ;;  %v4844_v14 = vmul.f32 %v11705_v8, %v10118_v48 }
0x137c   :  { %vm4690_vm12 = vweird.f32 %v11718_v10  ;;  %v4697_v21 = vor.u32 1.1754944e-38, %v4696_v28  ;;  %vm4695_vm14 = vcmp.eq.f32.partialorder %v4694_v30, 8.507059e+37  ;;  %v8547_v28 = vld [vmem:[#allocation25 + $0x68] sm:$0xff] }
0x137d   :  { %v4673_v47 = vmul.f32 %v9002_v41, %v4672_v13  ;;  %v11731_v46 = vadd.f32 %v4867_v55, %v4845_v36  ;;  %v4861_v22 = vadd.f32 %v11684_v53, %v4844_v14 }
0x137f   :  { %v4674_v2 = vadd.f32 %v9002_v41, %v4673_v47 }
0x1380   :  { %v9004_v60 = vpop.eup %9003 }
0x1381   :  { %v4678_v29 = vsel %vm4677_vm9, %v9002_v41, %v4674_v2  ;;  %v4686_v33 = vmul.f32 %v9004_v60, %v11718_v10  ;;  %v4354_v12 = vpop.xlane.xlu0 %4353  ;;  %vm4691_vm11 = vweird.f32 %v9004_v60 }
0x1382   :  { %9005 = vrcp.f32 %v4354_v12  ;;  %v4802_v9 = vpop.f32.mrf.mxu3  ;;  %v4683_v51 = vsel %vm4680_vm10, %v4682_v62, %v4678_v29  ;;  %vm4692_vm13 = vmor %vm4690_vm12, %vm4691_vm11  ;;  %v4709_v49 = vand.u32 2147483647, %v4354_v12  ;;  %v4711_v32 = vand.u32 2147483648, %v4354_v12 }
0x1383   :  { %v4687_v39 = vsub.f32 1.0, %v4686_v33  ;;  %v4846_v3 = vmul.f32 %v4802_v9, %v10118_v48  ;;  %v4684_v40 = vmul.f32 %v11640_v44, %v4683_v51  ;;  %v5400_v44 = vsel %vm2405_vm5, %v11709_v23, 0.0  ;;  %v8548_v51 = vld [vmem:[#allocation25 + $0x70] sm:$0xff] }
0x1384   :  { %v5401_v19 = vadd.f32 %v5400_v44, %v11688_v1  ;;  %vm4705_vm15 = vweird.f32 %v4354_v12  ;;  %v4712_v11 = vor.u32 1.1754944e-38, %v4711_v32  ;;  %vm4710_vm3 = vcmp.eq.f32.partialorder %v4709_v49, 8.507059e+37  ;;  %4953 = vmatpush.bf16.msrb.mxu1 %v8548_v51 }
0x1385   :  { %v4688_v50 = vmul.f32 %v9004_v60, %v4687_v39  ;;  %v11746_v41 = vadd.f32 %v4874_v61, %v4846_v3  ;;  %v4725_v15 = vpack.c.bf16 %v4684_v40, %v4669_v56  ;;  %v5387_v59 = vsel %vm2405_vm5, %v4684_v40, 0.0 }
0x1386   :  { %v5388_v55 = vadd.f32 %v5387_v59, %v5386_v43  ;;  %v8544_v59 = vld [vmem:[#allocation25 + $0x50] sm:$0xff] }
0x1387   :  { %v4689_v58 = vadd.f32 %v9004_v60, %v4688_v50  ;;  %7942 = vmatmul.msk.bf16.gmra.mxu3 %vm2405_vm5, %v4725_v15 }
0x1388   :  { %v9006_v17 = vpop.eup %9005  ;;  %v5419_v36 = vmul.f32 %v5388_v55, %v10450_v0  ;;  %4954 = vmatpush.bf16.msrb.mxu1 %v8547_v28  ;;  %v8543_v55 = vld [vmem:[#allocation25 + $0x48] sm:$0xff]  ;;  %v8038_v28 = vld [vmem:[#allocation26 + $0xf0] sm:$0xf] }
0x1389   :  { %v4693_v13 = vsel %vm4692_vm13, %v9004_v60, %v4689_v58  ;;  %v4701_v8 = vmul.f32 %v9006_v17, %v4354_v12  ;;  %vm4706_vm1 = vweird.f32 %v9006_v17 }
0x138a   :  { %v4805_v18 = vpop.f32.mrf.mxu3  ;;  %v4698_v10 = vsel %vm4695_vm14, %v4697_v21, %v4693_v13  ;;  %v5422_v47 = vsel %vm2405_vm5, %v5419_v36, 0.0  ;;  %vm4707_vm2 = vmor %vm4705_vm15, %vm4706_vm1 }
0x138b   :  { %v4702_v54 = vsub.f32 1.0, %v4701_v8  ;;  %v4847_v37 = vmul.f32 %v4805_v18, %v10065_v31  ;;  %v4699_v23 = vmul.f32 %v11652_v52, %v4698_v10  ;;  %8108 = vst [vmem:[%s9878_s14 + $0x18] sm:$0xff] %v5422_v47  ;;  %v5415_v52 = vsel %vm2405_vm5, %v4669_v56, 0.0 }
0x138c   :  { %v5416_v12 = vadd.f32 %v5415_v52, %v11692_v7  ;;  %v8546_v7 = vld [vmem:[#allocation25 + $0x60] sm:$0xff] }
0x138d   :  { %v4703_v24 = vmul.f32 %v9006_v17, %v4702_v54  ;;  %v4862_v16 = vadd.f32 %v4861_v22, %v4847_v37  ;;  %v5402_v53 = vsel %vm2405_vm5, %v4699_v23, 0.0  ;;  %4955 = vmatpush.bf16.msrb.mxu1 %v8546_v7 }
0x138e   :  { %v5403_v2 = vadd.f32 %v5402_v53, %v5401_v19 }
0x138f   :  { %v4704_v60 = vadd.f32 %v9006_v17, %v4703_v24 }
0x1390   :  { %v5420_v38 = vmul.f32 %v5403_v2, %v10450_v0 }
0x1391   :  { %v4708_v29 = vsel %vm4707_vm2, %v9006_v17, %v4704_v60  ;;  %4956 = vmatpush.bf16.msrb.mxu1 %v8545_v42  ;;  %v8542_v17 = vld [vmem:[#allocation25 + $0x40] sm:$0xff] }
0x1392   :  { %v4807_v1 = vpop.f32.mrf.mxu3  ;;  %v4713_v62 = vsel %vm4710_vm3, %v4712_v11, %v4708_v29  ;;  %v5423_v33 = vsel %vm2405_vm5, %v5420_v38, 0.0  ;;  %v8014_v42 = vld [vmem:[#allocation26 + $0xc0] sm:$0xf] }
0x1393   :  { %v4848_v45 = vmul.f32 %v4807_v1, %v10065_v31  ;;  %v4714_v9 = vmul.f32 %v11664_v4, %v4713_v62  ;;  %8109 = vst [vmem:[%s9878_s14 + $0x20] sm:$0xff] %v5423_v33  ;;  %v8724_v1 = vld [vmem:[%s12573_s13 + $0x1] ss:$0 sm:$0xff] }
0x1395   :  { %v4869_v61 = vadd.f32 %v11731_v46, %v4848_v45  ;;  %v4726_v39 = vpack.c.bf16 %v4714_v9, %v4699_v23  ;;  %v5417_v3 = vsel %vm2405_vm5, %v4714_v9, 0.0  ;;  %4957 = vmatpush.bf16.msrb.mxu1 %v8544_v59 }
0x1396   :  { %v5418_v43 = vadd.f32 %v5417_v3, %v5416_v12 }
0x1397   :  { %7943 = vmatmul.msk.bf16.gmra.mxu3 %vm2405_vm5, %v4726_v39 }
0x1398   :  { %v5421_v56 = vmul.f32 %v5418_v43, %v10450_v0 }
0x1399   :  { %4958 = vmatpush.bf16.msrb.mxu1 %v8543_v55 }
0x139a   :  { %v5424_v40 = vsel %vm2405_vm5, %v5421_v56, 0.0  ;;  %v4810_v50 = vpop.f32.mrf.mxu3  ;;  %v8565_v56 = vld [vmem:[#allocation26 + $0xf4] sm:$0xf0] }
0x139b   :  { %8110 = vst [vmem:[%s9878_s14 + $0x28] sm:$0xff] %v5424_v40  ;;  %v4849_v4 = vmul.f32 %v4810_v50, %v10065_v31  ;;  %v8030_v40 = vld [vmem:[#allocation26 + $0xe0] sm:$0xf]  ;;  %v8039_v50 = vor.u32 %v8565_v56, %v8038_v28  ;;  %v7992_v56 = vld [vmem:[#allocation26 + $0x98] sm:$0xf0] }
0x139d   :  { %v4876_v46 = vadd.f32 %v11746_v41, %v4849_v4  ;;  %4959 = vmatpush.bf16.msrb.mxu1 %v8542_v17  ;;  %v8563_v4 = vld [vmem:[#allocation26 + $0xe4] sm:$0xf0]  ;;  %5155 = vmatpush.bf16.msrb.mxu0 %v8039_v50  ;;  %v7982_v50 = vld [vmem:[#allocation26 + $0x80] sm:$0xf] }
0x139e   :  { %v8031_v7 = vor.u32 %v8563_v4, %v8030_v40  ;;  %v8551_v4 = vld [vmem:[#allocation26 + $0x84] sm:$0xf0] }
0x13a1   :  { %5156 = vmatpush.bf16.msrb.mxu0 %v8031_v7  ;;  %v8550_v7 = vld [vmem:[#allocation26 + $0x84] sm:$0xf] }
0x13a2   :  { %v4812_v30 = vpop.f32.mrf.mxu3 }
0x13a3   :  { %v4850_v8 = vmul.f32 %v4812_v30, %v10072_v35 }
0x13a5   :  { %v4863_v18 = vadd.f32 %v4862_v16, %v4850_v8 }
0x13aa   :  { %v4815_v14 = vpop.f32.mrf.mxu3 }
0x13ab   :  { %v4851_v41 = vmul.f32 %v4815_v14, %v10072_v35 }
0x13ad   :  { %v4870_v10 = vadd.f32 %v4869_v61, %v4851_v41 }
0x13b2   :  { %v4817_v15 = vpop.f32.mrf.mxu3 }
0x13b3   :  { %v4852_v53 = vmul.f32 %v4817_v15, %v10072_v35 }
0x13b5   :  { %v4877_v11 = vadd.f32 %v4876_v46, %v4852_v53  ;;  %v8561_v46 = vld [vmem:[#allocation26 + $0xd4] sm:$0xf0] }
0x13fa   :  { %v4820_v58 = vpop.f32.mrf.mxu3 }
0x13fb   :  { %v4853_v36 = vmul.f32 %v4820_v58, %v10093_v6 }
0x13fd   :  { %v4864_v37 = vadd.f32 %v4863_v18, %v4853_v36  ;;  %v8040_v18 = vld [vmem:[#allocation26 + $0xf8] sm:$0xf0] }
0x1402   :  { %v4822_v44 = vpop.f32.mrf.mxu3 }
0x1403   :  { %v4854_v22 = vmul.f32 %v4822_v44, %v10093_v6 }
0x1405   :  { %v4871_v23 = vadd.f32 %v4870_v10, %v4854_v22  ;;  %v8564_v22 = vld [vmem:[#allocation26 + $0xf4] sm:$0xf] }
0x1406   :  { %v8043_v10 = vor.u32 %v8564_v22, %v8040_v18 }
0x1408   :  { %5173 = vmatpush.bf16.msra.mxu1 %v8043_v10 }
0x140a   :  { %v4825_v21 = vpop.f32.mrf.mxu3 }
0x140b   :  { %v4855_v60 = vmul.f32 %v4825_v21, %v10093_v6 }
0x140d   :  { %v4878_v38 = vadd.f32 %v4877_v11, %v4855_v60  ;;  %v8557_v60 = vld [vmem:[#allocation26 + $0xb4] sm:$0xf0] }
0x1412   :  { %v4827_v13 = vpop.f32.mrf.mxu3 }
0x1413   :  { %v4856_v54 = vmul.f32 %v4827_v13, %v10107_v27 }
0x1415   :  { %v4865_v49 = vadd.f32 %v4864_v37, %v4856_v54  ;;  %v8562_v54 = vld [vmem:[#allocation26 + $0xe4] sm:$0xf] }
0x141a   :  { %v4830_v47 = vpop.f32.mrf.mxu3 }
0x141b   :  { %v4857_v19 = vmul.f32 %v4830_v47, %v10107_v27  ;;  %v8032_v47 = vld [vmem:[#allocation26 + $0xe8] sm:$0xf0] }
0x141c   :  { %v8035_v37 = vor.u32 %v8562_v54, %v8032_v47  ;;  %v8573_v54 = vld [vmem:[#allocation28 + $0xb8] sm:$0xff] }
0x141d   :  { %v4872_v32 = vadd.f32 %v4871_v23, %v4857_v19  ;;  %v8560_v23 = vld [vmem:[#allocation26 + $0xd4] sm:$0xf]  ;;  %v8024_v19 = vld [vmem:[#allocation26 + $0xd8] sm:$0xf0] }
0x141e   :  { %5174 = vmatpush.bf16.msra.mxu1 %v8035_v37  ;;  %v8581_v47 = vld [vmem:[#allocation28 + $0xf8] sm:$0xff] }
0x141f   :  { %v4880_v24 = vpack.c.bf16 %v4872_v32, %v4865_v49  ;;  %v8027_v49 = vor.u32 %v8560_v23, %v8024_v19  ;;  %v8558_v32 = vld [vmem:[#allocation26 + $0xc4] sm:$0xf]  ;;  %v8572_v19 = vld [vmem:[#allocation28 + $0xb0] sm:$0xff] }
0x1421   :  { %4960 = vmatmul.bf16.vlgmr.msrb.gmra.mxu1 %v4880_v24  ;;  %v8016_v24 = vld [vmem:[#allocation26 + $0xc8] sm:$0xf0] }
0x1422   :  { %v4832_v2 = vpop.f32.mrf.mxu3  ;;  %5175 = vmatpush.bf16.msra.mxu1 %v8027_v49  ;;  %v8019_v53 = vor.u32 %v8558_v32, %v8016_v24  ;;  %v8580_v49 = vld [vmem:[#allocation28 + $0xf0] sm:$0xff] }
0x1423   :  { %v4858_v16 = vmul.f32 %v4832_v2, %v10107_v27  ;;  %v8006_v2 = vld [vmem:[#allocation26 + $0xb0] sm:$0xf] }
0x1424   :  { %v8007_v11 = vor.u32 %v8557_v60, %v8006_v2 }
0x1425   :  { %v4879_v29 = vadd.f32 %v4878_v38, %v4858_v16  ;;  %v8556_v16 = vld [vmem:[#allocation26 + $0xb4] sm:$0xf]  ;;  %v8008_v38 = vld [vmem:[#allocation26 + $0xb8] sm:$0xf0] }
0x1426   :  { %5176 = vmatpush.bf16.msra.mxu1 %v8019_v53  ;;  %v8725_v53 = vld [vmem:[%s12574_s18 + $0x1] ss:$0 sm:$0xff] }
0x1427   :  { %v4881_v52 = vpack.c.bf16 %v4879_v29, %v4879_v29  ;;  %v8011_v29 = vor.u32 %v8556_v16, %v8008_v38  ;;  %v8571_v16 = vld [vmem:[#allocation28 + $0xa8] sm:$0xff] }
0x1428   :  { %v8579_v38 = vld [vmem:[#allocation28 + $0xe8] sm:$0xff] }
0x142a   :  { %5177 = vmatpush.bf16.msra.mxu1 %v8011_v29 }
0x1431   :  { %4965 = vmatmul.bf16.gmra.mxu1 %v4881_v52 }
0x149e   :  { %v4961_v62 = vpop.f32.mrf.mxu1 }
0x149f   :  { %v4962_v33 = vadd.f32 %v8724_v1, %v4961_v62  ;;  %v7998_v62 = vld [vmem:[#allocation26 + $0xa0] sm:$0xf] }
0x14a1   :  { %v4970_v45 = vadd.f32 %v4962_v33, %v11165_v25  ;;  %v8022_v25 = vld [vmem:[#allocation26 + $0xd0] sm:$0xf]  ;;  %v8555_v33 = vld [vmem:[#allocation26 + $0xa4] sm:$0xf0] }
0x14a2   :  { %v8023_v30 = vor.u32 %v8561_v46, %v8022_v25  ;;  %v7983_v46 = vor.u32 %v8551_v4, %v7982_v50  ;;  %v8569_v4 = vld [vmem:[#allocation28 + $0x98] sm:$0xff] }
0x14a3   :  { %4977 = vadd.xlane.f32.xlu1 %v4970_v45 }
0x14a4   :  { %5157 = vmatpush.bf16.msrb.mxu0 %v8023_v30  ;;  %v7984_v30 = vld [vmem:[#allocation26 + $0x88] sm:$0xf0] }
0x14a6   :  { %v4963_v9 = vpop.f32.mrf.mxu1 }
0x14a7   :  { %v4964_v12 = vadd.f32 %v8724_v1, %v4963_v9  ;;  %v7999_v9 = vor.u32 %v8555_v33, %v7998_v62 }
0x14a9   :  { %v4971_v61 = vadd.f32 %v4964_v12, %v11168_v57  ;;  %v8559_v57 = vld [vmem:[#allocation26 + $0xc4] sm:$0xf0]  ;;  %v8000_v12 = vld [vmem:[#allocation26 + $0xa8] sm:$0xf0] }
0x14ab   :  { %4979 = vadd.xlane.f32.xlu2 %v4971_v61 }
0x14ae   :  { %v4966_v39 = vpop.f32.mrf.mxu1 }
0x14af   :  { %v4967_v3 = vadd.f32 %v8724_v1, %v4966_v39 }
0x14b1   :  { %v4972_v51 = vadd.f32 %v4967_v3, %v11175_v63  ;;  %v8015_v63 = vor.u32 %v8559_v57, %v8014_v42  ;;  %v7990_v3 = vld [vmem:[#allocation26 + $0x90] sm:$0xf]  ;;  %v7987_v57 = vor.u32 %v8550_v7, %v7984_v30  ;;  %v8577_v7 = vld [vmem:[#allocation28 + $0xd8] sm:$0xff]  ;;  %v8567_v30 = vld [vmem:[#allocation28 + $0x88] sm:$0xff] }
0x14b3   :  { %4981 = vadd.xlane.f32.xlu0 %v4972_v51  ;;  %5158 = vmatpush.bf16.msrb.mxu0 %v8015_v63 }
0x14b6   :  { %v4968_v43 = vpop.f32.mrf.mxu1 }
0x14b7   :  { %5159 = vmatpush.bf16.msrb.mxu0 %v8007_v11  ;;  %v8552_v43 = vld [vmem:[#allocation26 + $0x94] sm:$0xf] }
0x14b8   :  { %v7995_v40 = vor.u32 %v8552_v43, %v7992_v56 }
0x14bb   :  { %5160 = vmatpush.bf16.msrb.mxu0 %v7999_v9 }
0x1516   :  { %v4978_v14 = vpop.xlane.xlu1 %4977 }
0x1517   :  { %v4983_v15 = vmul.f32 %v4978_v14, %v10487_v20 }
0x1519   :  { %v11792_v59 = vsub.f32 %v4970_v45, %v4983_v15  ;;  %v8554_v45 = vld [vmem:[#allocation26 + $0xa4] sm:$0xf] }
0x151a   :  { %v8003_v39 = vor.u32 %v8554_v45, %v8000_v12  ;;  %v8570_v12 = vld [vmem:[#allocation28 + $0xa0] sm:$0xff] }
0x151b   :  { %v4989_v58 = vmul.f32 %v11792_v59, %v11792_v59 }
0x151c   :  { %5178 = vmatpush.bf16.msra.mxu1 %v8003_v39 }
0x151d   :  { %4992 = vadd.xlane.f32.xlu1 %v4989_v58 }
0x151e   :  { %v4980_v55 = vpop.xlane.xlu2 %4979 }
0x151f   :  { %v4984_v17 = vmul.f32 %v4980_v55, %v10487_v20 }
0x1520   :  { %5179 = vmatpush.bf16.msra.mxu1 %v7995_v40 }
0x1521   :  { %v11797_v44 = vsub.f32 %v4971_v61, %v4984_v17 }
0x1523   :  { %v4990_v21 = vmul.f32 %v11797_v44, %v11797_v44 }
0x1524   :  { %5180 = vmatpush.bf16.msra.mxu1 %v7987_v57  ;;  %v8574_v57 = vld [vmem:[#allocation28 + $0xc0] sm:$0xff] }
0x1525   :  { %4994 = vadd.xlane.f32.xlu2 %v4990_v21 }
0x1526   :  { %v4982_v13 = vpop.xlane.xlu0 %4981 }
0x1527   :  { %v4985_v8 = vmul.f32 %v4982_v13, %v10487_v20 }
0x1528   :  { %5353 = vmatpush.bf16.msrb.mxu1 %v8581_v47 }
0x1529   :  { %v11802_v41 = vsub.f32 %v4972_v51, %v4985_v8  ;;  %v8553_v51 = vld [vmem:[#allocation26 + $0x94] sm:$0xf0] }
0x152a   :  { %v7991_v28 = vor.u32 %v8553_v51, %v7990_v3 }
0x152b   :  { %v4991_v36 = vmul.f32 %v11802_v41, %v11802_v41 }
0x152c   :  { %5161 = vmatpush.bf16.msrb.mxu0 %v7991_v28  ;;  %5354 = vmatpush.bf16.msrb.mxu1 %v8580_v49  ;;  %v8593_v49 = vld [vmem:[#allocation22 + $0x154] sm:$0xf0] }
0x152d   :  { %4996 = vadd.xlane.f32.xlu0 %v4991_v36 }
0x1530   :  { %5162 = vmatpush.bf16.msrb.mxu0 %v7983_v46  ;;  %5355 = vmatpush.bf16.msrb.mxu1 %v8579_v38  ;;  %v8576_v46 = vld [vmem:[#allocation28 + $0xd0] sm:$0xff] }
0x1534   :  { %5335 = vmatpush.bf16.msra.mxu0 %v8573_v54 }
0x1538   :  { %5336 = vmatpush.bf16.msra.mxu0 %v8572_v19  ;;  %v8154_v19 = vld [vmem:[#allocation22 + $0x150] sm:$0xf] }
0x153c   :  { %5337 = vmatpush.bf16.msra.mxu0 %v8571_v16 }
0x1540   :  { %5338 = vmatpush.bf16.msra.mxu0 %v8570_v12 }
0x1544   :  { %5339 = vmatpush.bf16.msra.mxu0 %v8569_v4 }
0x1590   :  { %v4993_v52 = vpop.xlane.xlu1 %4992 }
0x1591   :  { %v4998_v1 = vmul.f32 %v4993_v52, %v10487_v20 }
0x1593   :  { %v5001_v61 = vadd.f32 1e-05, %v4998_v1  ;;  %v8726_v1 = vld [vmem:[%s12575_s0 + $0x1] ss:$0 sm:$0xff] }
0x1595   :  { %9007 = vrsqrt.f32 %v5001_v61  ;;  %vm5010_vm6 = vweird.f32 %v5001_v61 }
0x1598   :  { %v4995_v25 = vpop.xlane.xlu2 %4994 }
0x1599   :  { %v4999_v42 = vmul.f32 %v4995_v25, %v10487_v20  ;;  %v8568_v25 = vld [vmem:[#allocation28 + $0x90] sm:$0xff] }
0x159a   :  { %5340 = vmatpush.bf16.msra.mxu0 %v8568_v25  ;;  %v8146_v25 = vld [vmem:[#allocation22 + $0x140] sm:$0xf] }
0x159b   :  { %v9008_v14 = vpop.eup %9007  ;;  %v5002_v15 = vadd.f32 1e-05, %v4999_v42  ;;  %v8575_v42 = vld [vmem:[#allocation28 + $0xc8] sm:$0xff] }
0x159c   :  { %v5005_v63 = vmul.f32 %v9008_v14, %v5001_v61  ;;  %vm5011_vm4 = vweird.f32 %v9008_v14 }
0x159d   :  { %9009 = vrsqrt.f32 %v5002_v15  ;;  %vm5012_vm7 = vmor %vm5010_vm6, %vm5011_vm4  ;;  %vm5020_vm9 = vweird.f32 %v5002_v15 }
0x159e   :  { %v5006_v58 = vmul.f32 %v9008_v14, %v5005_v63  ;;  %5341 = vmatpush.bf16.msra.mxu0 %v8567_v30  ;;  %v8597_v63 = vld [vmem:[#allocation22 + $0x174] sm:$0xf0]  ;;  %v8590_v30 = vld [vmem:[#allocation22 + $0x144] sm:$0xf] }
0x15a0   :  { %v5007_v55 = vmul.f32 0.5, %v5006_v58  ;;  %v4997_v17 = vpop.xlane.xlu0 %4996  ;;  %v8596_v58 = vld [vmem:[#allocation22 + $0x174] sm:$0xf] }
0x15a1   :  { %v5000_v21 = vmul.f32 %v4997_v17, %v10487_v20 }
0x15a2   :  { %v5008_v13 = vsub.f32 1.5, %v5007_v55 }
0x15a3   :  { %v9010_v8 = vpop.eup %9009  ;;  %v5003_v36 = vadd.f32 1e-05, %v5000_v21 }
0x15a4   :  { %v5009_v22 = vmul.f32 %v9008_v14, %v5008_v13  ;;  %v5015_v18 = vmul.f32 %v9010_v8, %v5002_v15  ;;  %vm5021_vm8 = vweird.f32 %v9010_v8  ;;  %v8170_v15 = vld [vmem:[#allocation22 + $0x170] sm:$0xf]  ;;  %v8172_v13 = vld [vmem:[#allocation22 + $0x178] sm:$0xf0] }
0x15a5   :  { %9011 = vrsqrt.f32 %v5003_v36  ;;  %vm5022_vm10 = vmor %vm5020_vm9, %vm5021_vm8  ;;  %vm5030_vm12 = vweird.f32 %v5003_v36  ;;  %v8171_v21 = vor.u32 %v8597_v63, %v8170_v15  ;;  %v8589_v15 = vld [vmem:[#allocation22 + $0x134] sm:$0xf0]  ;;  %v8588_v63 = vld [vmem:[#allocation22 + $0x134] sm:$0xf] }
0x15a6   :  { %v5016_v10 = vmul.f32 %v9010_v8, %v5015_v18  ;;  %v5013_v37 = vsel %vm5012_vm7, %v9008_v14, %v5009_v22  ;;  %v7979_v14 = vld [vmem:[%s12576_s16 + $0x2] sm:$0x3]  ;;  %v8175_v22 = vor.u32 %v8596_v58, %v8172_v13  ;;  %v8594_v18 = vld [vmem:[#allocation22 + $0x164] sm:$0xf]  ;;  %v8587_v13 = vld [vmem:[#allocation22 + $0x124] sm:$0xf0] }
0x15a7   :  { %v5034_v2 = vmul.f32 %v5013_v37, %v11792_v59  ;;  %v8578_v59 = vld [vmem:[#allocation28 + $0xe0] sm:$0xff]  ;;  %v5071_v47 = vperm.slane %v7979_v14, 0  ;;  %v5072_v37 = vperm.slane %v7979_v14, 1  ;;  %v8138_v14 = vld [vmem:[#allocation22 + $0x130] sm:$0xf] }
0x15a8   :  { %v5017_v23 = vmul.f32 0.5, %v5016_v10  ;;  %5356 = vmatpush.bf16.msrb.mxu1 %v8578_v59  ;;  %v8164_v10 = vld [vmem:[#allocation22 + $0x168] sm:$0xf0]  ;;  %v8139_v58 = vor.u32 %v8589_v15, %v8138_v14 }
0x15a9   :  { %v5040_v62 = vmul.f32 %v8725_v53, %v5034_v2 }
0x15aa   :  { %v5018_v32 = vsub.f32 1.5, %v5017_v23  ;;  %v8167_v23 = vor.u32 %v8594_v18, %v8164_v10  ;;  %v8122_v10 = vld [vmem:[#allocation22 + $0x110] sm:$0xf] }
0x15ab   :  { %v9012_v24 = vpop.eup %9011  ;;  %v11813_v39 = vadd.f32 %v8726_v1, %v5040_v62 }
0x15ac   :  { %v5019_v60 = vmul.f32 %v9010_v8, %v5018_v32  ;;  %v5025_v11 = vmul.f32 %v9012_v24, %v5003_v36  ;;  %vm5031_vm11 = vweird.f32 %v9012_v24  ;;  %5357 = vmatpush.bf16.msrb.mxu1 %v8577_v7  ;;  %v8595_v36 = vld [vmem:[#allocation22 + $0x164] sm:$0xf0]  ;;  %v8592_v32 = vld [vmem:[#allocation22 + $0x154] sm:$0xf] }
0x15ad   :  { %vm5032_vm13 = vmor %vm5030_vm12, %vm5031_vm11 }
0x15ae   :  { %v5023_v29 = vsel %vm5022_vm10, %v9010_v8, %v5019_v60  ;;  %v5026_v52 = vmul.f32 %v9012_v24, %v5025_v11  ;;  %v8162_v8 = vld [vmem:[#allocation22 + $0x160] sm:$0xf] }
0x15af   :  { %v5035_v33 = vmul.f32 %v5023_v29, %v11797_v44  ;;  %v8163_v54 = vor.u32 %v8595_v36, %v8162_v8  ;;  %v8586_v8 = vld [vmem:[#allocation22 + $0x124] sm:$0xf] }
0x15b0   :  { %v5027_v45 = vmul.f32 0.5, %v5026_v52  ;;  %5358 = vmatpush.bf16.msrb.mxu1 %v8576_v46  ;;  %v8591_v46 = vld [vmem:[#allocation22 + $0x144] sm:$0xf0] }
0x15b1   :  { %v5041_v9 = vmul.f32 %v8725_v53, %v5035_v33 }
0x15b2   :  { %v5028_v61 = vsub.f32 1.5, %v5027_v45 }
0x15b3   :  { %v11815_v3 = vadd.f32 %v8726_v1, %v5041_v9 }
0x15b4   :  { %v5029_v51 = vmul.f32 %v9012_v24, %v5028_v61  ;;  %5359 = vmatpush.bf16.msrb.mxu1 %v8575_v42  ;;  %v8147_v42 = vor.u32 %v8591_v46, %v8146_v25 }
0x15b5   :  { %v5049_v43 = vpack.c.bf16 %v11815_v3, %v11813_v39 }
0x15b6   :  { %v5033_v44 = vsel %vm5032_vm13, %v9012_v24, %v5029_v51  ;;  %v8156_v24 = vld [vmem:[#allocation22 + $0x158] sm:$0xf0] }
0x15b7   :  { %5163 = vmatmul.bf16.vlgmr.msrb.gmra.mxu0 %v5049_v43  ;;  %5181 = vmatmul.bf16.vlgmr.msra.gmra.mxu1 %v5049_v43  ;;  %v5036_v28 = vmul.f32 %v5033_v44, %v11802_v41  ;;  %v8566_v41 = vld [vmem:[#allocation28 + $0x80] sm:$0xff]  ;;  %v8159_v11 = vor.u32 %v8592_v32, %v8156_v24  ;;  %v8583_v32 = vld [vmem:[#allocation22 + $0x104] sm:$0xf0] }
0x15b8   :  { %5342 = vmatpush.bf16.msra.mxu0 %v8566_v41  ;;  %5360 = vmatpush.bf16.msrb.mxu1 %v8574_v57  ;;  %v8148_v41 = vld [vmem:[#allocation22 + $0x148] sm:$0xf0]  ;;  %v8582_v24 = vld [vmem:[#allocation22 + $0x104] sm:$0xf] }
0x15b9   :  { %v5042_v56 = vmul.f32 %v8725_v53, %v5036_v28  ;;  %v8155_v53 = vor.u32 %v8593_v49, %v8154_v19  ;;  %v8151_v57 = vor.u32 %v8590_v30, %v8148_v41  ;;  %v8114_v49 = vld [vmem:[#allocation22 + $0x100] sm:$0xf] }
0x15bb   :  { %v11820_v40 = vadd.f32 %v8726_v1, %v5042_v56 }
0x15bc   :  { %5538 = vmatpush.bf16.msrb.mxu0 %v8171_v21  ;;  %5556 = vmatpush.bf16.msra.mxu1 %v8175_v22  ;;  %v8130_v21 = vld [vmem:[#allocation22 + $0x120] sm:$0xf]  ;;  %v8132_v22 = vld [vmem:[#allocation22 + $0x128] sm:$0xf0] }
0x15bd   :  { %v5050_v50 = vpack.c.bf16 %v11820_v40, %v11820_v40  ;;  %v8131_v36 = vor.u32 %v8587_v13, %v8130_v21  ;;  %v8135_v18 = vor.u32 %v8586_v8, %v8132_v22  ;;  %v8111_v13 = vld [vmem:[%s12560_s8 + $0x4] sm:$0x3] }
0x15be   :  { %v5454_v8 = vperm.slane %v8111_v13, 0 }
0x15c0   :  { %5539 = vmatpush.bf16.msrb.mxu0 %v8163_v54  ;;  %5557 = vmatpush.bf16.msra.mxu1 %v8167_v23  ;;  %v8585_v54 = vld [vmem:[#allocation22 + $0x114] sm:$0xf0]  ;;  %v8124_v23 = vld [vmem:[#allocation22 + $0x118] sm:$0xf0] }
0x15c4   :  { %5540 = vmatpush.bf16.msrb.mxu0 %v8155_v53  ;;  %5558 = vmatpush.bf16.msra.mxu1 %v8159_v11  ;;  %v8115_v53 = vor.u32 %v8583_v32, %v8114_v49 }
0x15c7   :  { %5168 = vmatmul.bf16.gmra.mxu0 %v5050_v50  ;;  %5186 = vmatmul.bf16.gmra.mxu1 %v5050_v50 }
0x15c8   :  { %5541 = vmatpush.bf16.msrb.mxu0 %v8147_v42  ;;  %5559 = vmatpush.bf16.msra.mxu1 %v8151_v57 }
0x15cc   :  { %5542 = vmatpush.bf16.msrb.mxu0 %v8139_v58 }
0x15d0   :  { %5543 = vmatpush.bf16.msrb.mxu0 %v8131_v36 }
0x1634   :  { %v5164_v55 = vpop.f32.mrf.mxu0  ;;  %v5182_v17 = vpop.f32.mrf.mxu1 }
0x1635   :  { %v5165_v2 = vadd.f32 %v5164_v55, %v5071_v47  ;;  %v5183_v60 = vadd.f32 %v5182_v17, %v5072_v37  ;;  %v8140_v55 = vld [vmem:[#allocation22 + $0x138] sm:$0xf0] }
0x1636   :  { %v8143_v17 = vor.u32 %v8588_v63, %v8140_v55  ;;  %v9123_v63 = vld [vmem:[%s12559_s4 + $0x10] sm:$0xff] }
0x1637   :  { %v5191_v1 = vmax.f32 %v5165_v2, 0.0  ;;  %v5192_v62 = vmax.f32 %v5183_v60, 0.0  ;;  %v8116_v2 = vld [vmem:[#allocation22 + $0x108] sm:$0xf0]  ;;  %v8605_v60 = vld [vmem:[#allocation23 + $0xb8] sm:$0xff] }
0x1638   :  { %5560 = vmatpush.bf16.msra.mxu1 %v8143_v17  ;;  %v8119_v11 = vor.u32 %v8582_v24, %v8116_v2 }
0x163c   :  { %v5166_v16 = vpop.f32.mrf.mxu0  ;;  %v5184_v38 = vpop.f32.mrf.mxu1  ;;  %5561 = vmatpush.bf16.msra.mxu1 %v8135_v18 }
0x163d   :  { %v5167_v29 = vadd.f32 %v5166_v16, %v5071_v47  ;;  %v5185_v52 = vadd.f32 %v5184_v38, %v5072_v37  ;;  %v8604_v16 = vld [vmem:[#allocation23 + $0xb0] sm:$0xff]  ;;  %v8603_v38 = vld [vmem:[#allocation23 + $0xa8] sm:$0xff] }
0x163f   :  { %v5193_v33 = vmax.f32 %v5167_v29, 0.0  ;;  %v5194_v45 = vmax.f32 %v5185_v52, 0.0  ;;  %v8727_v29 = vld [vmem:[#allocation29 + $0x1] ss:$0 sm:$0xff] }
0x1641   :  { %v5197_v9 = vpack.c.bf16 %v5193_v33, %v5191_v1  ;;  %v5198_v12 = vpack.c.bf16 %v5194_v45, %v5192_v62  ;;  %v8602_v62 = vld [vmem:[#allocation23 + $0xa0] sm:$0xff]  ;;  %v8601_v45 = vld [vmem:[#allocation23 + $0x98] sm:$0xff] }
0x1643   :  { %5343 = vmatmul.bf16.vlgmr.msra.gmra.mxu0 %v5197_v9  ;;  %5361 = vmatmul.bf16.vlgmr.msrb.gmra.mxu1 %v5198_v12 }
0x1644   :  { %v5169_v59 = vpop.f32.mrf.mxu0  ;;  %v5187_v61 = vpop.f32.mrf.mxu1 }
0x1645   :  { %v5170_v51 = vadd.f32 %v5169_v59, %v5071_v47  ;;  %v5188_v43 = vadd.f32 %v5187_v61, %v5072_v37  ;;  %v8584_v47 = vld [vmem:[#allocation22 + $0x114] sm:$0xf]  ;;  %v8123_v37 = vor.u32 %v8585_v54, %v8122_v10 }
0x1646   :  { %v8127_v19 = vor.u32 %v8584_v47, %v8124_v23 }
0x1647   :  { %v5195_v56 = vmax.f32 %v5170_v51, 0.0  ;;  %v5196_v50 = vmax.f32 %v5188_v43, 0.0  ;;  %5544 = vmatpush.bf16.msrb.mxu0 %v8123_v37  ;;  %v8600_v51 = vld [vmem:[#allocation23 + $0x90] sm:$0xff] }
0x1648   :  { %5562 = vmatpush.bf16.msra.mxu1 %v8127_v19 }
0x1649   :  { %v5199_v4 = vpack.c.bf16 %v5195_v56, %v5195_v56  ;;  %v5200_v7 = vpack.c.bf16 %v5196_v50, %v5196_v50  ;;  %v8599_v56 = vld [vmem:[#allocation23 + $0x88] sm:$0xff]  ;;  %v9121_v50 = vld [vmem:[%s12559_s4] sm:$0xff] }
0x164b   :  { %5545 = vmatpush.bf16.msrb.mxu0 %v8115_v53 }
0x164c   :  { %v5171_v44 = vpop.f32.mrf.mxu0  ;;  %v5189_v28 = vpop.f32.mrf.mxu1  ;;  %5563 = vmatpush.bf16.msra.mxu1 %v8119_v11  ;;  %v5455_v11 = vperm.slane %v8111_v13, 1 }
0x164f   :  { %5646 = vmatpush.bf16.msra.mxu0 %v8605_v60 }
0x1653   :  { %5348 = vmatmul.bf16.gmra.mxu0 %v5199_v4  ;;  %5366 = vmatmul.bf16.gmra.mxu1 %v5200_v7  ;;  %v9122_v7 = vld [vmem:[%s12559_s4 + $0x8] sm:$0xff] }
0x1654   :  { %5647 = vmatpush.bf16.msra.mxu0 %v8604_v16 }
0x1658   :  { %5648 = vmatpush.bf16.msra.mxu0 %v8603_v38 }
0x165c   :  { %5649 = vmatpush.bf16.msra.mxu0 %v8602_v62 }
0x1660   :  { %5650 = vmatpush.bf16.msra.mxu0 %v8601_v45 }
0x1664   :  { %5651 = vmatpush.bf16.msra.mxu0 %v8600_v51 }
0x1668   :  { %5652 = vmatpush.bf16.msra.mxu0 %v8599_v56 }
0x16c0   :  { %v5344_v52 = vpop.f32.mrf.mxu0  ;;  %v5362_v1 = vpop.f32.mrf.mxu1 }
0x16c1   :  { %v5345_v33 = vadd.f32 %v8727_v29, %v5344_v52 }
0x16c3   :  { %v5363_v9 = vadd.f32 %v5362_v1, %v5345_v33 }
0x16c5   :  { %v11826_v43 = vadd.f32 %v5363_v9, %v11813_v39  ;;  %v8598_v39 = vld [vmem:[#allocation23 + $0x80] sm:$0xff] }
0x16c6   :  { %5653 = vmatpush.bf16.msra.mxu0 %v8598_v39 }
0x16c7   :  { %v5429_v4 = vadd.f32 %v9121_v50, %v11826_v43 }
0x16c8   :  { %v5346_v12 = vpop.f32.mrf.mxu0  ;;  %v5364_v59 = vpop.f32.mrf.mxu1 }
0x16c9   :  { %v5347_v61 = vadd.f32 %v8727_v29, %v5346_v12 }
0x16cb   :  { %v5365_v44 = vadd.f32 %v5364_v59, %v5347_v61 }
0x16cd   :  { %v11829_v28 = vadd.f32 %v5365_v44, %v11815_v3 }
0x16cf   :  { %v5430_v25 = vadd.f32 %v9122_v7, %v11829_v28  ;;  %v5574_v17 = vpack.c.bf16 %v11829_v28, %v11826_v43 }
0x16d0   :  { %v5349_v46 = vpop.f32.mrf.mxu0  ;;  %v5367_v30 = vpop.f32.mrf.mxu1 }
0x16d1   :  { %v5432_v42 = vpack.c.bf16 %v5430_v25, %v5429_v4  ;;  %v5350_v41 = vadd.f32 %v8727_v29, %v5349_v46 }
0x16d3   :  { %5546 = vmatmul.bf16.vlgmr.msrb.gmra.mxu0 %v5432_v42  ;;  %5564 = vmatmul.bf16.vlgmr.msra.gmra.mxu1 %v5432_v42  ;;  %v5368_v3 = vadd.f32 %v5367_v30, %v5350_v41 }
0x16d5   :  { %v11836_v15 = vadd.f32 %v5368_v3, %v11820_v40 }
0x16d7   :  { %v5431_v58 = vadd.f32 %v9123_v63, %v11836_v15  ;;  %v5575_v21 = vpack.c.bf16 %v11836_v15, %v11836_v15 }
0x16d8   :  { %v5351_v57 = vpop.f32.mrf.mxu0  ;;  %v5369_v14 = vpop.f32.mrf.mxu1 }
0x16d9   :  { %v5433_v55 = vpack.c.bf16 %v5431_v58, %v5431_v58 }
0x16e3   :  { %5551 = vmatmul.bf16.gmra.mxu0 %v5433_v55  ;;  %5569 = vmatmul.bf16.gmra.mxu1 %v5433_v55 }
0x16f3   :  { %5654 = vmatmul.bf16.vlgmr.msra.gmra.mxu0 %v5574_v17 }
0x1703   :  { %5659 = vmatmul.bf16.gmra.mxu0 %v5575_v21 }
0x1750   :  { %v5547_v36 = vpop.f32.mrf.mxu0  ;;  %v5565_v22 = vpop.f32.mrf.mxu1 }
0x1751   :  { %v11845_v40 = vadd.f32 %v5547_v36, %v5454_v8 }
0x1753   :  { %v5676_v54 = vmul.f32 %v11845_v40, %v10065_v31  ;;  %v5682_v47 = vmul.f32 %v11845_v40, %v10093_v6  ;;  %v5679_v23 = vmul.f32 %v11845_v40, %v10072_v35  ;;  %v5685_v53 = vmul.f32 %v11845_v40, %v10107_v27 }
0x1754   :  { %v5664_v44 = vmul.f32 %v11845_v40, %v10070_v34 }
0x1755   :  { %v5700_v49 = vpack.c.bf16 %v5676_v54, %v5676_v54  ;;  %v5706_v24 = vpack.c.bf16 %v5682_v47, %v5682_v47  ;;  %v5703_v38 = vpack.c.bf16 %v5679_v23, %v5679_v23  ;;  %v5709_v61 = vpack.c.bf16 %v5685_v53, %v5685_v53 }
0x1757   :  { %v11865_v62 = vunpack.c.l.b16 %v5700_v49  ;;  %v11869_v45 = vunpack.c.l.b16 %v5706_v24  ;;  %v11883_v25 = vunpack.c.l.b16 %v5703_v38  ;;  %v11895_v57 = vunpack.c.l.b16 %v5709_v61 }
0x1758   :  { %v5549_v18 = vpop.f32.mrf.mxu0  ;;  %v5567_v10 = vpop.f32.mrf.mxu1  ;;  %v5566_v24 = vadd.f32 %v5565_v22, %v5455_v11 }
0x1759   :  { %v11851_v37 = vadd.f32 %v5549_v18, %v5454_v8  ;;  %v5568_v13 = vadd.f32 %v5567_v10, %v5455_v11 }
0x175b   :  { %v5677_v19 = vmul.f32 %v11851_v37, %v10065_v31  ;;  %v5683_v32 = vmul.f32 %v11851_v37, %v10093_v6  ;;  %v5674_v16 = vmul.f32 %v11851_v37, %v10118_v48  ;;  %v5680_v29 = vmul.f32 %v11851_v37, %v10072_v35 }
0x175c   :  { %v5686_v51 = vmul.f32 %v11851_v37, %v10107_v27  ;;  %v5665_v3 = vmul.f32 %v11851_v37, %v10070_v34 }
0x175d   :  { %v5701_v2 = vpack.c.bf16 %v5677_v19, %v5677_v19  ;;  %v5707_v60 = vpack.c.bf16 %v5683_v32, %v5683_v32  ;;  %v5698_v7 = vpack.c.bf16 %v5674_v16, %v5674_v16  ;;  %v5704_v46 = vpack.c.bf16 %v5680_v29, %v5680_v29 }
0x175e   :  { %v5710_v63 = vpack.c.bf16 %v5686_v51, %v5686_v51  ;;  %v5689_v53 = vpack.c.bf16 %v5665_v3, %v5665_v3 }
0x175f   :  { %v11867_v33 = vunpack.c.l.b16 %v5701_v2  ;;  %v11871_v9 = vunpack.c.l.b16 %v5707_v60  ;;  %v11901_v36 = vunpack.c.l.b16 %v5704_v46 }
0x1760   :  { %v5552_v52 = vpop.f32.mrf.mxu0  ;;  %v5570_v1 = vpop.f32.mrf.mxu1  ;;  %v11911_v2 = vunpack.c.l.b16 %v5710_v63 }
0x1761   :  { %v11873_v12 = vadd.f32 %v5552_v52, %v5454_v8  ;;  %v5571_v59 = vadd.f32 %v5570_v1, %v5455_v11  ;;  %v5770_v56 = vpack.c.b16 %v11867_v33, %v11865_v62  ;;  %v5773_v50 = vpack.c.b16 %v11871_v9, %v11869_v45  ;;  %v11957_v33 = vld [vmem:[%s12562_s15 + $0x10] sm:$0xff] }
0x1762   :  { %v11899_v8 = vunpack.c.l.b16 %v5698_v7  ;;  %v5712_v52 = vpack.c.bf16 %v5568_v13, %v5566_v24  ;;  %v5688_v11 = vpack.c.bf16 %v5664_v44, %v5664_v44  ;;  %v5741_v1 = vunpack.c.l.b16 %v5689_v53 }
0x1763   :  { %v5713_v4 = vpack.c.bf16 %v5571_v59, %v5571_v59  ;;  %v5675_v30 = vmul.f32 %v11873_v12, %v10118_v48  ;;  %v5678_v42 = vmul.f32 %v11873_v12, %v10065_v31  ;;  %v5681_v41 = vmul.f32 %v11873_v12, %v10072_v35 }
0x1764   :  { %v5684_v39 = vmul.f32 %v11873_v12, %v10093_v6  ;;  %v5687_v14 = vmul.f32 %v11873_v12, %v10107_v27  ;;  %v5740_v61 = vunpack.c.l.b16 %v5688_v11  ;;  %v5670_v24 = vmul.f32 %v11845_v40, %v10105_v26 }
0x1765   :  { %5794 = vmatpush.bf16.xpose.msrb.mxu1 %v5713_v4  ;;  %v5699_v58 = vpack.c.bf16 %v5675_v30, %v5675_v30  ;;  %v5702_v55 = vpack.c.bf16 %v5678_v42, %v5678_v42  ;;  %v5705_v17 = vpack.c.bf16 %v5681_v41, %v5681_v41  ;;  %v5666_v4 = vmul.f32 %v11873_v12, %v10070_v34  ;;  %v8728_v41 = vld [vmem:[%s12561_s24 + $0x2] ss:$0 sm:$0xff] }
0x1766   :  { %v5708_v21 = vpack.c.bf16 %v5684_v39, %v5684_v39  ;;  %v5711_v18 = vpack.c.bf16 %v5687_v14, %v5687_v14  ;;  %v5764_v51 = vpack.c.b16 %v5741_v1, %v5740_v61  ;;  %v5672_v61 = vmul.f32 %v11873_v12, %v10105_v26 }
0x1767   :  { %v11903_v23 = vunpack.c.l.b16 %v5699_v58  ;;  %v11905_v19 = vunpack.c.l.b16 %v5702_v55  ;;  %v11907_v49 = vunpack.c.l.b16 %v5705_v17  ;;  %v5690_v46 = vpack.c.bf16 %v5666_v4, %v5666_v4 }
0x1768   :  { %v5554_v54 = vpop.f32.mrf.mxu0  ;;  %v5572_v47 = vpop.f32.mrf.mxu1  ;;  %v11909_v32 = vunpack.c.l.b16 %v5708_v21  ;;  %v11913_v10 = vunpack.c.l.b16 %v5711_v18  ;;  %v5669_v21 = vmul.f32 %v11873_v12, %v10091_v5  ;;  %v5696_v4 = vpack.c.bf16 %v5672_v61, %v5672_v61 }
0x1769   :  { %v5769_v60 = vpack.c.b16 %v11903_v23, %v11899_v8  ;;  %v5771_v16 = vpack.c.b16 %v11883_v25, %v11905_v19  ;;  %v5772_v38 = vpack.c.b16 %v11907_v49, %v11901_v36  ;;  %v5667_v25 = vmul.f32 %v11845_v40, %v10091_v5 }
0x176a   :  { %v5774_v29 = vpack.c.b16 %v11895_v57, %v11909_v32  ;;  %v5775_v22 = vpack.c.b16 %v11913_v10, %v11911_v2  ;;  %v5742_v42 = vunpack.c.l.b16 %v5690_v46  ;;  %v5668_v36 = vmul.f32 %v11851_v37, %v10091_v5 }
0x176b   :  { %v5691_v30 = vpack.c.bf16 %v5667_v25, %v5667_v25  ;;  %v5693_v18 = vpack.c.bf16 %v5669_v21, %v5669_v21  ;;  %v5671_v49 = vmul.f32 %v11851_v37, %v10105_v26  ;;  %v5748_v37 = vunpack.c.l.b16 %v5696_v4 }
0x176c   :  { %v5692_v54 = vpack.c.bf16 %v5668_v36, %v5668_v36 }
0x176d   :  { %5795 = vmatpush.bf16.xpose.msrb.mxu1 %v5712_v52  ;;  %v5743_v3 = vunpack.c.l.b16 %v5691_v30  ;;  %v5745_v47 = vunpack.c.l.b16 %v5693_v18  ;;  %v5695_v53 = vpack.c.bf16 %v5671_v49, %v5671_v49  ;;  %v5694_v52 = vpack.c.bf16 %v5670_v24, %v5670_v24 }
0x176e   :  { %v5744_v23 = vunpack.c.l.b16 %v5692_v54 }
0x176f   :  { %v5765_v14 = vpack.c.b16 %v5743_v3, %v5742_v42  ;;  %v5747_v11 = vunpack.c.l.b16 %v5695_v53  ;;  %v5746_v1 = vunpack.c.l.b16 %v5694_v52  ;;  %v11947_v42 = vld [vmem:[%s12562_s15] sm:$0xff] }
0x1770   :  { %v5655_v59 = vpop.f32.mrf.mxu0  ;;  %v5766_v19 = vpack.c.b16 %v5745_v47, %v5744_v23 }
0x1771   :  { %v5656_v17 = vadd.f32 %v8728_v41, %v5655_v59  ;;  %v5767_v59 = vpack.c.b16 %v5747_v11, %v5746_v1 }
0x1774   :  { %5796 = vmatmul.bf16.vlgmr.msrb.gmra.mxu1 %v5764_v51  ;;  %v5673_v51 = vmul.f32 %v11845_v40, %v10118_v48 }
0x1778   :  { %v5657_v7 = vpop.f32.mrf.mxu0 }
0x1779   :  { %v5658_v58 = vadd.f32 %v8728_v41, %v5657_v7  ;;  %v5697_v7 = vpack.c.bf16 %v5673_v51, %v5673_v51 }
0x177b   :  { %v5714_v13 = vpack.c.bf16 %v5658_v58, %v5656_v17  ;;  %v5749_v25 = vunpack.c.l.b16 %v5697_v7 }
0x177d   :  { %v5768_v46 = vpack.c.b16 %v5749_v25, %v5748_v37 }
0x1780   :  { %v5660_v39 = vpop.f32.mrf.mxu0 }
0x1781   :  { %v5661_v44 = vadd.f32 %v8728_v41, %v5660_v39  ;;  %v11952_v39 = vld [vmem:[%s12562_s15 + $0x8] sm:$0xff] }
0x1783   :  { %v5715_v63 = vpack.c.bf16 %v5661_v44, %v5661_v44 }
0x1784   :  { %5801 = vmatmul.bf16.gmra.mxu1 %v5765_v14 }
0x1785   :  { %v6506_v55 = vsel %vm423_vm0, %v5715_v63, 0 }
0x1786   :  { %6514 = vmatpush.bf16.msrb.mxu0 %v6506_v55 }
0x1788   :  { %v5662_v8 = vpop.f32.mrf.mxu0 }
0x178a   :  { %6515 = vmatpush.bf16.msrb.mxu0 %v5714_v13 }
0x1794   :  { %5806 = vmatmul.bf16.gmra.mxu1 %v5766_v19 }
0x17a4   :  { %5811 = vmatmul.bf16.gmra.mxu1 %v5767_v59 }
0x17b4   :  { %5816 = vmatmul.bf16.gmra.mxu1 %v5768_v46 }
0x17c4   :  { %5821 = vmatmul.bf16.gmra.mxu1 %v5769_v60 }
0x17d4   :  { %5826 = vmatmul.bf16.gmra.mxu1 %v5770_v56 }
0x17e4   :  { %5831 = vmatmul.bf16.gmra.mxu1 %v5771_v16 }
0x17f1   :  { %v5797_v30 = vpop.f32.mrf.mxu1 }
0x17f2   :  { %v5857_v12 = vadd.f32 %v11947_v42, %v5797_v30 }
0x17f4   :  { %5836 = vmatmul.bf16.gmra.mxu1 %v5772_v38  ;;  %v5881_v40 = vsel %vm2405_vm5, %v5857_v12, -inf }
0x17f5   :  { %5882 = vmax.xlane.f32.xlu1 %v5881_v40 }
0x17f9   :  { %v5799_v41 = vpop.f32.mrf.mxu1 }
0x17fa   :  { %v5858_v3 = vadd.f32 %v11952_v39, %v5799_v41 }
0x17fc   :  { %v5884_v60 = vsel %vm2405_vm5, %v5858_v3, -inf }
0x17fd   :  { %5885 = vmax.xlane.f32.xlu2 %v5884_v60 }
0x1801   :  { %v5802_v62 = vpop.f32.mrf.mxu1 }
0x1802   :  { %v5859_v56 = vadd.f32 %v11957_v33, %v5802_v62 }
0x1804   :  { %5841 = vmatmul.bf16.gmra.mxu1 %v5773_v50  ;;  %v5887_v16 = vsel %vm2405_vm5, %v5859_v56, -inf }
0x1805   :  { %5888 = vmax.xlane.f32.xlu0 %v5887_v16 }
0x1809   :  { %v5804_v38 = vpop.f32.mrf.mxu1 }
0x180a   :  { %v5860_v44 = vadd.f32 %v11947_v42, %v5804_v38 }
0x180c   :  { %v5890_v14 = vsel %vm2405_vm5, %v5860_v44, -inf }
0x180d   :  { %5891 = vmax.xlane.f32.xlu1 %v5890_v14 }
0x1811   :  { %v5807_v63 = vpop.f32.mrf.mxu1 }
0x1812   :  { %v5861_v58 = vadd.f32 %v11952_v39, %v5807_v63 }
0x1814   :  { %5846 = vmatmul.bf16.gmra.mxu1 %v5774_v29  ;;  %v5893_v55 = vsel %vm2405_vm5, %v5861_v58, -inf }
0x1815   :  { %5894 = vmax.xlane.f32.xlu2 %v5893_v55 }
0x1819   :  { %v5809_v45 = vpop.f32.mrf.mxu1 }
0x181a   :  { %v11972_v9 = vadd.f32 %v11957_v33, %v5809_v45 }
0x181c   :  { %v5896_v50 = vsel %vm2405_vm5, %v11972_v9, -inf }
0x181d   :  { %5897 = vmax.xlane.f32.xlu0 %v5896_v50 }
0x1821   :  { %v5812_v17 = vpop.f32.mrf.mxu1 }
0x1822   :  { %v11977_v21 = vadd.f32 %v11947_v42, %v5812_v17 }
0x1824   :  { %5851 = vmatmul.bf16.gmra.mxu1 %v5775_v22  ;;  %v5899_v57 = vsel %vm2405_vm5, %v11977_v21, -inf }
0x1825   :  { %5900 = vmax.xlane.f32.xlu1 %v5899_v57 }
0x1829   :  { %v5814_v32 = vpop.f32.mrf.mxu1 }
0x182a   :  { %v11985_v29 = vadd.f32 %v11952_v39, %v5814_v32 }
0x182c   :  { %v5902_v13 = vsel %vm2405_vm5, %v11985_v29, -inf }
0x182d   :  { %5903 = vmax.xlane.f32.xlu2 %v5902_v13 }
0x1831   :  { %v5817_v8 = vpop.f32.mrf.mxu1 }
0x1832   :  { %v11990_v36 = vadd.f32 %v11957_v33, %v5817_v8 }
0x1834   :  { %v5905_v2 = vsel %vm2405_vm5, %v11990_v36, -inf }
0x1835   :  { %5906 = vmax.xlane.f32.xlu2 %v5905_v2 }
0x1839   :  { %v5819_v10 = vpop.f32.mrf.mxu1 }
0x183a   :  { %v11999_v11 = vadd.f32 %v11947_v42, %v5819_v10 }
0x183c   :  { %v5908_v7 = vsel %vm2405_vm5, %v11999_v11, -inf }
0x1841   :  { %v5822_v47 = vpop.f32.mrf.mxu1 }
0x1842   :  { %v12008_v37 = vadd.f32 %v11952_v39, %v5822_v47 }
0x1849   :  { %v5824_v52 = vpop.f32.mrf.mxu1 }
0x184a   :  { %v12017_v60 = vadd.f32 %v11957_v33, %v5824_v52 }
0x184c   :  { %v5914_v63 = vsel %vm2405_vm5, %v12017_v60, -inf }
0x1851   :  { %v5827_v46 = vpop.f32.mrf.mxu1 }
0x1852   :  { %v12026_v55 = vadd.f32 %v11947_v42, %v5827_v46 }
0x1854   :  { %v5917_v32 = vsel %vm2405_vm5, %v12026_v55, -inf }
0x1859   :  { %v5829_v38 = vpop.f32.mrf.mxu1 }
0x185a   :  { %v12036_v8 = vadd.f32 %v11952_v39, %v5829_v38 }
0x1861   :  { %v5832_v13 = vpop.f32.mrf.mxu1 }
0x1868   :  { %v5883_v22 = vpop.xlane.xlu1 %5882 }
0x1869   :  { %v5953_v18 = vsub.f32 %v5857_v12, %v5883_v22  ;;  %v5834_v47 = vpop.f32.mrf.mxu1 }
0x186b   :  { %v5977_v54 = vmul.f32 1.442695, %v5953_v18 }
0x186d   :  { %9013 = vpow2.f32 %v5977_v54  ;;  %v5920_v54 = vsel %vm2405_vm5, %v12036_v8, -inf }
0x1870   :  { %v5886_v23 = vpop.xlane.xlu2 %5885 }
0x1871   :  { %v5954_v19 = vsub.f32 %v5858_v3, %v5886_v23  ;;  %v5911_v3 = vsel %vm2405_vm5, %v12008_v37, -inf  ;;  %v12046_v23 = vadd.f32 %v11957_v33, %v5832_v13 }
0x1873   :  { %v11994_v49 = vpop.eup %9013  ;;  %v5979_v24 = vmul.f32 1.442695, %v5954_v19 }
0x1874   :  { %v6025_v53 = vsel %vm2405_vm5, %v11994_v49, 0.0 }
0x1875   :  { %9015 = vpow2.f32 %v5979_v24  ;;  %6026 = vadd.xlane.f32.xlu0 %v6025_v53 }
0x1878   :  { %v5889_v1 = vpop.xlane.xlu0 %5888 }
0x1879   :  { %v5955_v59 = vsub.f32 %v5859_v56, %v5889_v1  ;;  %v5923_v1 = vsel %vm2405_vm5, %v12046_v23, -inf }
0x187b   :  { %v12001_v61 = vpop.eup %9015  ;;  %v5981_v51 = vmul.f32 1.442695, %v5955_v59  ;;  %v12056_v59 = vadd.f32 %v11947_v42, %v5834_v47 }
0x187c   :  { %v6028_v4 = vsel %vm2405_vm5, %v12001_v61, 0.0 }
0x187d   :  { %9017 = vpow2.f32 %v5981_v51  ;;  %6029 = vadd.xlane.f32.xlu1 %v6028_v4  ;;  %5909 = vmax.xlane.f32.xlu0 %v5908_v7  ;;  %v5837_v4 = vpop.f32.mrf.mxu1 }
0x1880   :  { %v5892_v25 = vpop.xlane.xlu1 %5891 }
0x1881   :  { %v5956_v30 = vsub.f32 %v5860_v44, %v5892_v25 }
0x1883   :  { %v12010_v12 = vpop.eup %9017  ;;  %v5983_v40 = vmul.f32 1.442695, %v5956_v30  ;;  %v5926_v30 = vsel %vm2405_vm5, %v12056_v59, -inf }
0x1884   :  { %v6031_v41 = vsel %vm2405_vm5, %v12010_v12, 0.0 }
0x1885   :  { %9019 = vpow2.f32 %v5983_v40  ;;  %6032 = vadd.xlane.f32.xlu1 %v6031_v41  ;;  %5912 = vmax.xlane.f32.xlu0 %v5911_v3  ;;  %v12066_v40 = vadd.f32 %v11952_v39, %v5837_v4  ;;  %v5839_v3 = vpop.f32.mrf.mxu1 }
0x1888   :  { %v5895_v62 = vpop.xlane.xlu2 %5894 }
0x1889   :  { %v5957_v56 = vsub.f32 %v5861_v58, %v5895_v62  ;;  %v5929_v62 = vsel %vm2405_vm5, %v12066_v40, -inf }
0x188b   :  { %v12019_v16 = vpop.eup %9019  ;;  %v5985_v44 = vmul.f32 1.442695, %v5957_v56  ;;  %v12075_v56 = vadd.f32 %v11957_v33, %v5839_v3 }
0x188c   :  { %v6034_v14 = vsel %vm2405_vm5, %v12019_v16, 0.0 }
0x188d   :  { %9021 = vpow2.f32 %v5985_v44  ;;  %6035 = vadd.xlane.f32.xlu2 %v6034_v14  ;;  %5915 = vmax.xlane.f32.xlu1 %v5914_v63  ;;  %v5932_v38 = vsel %vm2405_vm5, %v12075_v56, -inf  ;;  %v5842_v44 = vpop.f32.mrf.mxu1 }
0x188e   :  { %v12080_v14 = vadd.f32 %v11947_v42, %v5842_v44 }
0x1890   :  { %v5898_v45 = vpop.xlane.xlu0 %5897  ;;  %v5935_v63 = vsel %vm2405_vm5, %v12080_v14, -inf }
0x1891   :  { %v5958_v50 = vsub.f32 %v11972_v9, %v5898_v45 }
0x1893   :  { %v12029_v58 = vpop.eup %9021  ;;  %v5987_v17 = vmul.f32 1.442695, %v5958_v50 }
0x1894   :  { %v6037_v57 = vsel %vm2405_vm5, %v12029_v58, 0.0 }
0x1895   :  { %9023 = vpow2.f32 %v5987_v17  ;;  %6038 = vadd.xlane.f32.xlu2 %v6037_v57  ;;  %5918 = vmax.xlane.f32.xlu1 %v5917_v32 }
0x1898   :  { %v5901_v2 = vpop.xlane.xlu1 %5900 }
0x1899   :  { %v5959_v10 = vsub.f32 %v11977_v21, %v5901_v2 }
0x189b   :  { %v12039_v9 = vpop.eup %9023  ;;  %v5989_v22 = vmul.f32 1.442695, %v5959_v10 }
0x189c   :  { %v6040_v18 = vsel %vm2405_vm5, %v12039_v9, 0.0 }
0x189d   :  { %9025 = vpow2.f32 %v5989_v22  ;;  %6041 = vadd.xlane.f32.xlu0 %v6040_v18  ;;  %5921 = vmax.xlane.f32.xlu2 %v5920_v54 }
0x18a0   :  { %v5904_v19 = vpop.xlane.xlu2 %5903 }
0x18a1   :  { %v5960_v24 = vsub.f32 %v11985_v29, %v5904_v19 }
0x18a3   :  { %v12049_v21 = vpop.eup %9025  ;;  %v5991_v53 = vmul.f32 1.442695, %v5960_v24 }
0x18a4   :  { %v6043_v52 = vsel %vm2405_vm5, %v12049_v21, 0.0 }
0x18a5   :  { %9027 = vpow2.f32 %v5991_v53  ;;  %6044 = vadd.xlane.f32.xlu0 %v6043_v52  ;;  %5924 = vmax.xlane.f32.xlu2 %v5923_v1 }
0x18a8   :  { %v5907_v51 = vpop.xlane.xlu2 %5906 }
0x18a9   :  { %v5961_v7 = vsub.f32 %v11990_v36, %v5907_v51 }
0x18ab   :  { %v12059_v29 = vpop.eup %9027  ;;  %v5993_v25 = vmul.f32 1.442695, %v5961_v7 }
0x18ac   :  { %v6046_v46 = vsel %vm2405_vm5, %v12059_v29, 0.0 }
0x18ad   :  { %9029 = vpow2.f32 %v5993_v25  ;;  %6047 = vadd.xlane.f32.xlu1 %v6046_v46  ;;  %5927 = vmax.xlane.f32.xlu0 %v5926_v30 }
0x18b3   :  { %v12068_v41 = vpop.eup %9029 }
0x18b4   :  { %v6049_v36 = vsel %vm2405_vm5, %v12068_v41, 0.0 }
0x18b5   :  { %6050 = vadd.xlane.f32.xlu1 %v6049_v36  ;;  %5930 = vmax.xlane.f32.xlu0 %v5929_v62  ;;  %v5844_v36 = vpop.f32.mrf.mxu1 }
0x18bd   :  { %5933 = vmax.xlane.f32.xlu1 %v5932_v38 }
0x18c5   :  { %5936 = vmax.xlane.f32.xlu1 %v5935_v63 }
0x18e8   :  { %v6027_v45 = vpop.xlane.xlu0 %6026 }
0x18e9   :  { %9031 = vrcp.f32 %v6027_v45  ;;  %v6108_v53 = vand.u32 2147483648, %v6027_v45  ;;  %vm6102_vm14 = vweird.f32 %v6027_v45  ;;  %v6106_v52 = vand.u32 2147483647, %v6027_v45 }
0x18eb   :  { %v6109_v62 = vor.u32 1.1754944e-38, %v6108_v53  ;;  %vm6107_vm2 = vcmp.eq.f32.partialorder %v6106_v52, 8.507059e+37 }
0x18ef   :  { %v9032_v50 = vpop.eup %9031 }
0x18f0   :  { %v6098_v17 = vmul.f32 %v9032_v50, %v6027_v45  ;;  %v6030_v57 = vpop.xlane.xlu1 %6029  ;;  %v5910_v32 = vpop.xlane.xlu0 %5909  ;;  %vm6103_vm0 = vweird.f32 %v9032_v50 }
0x18f1   :  { %9033 = vrcp.f32 %v6030_v57  ;;  %v5962_v2 = vsub.f32 %v11999_v11, %v5910_v32  ;;  %vm12089_vm1 = vmor %vm6102_vm14, %vm6103_vm0  ;;  %v6121_v4 = vand.u32 2147483647, %v6030_v57  ;;  %v6123_v7 = vand.u32 2147483648, %v6030_v57 }
0x18f2   :  { %v6099_v13 = vsub.f32 1.0, %v6098_v17  ;;  %vm6117_vm3 = vweird.f32 %v6030_v57  ;;  %v12118_v11 = vadd.f32 %v11952_v39, %v5844_v36 }
0x18f3   :  { %v5995_v22 = vmul.f32 1.442695, %v5962_v2  ;;  %v6124_v45 = vor.u32 1.1754944e-38, %v6123_v7  ;;  %vm6122_vm6 = vcmp.eq.f32.partialorder %v6121_v4, 8.507059e+37 }
0x18f4   :  { %v6100_v10 = vmul.f32 %v9032_v50, %v6099_v13 }
0x18f5   :  { %9035 = vpow2.f32 %v5995_v22 }
0x18f6   :  { %v6101_v54 = vadd.f32 %v9032_v50, %v6100_v10 }
0x18f7   :  { %v9034_v18 = vpop.eup %9033 }
0x18f8   :  { %v6113_v47 = vmul.f32 %v9034_v18, %v6030_v57  ;;  %v12085_v19 = vpop.xlane.xlu1 %6032  ;;  %v5913_v24 = vpop.xlane.xlu0 %5912  ;;  %v6105_v46 = vsel %vm12089_vm1, %v9032_v50, %v6101_v54  ;;  %vm6118_vm15 = vweird.f32 %v9034_v18 }
0x18f9   :  { %9037 = vrcp.f32 %v12085_v19  ;;  %v5963_v51 = vsub.f32 %v12008_v37, %v5913_v24  ;;  %v6110_v63 = vsel %vm6107_vm2, %v6109_v62, %v6105_v46  ;;  %vm6119_vm4 = vmor %vm6117_vm3, %vm6118_vm15  ;;  %v6138_v7 = vand.u32 2147483648, %v12085_v19 }
0x18fa   :  { %v6114_v1 = vsub.f32 1.0, %v6113_v47  ;;  %v6111_v10 = vmul.f32 %v11994_v49, %v6110_v63  ;;  %vm6132_vm8 = vweird.f32 %v12085_v19 }
0x18fb   :  { %v12093_v25 = vpop.eup %9035  ;;  %v5997_v3 = vmul.f32 1.442695, %v5963_v51 }
0x18fc   :  { %v6115_v30 = vmul.f32 %v9034_v18, %v6114_v1  ;;  %v6052_v38 = vsel %vm2405_vm5, %v12093_v25, 0.0 }
0x18fd   :  { %9039 = vpow2.f32 %v5997_v3  ;;  %6053 = vadd.xlane.f32.xlu2 %v6052_v38  ;;  %v6136_v3 = vand.u32 2147483647, %v12085_v19 }
0x18fe   :  { %v6116_v37 = vadd.f32 %v9034_v18, %v6115_v30 }
0x18ff   :  { %v12099_v44 = vpop.eup %9037  ;;  %vm6137_vm12 = vcmp.eq.f32.partialorder %v6136_v3, 8.507059e+37 }
0x1900   :  { %v6120_v17 = vsel %vm6119_vm4, %v9034_v18, %v6116_v37  ;;  %v6128_v50 = vmul.f32 %v12099_v44, %v12085_v19  ;;  %v6036_v32 = vpop.xlane.xlu2 %6035  ;;  %v5916_v13 = vpop.xlane.xlu1 %5915  ;;  %vm6133_vm7 = vweird.f32 %v12099_v44  ;;  %v5938_v19 = vsel %vm2405_vm5, %v12118_v11, -inf }
0x1901   :  { %v6125_v2 = vsel %vm6122_vm6, %v6124_v45, %v6120_v17  ;;  %9041 = vrcp.f32 %v6036_v32  ;;  %v5964_v54 = vsub.f32 %v12017_v60, %v5916_v13  ;;  %vm12129_vm9 = vmor %vm6132_vm8, %vm6133_vm7  ;;  %v6153_v37 = vand.u32 2147483648, %v6036_v32 }
0x1902   :  { %v12105_v57 = vmul.f32 %v12001_v61, %v6125_v2  ;;  %v6129_v22 = vsub.f32 1.0, %v6128_v50  ;;  %v5847_v61 = vpop.f32.mrf.mxu1  ;;  %v6151_v17 = vand.u32 2147483647, %v6036_v32  ;;  %v6139_v50 = vor.u32 1.1754944e-38, %v6138_v7 }
0x1903   :  { %v12108_v47 = vpop.eup %9039  ;;  %v5999_v24 = vmul.f32 1.442695, %v5964_v54  ;;  %vm6147_vm11 = vweird.f32 %v6036_v32  ;;  %v6154_v54 = vor.u32 1.1754944e-38, %v6153_v37 }
0x1904   :  { %v6457_v18 = vpack.c.bf16 %v12105_v57, %v6111_v10  ;;  %v6130_v53 = vmul.f32 %v12099_v44, %v6129_v22  ;;  %v6055_v52 = vsel %vm2405_vm5, %v12108_v47, 0.0  ;;  %v12141_v22 = vadd.f32 %v11957_v33, %v5847_v61 }
0x1905   :  { %9043 = vpow2.f32 %v5999_v24  ;;  %6056 = vadd.xlane.f32.xlu2 %v6055_v52  ;;  %vm6152_vm0 = vcmp.eq.f32.partialorder %v6151_v17, 8.507059e+37 }
0x1906   :  { %8209 = vmatmul.msk.bf16.vlgmr.msrb.gmra.mxu0 %vm2405_vm5, %v6457_v18  ;;  %v6131_v4 = vadd.f32 %v12099_v44, %v6130_v53 }
0x1907   :  { %v9042_v49 = vpop.eup %9041 }
0x1908   :  { %v6143_v1 = vmul.f32 %v9042_v49, %v6036_v32  ;;  %v12115_v51 = vpop.xlane.xlu2 %6038  ;;  %v5919_v60 = vpop.xlane.xlu1 %5918  ;;  %vm6148_vm10 = vweird.f32 %v9042_v49  ;;  %v6135_v45 = vsel %vm12129_vm9, %v12099_v44, %v6131_v4  ;;  %v5941_v4 = vsel %vm2405_vm5, %v12141_v22, -inf }
0x1909   :  { %9045 = vrcp.f32 %v12115_v51  ;;  %v5965_v30 = vsub.f32 %v12026_v55, %v5919_v60  ;;  %vm6149_vm13 = vmor %vm6147_vm11, %vm6148_vm10  ;;  %v6140_v52 = vsel %vm6137_vm12, %v6139_v50, %v6135_v45  ;;  %v6168_v36 = vand.u32 2147483648, %v12115_v51 }
0x190a   :  { %v6144_v46 = vsub.f32 1.0, %v6143_v1  ;;  %v5849_v32 = vpop.f32.mrf.mxu1  ;;  %vm6162_vm1 = vweird.f32 %v12115_v51 }
0x190b   :  { %v12127_v62 = vpop.eup %9043  ;;  %v6001_v63 = vmul.f32 1.442695, %v5965_v30  ;;  %v12168_v17 = vadd.f32 %v11947_v42, %v5849_v32 }
0x190c   :  { %v6145_v38 = vmul.f32 %v9042_v49, %v6144_v46  ;;  %v6058_v55 = vsel %vm2405_vm5, %v12127_v62, 0.0  ;;  %v7116_v46 = vsel %vm2405_vm5, %v6111_v10, 0.0 }
0x190d   :  { %9047 = vpow2.f32 %v6001_v63  ;;  %6059 = vadd.xlane.f32.xlu0 %v6058_v55  ;;  %5939 = vmax.xlane.f32.xlu2 %v5938_v19  ;;  %v6169_v19 = vor.u32 1.1754944e-38, %v6168_v36  ;;  %v5944_v42 = vsel %vm2405_vm5, %v12168_v17, -inf }
0x190e   :  { %v6146_v13 = vadd.f32 %v9042_v49, %v6145_v38 }
0x190f   :  { %v9046_v2 = vpop.eup %9045 }
0x1910   :  { %v6150_v44 = vsel %vm6149_vm13, %v9042_v49, %v6146_v13  ;;  %v6158_v18 = vmul.f32 %v9046_v2, %v12115_v51  ;;  %v12145_v24 = vpop.xlane.xlu0 %6041  ;;  %v5922_v53 = vpop.xlane.xlu2 %5921  ;;  %v12152_v49 = vmul.f32 %v12010_v12, %v6140_v52  ;;  %vm6163_vm14 = vweird.f32 %v9046_v2 }
0x1911   :  { %9049 = vrcp.f32 %v12145_v24  ;;  %v5966_v60 = vsub.f32 %v12036_v8, %v5922_v53  ;;  %v6155_v61 = vsel %vm6152_vm0, %v6154_v54, %v6150_v44  ;;  %v6166_v8 = vand.u32 2147483647, %v12115_v51  ;;  %vm6164_vm15 = vmor %vm6162_vm1, %vm6163_vm14 }
0x1912   :  { %v6159_v1 = vsub.f32 1.0, %v6158_v18  ;;  %v6156_v7 = vmul.f32 %v12019_v16, %v6155_v61  ;;  %v6181_v61 = vand.u32 2147483647, %v12145_v24  ;;  %vm6177_vm4 = vweird.f32 %v12145_v24 }
0x1913   :  { %v12156_v30 = vpop.eup %9047  ;;  %v6003_v38 = vmul.f32 1.442695, %v5966_v60  ;;  %vm6167_vm2 = vcmp.eq.f32.partialorder %v6166_v8, 8.507059e+37 }
0x1914   :  { %v6160_v3 = vmul.f32 %v9046_v2, %v6159_v1  ;;  %v6061_v37 = vsel %vm2405_vm5, %v12156_v30, 0.0  ;;  %v6458_v63 = vpack.c.bf16 %v6156_v7, %v12152_v49  ;;  %v7117_v12 = vsel %vm2405_vm5, %v6156_v7, 0.0 }
0x1915   :  { %9051 = vpow2.f32 %v6003_v38  ;;  %6062 = vadd.xlane.f32.xlu0 %v6061_v37  ;;  %5942 = vmax.xlane.f32.xlu2 %v5941_v4  ;;  %v12165_v16 = vadd.f32 %v7117_v12, %v7116_v46  ;;  %v6183_v1 = vand.u32 2147483648, %v12145_v24  ;;  %vm6182_vm7 = vcmp.eq.f32.partialorder %v6181_v61, 8.507059e+37 }
0x1916   :  { %v6161_v45 = vadd.f32 %v9046_v2, %v6160_v3  ;;  %8210 = vmatmul.msk.bf16.gmra.mxu0 %vm2405_vm5, %v6458_v63 }
0x1917   :  { %v9050_v10 = vpop.eup %9049  ;;  %v6184_v8 = vor.u32 1.1754944e-38, %v6183_v1 }
0x1918   :  { %v6165_v55 = vsel %vm6164_vm15, %v9046_v2, %v6161_v45  ;;  %v6173_v50 = vmul.f32 %v9050_v10, %v12145_v24  ;;  %v12173_v13 = vpop.xlane.xlu0 %6044  ;;  %v5925_v51 = vpop.xlane.xlu2 %5924  ;;  %vm6178_vm3 = vweird.f32 %v9050_v10 }
0x1919   :  { %9053 = vrcp.f32 %v12173_v13  ;;  %v5967_v54 = vsub.f32 %v12046_v23, %v5925_v51  ;;  %v6170_v18 = vsel %vm6167_vm2, %v6169_v19, %v6165_v55  ;;  %v5852_v2 = vpop.f32.mrf.mxu1  ;;  %v7131_v23 = vsel %vm2405_vm5, %v12105_v57, 0.0  ;;  %vm6179_vm6 = vmor %vm6177_vm4, %vm6178_vm3 }
0x191a   :  { %v6174_v44 = vsub.f32 1.0, %v6173_v50  ;;  %v6171_v53 = vmul.f32 %v12029_v58, %v6170_v18  ;;  %v12193_v36 = vadd.f32 %v11952_v39, %v5852_v2  ;;  %v7146_v55 = vsel %vm2405_vm5, %v12152_v49, 0.0 }
0x191b   :  { %v12180_v52 = vpop.eup %9051  ;;  %v6005_v60 = vmul.f32 1.442695, %v5967_v54  ;;  %v6198_v51 = vand.u32 2147483648, %v12173_v13  ;;  %v6196_v54 = vand.u32 2147483647, %v12173_v13  ;;  %vm6192_vm9 = vweird.f32 %v12173_v13 }
0x191c   :  { %v6175_v32 = vmul.f32 %v9050_v10, %v6174_v44  ;;  %v6064_v4 = vsel %vm2405_vm5, %v12180_v52, 0.0  ;;  %v7132_v7 = vsel %vm2405_vm5, %v6171_v53, 0.0  ;;  %v5947_v39 = vsel %vm2405_vm5, %v12193_v36, -inf }
0x191d   :  { %9055 = vpow2.f32 %v6005_v60  ;;  %6065 = vadd.xlane.f32.xlu1 %v6064_v4  ;;  %5945 = vmax.xlane.f32.xlu0 %v5944_v42  ;;  %v12190_v58 = vadd.f32 %v7132_v7, %v7131_v23  ;;  %v6199_v60 = vor.u32 1.1754944e-38, %v6198_v51  ;;  %vm6197_vm11 = vcmp.eq.f32.partialorder %v6196_v54, 8.507059e+37 }
0x191e   :  { %v6176_v46 = vadd.f32 %v9050_v10, %v6175_v32 }
0x191f   :  { %v9054_v3 = vpop.eup %9053 }
0x1920   :  { %v6180_v38 = vsel %vm6179_vm6, %v9050_v10, %v6176_v46  ;;  %v6188_v57 = vmul.f32 %v9054_v3, %v12173_v13  ;;  %v6048_v37 = vpop.xlane.xlu1 %6047  ;;  %v5928_v63 = vpop.xlane.xlu0 %5927  ;;  %vm6193_vm8 = vweird.f32 %v9054_v3 }
0x1921   :  { %9057 = vrcp.f32 %v6048_v37  ;;  %v5968_v12 = vsub.f32 %v12056_v59, %v5928_v63  ;;  %v6185_v45 = vsel %vm6182_vm7, %v6184_v8, %v6180_v38  ;;  %v5854_v42 = vpop.f32.mrf.mxu1  ;;  %vm6194_vm10 = vmor %vm6192_vm9, %vm6193_vm8  ;;  %v6213_v38 = vand.u32 2147483648, %v6048_v37 }
0x1922   :  { %v6189_v24 = vsub.f32 1.0, %v6188_v57  ;;  %v6186_v19 = vmul.f32 %v12039_v9, %v6185_v45  ;;  %v12218_v23 = vadd.f32 %v11957_v33, %v5854_v42  ;;  %vm6207_vm13 = vweird.f32 %v6048_v37 }
0x1923   :  { %v12203_v10 = vpop.eup %9055  ;;  %v6007_v44 = vmul.f32 1.442695, %v5968_v12 }
0x1924   :  { %v6190_v50 = vmul.f32 %v9054_v3, %v6189_v24  ;;  %v6067_v59 = vsel %vm2405_vm5, %v12203_v10, 0.0  ;;  %v6459_v18 = vpack.c.bf16 %v6186_v19, %v6171_v53  ;;  %v7147_v49 = vsel %vm2405_vm5, %v6186_v19, 0.0 }
0x1925   :  { %9059 = vpow2.f32 %v6007_v44  ;;  %6068 = vadd.xlane.f32.xlu1 %v6067_v59  ;;  %5948 = vmax.xlane.f32.xlu0 %v5947_v39  ;;  %v12211_v9 = vadd.f32 %v7147_v49, %v7146_v55  ;;  %v5950_v33 = vsel %vm2405_vm5, %v12218_v23, -inf }
0x1926   :  { %v6191_v2 = vadd.f32 %v9054_v3, %v6190_v50  ;;  %8211 = vmatmul.msk.bf16.gmra.mxu0 %vm2405_vm5, %v6459_v18 }
0x1927   :  { %v9058_v32 = vpop.eup %9057 }
0x1928   :  { %v6195_v1 = vsel %vm6194_vm10, %v9054_v3, %v6191_v2  ;;  %v6203_v61 = vmul.f32 %v9058_v32, %v6048_v37  ;;  %v12215_v53 = vpop.xlane.xlu1 %6050  ;;  %v5931_v4 = vpop.xlane.xlu0 %5930  ;;  %vm6208_vm12 = vweird.f32 %v9058_v32  ;;  %v6211_v3 = vand.u32 2147483647, %v6048_v37 }
0x1929   :  { %v5969_v7 = vsub.f32 %v12066_v40, %v5931_v4  ;;  %v6200_v46 = vsel %vm6197_vm11, %v6199_v60, %v6195_v1  ;;  %vm6209_vm0 = vmor %vm6207_vm13, %vm6208_vm12  ;;  %v6214_v40 = vor.u32 1.1754944e-38, %v6213_v38  ;;  %vm6222_vm15 = vweird.f32 %v12215_v53 }
0x192a   :  { %v6204_v13 = vsub.f32 1.0, %v6203_v61  ;;  %v6201_v8 = vmul.f32 %v12049_v21, %v6200_v46  ;;  %vm6212_vm14 = vcmp.eq.f32.partialorder %v6211_v3, 8.507059e+37 }
0x192b   :  { %v12222_v57 = vpop.eup %9059  ;;  %v6009_v24 = vmul.f32 1.442695, %v5969_v7 }
0x192c   :  { %v6205_v63 = vmul.f32 %v9058_v32, %v6204_v13  ;;  %v6070_v12 = vsel %vm2405_vm5, %v12222_v57, 0.0  ;;  %v7119_v45 = vsel %vm2405_vm5, %v6201_v8, 0.0 }
0x192d   :  { %9061 = vpow2.f32 %v6009_v24  ;;  %6071 = vadd.xlane.f32.xlu2 %v6070_v12  ;;  %5951 = vmax.xlane.f32.xlu1 %v5950_v33  ;;  %v12230_v21 = vadd.f32 %v7119_v45, %v12165_v16  ;;  %v6226_v24 = vand.u32 2147483647, %v12215_v53 }
0x192e   :  { %v6206_v55 = vadd.f32 %v9058_v32, %v6205_v63  ;;  %v6228_v63 = vand.u32 2147483648, %v12215_v53 }
0x192f   :  { %vm6227_vm6 = vcmp.eq.f32.partialorder %v6226_v24, 8.507059e+37 }
0x1930   :  { %v6210_v39 = vsel %vm6209_vm0, %v9058_v32, %v6206_v55  ;;  %v5934_v19 = vpop.xlane.xlu1 %5933 }
0x1931   :  { %v5970_v50 = vsub.f32 %v12075_v56, %v5934_v19  ;;  %v6215_v51 = vsel %vm6212_vm14, %v6214_v40, %v6210_v39  ;;  %v6229_v39 = vor.u32 1.1754944e-38, %v6228_v63 }
0x1932   :  { %v6216_v44 = vmul.f32 %v12059_v29, %v6215_v51 }
0x1933   :  { %v6011_v54 = vmul.f32 1.442695, %v5970_v50  ;;  %v12234_v59 = vpop.eup %9061 }
0x1934   :  { %v6460_v37 = vpack.c.bf16 %v6216_v44, %v6201_v8  ;;  %v7134_v18 = vsel %vm2405_vm5, %v6216_v44, 0.0  ;;  %v6073_v16 = vsel %vm2405_vm5, %v12234_v59, 0.0 }
0x1935   :  { %9063 = vpow2.f32 %v6011_v54  ;;  %v12240_v49 = vadd.f32 %v7134_v18, %v12190_v58  ;;  %6074 = vadd.xlane.f32.xlu2 %v6073_v16 }
0x1936   :  { %8212 = vmatmul.msk.bf16.gmra.mxu0 %vm2405_vm5, %v6460_v37 }
0x1938   :  { %v5937_v56 = vpop.xlane.xlu1 %5936 }
0x1939   :  { %v5971_v42 = vsub.f32 %v12080_v14, %v5937_v56 }
0x193b   :  { %v12244_v29 = vpop.eup %9063  ;;  %v6013_v2 = vmul.f32 1.442695, %v5971_v42 }
0x193c   :  { %v6076_v32 = vsel %vm2405_vm5, %v12244_v29, 0.0 }
0x193d   :  { %9065 = vpow2.f32 %v6013_v2  ;;  %6077 = vadd.xlane.f32.xlu0 %v6076_v32 }
0x193e   :  { %9067 = vrcp.f32 %v12215_v53 }
0x1943   :  { %v12248_v1 = vpop.eup %9065 }
0x1944   :  { %v6079_v58 = vsel %vm2405_vm5, %v12248_v1, 0.0  ;;  %v9068_v60 = vpop.eup %9067 }
0x1945   :  { %6080 = vadd.xlane.f32.xlu1 %v6079_v58  ;;  %v6218_v61 = vmul.f32 %v9068_v60, %v12215_v53  ;;  %vm6223_vm1 = vweird.f32 %v9068_v60 }
0x1946   :  { %vm12257_vm2 = vmor %vm6222_vm15, %vm6223_vm1 }
0x1947   :  { %v6219_v4 = vsub.f32 1.0, %v6218_v61 }
0x1949   :  { %v6220_v13 = vmul.f32 %v9068_v60, %v6219_v4 }
0x194b   :  { %v6221_v8 = vadd.f32 %v9068_v60, %v6220_v13 }
0x194d   :  { %v6225_v55 = vsel %vm12257_vm2, %v9068_v60, %v6221_v8 }
0x194e   :  { %v6230_v18 = vsel %vm6227_vm6, %v6229_v39, %v6225_v55 }
0x194f   :  { %v6231_v32 = vmul.f32 %v12068_v41, %v6230_v18 }
0x1970   :  { %v6054_v14 = vpop.xlane.xlu2 %6053 }
0x1971   :  { %9069 = vrcp.f32 %v6054_v14  ;;  %v6243_v45 = vand.u32 2147483648, %v6054_v14  ;;  %v6241_v40 = vand.u32 2147483647, %v6054_v14  ;;  %vm6237_vm4 = vweird.f32 %v6054_v14 }
0x1973   :  { %v6244_v44 = vor.u32 1.1754944e-38, %v6243_v45  ;;  %vm6242_vm8 = vcmp.eq.f32.partialorder %v6241_v40, 8.507059e+37 }
0x1977   :  { %v9070_v7 = vpop.eup %9069 }
0x1978   :  { %v6233_v46 = vmul.f32 %v9070_v7, %v6054_v14  ;;  %v6057_v38 = vpop.xlane.xlu2 %6056  ;;  %vm6238_vm3 = vweird.f32 %v9070_v7 }
0x1979   :  { %9071 = vrcp.f32 %v6057_v38  ;;  %vm6239_vm7 = vmor %vm6237_vm4, %vm6238_vm3  ;;  %v6258_v61 = vand.u32 2147483648, %v6057_v38  ;;  %v6256_v4 = vand.u32 2147483647, %v6057_v38  ;;  %vm6252_vm10 = vweird.f32 %v6057_v38 }
0x197a   :  { %v6234_v3 = vsub.f32 1.0, %v6233_v46 }
0x197b   :  { %vm6257_vm12 = vcmp.eq.f32.partialorder %v6256_v4, 8.507059e+37 }
0x197c   :  { %v6235_v33 = vmul.f32 %v9070_v7, %v6234_v3 }
0x197e   :  { %v6236_v19 = vadd.f32 %v9070_v7, %v6235_v33 }
0x197f   :  { %v9072_v50 = vpop.eup %9071 }
0x1980   :  { %v6240_v51 = vsel %vm6239_vm7, %v9070_v7, %v6236_v19  ;;  %v6248_v53 = vmul.f32 %v9072_v50, %v6057_v38  ;;  %v6060_v54 = vpop.xlane.xlu0 %6059  ;;  %v5940_v37 = vpop.xlane.xlu2 %5939  ;;  %vm6253_vm9 = vweird.f32 %v9072_v50 }
0x1981   :  { %9073 = vrcp.f32 %v6060_v54  ;;  %v5972_v56 = vsub.f32 %v12118_v11, %v5940_v37  ;;  %v6245_v2 = vsel %vm6242_vm8, %v6244_v44, %v6240_v51  ;;  %vm6254_vm11 = vmor %vm6252_vm10, %vm6253_vm9  ;;  %v6273_v39 = vand.u32 2147483648, %v6060_v54 }
0x1982   :  { %v6249_v16 = vsub.f32 1.0, %v6248_v53  ;;  %v6246_v58 = vmul.f32 %v12093_v25, %v6245_v2  ;;  %v6259_v25 = vor.u32 1.1754944e-38, %v6258_v61  ;;  %vm6267_vm0 = vweird.f32 %v6060_v54 }
0x1983   :  { %v12264_v42 = vpop.f32.mrf.mxu0  ;;  %v6015_v14 = vmul.f32 1.442695, %v5972_v56  ;;  %v6274_v18 = vor.u32 1.1754944e-38, %v6273_v39 }
0x1984   :  { %v6250_v60 = vmul.f32 %v9072_v50, %v6249_v16  ;;  %v6461_v13 = vpack.c.bf16 %v6246_v58, %v6231_v32  ;;  %v7121_v7 = vsel %vm2405_vm5, %v6246_v58, 0.0  ;;  %v7149_v16 = vsel %vm2405_vm5, %v6231_v32, 0.0 }
0x1985   :  { %9075 = vpow2.f32 %v6015_v14  ;;  %v12270_v11 = vadd.f32 %v7121_v7, %v12230_v21  ;;  %v7150_v14 = vadd.f32 %v7149_v16, %v12211_v9 }
0x1986   :  { %v6251_v46 = vadd.f32 %v9072_v50, %v6250_v60  ;;  %8213 = vmatmul.msk.bf16.gmra.mxu0 %vm2405_vm5, %v6461_v13 }
0x1987   :  { %v9074_v8 = vpop.eup %9073 }
0x1988   :  { %v6255_v41 = vsel %vm6254_vm11, %v9072_v50, %v6251_v46  ;;  %v6263_v63 = vmul.f32 %v9074_v8, %v6060_v54  ;;  %v6063_v3 = vpop.xlane.xlu0 %6062  ;;  %v5943_v24 = vpop.xlane.xlu2 %5942  ;;  %vm6268_vm13 = vweird.f32 %v9074_v8  ;;  %v6271_v50 = vand.u32 2147483647, %v6060_v54 }
0x1989   :  { %9077 = vrcp.f32 %v6063_v3  ;;  %v5973_v33 = vsub.f32 %v12141_v22, %v5943_v24  ;;  %v6260_v38 = vsel %vm6257_vm12, %v6259_v25, %v6255_v41  ;;  %vm6269_vm14 = vmor %vm6267_vm0, %vm6268_vm13  ;;  %v6288_v32 = vand.u32 2147483648, %v6063_v3 }
0x198a   :  { %v6264_v12 = vsub.f32 1.0, %v6263_v63  ;;  %v6261_v21 = vmul.f32 %v12108_v47, %v6260_v38  ;;  %vm6272_vm1 = vcmp.eq.f32.partialorder %v6271_v50, 8.507059e+37  ;;  %vm6282_vm2 = vweird.f32 %v6063_v3 }
0x198b   :  { %v12274_v45 = vpop.f32.mrf.mxu0  ;;  %v12277_v55 = vpop.eup %9075  ;;  %v6017_v19 = vmul.f32 1.442695, %v5973_v33 }
0x198c   :  { %v6265_v40 = vmul.f32 %v9074_v8, %v6264_v12  ;;  %v6082_v51 = vsel %vm2405_vm5, %v12277_v55, 0.0  ;;  %v7136_v44 = vsel %vm2405_vm5, %v6261_v21, 0.0  ;;  %v6289_v12 = vor.u32 1.1754944e-38, %v6288_v32 }
0x198d   :  { %9079 = vpow2.f32 %v6017_v19  ;;  %6083 = vadd.xlane.f32.xlu2 %v6082_v51  ;;  %v12283_v22 = vadd.f32 %v7136_v44, %v12240_v49  ;;  %v6577_v19 = vmul.f32 %v12264_v42, %v10070_v34 }
0x198e   :  { %v6266_v53 = vadd.f32 %v9074_v8, %v6265_v40 }
0x198f   :  { %v9078_v47 = vpop.eup %9077 }
0x1990   :  { %v6270_v37 = vsel %vm6269_vm14, %v9074_v8, %v6266_v53  ;;  %v6278_v56 = vmul.f32 %v9078_v47, %v6063_v3  ;;  %v6066_v2 = vpop.xlane.xlu1 %6065  ;;  %v5946_v58 = vpop.xlane.xlu0 %5945  ;;  %vm6283_vm15 = vweird.f32 %v9078_v47  ;;  %v6286_v8 = vand.u32 2147483647, %v6063_v3 }
0x1991   :  { %9081 = vrcp.f32 %v6066_v2  ;;  %v5974_v61 = vsub.f32 %v12168_v17, %v5946_v58  ;;  %v6275_v54 = vsel %vm6272_vm1, %v6274_v18, %v6270_v37  ;;  %vm6284_vm3 = vmor %vm6282_vm2, %vm6283_vm15  ;;  %v6303_v50 = vand.u32 2147483648, %v6066_v2 }
0x1992   :  { %v6279_v60 = vsub.f32 1.0, %v6278_v56  ;;  %v6276_v49 = vmul.f32 %v12127_v62, %v6275_v54  ;;  %vm6287_vm4 = vcmp.eq.f32.partialorder %v6286_v8, 8.507059e+37  ;;  %vm6297_vm7 = vweird.f32 %v6066_v2 }
0x1993   :  { %v12288_v4 = vpop.f32.mrf.mxu0  ;;  %v12291_v13 = vpop.eup %9079  ;;  %v6019_v46 = vmul.f32 1.442695, %v5974_v61  ;;  %v6301_v16 = vand.u32 2147483647, %v6066_v2  ;;  %v6304_v54 = vor.u32 1.1754944e-38, %v6303_v50  ;;  %v6578_v8 = vmul.f32 %v12274_v45, %v10070_v34 }
0x1994   :  { %v6280_v7 = vmul.f32 %v9078_v47, %v6279_v60  ;;  %v6085_v41 = vsel %vm2405_vm5, %v12291_v13, 0.0  ;;  %v6462_v25 = vpack.c.bf16 %v6276_v49, %v6261_v21  ;;  %v7151_v17 = vsel %vm2405_vm5, %v6276_v49, 0.0 }
0x1995   :  { %9083 = vpow2.f32 %v6019_v46  ;;  %6086 = vadd.xlane.f32.xlu0 %v6085_v41  ;;  %v12296_v9 = vadd.f32 %v7151_v17, %v7150_v14  ;;  %vm6302_vm9 = vcmp.eq.f32.partialorder %v6301_v16, 8.507059e+37 }
0x1996   :  { %v6281_v63 = vadd.f32 %v9078_v47, %v6280_v7  ;;  %8214 = vmatmul.msk.bf16.gmra.mxu0 %vm2405_vm5, %v6462_v25 }
0x1997   :  { %v9082_v62 = vpop.eup %9081 }
0x1998   :  { %v6285_v24 = vsel %vm6284_vm3, %v9078_v47, %v6281_v63  ;;  %v6293_v33 = vmul.f32 %v9082_v62, %v6066_v2  ;;  %v12299_v38 = vpop.xlane.xlu1 %6068  ;;  %v5949_v40 = vpop.xlane.xlu0 %5948  ;;  %vm6298_vm6 = vweird.f32 %v9082_v62 }
0x1999   :  { %9085 = vrcp.f32 %v12299_v38  ;;  %v5975_v3 = vsub.f32 %v12193_v36, %v5949_v40  ;;  %v6290_v39 = vsel %vm6287_vm4, %v6289_v12, %v6285_v24  ;;  %vm6299_vm8 = vmor %vm6297_vm7, %vm6298_vm6  ;;  %vm6312_vm10 = vweird.f32 %v12299_v38 }
0x199a   :  { %v6294_v21 = vsub.f32 1.0, %v6293_v33  ;;  %v6291_v44 = vmul.f32 %v12156_v30, %v6290_v39 }
0x199b   :  { %v6524_v51 = vpop.f32.mrf.mxu0  ;;  %v12306_v53 = vpop.eup %9083  ;;  %v6021_v37 = vmul.f32 1.442695, %v5975_v3 }
0x199c   :  { %v6295_v47 = vmul.f32 %v9082_v62, %v6294_v21  ;;  %v6580_v18 = vmul.f32 %v6524_v51, %v10091_v5  ;;  %v6088_v36 = vsel %vm2405_vm5, %v12306_v53, 0.0  ;;  %v7123_v56 = vsel %vm2405_vm5, %v6291_v44, 0.0 }
0x199d   :  { %9087 = vpow2.f32 %v6021_v37  ;;  %6089 = vadd.xlane.f32.xlu1 %v6088_v36  ;;  %v12315_v30 = vadd.f32 %v7123_v56, %v12270_v11  ;;  %v6318_v11 = vand.u32 2147483648, %v12299_v38  ;;  %v6579_v37 = vmul.f32 %v12288_v4, %v10070_v34 }
0x199e   :  { %v6296_v58 = vadd.f32 %v9082_v62, %v6295_v47  ;;  %v12312_v42 = vadd.f32 %v6580_v18, %v6577_v19 }
0x199f   :  { %v9086_v60 = vpop.eup %9085  ;;  %v6319_v19 = vor.u32 1.1754944e-38, %v6318_v11 }
0x19a0   :  { %v6300_v61 = vsel %vm6299_vm8, %v9082_v62, %v6296_v58  ;;  %v6308_v14 = vmul.f32 %v9086_v60, %v12299_v38  ;;  %v6072_v2 = vpop.xlane.xlu2 %6071  ;;  %v5952_v49 = vpop.xlane.xlu1 %5951  ;;  %vm6313_vm11 = vweird.f32 %v9086_v60 }
0x19a1   :  { %9089 = vrcp.f32 %v6072_v2  ;;  %v5976_v32 = vsub.f32 %v12218_v23, %v5952_v49  ;;  %v6305_v46 = vsel %vm6302_vm9, %v6304_v54, %v6300_v61  ;;  %v6316_v23 = vand.u32 2147483647, %v12299_v38  ;;  %vm6314_vm12 = vmor %vm6312_vm10, %vm6313_vm11 }
0x19a2   :  { %v6309_v7 = vsub.f32 1.0, %v6308_v14  ;;  %v6306_v25 = vmul.f32 %v12180_v52, %v6305_v46  ;;  %v6333_v18 = vand.u32 2147483648, %v6072_v2  ;;  %v6331_v56 = vand.u32 2147483647, %v6072_v2 }
0x19a3   :  { %v6527_v41 = vpop.f32.mrf.mxu0  ;;  %v12324_v17 = vpop.eup %9087  ;;  %v6023_v62 = vmul.f32 1.442695, %v5976_v32  ;;  %vm6317_vm13 = vcmp.eq.f32.partialorder %v6316_v23, 8.507059e+37  ;;  %vm6327_vm14 = vweird.f32 %v6072_v2 }
0x19a4   :  { %v6310_v63 = vmul.f32 %v9086_v60, %v6309_v7  ;;  %v6581_v24 = vmul.f32 %v6527_v41, %v10091_v5  ;;  %v6091_v12 = vsel %vm2405_vm5, %v12324_v17, 0.0  ;;  %v6463_v45 = vpack.c.bf16 %v6306_v25, %v6291_v44 }
0x19a5   :  { %v7138_v33 = vsel %vm2405_vm5, %v6306_v25, 0.0  ;;  %9091 = vpow2.f32 %v6023_v62  ;;  %6092 = vadd.xlane.f32.xlu2 %v6091_v12  ;;  %v6334_v4 = vor.u32 1.1754944e-38, %v6333_v18  ;;  %vm6332_vm15 = vcmp.eq.f32.partialorder %v6331_v56, 8.507059e+37 }
0x19a6   :  { %v6311_v40 = vadd.f32 %v9086_v60, %v6310_v63  ;;  %v12331_v21 = vadd.f32 %v6581_v24, %v6578_v8  ;;  %v12334_v52 = vadd.f32 %v7138_v33, %v12283_v22  ;;  %8215 = vmatmul.msk.bf16.gmra.mxu0 %vm2405_vm5, %v6463_v45 }
0x19a7   :  { %v9090_v3 = vpop.eup %9089 }
0x19a8   :  { %v6315_v39 = vsel %vm6314_vm12, %v9086_v60, %v6311_v40  ;;  %v6323_v50 = vmul.f32 %v9090_v3, %v6072_v2  ;;  %v6075_v51 = vpop.xlane.xlu2 %6074  ;;  %vm6328_vm0 = vweird.f32 %v9090_v3 }
0x19a9   :  { %9093 = vrcp.f32 %v6075_v51  ;;  %v6320_v47 = vsel %vm6317_vm13, %v6319_v19, %v6315_v39  ;;  %vm6329_vm1 = vmor %vm6327_vm14, %vm6328_vm0  ;;  %v6346_v11 = vand.u32 2147483647, %v6075_v51  ;;  %v6348_v2 = vand.u32 2147483648, %v6075_v51 }
0x19aa   :  { %v6324_v44 = vsub.f32 1.0, %v6323_v50  ;;  %v6321_v16 = vmul.f32 %v12203_v10, %v6320_v47  ;;  %vm6342_vm3 = vweird.f32 %v6075_v51 }
0x19ab   :  { %v6529_v22 = vpop.f32.mrf.mxu0  ;;  %v12342_v36 = vpop.eup %9091  ;;  %vm6347_vm6 = vcmp.eq.f32.partialorder %v6346_v11, 8.507059e+37 }
0x19ac   :  { %v6325_v38 = vmul.f32 %v9090_v3, %v6324_v44  ;;  %v6582_v58 = vmul.f32 %v6529_v22, %v10091_v5  ;;  %v6094_v60 = vsel %vm2405_vm5, %v12342_v36, 0.0  ;;  %v7153_v61 = vsel %vm2405_vm5, %v6321_v16, 0.0 }
0x19ad   :  { %6095 = vadd.xlane.f32.xlu0 %v6094_v60  ;;  %v7154_v34 = vadd.f32 %v7153_v61, %v12296_v9 }
0x19ae   :  { %v6326_v54 = vadd.f32 %v9090_v3, %v6325_v38  ;;  %v12348_v14 = vadd.f32 %v6582_v58, %v6579_v37 }
0x19af   :  { %v9094_v10 = vpop.eup %9093 }
0x19b0   :  { %v6078_v49 = vpop.xlane.xlu0 %6077  ;;  %v6330_v7 = vsel %vm6329_vm1, %v9090_v3, %v6326_v54  ;;  %v6338_v32 = vmul.f32 %v9094_v10, %v6075_v51  ;;  %vm6343_vm2 = vweird.f32 %v9094_v10 }
0x19b1   :  { %9095 = vrcp.f32 %v6078_v49  ;;  %v6335_v5 = vsel %vm6332_vm15, %v6334_v4, %v6330_v7  ;;  %vm6344_vm4 = vmor %vm6342_vm3, %vm6343_vm2  ;;  %v6363_v19 = vand.u32 2147483648, %v6078_v49  ;;  %vm6357_vm8 = vweird.f32 %v6078_v49 }
0x19b2   :  { %v6339_v46 = vsub.f32 1.0, %v6338_v32  ;;  %v6336_v8 = vmul.f32 %v12222_v57, %v6335_v5  ;;  %v6349_v57 = vor.u32 1.1754944e-38, %v6348_v2 }
0x19b3   :  { %v6532_v41 = vpop.f32.mrf.mxu0  ;;  %v6364_v37 = vor.u32 1.1754944e-38, %v6363_v19 }
0x19b4   :  { %v6340_v25 = vmul.f32 %v9094_v10, %v6339_v46  ;;  %v6583_v63 = vmul.f32 %v6532_v41, %v10105_v26  ;;  %v6464_v9 = vpack.c.bf16 %v6336_v8, %v6321_v16  ;;  %v7125_v62 = vsel %vm2405_vm5, %v6336_v8, 0.0 }
0x19b5   :  { %v12355_v24 = vadd.f32 %v7125_v62, %v12315_v30  ;;  %v6361_v30 = vand.u32 2147483647, %v6078_v49 }
0x19b6   :  { %v6341_v12 = vadd.f32 %v9094_v10, %v6340_v25  ;;  %v6602_v45 = vadd.f32 %v12312_v42, %v6583_v63  ;;  %8216 = vmatmul.msk.bf16.gmra.mxu0 %vm2405_vm5, %v6464_v9 }
0x19b7   :  { %v9096_v23 = vpop.eup %9095  ;;  %vm6362_vm10 = vcmp.eq.f32.partialorder %v6361_v30, 8.507059e+37 }
0x19b8   :  { %v6353_v33 = vmul.f32 %v9096_v23, %v6078_v49  ;;  %v6345_v40 = vsel %vm6344_vm4, %v9094_v10, %v6341_v12  ;;  %vm6358_vm7 = vweird.f32 %v9096_v23  ;;  %v6081_v58 = vpop.xlane.xlu1 %6080 }
0x19b9   :  { %v6350_v39 = vsel %vm6347_vm6, %v6349_v57, %v6345_v40  ;;  %vm6359_vm9 = vmor %vm6357_vm8, %vm6358_vm7  ;;  %9097 = vrcp.f32 %v6081_v58  ;;  %v6378_v8 = vand.u32 2147483648, %v6081_v58  ;;  %vm6372_vm12 = vweird.f32 %v6081_v58 }
0x19ba   :  { %v6354_v3 = vsub.f32 1.0, %v6353_v33  ;;  %v6351_v50 = vmul.f32 %v12234_v59, %v6350_v39  ;;  %v6376_v2 = vand.u32 2147483647, %v6081_v58 }
0x19bb   :  { %v6534_v61 = vpop.f32.mrf.mxu0  ;;  %v6379_v12 = vor.u32 1.1754944e-38, %v6378_v8 }
0x19bc   :  { %v6355_v44 = vmul.f32 %v9096_v23, %v6354_v3  ;;  %v7140_v47 = vsel %vm2405_vm5, %v6351_v50, 0.0  ;;  %vm6377_vm1 = vcmp.eq.f32.partialorder %v6376_v2, 8.507059e+37  ;;  %v6584_v3 = vmul.f32 %v6534_v61, %v10105_v26 }
0x19bd   :  { %v12362_v42 = vadd.f32 %v7140_v47, %v12334_v52 }
0x19be   :  { %v6356_v51 = vadd.f32 %v9096_v23, %v6355_v44 }
0x19bf   :  { %v9098_v60 = vpop.eup %9097 }
0x19c0   :  { %v6360_v18 = vsel %vm6359_vm9, %v9096_v23, %v6356_v51  ;;  %v6368_v52 = vmul.f32 %v9098_v60, %v6081_v58  ;;  %vm6373_vm11 = vweird.f32 %v9098_v60 }
0x19c1   :  { %v6365_v22 = vsel %vm6362_vm10, %v6364_v37, %v6360_v18  ;;  %vm12376_vm13 = vmor %vm6372_vm12, %vm6373_vm11 }
0x19c2   :  { %v6366_v16 = vmul.f32 %v12244_v29, %v6365_v22  ;;  %v6369_v10 = vsub.f32 1.0, %v6368_v52  ;;  %v6609_v22 = vadd.f32 %v12331_v21, %v6584_v3 }
0x19c4   :  { %v6465_v38 = vpack.c.bf16 %v6366_v16, %v6351_v50  ;;  %v7155_v59 = vsel %vm2405_vm5, %v6366_v16, 0.0  ;;  %v6370_v7 = vmul.f32 %v9098_v60, %v6369_v10 }
0x19c5   :  { %v12366_v56 = vadd.f32 %v7155_v59, %v7154_v34 }
0x19c6   :  { %8217 = vmatmul.msk.bf16.gmra.mxu0 %vm2405_vm5, %v6465_v38  ;;  %v6371_v46 = vadd.f32 %v9098_v60, %v6370_v7 }
0x19c8   :  { %v6375_v62 = vsel %vm12376_vm13, %v9098_v60, %v6371_v46 }
0x19c9   :  { %v6380_v30 = vsel %vm6377_vm1, %v6379_v12, %v6375_v62 }
0x19ca   :  { %v6381_v18 = vmul.f32 %v12248_v1, %v6380_v30 }
0x1a00   :  { %v6084_v54 = vpop.xlane.xlu2 %6083 }
0x1a01   :  { %9099 = vrcp.f32 %v6084_v54  ;;  %v6391_v23 = vand.u32 2147483647, %v6084_v54  ;;  %vm6387_vm14 = vweird.f32 %v6084_v54 }
0x1a03   :  { %v6537_v4 = vpop.f32.mrf.mxu0  ;;  %vm6392_vm2 = vcmp.eq.f32.partialorder %v6391_v23, 8.507059e+37 }
0x1a04   :  { %v6585_v49 = vmul.f32 %v6537_v4, %v10105_v26 }
0x1a06   :  { %v12371_v29 = vadd.f32 %v12348_v14, %v6585_v49  ;;  %v6393_v14 = vand.u32 2147483648, %v6084_v54 }
0x1a07   :  { %v9100_v32 = vpop.eup %9099 }
0x1a08   :  { %v6383_v34 = vmul.f32 %v9100_v32, %v6084_v54  ;;  %v12373_v5 = vpop.xlane.xlu0 %6086  ;;  %vm6388_vm0 = vweird.f32 %v9100_v32  ;;  %v6394_v19 = vor.u32 1.1754944e-38, %v6393_v14 }
0x1a09   :  { %9101 = vrcp.f32 %v12373_v5  ;;  %vm6389_vm15 = vmor %vm6387_vm14, %vm6388_vm0  ;;  %v6408_v1 = vand.u32 2147483648, %v12373_v5  ;;  %vm6402_vm4 = vweird.f32 %v12373_v5 }
0x1a0a   :  { %v6384_v11 = vsub.f32 1.0, %v6383_v34 }
0x1a0b   :  { %v6539_v41 = vpop.f32.mrf.mxu0  ;;  %v6409_v46 = vor.u32 1.1754944e-38, %v6408_v1 }
0x1a0c   :  { %v6385_v63 = vmul.f32 %v9100_v32, %v6384_v11  ;;  %v6586_v9 = vmul.f32 %v6539_v41, %v10118_v48  ;;  %v7127_v41 = vsel %vm2405_vm5, %v6381_v18, 0.0 }
0x1a0d   :  { %v7128_v12 = vadd.f32 %v7127_v41, %v12355_v24 }
0x1a0e   :  { %v6386_v57 = vadd.f32 %v9100_v32, %v6385_v63  ;;  %v12383_v33 = vadd.f32 %v6602_v45, %v6586_v9 }
0x1a0f   :  { %v9102_v40 = vpop.eup %9101 }
0x1a10   :  { %v6390_v39 = vsel %vm6389_vm15, %v9100_v32, %v6386_v57  ;;  %v6398_v50 = vmul.f32 %v9102_v40, %v12373_v5  ;;  %v6090_v44 = vpop.xlane.xlu1 %6089  ;;  %vm6403_vm3 = vweird.f32 %v9102_v40 }
0x1a11   :  { %9103 = vrcp.f32 %v6090_v44  ;;  %v6395_v51 = vsel %vm6392_vm2, %v6394_v19, %v6390_v39  ;;  %vm12397_vm6 = vmor %vm6402_vm4, %vm6403_vm3  ;;  %v6423_v49 = vand.u32 2147483648, %v6090_v44  ;;  %v6421_v34 = vand.u32 2147483647, %v6090_v44 }
0x1a12   :  { %v6399_v47 = vsub.f32 1.0, %v6398_v50  ;;  %v6396_v45 = vmul.f32 %v12277_v55, %v6395_v51  ;;  %v6406_v55 = vand.u32 2147483647, %v12373_v5  ;;  %vm6417_vm8 = vweird.f32 %v6090_v44  ;;  %v8613_v5 = vld [vmem:[#allocation25 + $0xb8] sm:$0xff] }
0x1a13   :  { %v6542_v37 = vpop.f32.mrf.mxu0  ;;  %v6424_v63 = vor.u32 1.1754944e-38, %v6423_v49  ;;  %6694 = vmatpush.bf16.msrb.mxu2 %v8613_v5  ;;  %vm6422_vm11 = vcmp.eq.f32.partialorder %v6421_v34, 8.507059e+37  ;;  %v8612_v49 = vld [vmem:[#allocation25 + $0xb0] sm:$0xff]  ;;  %v8611_v34 = vld [vmem:[#allocation25 + $0xa8] sm:$0xff] }
0x1a14   :  { %v6587_v26 = vmul.f32 %v6542_v37, %v10118_v48  ;;  %v6400_v16 = vmul.f32 %v9102_v40, %v6399_v47  ;;  %v6466_v38 = vpack.c.bf16 %v6396_v45, %v6381_v18  ;;  %vm6407_vm9 = vcmp.eq.f32.partialorder %v6406_v55, 8.507059e+37 }
0x1a16   :  { %v12391_v59 = vadd.f32 %v6609_v22, %v6587_v26  ;;  %8218 = vmatmul.msk.bf16.gmra.mxu0 %vm2405_vm5, %v6466_v38  ;;  %v6401_v52 = vadd.f32 %v9102_v40, %v6400_v16 }
0x1a17   :  { %v9104_v58 = vpop.eup %9103  ;;  %6695 = vmatpush.bf16.msrb.mxu2 %v8612_v49 }
0x1a18   :  { %v6413_v60 = vmul.f32 %v9104_v58, %v6090_v44  ;;  %v6093_v61 = vpop.xlane.xlu2 %6092  ;;  %vm6418_vm7 = vweird.f32 %v9104_v58  ;;  %v6405_v32 = vsel %vm12397_vm6, %v9102_v40, %v6401_v52 }
0x1a19   :  { %9105 = vrcp.f32 %v6093_v61  ;;  %vm6419_vm10 = vmor %vm6417_vm8, %vm6418_vm7  ;;  %v6410_v9 = vsel %vm6407_vm9, %v6409_v46, %v6405_v32  ;;  %v6436_v19 = vand.u32 2147483647, %v6093_v61  ;;  %vm6432_vm13 = vweird.f32 %v6093_v61 }
0x1a1a   :  { %v6414_v54 = vsub.f32 1.0, %v6413_v60  ;;  %v6411_v40 = vmul.f32 %v12291_v13, %v6410_v9  ;;  %v7142_v13 = vsel %vm2405_vm5, %v6396_v45, 0.0 }
0x1a1b   :  { %v6544_v21 = vpop.f32.mrf.mxu0  ;;  %vm6437_vm14 = vcmp.eq.f32.partialorder %v6436_v19, 8.507059e+37  ;;  %v7143_v60 = vadd.f32 %v7142_v13, %v12362_v42  ;;  %6696 = vmatpush.bf16.msrb.mxu2 %v8611_v34  ;;  %v8307_v34 = vld [vmem:[#allocation26 + $0x160] sm:$0xf] }
0x1a1c   :  { %v6415_v4 = vmul.f32 %v9104_v58, %v6414_v54  ;;  %v6588_v7 = vmul.f32 %v6544_v21, %v10118_v48  ;;  %v7157_v32 = vsel %vm2405_vm5, %v6411_v40, 0.0 }
0x1a1e   :  { %v6416_v8 = vadd.f32 %v9104_v58, %v6415_v4  ;;  %v12405_v11 = vadd.f32 %v12371_v29, %v6588_v7  ;;  %v6438_v29 = vand.u32 2147483648, %v6093_v61 }
0x1a1f   :  { %v9106_v2 = vpop.eup %9105 }
0x1a20   :  { %v6420_v25 = vsel %vm6419_vm10, %v9104_v58, %v6416_v8  ;;  %v6428_v14 = vmul.f32 %v9106_v2, %v6093_v61  ;;  %v6096_v48 = vpop.xlane.xlu0 %6095  ;;  %vm6433_vm12 = vweird.f32 %v9106_v2 }
0x1a21   :  { %9107 = vrcp.f32 %v6096_v48  ;;  %v6425_v23 = vsel %vm6422_vm11, %v6424_v63, %v6420_v25  ;;  %vm6434_vm0 = vmor %vm6432_vm13, %vm6433_vm12  ;;  %v6451_v61 = vand.u32 2147483647, %v6096_v48  ;;  %v6453_v52 = vand.u32 2147483648, %v6096_v48 }
0x1a22   :  { %v6429_v62 = vsub.f32 1.0, %v6428_v14  ;;  %v6426_v3 = vmul.f32 %v12306_v53, %v6425_v23  ;;  %v6439_v53 = vor.u32 1.1754944e-38, %v6438_v29  ;;  %vm6447_vm15 = vweird.f32 %v6096_v48  ;;  %v8610_v14 = vld [vmem:[#allocation25 + $0xa0] sm:$0xff]  ;;  %v8609_v23 = vld [vmem:[#allocation25 + $0x98] sm:$0xff]  ;;  %v8608_v29 = vld [vmem:[#allocation25 + $0x90] sm:$0xff] }
0x1a23   :  { %v6547_v57 = vpop.f32.mrf.mxu0  ;;  %vm6452_vm3 = vcmp.eq.f32.partialorder %v6451_v61, 8.507059e+37  ;;  %6697 = vmatpush.bf16.msrb.mxu2 %v8610_v14 }
0x1a24   :  { %v6430_v39 = vmul.f32 %v9106_v2, %v6429_v62  ;;  %v6589_v50 = vmul.f32 %v6547_v57, %v10065_v31  ;;  %v6467_v44 = vpack.c.bf16 %v6426_v3, %v6411_v40  ;;  %v7129_v30 = vsel %vm2405_vm5, %v6426_v3, 0.0  ;;  %v8607_v40 = vld [vmem:[#allocation25 + $0x88] sm:$0xff]  ;;  %v8606_v3 = vld [vmem:[#allocation25 + $0x80] sm:$0xff] }
0x1a25   :  { %v7130_v24 = vadd.f32 %v7129_v30, %v7128_v12 }
0x1a26   :  { %v6431_v47 = vadd.f32 %v9106_v2, %v6430_v39  ;;  %v12414_v51 = vadd.f32 %v12383_v33, %v6589_v50  ;;  %8219 = vmatmul.msk.bf16.gmra.mxu0 %vm2405_vm5, %v6467_v44 }
0x1a27   :  { %v9108_v37 = vpop.eup %9107  ;;  %v7161_v26 = vmul.f32 %v7130_v24, %v10450_v0  ;;  %6698 = vmatpush.bf16.msrb.mxu2 %v8609_v23 }
0x1a28   :  { %v6435_v18 = vsel %vm6434_vm0, %v9106_v2, %v6431_v47  ;;  %v6443_v22 = vmul.f32 %v9108_v37, %v6096_v48  ;;  %vm6448_vm1 = vweird.f32 %v9108_v37 }
0x1a29   :  { %v6440_v16 = vsel %vm6437_vm14, %v6439_v53, %v6435_v18  ;;  %v7164_v58 = vsel %vm2405_vm5, %v7161_v26, 0.0  ;;  %vm6449_vm2 = vmor %vm6447_vm15, %vm6448_vm1 }
0x1a2a   :  { %v6444_v38 = vsub.f32 1.0, %v6443_v22  ;;  %v6441_v33 = vmul.f32 %v12324_v17, %v6440_v16  ;;  %8385 = vst [vmem:[%s9878_s14 + $0x30] sm:$0xff] %v7164_v58  ;;  %v6454_v17 = vor.u32 1.1754944e-38, %v6453_v52 }
0x1a2b   :  { %v6549_v45 = vpop.f32.mrf.mxu0  ;;  %6699 = vmatpush.bf16.msrb.mxu2 %v8608_v29 }
0x1a2c   :  { %v6445_v1 = vmul.f32 %v9108_v37, %v6444_v38  ;;  %v6590_v54 = vmul.f32 %v6549_v45, %v10065_v31  ;;  %v7144_v55 = vsel %vm2405_vm5, %v6441_v33, 0.0 }
0x1a2d   :  { %v7145_v21 = vadd.f32 %v7144_v55, %v7143_v60 }
0x1a2e   :  { %v6446_v10 = vadd.f32 %v9108_v37, %v6445_v1  ;;  %v6611_v4 = vadd.f32 %v12391_v59, %v6590_v54  ;;  %v7158_v59 = vadd.f32 %v7157_v32, %v12366_v56  ;;  %v8729_v54 = vld [vmem:[%s12573_s13 + $0x2] ss:$0 sm:$0xff]  ;;  %v8629_v32 = vld [vmem:[#allocation26 + $0x174] sm:$0xf0] }
0x1a2f   :  { %v7162_v42 = vmul.f32 %v7145_v21, %v10450_v0  ;;  %6700 = vmatpush.bf16.msrb.mxu2 %v8607_v40  ;;  %v8317_v40 = vld [vmem:[#allocation26 + $0x178] sm:$0xf0] }
0x1a30   :  { %v6450_v7 = vsel %vm6449_vm2, %v9108_v37, %v6446_v10 }
0x1a31   :  { %v6455_v46 = vsel %vm6452_vm3, %v6454_v17, %v6450_v7  ;;  %v7165_v8 = vsel %vm2405_vm5, %v7162_v42, 0.0  ;;  %v8315_v7 = vld [vmem:[#allocation26 + $0x170] sm:$0xf] }
0x1a32   :  { %v6456_v5 = vmul.f32 %v12342_v36, %v6455_v46  ;;  %8386 = vst [vmem:[%s9878_s14 + $0x38] sm:$0xff] %v7165_v8  ;;  %v8316_v46 = vor.u32 %v8629_v32, %v8315_v7  ;;  %v8627_v8 = vld [vmem:[#allocation26 + $0x164] sm:$0xf0] }
0x1a33   :  { %v6552_v2 = vpop.f32.mrf.mxu0  ;;  %6701 = vmatpush.bf16.msrb.mxu2 %v8606_v3 }
0x1a34   :  { %v6591_v41 = vmul.f32 %v6552_v2, %v10065_v31  ;;  %v6468_v25 = vpack.c.bf16 %v6456_v5, %v6441_v33  ;;  %v7159_v63 = vsel %vm2405_vm5, %v6456_v5, 0.0  ;;  %6897 = vmatpush.bf16.msrb.mxu3 %v8316_v46  ;;  %v8308_v5 = vor.u32 %v8627_v8, %v8307_v34 }
0x1a35   :  { %v7160_v48 = vadd.f32 %v7159_v63, %v7158_v59  ;;  %v8625_v59 = vld [vmem:[#allocation26 + $0x154] sm:$0xf0] }
0x1a36   :  { %v6618_v9 = vadd.f32 %v12405_v11, %v6591_v41  ;;  %8220 = vmatmul.msk.bf16.gmra.mxu0 %vm2405_vm5, %v6468_v25  ;;  %v8291_v41 = vld [vmem:[#allocation26 + $0x140] sm:$0xf] }
0x1a37   :  { %v7163_v62 = vmul.f32 %v7160_v48, %v10450_v0 }
0x1a38   :  { %6898 = vmatpush.bf16.msrb.mxu3 %v8308_v5 }
0x1a39   :  { %v7166_v36 = vsel %vm2405_vm5, %v7163_v62, 0.0 }
0x1a3a   :  { %8387 = vst [vmem:[%s9878_s14 + $0x40] sm:$0xff] %v7166_v36  ;;  %s9693_s14 = smov [#allocation32]  }
0x1a3b   :  { %v6554_v56 = vpop.f32.mrf.mxu0  ;;  %s7221_s6 = sshll.u32 %s9693_s14, 4  ;;  %s7222_s6 = int_to_ptr.vmem [resolvable:$true] %s7221_s6 }
0x1a3c   :  { %v6592_v0 = vmul.f32 %v6554_v56, %v10072_v35 }
0x1a3e   :  { %v6605_v47 = vadd.f32 %v12414_v51, %v6592_v0  ;;  %v8624_v0 = vld [vmem:[#allocation26 + $0x154] sm:$0xf] }
0x1a43   :  { %v6557_v31 = vpop.f32.mrf.mxu0 }
0x1a44   :  { %v6593_v50 = vmul.f32 %v6557_v31, %v10072_v35 }
0x1a46   :  { %v6612_v24 = vadd.f32 %v6611_v4, %v6593_v50  ;;  %v8301_v50 = vld [vmem:[#allocation26 + $0x158] sm:$0xf0] }
0x1a4b   :  { %v6559_v12 = vpop.f32.mrf.mxu0 }
0x1a4c   :  { %v6594_v58 = vmul.f32 %v6559_v12, %v10072_v35 }
0x1a4e   :  { %v6619_v61 = vadd.f32 %v6618_v9, %v6594_v58  ;;  %v8618_v58 = vld [vmem:[#allocation26 + $0x124] sm:$0xf] }
0x1a93   :  { %v6562_v57 = vpop.f32.mrf.mxu0 }
0x1a94   :  { %v6595_v44 = vmul.f32 %v6562_v57, %v10093_v6  ;;  %v8628_v57 = vld [vmem:[#allocation26 + $0x174] sm:$0xf] }
0x1a95   :  { %v8320_v3 = vor.u32 %v8628_v57, %v8317_v40  ;;  %v8730_v40 = vld [vmem:[%s12574_s18 + $0x2] ss:$0 sm:$0xff] }
0x1a96   :  { %v6606_v53 = vadd.f32 %v6605_v47, %v6595_v44  ;;  %v8304_v44 = vor.u32 %v8624_v0, %v8301_v50  ;;  %v8293_v47 = vld [vmem:[#allocation26 + $0x148] sm:$0xf0] }
0x1a97   :  { %6915 = vmatpush.bf16.msra.mxu2 %v8320_v3  ;;  %v8643_v0 = vld [vmem:[#allocation28 + $0x168] sm:$0xff] }
0x1a9b   :  { %v6564_v11 = vpop.f32.mrf.mxu0 }
0x1a9c   :  { %v6596_v30 = vmul.f32 %v6564_v11, %v10093_v6  ;;  %v8626_v11 = vld [vmem:[#allocation26 + $0x164] sm:$0xf] }
0x1a9e   :  { %v6613_v18 = vadd.f32 %v6612_v24, %v6596_v30  ;;  %v8622_v30 = vld [vmem:[#allocation26 + $0x144] sm:$0xf] }
0x1a9f   :  { %v8296_v24 = vor.u32 %v8622_v30, %v8293_v47  ;;  %v8731_v30 = vld [vmem:[%s12575_s0 + $0x2] ss:$0 sm:$0xff] }
0x1aa3   :  { %v6567_v39 = vpop.f32.mrf.mxu0 }
0x1aa4   :  { %v6597_v60 = vmul.f32 %v6567_v39, %v10093_v6  ;;  %v8309_v39 = vld [vmem:[#allocation26 + $0x168] sm:$0xf0] }
0x1aa6   :  { %v6620_v52 = vadd.f32 %v6619_v61, %v6597_v60  ;;  %v8277_v60 = vld [vmem:[#allocation26 + $0x128] sm:$0xf0] }
0x1aab   :  { %v6569_v19 = vpop.f32.mrf.mxu0 }
0x1aac   :  { %v6598_v37 = vmul.f32 %v6569_v19, %v10107_v27  ;;  %v8312_v19 = vor.u32 %v8626_v11, %v8309_v39 }
0x1aae   :  { %v6607_v26 = vadd.f32 %v6606_v53, %v6598_v37  ;;  %6916 = vmatpush.bf16.msra.mxu2 %v8312_v19  ;;  %v8283_v37 = vld [vmem:[#allocation26 + $0x130] sm:$0xf]  ;;  %v8620_v53 = vld [vmem:[#allocation26 + $0x134] sm:$0xf]  ;;  %v8635_v19 = vld [vmem:[#allocation28 + $0x128] sm:$0xff] }
0x1ab2   :  { %6917 = vmatpush.bf16.msra.mxu2 %v8304_v44 }
0x1ab3   :  { %v6572_v13 = vpop.f32.mrf.mxu0 }
0x1ab4   :  { %v6599_v22 = vmul.f32 %v6572_v13, %v10107_v27  ;;  %v8621_v13 = vld [vmem:[#allocation26 + $0x134] sm:$0xf0] }
0x1ab6   :  { %v6614_v16 = vadd.f32 %v6613_v18, %v6599_v22  ;;  %6918 = vmatpush.bf16.msra.mxu2 %v8296_v24  ;;  %v8284_v18 = vor.u32 %v8621_v13, %v8283_v37  ;;  %v8285_v22 = vld [vmem:[#allocation26 + $0x138] sm:$0xf0] }
0x1ab8   :  { %v6622_v38 = vpack.c.bf16 %v6614_v16, %v6607_v26  ;;  %v8288_v26 = vor.u32 %v8620_v53, %v8285_v22  ;;  %v8275_v16 = vld [vmem:[#allocation26 + $0x120] sm:$0xf] }
0x1ab9   :  { %v8634_v53 = vld [vmem:[#allocation28 + $0x120] sm:$0xff] }
0x1aba   :  { %6702 = vmatmul.bf16.vlgmr.msrb.gmra.mxu2 %v6622_v38  ;;  %v8619_v38 = vld [vmem:[#allocation26 + $0x124] sm:$0xf0] }
0x1abb   :  { %v6574_v33 = vpop.f32.mrf.mxu0  ;;  %6919 = vmatpush.bf16.msra.mxu2 %v8288_v26 }
0x1abc   :  { %v6600_v51 = vmul.f32 %v6574_v33, %v10107_v27  ;;  %v8276_v33 = vor.u32 %v8619_v38, %v8275_v16 }
0x1abe   :  { %v6621_v45 = vadd.f32 %v6620_v52, %v6600_v51  ;;  %v8280_v51 = vor.u32 %v8618_v58, %v8277_v60 }
0x1ac0   :  { %v6623_v1 = vpack.c.bf16 %v6621_v45, %v6621_v45  ;;  %6920 = vmatpush.bf16.msra.mxu2 %v8280_v51  ;;  %v8267_v45 = vld [vmem:[#allocation26 + $0x110] sm:$0xf]  ;;  %v8633_v51 = vld [vmem:[#allocation28 + $0x118] sm:$0xff] }
0x1aca   :  { %6707 = vmatmul.bf16.gmra.mxu2 %v6623_v1  ;;  %v8617_v1 = vld [vmem:[#allocation26 + $0x114] sm:$0xf0] }
0x1b3d   :  { %v6703_v55 = vpop.f32.mrf.mxu2 }
0x1b3e   :  { %v6704_v21 = vadd.f32 %v8729_v54, %v6703_v55 }
0x1b40   :  { %v6712_v10 = vadd.f32 %v6704_v21, %v11826_v43  ;;  %v8299_v43 = vld [vmem:[#allocation26 + $0x150] sm:$0xf]  ;;  %v8268_v21 = vor.u32 %v8617_v1, %v8267_v45 }
0x1b41   :  { %v8300_v2 = vor.u32 %v8625_v59, %v8299_v43  ;;  %v8632_v45 = vld [vmem:[#allocation28 + $0x110] sm:$0xff] }
0x1b42   :  { %6719 = vadd.xlane.f32.xlu1 %v6712_v10  ;;  %v8640_v1 = vld [vmem:[#allocation28 + $0x150] sm:$0xff] }
0x1b43   :  { %6899 = vmatpush.bf16.msrb.mxu3 %v8300_v2 }
0x1b45   :  { %v6705_v4 = vpop.f32.mrf.mxu2 }
0x1b46   :  { %v6706_v49 = vadd.f32 %v8729_v54, %v6705_v4 }
0x1b48   :  { %v6713_v35 = vadd.f32 %v6706_v49, %v11829_v28  ;;  %v8623_v28 = vld [vmem:[#allocation26 + $0x144] sm:$0xf0]  ;;  %v8259_v49 = vld [vmem:[#allocation26 + $0x100] sm:$0xf] }
0x1b4a   :  { %6721 = vadd.xlane.f32.xlu2 %v6713_v35 }
0x1b4d   :  { %v6708_v17 = vpop.f32.mrf.mxu2 }
0x1b4e   :  { %v6709_v6 = vadd.f32 %v8729_v54, %v6708_v17  ;;  %v8616_v54 = vld [vmem:[#allocation26 + $0x114] sm:$0xf]  ;;  %v8614_v17 = vld [vmem:[#allocation26 + $0x104] sm:$0xf] }
0x1b50   :  { %v6714_v42 = vadd.f32 %v6709_v6, %v11836_v15  ;;  %v8292_v15 = vor.u32 %v8623_v28, %v8291_v41 }
0x1b52   :  { %6723 = vadd.xlane.f32.xlu0 %v6714_v42  ;;  %6900 = vmatpush.bf16.msrb.mxu3 %v8292_v15 }
0x1b55   :  { %v6710_v27 = vpop.f32.mrf.mxu2 }
0x1b56   :  { %6901 = vmatpush.bf16.msrb.mxu3 %v8284_v18 }
0x1b5a   :  { %6902 = vmatpush.bf16.msrb.mxu3 %v8276_v33 }
0x1b5e   :  { %6903 = vmatpush.bf16.msrb.mxu3 %v8268_v21  ;;  %v8638_v21 = vld [vmem:[#allocation28 + $0x140] sm:$0xff] }
0x1bb5   :  { %v6720_v25 = vpop.xlane.xlu1 %6719 }
0x1bb6   :  { %v6725_v63 = vmul.f32 %v6720_v25, %v10487_v20 }
0x1bb8   :  { %v12454_v14 = vsub.f32 %v6712_v10, %v6725_v63  ;;  %v8269_v10 = vld [vmem:[#allocation26 + $0x118] sm:$0xf0] }
0x1bb9   :  { %v8272_v4 = vor.u32 %v8616_v54, %v8269_v10  ;;  %v8631_v54 = vld [vmem:[#allocation28 + $0x108] sm:$0xff]  ;;  %v8256_v10 = vld [vmem:[%s12576_s16 + $0x4] sm:$0x3] }
0x1bba   :  { %v6731_v48 = vmul.f32 %v12454_v14, %v12454_v14 }
0x1bbb   :  { %6921 = vmatpush.bf16.msra.mxu2 %v8272_v4 }
0x1bbc   :  { %6734 = vadd.xlane.f32.xlu1 %v6731_v48 }
0x1bbd   :  { %v6722_v9 = vpop.xlane.xlu2 %6721 }
0x1bbe   :  { %v6726_v62 = vmul.f32 %v6722_v9, %v10487_v20  ;;  %v8637_v9 = vld [vmem:[#allocation28 + $0x138] sm:$0xff] }
0x1bc0   :  { %v12459_v36 = vsub.f32 %v6713_v35, %v6726_v62  ;;  %v8615_v35 = vld [vmem:[#allocation26 + $0x104] sm:$0xf0]  ;;  %v8645_v62 = vld [vmem:[#allocation28 + $0x178] sm:$0xff] }
0x1bc1   :  { %v8260_v6 = vor.u32 %v8615_v35, %v8259_v49  ;;  %v6813_v35 = vperm.slane %v8256_v10, 0 }
0x1bc2   :  { %v6732_v56 = vmul.f32 %v12459_v36, %v12459_v36 }
0x1bc3   :  { %6904 = vmatpush.bf16.msrb.mxu3 %v8260_v6 }
0x1bc4   :  { %6736 = vadd.xlane.f32.xlu2 %v6732_v56 }
0x1bc5   :  { %v6724_v23 = vpop.xlane.xlu0 %6723 }
0x1bc6   :  { %v6727_v31 = vmul.f32 %v6724_v23, %v10487_v20 }
0x1bc7   :  { %7077 = vmatpush.bf16.msra.mxu3 %v8637_v9 }
0x1bc8   :  { %v12464_v12 = vsub.f32 %v6714_v42, %v6727_v31  ;;  %v8261_v42 = vld [vmem:[#allocation26 + $0x108] sm:$0xf0]  ;;  %v8636_v31 = vld [vmem:[#allocation28 + $0x130] sm:$0xff] }
0x1bc9   :  { %v8264_v7 = vor.u32 %v8614_v17, %v8261_v42  ;;  %v6814_v17 = vperm.slane %v8256_v10, 1 }
0x1bca   :  { %v6733_v29 = vmul.f32 %v12464_v12, %v12464_v12 }
0x1bcb   :  { %6922 = vmatpush.bf16.msra.mxu2 %v8264_v7  ;;  %7078 = vmatpush.bf16.msra.mxu3 %v8636_v31 }
0x1bcc   :  { %6738 = vadd.xlane.f32.xlu0 %v6733_v29  ;;  %v8644_v29 = vld [vmem:[#allocation28 + $0x170] sm:$0xff] }
0x1bcf   :  { %7095 = vmatpush.bf16.msrb.mxu2 %v8645_v62  ;;  %7079 = vmatpush.bf16.msra.mxu3 %v8635_v19 }
0x1bd3   :  { %7096 = vmatpush.bf16.msrb.mxu2 %v8644_v29  ;;  %7080 = vmatpush.bf16.msra.mxu3 %v8634_v53 }
0x1bd7   :  { %7097 = vmatpush.bf16.msrb.mxu2 %v8643_v0  ;;  %7081 = vmatpush.bf16.msra.mxu3 %v8633_v51 }
0x1bdb   :  { %7082 = vmatpush.bf16.msra.mxu3 %v8632_v45 }
0x1bdf   :  { %7083 = vmatpush.bf16.msra.mxu3 %v8631_v54 }
0x1c2f   :  { %v6735_v61 = vpop.xlane.xlu1 %6734 }
0x1c30   :  { %v6740_v52 = vmul.f32 %v6735_v61, %v10487_v20 }
0x1c32   :  { %v6743_v55 = vadd.f32 1e-05, %v6740_v52  ;;  %v8641_v52 = vld [vmem:[#allocation28 + $0x158] sm:$0xff] }
0x1c34   :  { %9109 = vrsqrt.f32 %v6743_v55  ;;  %vm6752_vm6 = vweird.f32 %v6743_v55 }
0x1c37   :  { %v6737_v27 = vpop.xlane.xlu2 %6736 }
0x1c38   :  { %v6741_v32 = vmul.f32 %v6737_v27, %v10487_v20 }
0x1c3a   :  { %v9110_v34 = vpop.eup %9109  ;;  %v6744_v46 = vadd.f32 1e-05, %v6741_v32 }
0x1c3b   :  { %v6747_v8 = vmul.f32 %v9110_v34, %v6743_v55  ;;  %vm6753_vm4 = vweird.f32 %v9110_v34  ;;  %v8639_v55 = vld [vmem:[#allocation28 + $0x148] sm:$0xff] }
0x1c3c   :  { %9111 = vrsqrt.f32 %v6744_v46  ;;  %vm6754_vm7 = vmor %vm6752_vm6, %vm6753_vm4  ;;  %vm6762_vm9 = vweird.f32 %v6744_v46 }
0x1c3d   :  { %v6748_v5 = vmul.f32 %v9110_v34, %v6747_v8 }
0x1c3f   :  { %v6749_v43 = vmul.f32 0.5, %v6748_v5  ;;  %v6739_v59 = vpop.xlane.xlu0 %6738 }
0x1c40   :  { %v6742_v2 = vmul.f32 %v6739_v59, %v10487_v20 }
0x1c41   :  { %v6750_v41 = vsub.f32 1.5, %v6749_v43 }
0x1c42   :  { %v9112_v28 = vpop.eup %9111  ;;  %v6745_v25 = vadd.f32 1e-05, %v6742_v2 }
0x1c43   :  { %v6751_v63 = vmul.f32 %v9110_v34, %v6750_v41  ;;  %v6757_v15 = vmul.f32 %v9112_v28, %v6744_v46  ;;  %vm6763_vm8 = vweird.f32 %v9112_v28 }
0x1c44   :  { %9113 = vrsqrt.f32 %v6745_v25  ;;  %vm6764_vm10 = vmor %vm6762_vm9, %vm6763_vm8  ;;  %vm6772_vm12 = vweird.f32 %v6745_v25 }
0x1c45   :  { %v6758_v48 = vmul.f32 %v9112_v28, %v6757_v15  ;;  %v6755_v56 = vsel %vm6754_vm7, %v9110_v34, %v6751_v63 }
0x1c46   :  { %v6776_v3 = vmul.f32 %v6755_v56, %v12454_v14  ;;  %v8642_v14 = vld [vmem:[#allocation28 + $0x160] sm:$0xff] }
0x1c47   :  { %v6759_v23 = vmul.f32 0.5, %v6758_v48  ;;  %7098 = vmatpush.bf16.msrb.mxu2 %v8642_v14  ;;  %v7171_v14 = vld [vmem:[#allocation8] sm:$0xff] }
0x1c48   :  { %v6782_v47 = vmul.f32 %v8730_v40, %v6776_v3 }
0x1c49   :  { %v6760_v20 = vsub.f32 1.5, %v6759_v23 }
0x1c4a   :  { %v9114_v57 = vpop.eup %9113  ;;  %v12475_v22 = vadd.f32 %v8731_v30, %v6782_v47 }
0x1c4b   :  { %v6761_v11 = vmul.f32 %v9112_v28, %v6760_v20  ;;  %v6767_v39 = vmul.f32 %v9114_v57, %v6745_v25  ;;  %vm6773_vm11 = vweird.f32 %v9114_v57  ;;  %7099 = vmatpush.bf16.msrb.mxu2 %v8641_v52 }
0x1c4c   :  { %vm6774_vm13 = vmor %vm6772_vm12, %vm6773_vm11 }
0x1c4d   :  { %v6765_v50 = vsel %vm6764_vm10, %v9112_v28, %v6761_v11  ;;  %v6768_v44 = vmul.f32 %v9114_v57, %v6767_v39 }
0x1c4e   :  { %v6777_v24 = vmul.f32 %v6765_v50, %v12459_v36 }
0x1c4f   :  { %v6769_v37 = vmul.f32 0.5, %v6768_v44  ;;  %7100 = vmatpush.bf16.msrb.mxu2 %v8640_v1 }
0x1c50   :  { %v6783_v13 = vmul.f32 %v8730_v40, %v6777_v24 }
0x1c51   :  { %v6770_v18 = vsub.f32 1.5, %v6769_v37 }
0x1c52   :  { %v12477_v26 = vadd.f32 %v8731_v30, %v6783_v13 }
0x1c53   :  { %v6771_v16 = vmul.f32 %v9114_v57, %v6770_v18  ;;  %7101 = vmatpush.bf16.msrb.mxu2 %v8639_v55  ;;  %v7172_v18 = vld [vmem:[#allocation8 + $0x8] sm:$0xf] }
0x1c54   :  { %v6791_v38 = vpack.c.bf16 %v12477_v26, %v12475_v22 }
0x1c55   :  { %v6775_v36 = vsel %vm6774_vm13, %v9114_v57, %v6771_v16 }
0x1c56   :  { %6905 = vmatmul.bf16.vlgmr.msrb.gmra.mxu3 %v6791_v38  ;;  %6923 = vmatmul.bf16.vlgmr.msra.gmra.mxu2 %v6791_v38  ;;  %v6778_v58 = vmul.f32 %v6775_v36, %v12464_v12  ;;  %v8630_v12 = vld [vmem:[#allocation28 + $0x100] sm:$0xff] }
0x1c57   :  { %7084 = vmatpush.bf16.msra.mxu3 %v8630_v12  ;;  %7102 = vmatpush.bf16.msrb.mxu2 %v8638_v21 }
0x1c58   :  { %v6784_v33 = vmul.f32 %v8730_v40, %v6778_v58  ;;  %v8732_v40 = vld [vmem:[#allocation29 + $0x2] ss:$0 sm:$0xff] }
0x1c5a   :  { %v12482_v60 = vadd.f32 %v8731_v30, %v6784_v33 }
0x1c5c   :  { %v6792_v61 = vpack.c.bf16 %v12482_v60, %v12482_v60 }
0x1c66   :  { %6910 = vmatmul.bf16.gmra.mxu3 %v6792_v61  ;;  %6928 = vmatmul.bf16.gmra.mxu2 %v6792_v61 }
0x1cd9   :  { %v6906_v4 = vpop.f32.mrf.mxu3  ;;  %v6924_v49 = vpop.f32.mrf.mxu2 }
0x1cda   :  { %v6907_v6 = vadd.f32 %v6906_v4, %v6813_v35  ;;  %v6925_v42 = vadd.f32 %v6924_v49, %v6814_v17 }
0x1cdc   :  { %v6933_v46 = vmax.f32 %v6907_v6, 0.0  ;;  %v6934_v8 = vmax.f32 %v6925_v42, 0.0 }
0x1ce1   :  { %v6908_v27 = vpop.f32.mrf.mxu3  ;;  %v6926_v7 = vpop.f32.mrf.mxu2 }
0x1ce2   :  { %v6909_v32 = vadd.f32 %v6908_v27, %v6813_v35  ;;  %v6927_v34 = vadd.f32 %v6926_v7, %v6814_v17 }
0x1ce4   :  { %v6935_v5 = vmax.f32 %v6909_v32, 0.0  ;;  %v6936_v43 = vmax.f32 %v6927_v34, 0.0 }
0x1ce6   :  { %v6939_v59 = vpack.c.bf16 %v6935_v5, %v6933_v46  ;;  %v6940_v2 = vpack.c.bf16 %v6936_v43, %v6934_v8 }
0x1ce8   :  { %7085 = vmatmul.bf16.vlgmr.msra.gmra.mxu3 %v6939_v59  ;;  %7103 = vmatmul.bf16.vlgmr.msrb.gmra.mxu2 %v6940_v2 }
0x1ce9   :  { %v6911_v41 = vpop.f32.mrf.mxu3  ;;  %v6929_v28 = vpop.f32.mrf.mxu2 }
0x1cea   :  { %v6912_v25 = vadd.f32 %v6911_v41, %v6813_v35  ;;  %v6930_v63 = vadd.f32 %v6929_v28, %v6814_v17 }
0x1cec   :  { %v6937_v9 = vmax.f32 %v6912_v25, 0.0  ;;  %v6938_v62 = vmax.f32 %v6930_v63, 0.0 }
0x1cee   :  { %v6941_v56 = vpack.c.bf16 %v6937_v9, %v6937_v9  ;;  %v6942_v23 = vpack.c.bf16 %v6938_v62, %v6938_v62 }
0x1cf1   :  { %v6913_v15 = vpop.f32.mrf.mxu3  ;;  %v6931_v48 = vpop.f32.mrf.mxu2 }
0x1cf8   :  { %7090 = vmatmul.bf16.gmra.mxu3 %v6941_v56  ;;  %7108 = vmatmul.bf16.gmra.mxu2 %v6942_v23 }
0x1d6b   :  { %v7086_v31 = vpop.f32.mrf.mxu3  ;;  %v7104_v29 = vpop.f32.mrf.mxu2 }
0x1d6c   :  { %v7087_v19 = vadd.f32 %v8732_v40, %v7086_v31 }
0x1d6e   :  { %v7105_v30 = vadd.f32 %v7104_v29, %v7087_v19 }
0x1d70   :  { %v7113_v53 = vadd.f32 %v7105_v30, %v12475_v22 }
0x1d73   :  { %v7088_v20 = vpop.f32.mrf.mxu3  ;;  %v7106_v57 = vpop.f32.mrf.mxu2 }
0x1d74   :  { %v7089_v3 = vadd.f32 %v8732_v40, %v7088_v20 }
0x1d76   :  { %v7107_v50 = vadd.f32 %v7106_v57, %v7089_v3 }
0x1d78   :  { %v7114_v24 = vadd.f32 %v7107_v50, %v12477_v26 }
0x1d7b   :  { %v7091_v11 = vpop.f32.mrf.mxu3  ;;  %v7109_v39 = vpop.f32.mrf.mxu2 }
0x1d7c   :  { %v7092_v0 = vadd.f32 %v8732_v40, %v7091_v11 }
0x1d7e   :  { %v7110_v44 = vadd.f32 %v7109_v39, %v7092_v0 }
0x1d80   :  { %v7115_v47 = vadd.f32 %v7110_v44, %v12482_v60 }
0x1d82   :  { %7192 = vmatpush.msrb.mxu3 %v7115_v47 }
0x1d83   :  { %v7093_v37 = vpop.f32.mrf.mxu3  ;;  %v7111_v13 = vpop.f32.mrf.mxu2 }
0x1d84   :  { %7193 = vmatpush.msrb.mxu3 %v7114_v24 }
0x1d86   :  { %7194 = vmatpush.msrb.mxu3 %v7113_v53 }
0x1d87   :  { %8388 = vmatmul.msk.f32.vlgmr.msrb.gmra.mxu3 %vm2405_vm5, %v7171_v14 }
0x1d8f   :  { %8389 = vmatmul.msk.f32.gmra.mxu3 %vm2405_vm5, %v7172_v18 }
0x1d90   :  { %9582 = shalt.err (!%p9579_p10)
}
0x1d91   :  { %7229 = dma.vmem_to_hbm [thread:$0]  %s7222_s6, 256, %s7224_s9, [#allocation33], %s9667_s7, %s9667_s7, %s9668_s10  }
0x1d92   :  { %s9694_s27 = smov [#allocation31]   ;;  %s7210_s19 = sshll.u32 %s9863_s21, 4  ;;  %s7211_s19 = int_to_ptr.hbm [resolvable:$true] %s7210_s19 }
0x1d93   :  { %s7208_s1 = sshll.u32 %s9694_s27, 4  ;;  %s9595_s20 = sshra.s32 %s7211_s19, 4  ;;  %s7209_s1 = int_to_ptr.vmem [resolvable:$true] %s7208_s1  ;;  %s9596_s20 = int_to_ptr.hbm [resolvable:$true] %s9595_s20 }
0x1d94   :  { %s9597_s17 = scalar_lea.hbm %s9596_s20, 16  ;;  %s9599_s3 = scalar_lea.hbm %s9863_s21, 16 }
0x1d95   :  { %p9598_p11 = scmp.ne.s32.totalorder %s9596_s20, %s9597_s17  ;;  %p9600_p12 = scmp.lt.s32.totalorder %s9596_s20, %s9863_s21 }
0x1d96   :  { %p9601_p13 = scmp.lt.s32.totalorder %s9599_s3, %s9597_s17 }
0x1d98   :  { %p9602_p0 = por %p9601_p13, %p9600_p12 }
0x1d9a   :  { %p9603_p1 = pnand %p9602_p0, %p9598_p11 }
0x1e0a   :  { %v7196_v22 = vpop.f32.mrf.mxu3 }
0x1e0b   :  { %7202 = vst [vmem:[#allocation31] sm:$0xff] %v7196_v22 }
0x1e12   :  { %v7199_v26 = vpop.f32.mrf.mxu3 }
0x1e13   :  { %7203 = vst [vmem:[#allocation31 + $0x8] sm:$0xf] %v7199_v26 }
0x1e14   :  { %9606 = shalt.err (!%p9603_p1)
}
0x1e15   :  { %7216 = dma.vmem_to_hbm [thread:$0]  %s7209_s1, 256, %s7211_s19, [#allocation4], %s9667_s7, %s9667_s7, %s9668_s10  }
0x1e16   :  { %9627 = dma.done.wait [#allocation4], 256  }
0x1e17   :  { %9628 = vsyncadd [#allocation4], 4294967040 }
0x1e18   :  { %9629 = dma.done.wait [#allocation33], 256  }
0x1e19   :  { %9630 = vsyncadd [#allocation33], 4294967040 }
0x1e1a   :  { %7246 = vsyncpa [#allocation3], 1 }
0x1e1b   :  { %7247 = vsyncpa [#allocation6], 1 }
0x1e1c   :  { %7248 = vsyncpa [#allocation9], 1 }
0x1e1d   :  { %7249 = vsyncpa [#allocation12], 1 }
0x1e1e   :  { %7250 = vsyncpa [#allocation15], 1 }
0x1e1f   :  { %7251 = vsyncpa [#allocation18], 1 }
0x1e20   :  { %7252 = vsyncpa [#allocation21], 1 }
0x1e21   :  { %7253 = vsyncpa [#allocation24], 1 }
0x1e22   :  { %7254 = vsyncpa [#allocation27], 1 }
0x1e23   :  { %7255 = vsyncpa [#allocation30], 1 }
0x1e24   :  { %7256 = vsyncpa [#allocation4], 1 }
0x1e25   :  { %7257 = vsyncpa [#allocation33], 1 }

</bundles_post_ra>
